<compile_context>
chip_gen: v5e
topology: v5e:2x2
jax: 0.10.0
libtpu: 0.0.40
codegen_flags: <defaults>
</compile_context>

<pallas_src>
import functools
import math

import jax
import jax.numpy as jnp
from jax.experimental import pallas as pl
from jax.experimental.pallas import tpu as pltpu

BN_EPS = 1e-5
LEAKY_SLOPE = 0.2
KS = 4          # kernel_size of every block


def _round_up(x, m):
    return ((x + m - 1) // m) * m


def _pick_tm(m):
    """Row-tile: large for big M (roofline), minimal padding for tiny M, and >= 2 row
    blocks whenever M >= 128 so the parallel axis can use both v7x TensorCores."""
    if m >= 4096:
        return 512
    if m >= 1024:
        return 256
    if m >= 256:
        return 128
    if m >= 128:
        return 64
    return _round_up(m, 16)


def _pick_k(kred):
    if kred <= 256:
        k_pad = _round_up(kred, 16)      # single reduction step (bf16 sublane pack)
        return k_pad, k_pad
    tk = 256
    return _round_up(kred, tk), tk


# ----------------------------- Pallas kernels ------------------------------ #

def _mm_bn_stats_kernel(x_ref, w_ref, b_ref, o_ref, sum_ref, sq_ref, acc_ref):
    """o = bf16(x @ w + b) (f32 MXU accumulation over the K grid axis), plus fused
    per-row-block, per-column sums of d and d^2 with d = x @ w (bias-shifted BatchNorm
    statistics; zero-padded rows contribute exactly zero)."""
    k = pl.program_id(1)

    @pl.when(k == 0)
    def _():
        acc_ref[...] = jnp.zeros_like(acc_ref)

    acc_ref[...] += jnp.dot(x_ref[...], w_ref[...],
                            preferred_element_type=jnp.float32)

    @pl.when(k == pl.num_programs(1) - 1)
    def _():
        d = acc_ref[...]
        o_ref[...] = (d + b_ref[...]).astype(o_ref.dtype)
        sum_ref[0] = jnp.sum(d, axis=0, keepdims=True)
        sq_ref[0] = jnp.sum(d * d, axis=0, keepdims=True)


def _mm_tanh_kernel(x_ref, w_ref, b_ref, o_ref, acc_ref):
    """Final layer: o = tanh(x @ w + b), tanh fused into the matmul epilogue (no BN,
    no second HBM pass)."""
    k = pl.program_id(1)

    @pl.when(k == 0)
    def _():
        acc_ref[...] = jnp.zeros_like(acc_ref)

    acc_ref[...] += jnp.dot(x_ref[...], w_ref[...],
                            preferred_element_type=jnp.float32)

    @pl.when(k == pl.num_programs(1) - 1)
    def _():
        o_ref[...] = jnp.tanh(acc_ref[...] + b_ref[...]).astype(o_ref.dtype)


def matmul_bias_bn_stats(patches, w_mat, bias_row, tm, tk):
    """(M_pad, K_pad)bf16 @ (K_pad, Cp)bf16 + bias -> bf16 preact (M_pad, Cp) plus f32
    per-row-block bias-shifted column sums / sums-of-squares (M_pad//tm, 1, Cp)."""
    m_pad, k_pad = patches.shape
    cp = w_mat.shape[1]
    nmb, nkb = m_pad // tm, k_pad // tk
    return pl.pallas_call(
        _mm_bn_stats_kernel,
        out_shape=(jax.ShapeDtypeStruct((m_pad, cp), jnp.bfloat16),
                   jax.ShapeDtypeStruct((nmb, 1, cp), jnp.float32),
                   jax.ShapeDtypeStruct((nmb, 1, cp), jnp.float32)),
        grid_spec=pltpu.PrefetchScalarGridSpec(
            num_scalar_prefetch=0,
            grid=(nmb, nkb),
            in_specs=[
                pl.BlockSpec((tm, tk), lambda i, k: (i, k)),
                pl.BlockSpec((tk, cp), lambda i, k: (k, 0)),
                pl.BlockSpec((1, cp), lambda i, k: (0, 0)),
            ],
            out_specs=[
                pl.BlockSpec((tm, cp), lambda i, k: (i, 0)),
                pl.BlockSpec((1, 1, cp), lambda i, k: (i, 0, 0)),
                pl.BlockSpec((1, 1, cp), lambda i, k: (i, 0, 0)),
            ],
            scratch_shapes=[pltpu.VMEM((tm, cp), jnp.float32)],
        ),
        compiler_params=pltpu.CompilerParams(
            dimension_semantics=("parallel", "arbitrary")),
    )(patches, w_mat, bias_row)


def matmul_bias_tanh(patches, w_mat, bias_row, tm, tk):
    """Final layer matmul with tanh fused into the epilogue; f32 output."""
    m_pad, k_pad = patches.shape
    cp = w_mat.shape[1]
    nmb, nkb = m_pad // tm, k_pad // tk
    # TODO(synk): the final layer's Cp = 4*im_chan = 12 lane dim forces masked partial
    #             stores; a transposed (Cp, M) formulation would make the store lane-dense
    #             but needs a channel-major patch layout — left as follow-up.
    return pl.pallas_call(
        _mm_tanh_kernel,
        out_shape=jax.ShapeDtypeStruct((m_pad, cp), jnp.float32),
        grid_spec=pltpu.PrefetchScalarGridSpec(
            num_scalar_prefetch=0,
            grid=(nmb, nkb),
            in_specs=[
                pl.BlockSpec((tm, tk), lambda i, k: (i, k)),
                pl.BlockSpec((tk, cp), lambda i, k: (k, 0)),
                pl.BlockSpec((1, cp), lambda i, k: (0, 0)),
            ],
            out_specs=pl.BlockSpec((tm, cp), lambda i, k: (i, 0)),
            scratch_shapes=[pltpu.VMEM((tm, cp), jnp.float32)],
        ),
        compiler_params=pltpu.CompilerParams(
            dimension_semantics=("parallel", "arbitrary")),
    )(patches, w_mat, bias_row)


def _affine_leaky_kernel(x_ref, scale_ref, shift_ref, o_ref):
    """y = LeakyReLU_0.2(x * scale + shift); math in f32 (v5e guardrail), bf16 store."""
    y = x_ref[...].astype(jnp.float32) * scale_ref[...] + shift_ref[...]
    y = jnp.where(y >= 0.0, y, LEAKY_SLOPE * y)
    o_ref[...] = y.astype(o_ref.dtype)


def affine_leaky(x, scale, shift):
    """Memory-bound fused BN-apply + LeakyReLU with large row tiles; bf16 in / bf16 out."""
    m_pad, cp = x.shape
    tr = m_pad
    for cand in (2048, 1024, 512, 256, 128, 64, 32, 16, 8):
        # ~bf16 in + bf16 out, double buffered: 8 bytes/element live per block.
        if m_pad % cand == 0 and cand * cp * 8 <= (8 << 20):
            tr = cand
            break
    return pl.pallas_call(
        _affine_leaky_kernel,
        out_shape=jax.ShapeDtypeStruct((m_pad, cp), jnp.bfloat16),
        grid_spec=pltpu.PrefetchScalarGridSpec(
            num_scalar_prefetch=0,
            grid=(m_pad // tr,),
            in_specs=[
                pl.BlockSpec((tr, cp), lambda i: (i, 0)),
                pl.BlockSpec((1, cp), lambda i: (0, 0)),
                pl.BlockSpec((1, cp), lambda i: (0, 0)),
            ],
            out_specs=pl.BlockSpec((tr, cp), lambda i: (i, 0)),
        ),
        compiler_params=pltpu.CompilerParams(
            dimension_semantics=("parallel",)),
    )(x, scale.reshape(1, cp), shift.reshape(1, cp))


# ------------------------- one generator block ----------------------------- #

def gen_block(x_nhwc, w, b, stride, bn_params, final):
    """One generator block on an NHWC activation.

    x_nhwc: (N, H, W, Cin).  w: (Cin, Cout, K, K) (PyTorch ConvTranspose2d layout).

    * H == W == 1 (first block):  out[n, co, kh, kw] = sum_ci x[n, ci] * w[ci, co, kh, kw],
      i.e. one dense matmul with (kh, kw, co)-packed columns.
    * Otherwise: ConvTranspose2d(stride=s, padding=0) via sub-pixel (phase) decomposition,
        out[n, co, s*a+p, s*b+q] =
            sum_{jp,lp,ci} xpad[n, a+jp, b+lp, ci] * w[ci, co, p+s*(Ks-1-jp), q+s*(Ks-1-lp)]
      with Ks = K//s and xpad zero-padded by Ks-1: one shared (Ks,Ks) patch matrix feeds a
      single matmul with (p, q, co)-packed columns; a pixel shuffle re-interleaves phases.
    """
    N, H, W, Cin = x_nhwc.shape
    Cout, K = w.shape[1], w.shape[2]
    s = stride

    if H == 1 and W == 1:
        # ---- direct path: ConvTranspose2d on a 1x1 input is a plain matmul ----
        G = K * K
        patches = x_nhwc.reshape(N, Cin).astype(jnp.bfloat16)
        w_mat = w.transpose(0, 2, 3, 1).reshape(Cin, G * Cout).astype(jnp.bfloat16)
        M, Kred = N, Cin
        Ho = Wo = K

        def assemble(y):                       # columns (kh, kw, co) -> NHWC directly
            return y.reshape(N, K, K, Cout)
    else:
        assert K % s == 0, "phase decomposition assumes stride divides kernel_size"
        Ks = K // s
        Ah, Aw = H - 1 + Ks, W - 1 + Ks        # per-phase output extent
        Ho, Wo = s * Ah, s * Aw                # == (H-1)*s + K
        G = s * s

        # TODO(synk): patch construction (and the pixel shuffle below) stay in XLA glue;
        #             overlapping windows cannot be expressed with a rectangular BlockSpec
        #             and the in-kernel halo-DMA variant was judged too risky for the win.
        xp = jnp.pad(x_nhwc.astype(jnp.bfloat16),
                     ((0, 0), (Ks - 1, Ks - 1), (Ks - 1, Ks - 1), (0, 0)))
        cols = [xp[:, jp:jp + Ah, lp:lp + Aw, :]
                for jp in range(Ks) for lp in range(Ks)]
        patches = jnp.stack(cols, axis=3).reshape(N * Ah * Aw, Ks * Ks * Cin)

        # rows (jp, lp, ci), cols (p, q, co):
        #   W[(jp,lp,ci),(p,q,co)] = w[ci, co, p + s*(Ks-1-jp), q + s*(Ks-1-lp)]
        w_r = w.reshape(Cin, Cout, Ks, s, Ks, s)            # kh = m*s + p, kw = ml*s + q
        w_mat = (jnp.flip(w_r, axis=(2, 4))
                 .transpose(2, 4, 0, 3, 5, 1)
                 .reshape(Ks * Ks * Cin, G * Cout)
                 .astype(jnp.bfloat16))
        M, Kred = N * Ah * Aw, Ks * Ks * Cin

        def assemble(y):                       # pixel shuffle, stay NHWC
            y = y.reshape(N, Ah, Aw, s, s, Cout).transpose(0, 1, 3, 2, 4, 5)
            return y.reshape(N, Ho, Wo, Cout)

    Cp = G * Cout
    tm = _pick_tm(M)
    m_pad = _round_up(M, tm)
    k_pad, tk = _pick_k(Kred)

    # K padding is a no-op for the module configs (Kred already tile-aligned); only the
    # row dim of `patches` is actually padded.
    patches = jnp.pad(patches, ((0, m_pad - M), (0, k_pad - Kred)))
    w_mat = jnp.pad(w_mat, ((0, k_pad - Kred), (0, 0)))
    bias_cp = jnp.tile(b, G).astype(jnp.float32).reshape(1, Cp)   # per (group, co) column

    if final:
        # ---- Pallas hot path: matmul + bias + tanh fused, f32 output ----
        out = matmul_bias_tanh(patches, w_mat, bias_cp, tm, tk)
        return assemble(out[:M])

    # ---- Pallas hot path: matmul + bias + fused bias-shifted BN statistics ----
    preact, bsum, bsq = matmul_bias_bn_stats(patches, w_mat, bias_cp, tm, tk)

    # BatchNorm2d in training mode (fresh module default) -> batch statistics.
    # d = preact - bias; padded rows contribute exactly zero to both sums.
    gamma, beta = bn_params
    dsum = bsum[:, 0, :].sum(axis=0)                       # (Cp,)
    dsq = bsq[:, 0, :].sum(axis=0)
    cnt = float(M * G)                                     # == N * Ho * Wo
    ch_dsum = dsum.reshape(G, Cout).sum(axis=0)
    ch_dsq = dsq.reshape(G, Cout).sum(axis=0)
    mean_d = ch_dsum / cnt
    var = ch_dsq / cnt - mean_d * mean_d                   # biased, as PyTorch BN uses
    mean = mean_d + b
    scale_c = gamma / jnp.sqrt(var + BN_EPS)
    shift_c = beta - mean * scale_c
    scale_cp = jnp.tile(scale_c, G)
    shift_cp = jnp.tile(shift_c, G)

    # ---- Pallas hot path: fused BN-apply + LeakyReLU (phase-packed layout, bf16) ----
    y = affine_leaky(preact, scale_cp, shift_cp)[:M]
    return assemble(y)


# ------------------------------ the module --------------------------------- #

class GeneratorPallas:
    """Pallas re-implementation of old_cwgan Generator (forward only)."""

    def __init__(self, key, input_dim=100, im_chan=3, hidden_dim=64):
        self.input_dim = input_dim
        chans = [input_dim, hidden_dim * 8, hidden_dim * 4, hidden_dim * 2,
                 hidden_dim, hidden_dim, im_chan]
        strides = [1, 2, 2, 2, 2, 2]
        self.layers = []
        n_layers = len(strides)
        for li, (cin, cout, s) in enumerate(zip(chans[:-1], chans[1:], strides)):
            key, kw, kb = jax.random.split(key, 3)
            bound = 1.0 / math.sqrt(cin * KS * KS)
            w = jax.random.uniform(kw, (cin, cout, KS, KS), jnp.float32, -bound, bound)
            b = jax.random.uniform(kb, (cout,), jnp.float32, -bound, bound)
            final = (li == n_layers - 1)
            bn = None if final else (jnp.ones((cout,), jnp.float32),
                                     jnp.zeros((cout,), jnp.float32))
            self.layers.append((w, b, bn, s, final))

    def __call__(self, noise):
        n = noise.shape[0]
        x = noise.reshape(n, 1, 1, self.input_dim)        # NHWC (H = W = 1)
        for (w, b, bn, s, final) in self.layers:
            x = gen_block(x, w, b, s, bn, final)
        return x.transpose(0, 3, 1, 2)                    # NCHW, matching PyTorch


# --------------------------- pure-JAX references ---------------------------- #

def reference_forward(gen, noise, cast_bf16):
    """Pure-XLA reference.  With cast_bf16=True the conv operands AND the stored
    pre-activation are quantized to bfloat16 exactly like the Pallas path (f32
    accumulation / f32 BN statistics kept), so the comparison isolates kernel / tiling /
    BN-fusion correctness from the intentional bf16 optimizations."""
    x = noise.reshape(noise.shape[0], gen.input_dim, 1, 1)
    for (w, b, bn, s, final) in gen.layers:
        K = w.shape[2]
        wf = jnp.flip(w, (2, 3)).transpose(1, 0, 2, 3)            # OIHW
        lhs, rhs = x, wf
        if cast_bf16:
            lhs = lhs.astype(jnp.bfloat16)
            rhs = rhs.astype(jnp.bfloat16)
        x = jax.lax.conv_general_dilated(
            lhs, rhs, window_strides=(1, 1),
            padding=[(K - 1, K - 1), (K - 1, K - 1)],
            lhs_dilation=(s, s),
            dimension_numbers=("NCHW", "OIHW", "NCHW"),
            preferred_element_type=jnp.float32) + b[None, :, None, None]
        if final:
            x = jnp.tanh(x)
        else:
            gamma, beta = bn
            mean = x.mean(axis=(0, 2, 3), keepdims=True)          # stats from f32
            var = x.var(axis=(0, 2, 3), keepdims=True)
            if cast_bf16:
                # Pallas path stores the pre-activation in bf16 between the matmul and
                # the BN-apply pass (statistics come from the f32 accumulator).
                x = x.astype(jnp.bfloat16).astype(jnp.float32)
            x = (x - mean) / jnp.sqrt(var + BN_EPS)
            x = x * gamma[None, :, None, None] + beta[None, :, None, None]
            x = jnp.where(x >= 0.0, x, LEAKY_SLOPE * x)
    return x


# --------------------------------- main ------------------------------------ #

if __name__ == "__main__":
    key = jax.random.PRNGKey(0)
    pkey, nkey = jax.random.split(key)

    # Small config consistent with the module: batch=2, input_dim=24, hidden_dim=16,
    # im_chan=3 -> output (2, 3, 190, 190).  hidden_dim=16 makes layer 1's reduction
    # Kred = 4*128 = 512, so the multi-K-block accumulation path is exercised alongside
    # the direct 1x1 path, the single-K-block path and the fused-tanh final layer.
    gen = GeneratorPallas(pkey, input_dim=24, im_chan=3, hidden_dim=16)
    noise = jax.random.normal(nkey, (2, 24), jnp.float32)

    fwd = jax.jit(gen.__call__)
    out = jax.block_until_ready(fwd(noise))
    assert out.shape == (2, 3, 190, 190), out.shape
    assert bool(jnp.all(jnp.isfinite(out)))

    # Tight check vs a reference that applies the same bf16 quantization points.
    ref_matched = jax.block_until_ready(
        jax.jit(functools.partial(reference_forward, gen, cast_bf16=True))(noise))
    err_matched = float(jnp.max(jnp.abs(out - ref_matched)))
    assert err_matched < 5e-3, f"max abs err vs bf16-matched reference: {err_matched}"

    # Loose sanity check vs the pure-f32 reference (bf16 operands + bf16 preact are
    # intentional, review-requested perf changes; tanh output keeps the error bounded).
    ref_f32 = jax.block_until_ready(
        jax.jit(functools.partial(reference_forward, gen, cast_bf16=False))(noise))
    err_f32 = float(jnp.max(jnp.abs(out - ref_f32)))
    assert err_f32 < 1.5e-1, f"max abs err vs f32 reference: {err_f32}"

    print("KERNEL_OK")
</pallas_src>

<mosaic_0001>
module attributes {stable_mosaic.version = 11 : i64} {
  func.func @_affine_leaky_kernel(%arg0: i32, %arg1: memref<16x2048xbf16, #tpu.memory_space<vmem>>, %arg2: memref<1x2048xf32, #tpu.memory_space<vmem>>, %arg3: memref<1x2048xf32, #tpu.memory_space<vmem>>, %arg4: memref<16x2048xbf16, #tpu.memory_space<vmem>>) attributes {dimension_semantics = [#tpu.dimension_semantics<parallel>], iteration_bounds = array<i64: 1>, scalar_prefetch = 0 : i64, scratch_operands = 0 : i64, tpu.core_type = #tpu.core_type<tc>, window_params = [{transform_indices = @transform_0, window_bounds = array<i64: 16, 2048>}, {pipeline_mode = #tpu.pipeline_mode<synchronous>, transform_indices = @transform_1, window_bounds = array<i64: 1, 2048>}, {pipeline_mode = #tpu.pipeline_mode<synchronous>, transform_indices = @transform_2, window_bounds = array<i64: 1, 2048>}, {transform_indices = @transform_3, window_bounds = array<i64: 16, 2048>}]} {
    %c0 = arith.constant 0 : index
    %c0_0 = arith.constant 0 : index
    %0 = vector.load %arg1[%c0, %c0_0] : memref<16x2048xbf16, #tpu.memory_space<vmem>>, vector<16x2048xbf16>
    %1 = arith.extf %0 : vector<16x2048xbf16> to vector<16x2048xf32>
    %c0_1 = arith.constant 0 : index
    %c0_2 = arith.constant 0 : index
    %2 = vector.load %arg2[%c0_1, %c0_2] : memref<1x2048xf32, #tpu.memory_space<vmem>>, vector<1x2048xf32>
    %3 = vector.broadcast %2 : vector<1x2048xf32> to vector<16x2048xf32>
    %4 = arith.mulf %1, %3 : vector<16x2048xf32>
    %c0_3 = arith.constant 0 : index
    %c0_4 = arith.constant 0 : index
    %5 = vector.load %arg3[%c0_3, %c0_4] : memref<1x2048xf32, #tpu.memory_space<vmem>>, vector<1x2048xf32>
    %6 = vector.broadcast %5 : vector<1x2048xf32> to vector<16x2048xf32>
    %7 = arith.addf %4, %6 : vector<16x2048xf32>
    %cst = arith.constant 0.000000e+00 : f32
    %8 = vector.broadcast %cst : f32 to vector<16x2048xf32>
    %9 = arith.cmpf oge, %7, %8 : vector<16x2048xf32>
    %cst_5 = arith.constant 2.000000e-01 : f32
    %10 = vector.broadcast %cst_5 : f32 to vector<16x2048xf32>
    %11 = arith.mulf %10, %7 : vector<16x2048xf32>
    %12 = arith.select %9, %7, %11 : vector<16x2048xi1>, vector<16x2048xf32>
    %13 = arith.truncf %12 : vector<16x2048xf32> to vector<16x2048xbf16>
    %c0_6 = arith.constant 0 : index
    %c0_7 = arith.constant 0 : index
    %14 = vector.load %arg4[%c0_6, %c0_7] : memref<16x2048xbf16, #tpu.memory_space<vmem>>, vector<16x2048xbf16>
    tpu.vector_store %arg4[%c0_6, %c0_7], %13 {strides = array<i32>} : memref<16x2048xbf16, #tpu.memory_space<vmem>>, vector<16x2048xbf16>,
    return
  }
  func.func @transform_0(%arg0: i32) -> (i32, i32) {
    %c0_i32 = arith.constant 0 : i32
    %c0_i32_0 = arith.constant 0 : i32
    return %arg0, %c0_i32 : i32, i32
  }
  func.func @transform_1(%arg0: i32) -> (i32, i32) {
    %c0_i32 = arith.constant 0 : i32
    %c0_i32_0 = arith.constant 0 : i32
    %c0_i32_1 = arith.constant 0 : i32
    return %c0_i32, %c0_i32_0 : i32, i32
  }
  func.func @transform_2(%arg0: i32) -> (i32, i32) {
    %c0_i32 = arith.constant 0 : i32
    %c0_i32_0 = arith.constant 0 : i32
    %c0_i32_1 = arith.constant 0 : i32
    return %c0_i32, %c0_i32_0 : i32, i32
  }
  func.func @transform_3(%arg0: i32) -> (i32, i32) {
    %c0_i32 = arith.constant 0 : i32
    %c0_i32_0 = arith.constant 0 : i32
    return %arg0, %c0_i32 : i32, i32
  }
}

module attributes {stable_mosaic.version = 11 : i64} {
  func.func @_mm_bn_stats_kernel(%arg0: i32, %arg1: i32, %arg2: memref<16x32xbf16, #tpu.memory_space<vmem>>, %arg3: memref<32x2048xbf16, #tpu.memory_space<vmem>>, %arg4: memref<1x2048xf32, #tpu.memory_space<vmem>>, %arg5: memref<16x2048xbf16, #tpu.memory_space<vmem>>, %arg6: memref<1x1x2048xf32, #tpu.memory_space<vmem>>, %arg7: memref<1x1x2048xf32, #tpu.memory_space<vmem>>, %arg8: memref<16x2048xf32, #tpu.memory_space<vmem>>) attributes {dimension_semantics = [#tpu.dimension_semantics<parallel>, #tpu.dimension_semantics<arbitrary>], iteration_bounds = array<i64: 1, 1>, scalar_prefetch = 0 : i64, scratch_operands = 1 : i64, tpu.core_type = #tpu.core_type<tc>, window_params = [{transform_indices = @transform_0, window_bounds = array<i64: 16, 32>}, {transform_indices = @transform_1, window_bounds = array<i64: 32, 2048>}, {pipeline_mode = #tpu.pipeline_mode<synchronous>, transform_indices = @transform_2, window_bounds = array<i64: 1, 2048>}, {transform_indices = @transform_3, window_bounds = array<i64: 16, 2048>}, {transform_indices = @transform_4, window_bounds = array<i64: 1, 1, 2048>}, {transform_indices = @transform_5, window_bounds = array<i64: 1, 1, 2048>}]} {
    %c0_i32 = arith.constant 0 : i32
    %0 = arith.cmpi eq, %arg1, %c0_i32 : i32
    %1 = arith.extui %0 : i1 to i32
    %c0_i32_0 = arith.constant 0 : i32
    %2 = arith.cmpi ne, %1, %c0_i32_0 : i32
    scf.if %2 {
      %cst_10 = arith.constant 0.000000e+00 : f32
      %12 = vector.broadcast %cst_10 : f32 to vector<16x2048xf32>
      %c0_11 = arith.constant 0 : index
      %c0_12 = arith.constant 0 : index
      %13 = vector.load %arg8[%c0_11, %c0_12] : memref<16x2048xf32, #tpu.memory_space<vmem>>, vector<16x2048xf32>
      tpu.vector_store %arg8[%c0_11, %c0_12], %12 {strides = array<i32>} : memref<16x2048xf32, #tpu.memory_space<vmem>>, vector<16x2048xf32>,
    } else {
    }
    %c0 = arith.constant 0 : index
    %c0_1 = arith.constant 0 : index
    %3 = vector.load %arg8[%c0, %c0_1] : memref<16x2048xf32, #tpu.memory_space<vmem>>, vector<16x2048xf32>
    %c0_2 = arith.constant 0 : index
    %c0_3 = arith.constant 0 : index
    %4 = vector.load %arg2[%c0_2, %c0_3] : memref<16x32xbf16, #tpu.memory_space<vmem>>, vector<16x32xbf16>
    %c0_4 = arith.constant 0 : index
    %c0_5 = arith.constant 0 : index
    %5 = vector.load %arg3[%c0_4, %c0_5] : memref<32x2048xbf16, #tpu.memory_space<vmem>>, vector<32x2048xbf16>
    %cst = arith.constant dense<0.000000e+00> : vector<16x2048xf32>
    %6 = tpu.matmul %4, %5, %cst {dimension_numbers = #tpu.dot_dimension_numbers<[1], [0], [0], [1], [0, 0, 1, 1], [], []>} : vector<16x32xbf16>, vector<32x2048xbf16>, vector<16x2048xf32> -> vector<16x2048xf32>
    %7 = arith.addf %3, %6 : vector<16x2048xf32>
    %c0_6 = arith.constant 0 : index
    %c0_7 = arith.constant 0 : index
    %8 = vector.load %arg8[%c0_6, %c0_7] : memref<16x2048xf32, #tpu.memory_space<vmem>>, vector<16x2048xf32>
    tpu.vector_store %arg8[%c0_6, %c0_7], %7 {strides = array<i32>} : memref<16x2048xf32, #tpu.memory_space<vmem>>, vector<16x2048xf32>,
    %c0_i32_8 = arith.constant 0 : i32
    %9 = arith.cmpi eq, %arg1, %c0_i32_8 : i32
    %10 = arith.extui %9 : i1 to i32
    %c0_i32_9 = arith.constant 0 : i32
    %11 = arith.cmpi ne, %10, %c0_i32_9 : i32
    scf.if %11 {
      %c0_10 = arith.constant 0 : index
      %c0_11 = arith.constant 0 : index
      %12 = vector.load %arg8[%c0_10, %c0_11] : memref<16x2048xf32, #tpu.memory_space<vmem>>, vector<16x2048xf32>
      %c0_12 = arith.constant 0 : index
      %c0_13 = arith.constant 0 : index
      %13 = vector.load %arg4[%c0_12, %c0_13] : memref<1x2048xf32, #tpu.memory_space<vmem>>, vector<1x2048xf32>
      %14 = vector.broadcast %13 : vector<1x2048xf32> to vector<16x2048xf32>
      %15 = arith.addf %12, %14 : vector<16x2048xf32>
      %16 = arith.truncf %15 : vector<16x2048xf32> to vector<16x2048xbf16>
      %c0_14 = arith.constant 0 : index
      %c0_15 = arith.constant 0 : index
      %17 = vector.load %arg5[%c0_14, %c0_15] : memref<16x2048xbf16, #tpu.memory_space<vmem>>, vector<16x2048xbf16>
      tpu.vector_store %arg5[%c0_14, %c0_15], %16 {strides = array<i32>} : memref<16x2048xbf16, #tpu.memory_space<vmem>>, vector<16x2048xbf16>,
      %cst_16 = arith.constant dense<0.000000e+00> : vector<2048xf32>
      %18 = vector.multi_reduction <add>, %12, %cst_16 [0] : vector<16x2048xf32> to vector<2048xf32>
      %19 = vector.shape_cast %18 : vector<2048xf32> to vector<1x2048xf32>
      %c0_17 = arith.constant 0 : index
      %c0_18 = arith.constant 0 : index
      %c0_19 = arith.constant 0 : index
      %20 = vector.load %arg6[%c0_17, %c0_18, %c0_19] : memref<1x1x2048xf32, #tpu.memory_space<vmem>>, vector<1x1x2048xf32>
      %21 = vector.shape_cast %20 : vector<1x1x2048xf32> to vector<1x2048xf32>
      %22 = vector.shape_cast %19 : vector<1x2048xf32> to vector<1x1x2048xf32>
      tpu.vector_store %arg6[%c0_17, %c0_18, %c0_19], %22 {strides = array<i32>} : memref<1x1x2048xf32, #tpu.memory_space<vmem>>, vector<1x1x2048xf32>,
      %23 = arith.mulf %12, %12 : vector<16x2048xf32>
      %cst_20 = arith.constant dense<0.000000e+00> : vector<2048xf32>
      %24 = vector.multi_reduction <add>, %23, %cst_20 [0] : vector<16x2048xf32> to vector<2048xf32>
      %25 = vector.shape_cast %24 : vector<2048xf32> to vector<1x2048xf32>
      %c0_21 = arith.constant 0 : index
      %c0_22 = arith.constant 0 : index
      %c0_23 = arith.constant 0 : index
      %26 = vector.load %arg7[%c0_21, %c0_22, %c0_23] : memref<1x1x2048xf32, #tpu.memory_space<vmem>>, vector<1x1x2048xf32>
      %27 = vector.shape_cast %26 : vector<1x1x2048xf32> to vector<1x2048xf32>
      %28 = vector.shape_cast %25 : vector<1x2048xf32> to vector<1x1x2048xf32>
      tpu.vector_store %arg7[%c0_21, %c0_22, %c0_23], %28 {strides = array<i32>} : memref<1x1x2048xf32, #tpu.memory_space<vmem>>, vector<1x1x2048xf32>,
    } else {
    }
    return
  }
  func.func @transform_0(%arg0: i32, %arg1: i32) -> (i32, i32) {
    %c0_i32 = arith.constant 0 : i32
    return %arg0, %arg1 : i32, i32
  }
  func.func @transform_1(%arg0: i32, %arg1: i32) -> (i32, i32) {
    %c0_i32 = arith.constant 0 : i32
    %c0_i32_0 = arith.constant 0 : i32
    return %arg1, %c0_i32 : i32, i32
  }
  func.func @transform_2(%arg0: i32, %arg1: i32) -> (i32, i32) {
    %c0_i32 = arith.constant 0 : i32
    %c0_i32_0 = arith.constant 0 : i32
    %c0_i32_1 = arith.constant 0 : i32
    return %c0_i32, %c0_i32_0 : i32, i32
  }
  func.func @transform_3(%arg0: i32, %arg1: i32) -> (i32, i32) {
    %c0_i32 = arith.constant 0 : i32
    %c0_i32_0 = arith.constant 0 : i32
    return %arg0, %c0_i32 : i32, i32
  }
  func.func @transform_4(%arg0: i32, %arg1: i32) -> (i32, i32, i32) {
    %c0_i32 = arith.constant 0 : i32
    %c0_i32_0 = arith.constant 0 : i32
    %c0_i32_1 = arith.constant 0 : i32
    return %arg0, %c0_i32, %c0_i32_0 : i32, i32, i32
  }
  func.func @transform_5(%arg0: i32, %arg1: i32) -> (i32, i32, i32) {
    %c0_i32 = arith.constant 0 : i32
    %c0_i32_0 = arith.constant 0 : i32
    %c0_i32_1 = arith.constant 0 : i32
    return %arg0, %c0_i32, %c0_i32_0 : i32, i32, i32
  }
}

module attributes {stable_mosaic.version = 11 : i64} {
  func.func @_mm_bn_stats_kernel(%arg0: i32, %arg1: i32, %arg2: memref<64x256xbf16, #tpu.memory_space<vmem>>, %arg3: memref<256x256xbf16, #tpu.memory_space<vmem>>, %arg4: memref<1x256xf32, #tpu.memory_space<vmem>>, %arg5: memref<64x256xbf16, #tpu.memory_space<vmem>>, %arg6: memref<1x1x256xf32, #tpu.memory_space<vmem>>, %arg7: memref<1x1x256xf32, #tpu.memory_space<vmem>>, %arg8: memref<64x256xf32, #tpu.memory_space<vmem>>) attributes {dimension_semantics = [#tpu.dimension_semantics<parallel>, #tpu.dimension_semantics<arbitrary>], iteration_bounds = array<i64: 1, 2>, scalar_prefetch = 0 : i64, scratch_operands = 1 : i64, tpu.core_type = #tpu.core_type<tc>, window_params = [{transform_indices = @transform_0, window_bounds = array<i64: 64, 256>}, {transform_indices = @transform_1, window_bounds = array<i64: 256, 256>}, {pipeline_mode = #tpu.pipeline_mode<synchronous>, transform_indices = @transform_2, window_bounds = array<i64: 1, 256>}, {transform_indices = @transform_3, window_bounds = array<i64: 64, 256>}, {transform_indices = @transform_4, window_bounds = array<i64: 1, 1, 256>}, {transform_indices = @transform_5, window_bounds = array<i64: 1, 1, 256>}]} {
    %c0_i32 = arith.constant 0 : i32
    %0 = arith.cmpi eq, %arg1, %c0_i32 : i32
    %1 = arith.extui %0 : i1 to i32
    %c0_i32_0 = arith.constant 0 : i32
    %2 = arith.cmpi ne, %1, %c0_i32_0 : i32
    scf.if %2 {
      %cst_9 = arith.constant 0.000000e+00 : f32
      %12 = vector.broadcast %cst_9 : f32 to vector<64x256xf32>
      %c0_10 = arith.constant 0 : index
      %c0_11 = arith.constant 0 : index
      %13 = vector.load %arg8[%c0_10, %c0_11] : memref<64x256xf32, #tpu.memory_space<vmem>>, vector<64x256xf32>
      tpu.vector_store %arg8[%c0_10, %c0_11], %12 {strides = array<i32>} : memref<64x256xf32, #tpu.memory_space<vmem>>, vector<64x256xf32>,
    } else {
    }
    %c0 = arith.constant 0 : index
    %c0_1 = arith.constant 0 : index
    %3 = vector.load %arg8[%c0, %c0_1] : memref<64x256xf32, #tpu.memory_space<vmem>>, vector<64x256xf32>
    %c0_2 = arith.constant 0 : index
    %c0_3 = arith.constant 0 : index
    %4 = vector.load %arg2[%c0_2, %c0_3] : memref<64x256xbf16, #tpu.memory_space<vmem>>, vector<64x256xbf16>
    %c0_4 = arith.constant 0 : index
    %c0_5 = arith.constant 0 : index
    %5 = vector.load %arg3[%c0_4, %c0_5] : memref<256x256xbf16, #tpu.memory_space<vmem>>, vector<256x256xbf16>
    %cst = arith.constant dense<0.000000e+00> : vector<64x256xf32>
    %6 = tpu.matmul %4, %5, %cst {dimension_numbers = #tpu.dot_dimension_numbers<[1], [0], [0], [1], [0, 0, 1, 1], [], []>} : vector<64x256xbf16>, vector<256x256xbf16>, vector<64x256xf32> -> vector<64x256xf32>
    %7 = arith.addf %3, %6 : vector<64x256xf32>
    %c0_6 = arith.constant 0 : index
    %c0_7 = arith.constant 0 : index
    %8 = vector.load %arg8[%c0_6, %c0_7] : memref<64x256xf32, #tpu.memory_space<vmem>>, vector<64x256xf32>
    tpu.vector_store %arg8[%c0_6, %c0_7], %7 {strides = array<i32>} : memref<64x256xf32, #tpu.memory_space<vmem>>, vector<64x256xf32>,
    %c1_i32 = arith.constant 1 : i32
    %9 = arith.cmpi eq, %arg1, %c1_i32 : i32
    %10 = arith.extui %9 : i1 to i32
    %c0_i32_8 = arith.constant 0 : i32
    %11 = arith.cmpi ne, %10, %c0_i32_8 : i32
    scf.if %11 {
      %c0_9 = arith.constant 0 : index
      %c0_10 = arith.constant 0 : index
      %12 = vector.load %arg8[%c0_9, %c0_10] : memref<64x256xf32, #tpu.memory_space<vmem>>, vector<64x256xf32>
      %c0_11 = arith.constant 0 : index
      %c0_12 = arith.constant 0 : index
      %13 = vector.load %arg4[%c0_11, %c0_12] : memref<1x256xf32, #tpu.memory_space<vmem>>, vector<1x256xf32>
      %14 = vector.broadcast %13 : vector<1x256xf32> to vector<64x256xf32>
      %15 = arith.addf %12, %14 : vector<64x256xf32>
      %16 = arith.truncf %15 : vector<64x256xf32> to vector<64x256xbf16>
      %c0_13 = arith.constant 0 : index
      %c0_14 = arith.constant 0 : index
      %17 = vector.load %arg5[%c0_13, %c0_14] : memref<64x256xbf16, #tpu.memory_space<vmem>>, vector<64x256xbf16>
      tpu.vector_store %arg5[%c0_13, %c0_14], %16 {strides = array<i32>} : memref<64x256xbf16, #tpu.memory_space<vmem>>, vector<64x256xbf16>,
      %cst_15 = arith.constant dense<0.000000e+00> : vector<256xf32>
      %18 = vector.multi_reduction <add>, %12, %cst_15 [0] : vector<64x256xf32> to vector<256xf32>
      %19 = vector.shape_cast %18 : vector<256xf32> to vector<1x256xf32>
      %c0_16 = arith.constant 0 : index
      %c0_17 = arith.constant 0 : index
      %c0_18 = arith.constant 0 : index
      %20 = vector.load %arg6[%c0_16, %c0_17, %c0_18] : memref<1x1x256xf32, #tpu.memory_space<vmem>>, vector<1x1x256xf32>
      %21 = vector.shape_cast %20 : vector<1x1x256xf32> to vector<1x256xf32>
      %22 = vector.shape_cast %19 : vector<1x256xf32> to vector<1x1x256xf32>
      tpu.vector_store %arg6[%c0_16, %c0_17, %c0_18], %22 {strides = array<i32>} : memref<1x1x256xf32, #tpu.memory_space<vmem>>, vector<1x1x256xf32>,
      %23 = arith.mulf %12, %12 : vector<64x256xf32>
      %cst_19 = arith.constant dense<0.000000e+00> : vector<256xf32>
      %24 = vector.multi_reduction <add>, %23, %cst_19 [0] : vector<64x256xf32> to vector<256xf32>
      %25 = vector.shape_cast %24 : vector<256xf32> to vector<1x256xf32>
      %c0_20 = arith.constant 0 : index
      %c0_21 = arith.constant 0 : index
      %c0_22 = arith.constant 0 : index
      %26 = vector.load %arg7[%c0_20, %c0_21, %c0_22] : memref<1x1x256xf32, #tpu.memory_space<vmem>>, vector<1x1x256xf32>
      %27 = vector.shape_cast %26 : vector<1x1x256xf32> to vector<1x256xf32>
      %28 = vector.shape_cast %25 : vector<1x256xf32> to vector<1x1x256xf32>
      tpu.vector_store %arg7[%c0_20, %c0_21, %c0_22], %28 {strides = array<i32>} : memref<1x1x256xf32, #tpu.memory_space<vmem>>, vector<1x1x256xf32>,
    } else {
    }
    return
  }
  func.func @transform_0(%arg0: i32, %arg1: i32) -> (i32, i32) {
    %c0_i32 = arith.constant 0 : i32
    return %arg0, %arg1 : i32, i32
  }
  func.func @transform_1(%arg0: i32, %arg1: i32) -> (i32, i32) {
    %c0_i32 = arith.constant 0 : i32
    %c0_i32_0 = arith.constant 0 : i32
    return %arg1, %c0_i32 : i32, i32
  }
  func.func @transform_2(%arg0: i32, %arg1: i32) -> (i32, i32) {
    %c0_i32 = arith.constant 0 : i32
    %c0_i32_0 = arith.constant 0 : i32
    %c0_i32_1 = arith.constant 0 : i32
    return %c0_i32, %c0_i32_0 : i32, i32
  }
  func.func @transform_3(%arg0: i32, %arg1: i32) -> (i32, i32) {
    %c0_i32 = arith.constant 0 : i32
    %c0_i32_0 = arith.constant 0 : i32
    return %arg0, %c0_i32 : i32, i32
  }
  func.func @transform_4(%arg0: i32, %arg1: i32) -> (i32, i32, i32) {
    %c0_i32 = arith.constant 0 : i32
    %c0_i32_0 = arith.constant 0 : i32
    %c0_i32_1 = arith.constant 0 : i32
    return %arg0, %c0_i32, %c0_i32_0 : i32, i32, i32
  }
  func.func @transform_5(%arg0: i32, %arg1: i32) -> (i32, i32, i32) {
    %c0_i32 = arith.constant 0 : i32
    %c0_i32_0 = arith.constant 0 : i32
    %c0_i32_1 = arith.constant 0 : i32
    return %arg0, %c0_i32, %c0_i32_0 : i32, i32, i32
  }
}

module attributes {stable_mosaic.version = 11 : i64} {
  func.func @_affine_leaky_kernel(%arg0: i32, %arg1: memref<64x256xbf16, #tpu.memory_space<vmem>>, %arg2: memref<1x256xf32, #tpu.memory_space<vmem>>, %arg3: memref<1x256xf32, #tpu.memory_space<vmem>>, %arg4: memref<64x256xbf16, #tpu.memory_space<vmem>>) attributes {dimension_semantics = [#tpu.dimension_semantics<parallel>], iteration_bounds = array<i64: 1>, scalar_prefetch = 0 : i64, scratch_operands = 0 : i64, tpu.core_type = #tpu.core_type<tc>, window_params = [{transform_indices = @transform_0, window_bounds = array<i64: 64, 256>}, {pipeline_mode = #tpu.pipeline_mode<synchronous>, transform_indices = @transform_1, window_bounds = array<i64: 1, 256>}, {pipeline_mode = #tpu.pipeline_mode<synchronous>, transform_indices = @transform_2, window_bounds = array<i64: 1, 256>}, {transform_indices = @transform_3, window_bounds = array<i64: 64, 256>}]} {
    %c0 = arith.constant 0 : index
    %c0_0 = arith.constant 0 : index
    %0 = vector.load %arg1[%c0, %c0_0] : memref<64x256xbf16, #tpu.memory_space<vmem>>, vector<64x256xbf16>
    %1 = arith.extf %0 : vector<64x256xbf16> to vector<64x256xf32>
    %c0_1 = arith.constant 0 : index
    %c0_2 = arith.constant 0 : index
    %2 = vector.load %arg2[%c0_1, %c0_2] : memref<1x256xf32, #tpu.memory_space<vmem>>, vector<1x256xf32>
    %3 = vector.broadcast %2 : vector<1x256xf32> to vector<64x256xf32>
    %4 = arith.mulf %1, %3 : vector<64x256xf32>
    %c0_3 = arith.constant 0 : index
    %c0_4 = arith.constant 0 : index
    %5 = vector.load %arg3[%c0_3, %c0_4] : memref<1x256xf32, #tpu.memory_space<vmem>>, vector<1x256xf32>
    %6 = vector.broadcast %5 : vector<1x256xf32> to vector<64x256xf32>
    %7 = arith.addf %4, %6 : vector<64x256xf32>
    %cst = arith.constant 0.000000e+00 : f32
    %8 = vector.broadcast %cst : f32 to vector<64x256xf32>
    %9 = arith.cmpf oge, %7, %8 : vector<64x256xf32>
    %cst_5 = arith.constant 2.000000e-01 : f32
    %10 = vector.broadcast %cst_5 : f32 to vector<64x256xf32>
    %11 = arith.mulf %10, %7 : vector<64x256xf32>
    %12 = arith.select %9, %7, %11 : vector<64x256xi1>, vector<64x256xf32>
    %13 = arith.truncf %12 : vector<64x256xf32> to vector<64x256xbf16>
    %c0_6 = arith.constant 0 : index
    %c0_7 = arith.constant 0 : index
    %14 = vector.load %arg4[%c0_6, %c0_7] : memref<64x256xbf16, #tpu.memory_space<vmem>>, vector<64x256xbf16>
    tpu.vector_store %arg4[%c0_6, %c0_7], %13 {strides = array<i32>} : memref<64x256xbf16, #tpu.memory_space<vmem>>, vector<64x256xbf16>,
    return
  }
  func.func @transform_0(%arg0: i32) -> (i32, i32) {
    %c0_i32 = arith.constant 0 : i32
    %c0_i32_0 = arith.constant 0 : i32
    return %arg0, %c0_i32 : i32, i32
  }
  func.func @transform_1(%arg0: i32) -> (i32, i32) {
    %c0_i32 = arith.constant 0 : i32
    %c0_i32_0 = arith.constant 0 : i32
    %c0_i32_1 = arith.constant 0 : i32
    return %c0_i32, %c0_i32_0 : i32, i32
  }
  func.func @transform_2(%arg0: i32) -> (i32, i32) {
    %c0_i32 = arith.constant 0 : i32
    %c0_i32_0 = arith.constant 0 : i32
    %c0_i32_1 = arith.constant 0 : i32
    return %c0_i32, %c0_i32_0 : i32, i32
  }
  func.func @transform_3(%arg0: i32) -> (i32, i32) {
    %c0_i32 = arith.constant 0 : i32
    %c0_i32_0 = arith.constant 0 : i32
    return %arg0, %c0_i32 : i32, i32
  }
}

module attributes {stable_mosaic.version = 11 : i64} {
  func.func @_mm_bn_stats_kernel(%arg0: i32, %arg1: i32, %arg2: memref<64x256xbf16, #tpu.memory_space<vmem>>, %arg3: memref<256x128xbf16, #tpu.memory_space<vmem>>, %arg4: memref<1x128xf32, #tpu.memory_space<vmem>>, %arg5: memref<64x128xbf16, #tpu.memory_space<vmem>>, %arg6: memref<1x1x128xf32, #tpu.memory_space<vmem>>, %arg7: memref<1x1x128xf32, #tpu.memory_space<vmem>>, %arg8: memref<64x128xf32, #tpu.memory_space<vmem>>) attributes {dimension_semantics = [#tpu.dimension_semantics<parallel>, #tpu.dimension_semantics<arbitrary>], iteration_bounds = array<i64: 4, 1>, scalar_prefetch = 0 : i64, scratch_operands = 1 : i64, tpu.core_type = #tpu.core_type<tc>, window_params = [{transform_indices = @transform_0, window_bounds = array<i64: 64, 256>}, {transform_indices = @transform_1, window_bounds = array<i64: 256, 128>}, {pipeline_mode = #tpu.pipeline_mode<synchronous>, transform_indices = @transform_2, window_bounds = array<i64: 1, 128>}, {transform_indices = @transform_3, window_bounds = array<i64: 64, 128>}, {transform_indices = @transform_4, window_bounds = array<i64: 1, 1, 128>}, {transform_indices = @transform_5, window_bounds = array<i64: 1, 1, 128>}]} {
    %c0_i32 = arith.constant 0 : i32
    %0 = arith.cmpi eq, %arg1, %c0_i32 : i32
    %1 = arith.extui %0 : i1 to i32
    %c0_i32_0 = arith.constant 0 : i32
    %2 = arith.cmpi ne, %1, %c0_i32_0 : i32
    scf.if %2 {
      %cst_10 = arith.constant 0.000000e+00 : f32
      %12 = vector.broadcast %cst_10 : f32 to vector<64x128xf32>
      %c0_11 = arith.constant 0 : index
      %c0_12 = arith.constant 0 : index
      %13 = vector.load %arg8[%c0_11, %c0_12] : memref<64x128xf32, #tpu.memory_space<vmem>>, vector<64x128xf32>
      tpu.vector_store %arg8[%c0_11, %c0_12], %12 {strides = array<i32>} : memref<64x128xf32, #tpu.memory_space<vmem>>, vector<64x128xf32>,
    } else {
    }
    %c0 = arith.constant 0 : index
    %c0_1 = arith.constant 0 : index
    %3 = vector.load %arg8[%c0, %c0_1] : memref<64x128xf32, #tpu.memory_space<vmem>>, vector<64x128xf32>
    %c0_2 = arith.constant 0 : index
    %c0_3 = arith.constant 0 : index
    %4 = vector.load %arg2[%c0_2, %c0_3] : memref<64x256xbf16, #tpu.memory_space<vmem>>, vector<64x256xbf16>
    %c0_4 = arith.constant 0 : index
    %c0_5 = arith.constant 0 : index
    %5 = vector.load %arg3[%c0_4, %c0_5] : memref<256x128xbf16, #tpu.memory_space<vmem>>, vector<256x128xbf16>
    %cst = arith.constant dense<0.000000e+00> : vector<64x128xf32>
    %6 = tpu.matmul %4, %5, %cst {dimension_numbers = #tpu.dot_dimension_numbers<[1], [0], [0], [1], [0, 0, 1, 1], [], []>} : vector<64x256xbf16>, vector<256x128xbf16>, vector<64x128xf32> -> vector<64x128xf32>
    %7 = arith.addf %3, %6 : vector<64x128xf32>
    %c0_6 = arith.constant 0 : index
    %c0_7 = arith.constant 0 : index
    %8 = vector.load %arg8[%c0_6, %c0_7] : memref<64x128xf32, #tpu.memory_space<vmem>>, vector<64x128xf32>
    tpu.vector_store %arg8[%c0_6, %c0_7], %7 {strides = array<i32>} : memref<64x128xf32, #tpu.memory_space<vmem>>, vector<64x128xf32>,
    %c0_i32_8 = arith.constant 0 : i32
    %9 = arith.cmpi eq, %arg1, %c0_i32_8 : i32
    %10 = arith.extui %9 : i1 to i32
    %c0_i32_9 = arith.constant 0 : i32
    %11 = arith.cmpi ne, %10, %c0_i32_9 : i32
    scf.if %11 {
      %c0_10 = arith.constant 0 : index
      %c0_11 = arith.constant 0 : index
      %12 = vector.load %arg8[%c0_10, %c0_11] : memref<64x128xf32, #tpu.memory_space<vmem>>, vector<64x128xf32>
      %c0_12 = arith.constant 0 : index
      %c0_13 = arith.constant 0 : index
      %13 = vector.load %arg4[%c0_12, %c0_13] : memref<1x128xf32, #tpu.memory_space<vmem>>, vector<1x128xf32>
      %14 = vector.broadcast %13 : vector<1x128xf32> to vector<64x128xf32>
      %15 = arith.addf %12, %14 : vector<64x128xf32>
      %16 = arith.truncf %15 : vector<64x128xf32> to vector<64x128xbf16>
      %c0_14 = arith.constant 0 : index
      %c0_15 = arith.constant 0 : index
      %17 = vector.load %arg5[%c0_14, %c0_15] : memref<64x128xbf16, #tpu.memory_space<vmem>>, vector<64x128xbf16>
      tpu.vector_store %arg5[%c0_14, %c0_15], %16 {strides = array<i32>} : memref<64x128xbf16, #tpu.memory_space<vmem>>, vector<64x128xbf16>,
      %cst_16 = arith.constant dense<0.000000e+00> : vector<128xf32>
      %18 = vector.multi_reduction <add>, %12, %cst_16 [0] : vector<64x128xf32> to vector<128xf32>
      %19 = vector.shape_cast %18 : vector<128xf32> to vector<1x128xf32>
      %c0_17 = arith.constant 0 : index
      %c0_18 = arith.constant 0 : index
      %c0_19 = arith.constant 0 : index
      %20 = vector.load %arg6[%c0_17, %c0_18, %c0_19] : memref<1x1x128xf32, #tpu.memory_space<vmem>>, vector<1x1x128xf32>
      %21 = vector.shape_cast %20 : vector<1x1x128xf32> to vector<1x128xf32>
      %22 = vector.shape_cast %19 : vector<1x128xf32> to vector<1x1x128xf32>
      tpu.vector_store %arg6[%c0_17, %c0_18, %c0_19], %22 {strides = array<i32>} : memref<1x1x128xf32, #tpu.memory_space<vmem>>, vector<1x1x128xf32>,
      %23 = arith.mulf %12, %12 : vector<64x128xf32>
      %cst_20 = arith.constant dense<0.000000e+00> : vector<128xf32>
      %24 = vector.multi_reduction <add>, %23, %cst_20 [0] : vector<64x128xf32> to vector<128xf32>
      %25 = vector.shape_cast %24 : vector<128xf32> to vector<1x128xf32>
      %c0_21 = arith.constant 0 : index
      %c0_22 = arith.constant 0 : index
      %c0_23 = arith.constant 0 : index
      %26 = vector.load %arg7[%c0_21, %c0_22, %c0_23] : memref<1x1x128xf32, #tpu.memory_space<vmem>>, vector<1x1x128xf32>
      %27 = vector.shape_cast %26 : vector<1x1x128xf32> to vector<1x128xf32>
      %28 = vector.shape_cast %25 : vector<1x128xf32> to vector<1x1x128xf32>
      tpu.vector_store %arg7[%c0_21, %c0_22, %c0_23], %28 {strides = array<i32>} : memref<1x1x128xf32, #tpu.memory_space<vmem>>, vector<1x1x128xf32>,
    } else {
    }
    return
  }
  func.func @transform_0(%arg0: i32, %arg1: i32) -> (i32, i32) {
    %c0_i32 = arith.constant 0 : i32
    return %arg0, %arg1 : i32, i32
  }
  func.func @transform_1(%arg0: i32, %arg1: i32) -> (i32, i32) {
    %c0_i32 = arith.constant 0 : i32
    %c0_i32_0 = arith.constant 0 : i32
    return %arg1, %c0_i32 : i32, i32
  }
  func.func @transform_2(%arg0: i32, %arg1: i32) -> (i32, i32) {
    %c0_i32 = arith.constant 0 : i32
    %c0_i32_0 = arith.constant 0 : i32
    %c0_i32_1 = arith.constant 0 : i32
    return %c0_i32, %c0_i32_0 : i32, i32
  }
  func.func @transform_3(%arg0: i32, %arg1: i32) -> (i32, i32) {
    %c0_i32 = arith.constant 0 : i32
    %c0_i32_0 = arith.constant 0 : i32
    return %arg0, %c0_i32 : i32, i32
  }
  func.func @transform_4(%arg0: i32, %arg1: i32) -> (i32, i32, i32) {
    %c0_i32 = arith.constant 0 : i32
    %c0_i32_0 = arith.constant 0 : i32
    %c0_i32_1 = arith.constant 0 : i32
    return %arg0, %c0_i32, %c0_i32_0 : i32, i32, i32
  }
  func.func @transform_5(%arg0: i32, %arg1: i32) -> (i32, i32, i32) {
    %c0_i32 = arith.constant 0 : i32
    %c0_i32_0 = arith.constant 0 : i32
    %c0_i32_1 = arith.constant 0 : i32
    return %arg0, %c0_i32, %c0_i32_0 : i32, i32, i32
  }
}

module attributes {stable_mosaic.version = 11 : i64} {
  func.func @_affine_leaky_kernel(%arg0: i32, %arg1: memref<256x128xbf16, #tpu.memory_space<vmem>>, %arg2: memref<1x128xf32, #tpu.memory_space<vmem>>, %arg3: memref<1x128xf32, #tpu.memory_space<vmem>>, %arg4: memref<256x128xbf16, #tpu.memory_space<vmem>>) attributes {dimension_semantics = [#tpu.dimension_semantics<parallel>], iteration_bounds = array<i64: 1>, scalar_prefetch = 0 : i64, scratch_operands = 0 : i64, tpu.core_type = #tpu.core_type<tc>, window_params = [{transform_indices = @transform_0, window_bounds = array<i64: 256, 128>}, {pipeline_mode = #tpu.pipeline_mode<synchronous>, transform_indices = @transform_1, window_bounds = array<i64: 1, 128>}, {pipeline_mode = #tpu.pipeline_mode<synchronous>, transform_indices = @transform_2, window_bounds = array<i64: 1, 128>}, {transform_indices = @transform_3, window_bounds = array<i64: 256, 128>}]} {
    %c0 = arith.constant 0 : index
    %c0_0 = arith.constant 0 : index
    %0 = vector.load %arg1[%c0, %c0_0] : memref<256x128xbf16, #tpu.memory_space<vmem>>, vector<256x128xbf16>
    %1 = arith.extf %0 : vector<256x128xbf16> to vector<256x128xf32>
    %c0_1 = arith.constant 0 : index
    %c0_2 = arith.constant 0 : index
    %2 = vector.load %arg2[%c0_1, %c0_2] : memref<1x128xf32, #tpu.memory_space<vmem>>, vector<1x128xf32>
    %3 = vector.broadcast %2 : vector<1x128xf32> to vector<256x128xf32>
    %4 = arith.mulf %1, %3 : vector<256x128xf32>
    %c0_3 = arith.constant 0 : index
    %c0_4 = arith.constant 0 : index
    %5 = vector.load %arg3[%c0_3, %c0_4] : memref<1x128xf32, #tpu.memory_space<vmem>>, vector<1x128xf32>
    %6 = vector.broadcast %5 : vector<1x128xf32> to vector<256x128xf32>
    %7 = arith.addf %4, %6 : vector<256x128xf32>
    %cst = arith.constant 0.000000e+00 : f32
    %8 = vector.broadcast %cst : f32 to vector<256x128xf32>
    %9 = arith.cmpf oge, %7, %8 : vector<256x128xf32>
    %cst_5 = arith.constant 2.000000e-01 : f32
    %10 = vector.broadcast %cst_5 : f32 to vector<256x128xf32>
    %11 = arith.mulf %10, %7 : vector<256x128xf32>
    %12 = arith.select %9, %7, %11 : vector<256x128xi1>, vector<256x128xf32>
    %13 = arith.truncf %12 : vector<256x128xf32> to vector<256x128xbf16>
    %c0_6 = arith.constant 0 : index
    %c0_7 = arith.constant 0 : index
    %14 = vector.load %arg4[%c0_6, %c0_7] : memref<256x128xbf16, #tpu.memory_space<vmem>>, vector<256x128xbf16>
    tpu.vector_store %arg4[%c0_6, %c0_7], %13 {strides = array<i32>} : memref<256x128xbf16, #tpu.memory_space<vmem>>, vector<256x128xbf16>,
    return
  }
  func.func @transform_0(%arg0: i32) -> (i32, i32) {
    %c0_i32 = arith.constant 0 : i32
    %c0_i32_0 = arith.constant 0 : i32
    return %arg0, %c0_i32 : i32, i32
  }
  func.func @transform_1(%arg0: i32) -> (i32, i32) {
    %c0_i32 = arith.constant 0 : i32
    %c0_i32_0 = arith.constant 0 : i32
    %c0_i32_1 = arith.constant 0 : i32
    return %c0_i32, %c0_i32_0 : i32, i32
  }
  func.func @transform_2(%arg0: i32) -> (i32, i32) {
    %c0_i32 = arith.constant 0 : i32
    %c0_i32_0 = arith.constant 0 : i32
    %c0_i32_1 = arith.constant 0 : i32
    return %c0_i32, %c0_i32_0 : i32, i32
  }
  func.func @transform_3(%arg0: i32) -> (i32, i32) {
    %c0_i32 = arith.constant 0 : i32
    %c0_i32_0 = arith.constant 0 : i32
    return %arg0, %c0_i32 : i32, i32
  }
}

module attributes {stable_mosaic.version = 11 : i64} {
  func.func @_mm_bn_stats_kernel(%arg0: i32, %arg1: i32, %arg2: memref<256x128xbf16, #tpu.memory_space<vmem>>, %arg3: memref<128x64xbf16, #tpu.memory_space<vmem>>, %arg4: memref<1x64xf32, #tpu.memory_space<vmem>>, %arg5: memref<256x64xbf16, #tpu.memory_space<vmem>>, %arg6: memref<1x1x64xf32, #tpu.memory_space<vmem>>, %arg7: memref<1x1x64xf32, #tpu.memory_space<vmem>>, %arg8: memref<256x64xf32, #tpu.memory_space<vmem>>) attributes {dimension_semantics = [#tpu.dimension_semantics<parallel>, #tpu.dimension_semantics<arbitrary>], iteration_bounds = array<i64: 5, 1>, scalar_prefetch = 0 : i64, scratch_operands = 1 : i64, tpu.core_type = #tpu.core_type<tc>, window_params = [{transform_indices = @transform_0, window_bounds = array<i64: 256, 128>}, {transform_indices = @transform_1, window_bounds = array<i64: 128, 64>}, {pipeline_mode = #tpu.pipeline_mode<synchronous>, transform_indices = @transform_2, window_bounds = array<i64: 1, 64>}, {transform_indices = @transform_3, window_bounds = array<i64: 256, 64>}, {transform_indices = @transform_4, window_bounds = array<i64: 1, 1, 64>}, {transform_indices = @transform_5, window_bounds = array<i64: 1, 1, 64>}]} {
    %c0_i32 = arith.constant 0 : i32
    %0 = arith.cmpi eq, %arg1, %c0_i32 : i32
    %1 = arith.extui %0 : i1 to i32
    %c0_i32_0 = arith.constant 0 : i32
    %2 = arith.cmpi ne, %1, %c0_i32_0 : i32
    scf.if %2 {
      %cst_10 = arith.constant 0.000000e+00 : f32
      %12 = vector.broadcast %cst_10 : f32 to vector<256x64xf32>
      %c0_11 = arith.constant 0 : index
      %c0_12 = arith.constant 0 : index
      %13 = vector.load %arg8[%c0_11, %c0_12] : memref<256x64xf32, #tpu.memory_space<vmem>>, vector<256x64xf32>
      tpu.vector_store %arg8[%c0_11, %c0_12], %12 {strides = array<i32>} : memref<256x64xf32, #tpu.memory_space<vmem>>, vector<256x64xf32>,
    } else {
    }
    %c0 = arith.constant 0 : index
    %c0_1 = arith.constant 0 : index
    %3 = vector.load %arg8[%c0, %c0_1] : memref<256x64xf32, #tpu.memory_space<vmem>>, vector<256x64xf32>
    %c0_2 = arith.constant 0 : index
    %c0_3 = arith.constant 0 : index
    %4 = vector.load %arg2[%c0_2, %c0_3] : memref<256x128xbf16, #tpu.memory_space<vmem>>, vector<256x128xbf16>
    %c0_4 = arith.constant 0 : index
    %c0_5 = arith.constant 0 : index
    %5 = vector.load %arg3[%c0_4, %c0_5] : memref<128x64xbf16, #tpu.memory_space<vmem>>, vector<128x64xbf16>
    %cst = arith.constant dense<0.000000e+00> : vector<256x64xf32>
    %6 = tpu.matmul %4, %5, %cst {dimension_numbers = #tpu.dot_dimension_numbers<[1], [0], [0], [1], [0, 0, 1, 1], [], []>} : vector<256x128xbf16>, vector<128x64xbf16>, vector<256x64xf32> -> vector<256x64xf32>
    %7 = arith.addf %3, %6 : vector<256x64xf32>
    %c0_6 = arith.constant 0 : index
    %c0_7 = arith.constant 0 : index
    %8 = vector.load %arg8[%c0_6, %c0_7] : memref<256x64xf32, #tpu.memory_space<vmem>>, vector<256x64xf32>
    tpu.vector_store %arg8[%c0_6, %c0_7], %7 {strides = array<i32>} : memref<256x64xf32, #tpu.memory_space<vmem>>, vector<256x64xf32>,
    %c0_i32_8 = arith.constant 0 : i32
    %9 = arith.cmpi eq, %arg1, %c0_i32_8 : i32
    %10 = arith.extui %9 : i1 to i32
    %c0_i32_9 = arith.constant 0 : i32
    %11 = arith.cmpi ne, %10, %c0_i32_9 : i32
    scf.if %11 {
      %c0_10 = arith.constant 0 : index
      %c0_11 = arith.constant 0 : index
      %12 = vector.load %arg8[%c0_10, %c0_11] : memref<256x64xf32, #tpu.memory_space<vmem>>, vector<256x64xf32>
      %c0_12 = arith.constant 0 : index
      %c0_13 = arith.constant 0 : index
      %13 = vector.load %arg4[%c0_12, %c0_13] : memref<1x64xf32, #tpu.memory_space<vmem>>, vector<1x64xf32>
      %14 = vector.broadcast %13 : vector<1x64xf32> to vector<256x64xf32>
      %15 = arith.addf %12, %14 : vector<256x64xf32>
      %16 = arith.truncf %15 : vector<256x64xf32> to vector<256x64xbf16>
      %c0_14 = arith.constant 0 : index
      %c0_15 = arith.constant 0 : index
      %17 = vector.load %arg5[%c0_14, %c0_15] : memref<256x64xbf16, #tpu.memory_space<vmem>>, vector<256x64xbf16>
      tpu.vector_store %arg5[%c0_14, %c0_15], %16 {strides = array<i32>} : memref<256x64xbf16, #tpu.memory_space<vmem>>, vector<256x64xbf16>,
      %cst_16 = arith.constant dense<0.000000e+00> : vector<64xf32>
      %18 = vector.multi_reduction <add>, %12, %cst_16 [0] : vector<256x64xf32> to vector<64xf32>
      %19 = vector.shape_cast %18 : vector<64xf32> to vector<1x64xf32>
      %c0_17 = arith.constant 0 : index
      %c0_18 = arith.constant 0 : index
      %c0_19 = arith.constant 0 : index
      %20 = vector.load %arg6[%c0_17, %c0_18, %c0_19] : memref<1x1x64xf32, #tpu.memory_space<vmem>>, vector<1x1x64xf32>
      %21 = vector.shape_cast %20 : vector<1x1x64xf32> to vector<1x64xf32>
      %22 = vector.shape_cast %19 : vector<1x64xf32> to vector<1x1x64xf32>
      tpu.vector_store %arg6[%c0_17, %c0_18, %c0_19], %22 {strides = array<i32>} : memref<1x1x64xf32, #tpu.memory_space<vmem>>, vector<1x1x64xf32>,
      %23 = arith.mulf %12, %12 : vector<256x64xf32>
      %cst_20 = arith.constant dense<0.000000e+00> : vector<64xf32>
      %24 = vector.multi_reduction <add>, %23, %cst_20 [0] : vector<256x64xf32> to vector<64xf32>
      %25 = vector.shape_cast %24 : vector<64xf32> to vector<1x64xf32>
      %c0_21 = arith.constant 0 : index
      %c0_22 = arith.constant 0 : index
      %c0_23 = arith.constant 0 : index
      %26 = vector.load %arg7[%c0_21, %c0_22, %c0_23] : memref<1x1x64xf32, #tpu.memory_space<vmem>>, vector<1x1x64xf32>
      %27 = vector.shape_cast %26 : vector<1x1x64xf32> to vector<1x64xf32>
      %28 = vector.shape_cast %25 : vector<1x64xf32> to vector<1x1x64xf32>
      tpu.vector_store %arg7[%c0_21, %c0_22, %c0_23], %28 {strides = array<i32>} : memref<1x1x64xf32, #tpu.memory_space<vmem>>, vector<1x1x64xf32>,
    } else {
    }
    return
  }
  func.func @transform_0(%arg0: i32, %arg1: i32) -> (i32, i32) {
    %c0_i32 = arith.constant 0 : i32
    return %arg0, %arg1 : i32, i32
  }
  func.func @transform_1(%arg0: i32, %arg1: i32) -> (i32, i32) {
    %c0_i32 = arith.constant 0 : i32
    %c0_i32_0 = arith.constant 0 : i32
    return %arg1, %c0_i32 : i32, i32
  }
  func.func @transform_2(%arg0: i32, %arg1: i32) -> (i32, i32) {
    %c0_i32 = arith.constant 0 : i32
    %c0_i32_0 = arith.constant 0 : i32
    %c0_i32_1 = arith.constant 0 : i32
    return %c0_i32, %c0_i32_0 : i32, i32
  }
  func.func @transform_3(%arg0: i32, %arg1: i32) -> (i32, i32) {
    %c0_i32 = arith.constant 0 : i32
    %c0_i32_0 = arith.constant 0 : i32
    return %arg0, %c0_i32 : i32, i32
  }
  func.func @transform_4(%arg0: i32, %arg1: i32) -> (i32, i32, i32) {
    %c0_i32 = arith.constant 0 : i32
    %c0_i32_0 = arith.constant 0 : i32
    %c0_i32_1 = arith.constant 0 : i32
    return %arg0, %c0_i32, %c0_i32_0 : i32, i32, i32
  }
  func.func @transform_5(%arg0: i32, %arg1: i32) -> (i32, i32, i32) {
    %c0_i32 = arith.constant 0 : i32
    %c0_i32_0 = arith.constant 0 : i32
    %c0_i32_1 = arith.constant 0 : i32
    return %arg0, %c0_i32, %c0_i32_0 : i32, i32, i32
  }
}

module attributes {stable_mosaic.version = 11 : i64} {
  func.func @_affine_leaky_kernel(%arg0: i32, %arg1: memref<256x64xbf16, #tpu.memory_space<vmem>>, %arg2: memref<1x64xf32, #tpu.memory_space<vmem>>, %arg3: memref<1x64xf32, #tpu.memory_space<vmem>>, %arg4: memref<256x64xbf16, #tpu.memory_space<vmem>>) attributes {dimension_semantics = [#tpu.dimension_semantics<parallel>], iteration_bounds = array<i64: 5>, scalar_prefetch = 0 : i64, scratch_operands = 0 : i64, tpu.core_type = #tpu.core_type<tc>, window_params = [{transform_indices = @transform_0, window_bounds = array<i64: 256, 64>}, {pipeline_mode = #tpu.pipeline_mode<synchronous>, transform_indices = @transform_1, window_bounds = array<i64: 1, 64>}, {pipeline_mode = #tpu.pipeline_mode<synchronous>, transform_indices = @transform_2, window_bounds = array<i64: 1, 64>}, {transform_indices = @transform_3, window_bounds = array<i64: 256, 64>}]} {
    %c0 = arith.constant 0 : index
    %c0_0 = arith.constant 0 : index
    %0 = vector.load %arg1[%c0, %c0_0] : memref<256x64xbf16, #tpu.memory_space<vmem>>, vector<256x64xbf16>
    %1 = arith.extf %0 : vector<256x64xbf16> to vector<256x64xf32>
    %c0_1 = arith.constant 0 : index
    %c0_2 = arith.constant 0 : index
    %2 = vector.load %arg2[%c0_1, %c0_2] : memref<1x64xf32, #tpu.memory_space<vmem>>, vector<1x64xf32>
    %3 = vector.broadcast %2 : vector<1x64xf32> to vector<256x64xf32>
    %4 = arith.mulf %1, %3 : vector<256x64xf32>
    %c0_3 = arith.constant 0 : index
    %c0_4 = arith.constant 0 : index
    %5 = vector.load %arg3[%c0_3, %c0_4] : memref<1x64xf32, #tpu.memory_space<vmem>>, vector<1x64xf32>
    %6 = vector.broadcast %5 : vector<1x64xf32> to vector<256x64xf32>
    %7 = arith.addf %4, %6 : vector<256x64xf32>
    %cst = arith.constant 0.000000e+00 : f32
    %8 = vector.broadcast %cst : f32 to vector<256x64xf32>
    %9 = arith.cmpf oge, %7, %8 : vector<256x64xf32>
    %cst_5 = arith.constant 2.000000e-01 : f32
    %10 = vector.broadcast %cst_5 : f32 to vector<256x64xf32>
    %11 = arith.mulf %10, %7 : vector<256x64xf32>
    %12 = arith.select %9, %7, %11 : vector<256x64xi1>, vector<256x64xf32>
    %13 = arith.truncf %12 : vector<256x64xf32> to vector<256x64xbf16>
    %c0_6 = arith.constant 0 : index
    %c0_7 = arith.constant 0 : index
    %14 = vector.load %arg4[%c0_6, %c0_7] : memref<256x64xbf16, #tpu.memory_space<vmem>>, vector<256x64xbf16>
    tpu.vector_store %arg4[%c0_6, %c0_7], %13 {strides = array<i32>} : memref<256x64xbf16, #tpu.memory_space<vmem>>, vector<256x64xbf16>,
    return
  }
  func.func @transform_0(%arg0: i32) -> (i32, i32) {
    %c0_i32 = arith.constant 0 : i32
    %c0_i32_0 = arith.constant 0 : i32
    return %arg0, %c0_i32 : i32, i32
  }
  func.func @transform_1(%arg0: i32) -> (i32, i32) {
    %c0_i32 = arith.constant 0 : i32
    %c0_i32_0 = arith.constant 0 : i32
    %c0_i32_1 = arith.constant 0 : i32
    return %c0_i32, %c0_i32_0 : i32, i32
  }
  func.func @transform_2(%arg0: i32) -> (i32, i32) {
    %c0_i32 = arith.constant 0 : i32
    %c0_i32_0 = arith.constant 0 : i32
    %c0_i32_1 = arith.constant 0 : i32
    return %c0_i32, %c0_i32_0 : i32, i32
  }
  func.func @transform_3(%arg0: i32) -> (i32, i32) {
    %c0_i32 = arith.constant 0 : i32
    %c0_i32_0 = arith.constant 0 : i32
    return %arg0, %c0_i32 : i32, i32
  }
}

module attributes {stable_mosaic.version = 11 : i64} {
  func.func @_mm_bn_stats_kernel(%arg0: i32, %arg1: i32, %arg2: memref<512x64xbf16, #tpu.memory_space<vmem>>, %arg3: memref<64x64xbf16, #tpu.memory_space<vmem>>, %arg4: memref<1x64xf32, #tpu.memory_space<vmem>>, %arg5: memref<512x64xbf16, #tpu.memory_space<vmem>>, %arg6: memref<1x1x64xf32, #tpu.memory_space<vmem>>, %arg7: memref<1x1x64xf32, #tpu.memory_space<vmem>>, %arg8: memref<512x64xf32, #tpu.memory_space<vmem>>) attributes {dimension_semantics = [#tpu.dimension_semantics<parallel>, #tpu.dimension_semantics<arbitrary>], iteration_bounds = array<i64: 9, 1>, scalar_prefetch = 0 : i64, scratch_operands = 1 : i64, tpu.core_type = #tpu.core_type<tc>, window_params = [{transform_indices = @transform_0, window_bounds = array<i64: 512, 64>}, {transform_indices = @transform_1, window_bounds = array<i64: 64, 64>}, {pipeline_mode = #tpu.pipeline_mode<synchronous>, transform_indices = @transform_2, window_bounds = array<i64: 1, 64>}, {transform_indices = @transform_3, window_bounds = array<i64: 512, 64>}, {transform_indices = @transform_4, window_bounds = array<i64: 1, 1, 64>}, {transform_indices = @transform_5, window_bounds = array<i64: 1, 1, 64>}]} {
    %c0_i32 = arith.constant 0 : i32
    %0 = arith.cmpi eq, %arg1, %c0_i32 : i32
    %1 = arith.extui %0 : i1 to i32
    %c0_i32_0 = arith.constant 0 : i32
    %2 = arith.cmpi ne, %1, %c0_i32_0 : i32
    scf.if %2 {
      %cst_10 = arith.constant 0.000000e+00 : f32
      %12 = vector.broadcast %cst_10 : f32 to vector<512x64xf32>
      %c0_11 = arith.constant 0 : index
      %c0_12 = arith.constant 0 : index
      %13 = vector.load %arg8[%c0_11, %c0_12] : memref<512x64xf32, #tpu.memory_space<vmem>>, vector<512x64xf32>
      tpu.vector_store %arg8[%c0_11, %c0_12], %12 {strides = array<i32>} : memref<512x64xf32, #tpu.memory_space<vmem>>, vector<512x64xf32>,
    } else {
    }
    %c0 = arith.constant 0 : index
    %c0_1 = arith.constant 0 : index
    %3 = vector.load %arg8[%c0, %c0_1] : memref<512x64xf32, #tpu.memory_space<vmem>>, vector<512x64xf32>
    %c0_2 = arith.constant 0 : index
    %c0_3 = arith.constant 0 : index
    %4 = vector.load %arg2[%c0_2, %c0_3] : memref<512x64xbf16, #tpu.memory_space<vmem>>, vector<512x64xbf16>
    %c0_4 = arith.constant 0 : index
    %c0_5 = arith.constant 0 : index
    %5 = vector.load %arg3[%c0_4, %c0_5] : memref<64x64xbf16, #tpu.memory_space<vmem>>, vector<64x64xbf16>
    %cst = arith.constant dense<0.000000e+00> : vector<512x64xf32>
    %6 = tpu.matmul %4, %5, %cst {dimension_numbers = #tpu.dot_dimension_numbers<[1], [0], [0], [1], [0, 0, 1, 1], [], []>} : vector<512x64xbf16>, vector<64x64xbf16>, vector<512x64xf32> -> vector<512x64xf32>
    %7 = arith.addf %3, %6 : vector<512x64xf32>
    %c0_6 = arith.constant 0 : index
    %c0_7 = arith.constant 0 : index
    %8 = vector.load %arg8[%c0_6, %c0_7] : memref<512x64xf32, #tpu.memory_space<vmem>>, vector<512x64xf32>
    tpu.vector_store %arg8[%c0_6, %c0_7], %7 {strides = array<i32>} : memref<512x64xf32, #tpu.memory_space<vmem>>, vector<512x64xf32>,
    %c0_i32_8 = arith.constant 0 : i32
    %9 = arith.cmpi eq, %arg1, %c0_i32_8 : i32
    %10 = arith.extui %9 : i1 to i32
    %c0_i32_9 = arith.constant 0 : i32
    %11 = arith.cmpi ne, %10, %c0_i32_9 : i32
    scf.if %11 {
      %c0_10 = arith.constant 0 : index
      %c0_11 = arith.constant 0 : index
      %12 = vector.load %arg8[%c0_10, %c0_11] : memref<512x64xf32, #tpu.memory_space<vmem>>, vector<512x64xf32>
      %c0_12 = arith.constant 0 : index
      %c0_13 = arith.constant 0 : index
      %13 = vector.load %arg4[%c0_12, %c0_13] : memref<1x64xf32, #tpu.memory_space<vmem>>, vector<1x64xf32>
      %14 = vector.broadcast %13 : vector<1x64xf32> to vector<512x64xf32>
      %15 = arith.addf %12, %14 : vector<512x64xf32>
      %16 = arith.truncf %15 : vector<512x64xf32> to vector<512x64xbf16>
      %c0_14 = arith.constant 0 : index
      %c0_15 = arith.constant 0 : index
      %17 = vector.load %arg5[%c0_14, %c0_15] : memref<512x64xbf16, #tpu.memory_space<vmem>>, vector<512x64xbf16>
      tpu.vector_store %arg5[%c0_14, %c0_15], %16 {strides = array<i32>} : memref<512x64xbf16, #tpu.memory_space<vmem>>, vector<512x64xbf16>,
      %cst_16 = arith.constant dense<0.000000e+00> : vector<64xf32>
      %18 = vector.multi_reduction <add>, %12, %cst_16 [0] : vector<512x64xf32> to vector<64xf32>
      %19 = vector.shape_cast %18 : vector<64xf32> to vector<1x64xf32>
      %c0_17 = arith.constant 0 : index
      %c0_18 = arith.constant 0 : index
      %c0_19 = arith.constant 0 : index
      %20 = vector.load %arg6[%c0_17, %c0_18, %c0_19] : memref<1x1x64xf32, #tpu.memory_space<vmem>>, vector<1x1x64xf32>
      %21 = vector.shape_cast %20 : vector<1x1x64xf32> to vector<1x64xf32>
      %22 = vector.shape_cast %19 : vector<1x64xf32> to vector<1x1x64xf32>
      tpu.vector_store %arg6[%c0_17, %c0_18, %c0_19], %22 {strides = array<i32>} : memref<1x1x64xf32, #tpu.memory_space<vmem>>, vector<1x1x64xf32>,
      %23 = arith.mulf %12, %12 : vector<512x64xf32>
      %cst_20 = arith.constant dense<0.000000e+00> : vector<64xf32>
      %24 = vector.multi_reduction <add>, %23, %cst_20 [0] : vector<512x64xf32> to vector<64xf32>
      %25 = vector.shape_cast %24 : vector<64xf32> to vector<1x64xf32>
      %c0_21 = arith.constant 0 : index
      %c0_22 = arith.constant 0 : index
      %c0_23 = arith.constant 0 : index
      %26 = vector.load %arg7[%c0_21, %c0_22, %c0_23] : memref<1x1x64xf32, #tpu.memory_space<vmem>>, vector<1x1x64xf32>
      %27 = vector.shape_cast %26 : vector<1x1x64xf32> to vector<1x64xf32>
      %28 = vector.shape_cast %25 : vector<1x64xf32> to vector<1x1x64xf32>
      tpu.vector_store %arg7[%c0_21, %c0_22, %c0_23], %28 {strides = array<i32>} : memref<1x1x64xf32, #tpu.memory_space<vmem>>, vector<1x1x64xf32>,
    } else {
    }
    return
  }
  func.func @transform_0(%arg0: i32, %arg1: i32) -> (i32, i32) {
    %c0_i32 = arith.constant 0 : i32
    return %arg0, %arg1 : i32, i32
  }
  func.func @transform_1(%arg0: i32, %arg1: i32) -> (i32, i32) {
    %c0_i32 = arith.constant 0 : i32
    %c0_i32_0 = arith.constant 0 : i32
    return %arg1, %c0_i32 : i32, i32
  }
  func.func @transform_2(%arg0: i32, %arg1: i32) -> (i32, i32) {
    %c0_i32 = arith.constant 0 : i32
    %c0_i32_0 = arith.constant 0 : i32
    %c0_i32_1 = arith.constant 0 : i32
    return %c0_i32, %c0_i32_0 : i32, i32
  }
  func.func @transform_3(%arg0: i32, %arg1: i32) -> (i32, i32) {
    %c0_i32 = arith.constant 0 : i32
    %c0_i32_0 = arith.constant 0 : i32
    return %arg0, %c0_i32 : i32, i32
  }
  func.func @transform_4(%arg0: i32, %arg1: i32) -> (i32, i32, i32) {
    %c0_i32 = arith.constant 0 : i32
    %c0_i32_0 = arith.constant 0 : i32
    %c0_i32_1 = arith.constant 0 : i32
    return %arg0, %c0_i32, %c0_i32_0 : i32, i32, i32
  }
  func.func @transform_5(%arg0: i32, %arg1: i32) -> (i32, i32, i32) {
    %c0_i32 = arith.constant 0 : i32
    %c0_i32_0 = arith.constant 0 : i32
    %c0_i32_1 = arith.constant 0 : i32
    return %arg0, %c0_i32, %c0_i32_0 : i32, i32, i32
  }
}

module attributes {stable_mosaic.version = 11 : i64} {
  func.func @_affine_leaky_kernel(%arg0: i32, %arg1: memref<512x64xbf16, #tpu.memory_space<vmem>>, %arg2: memref<1x64xf32, #tpu.memory_space<vmem>>, %arg3: memref<1x64xf32, #tpu.memory_space<vmem>>, %arg4: memref<512x64xbf16, #tpu.memory_space<vmem>>) attributes {dimension_semantics = [#tpu.dimension_semantics<parallel>], iteration_bounds = array<i64: 9>, scalar_prefetch = 0 : i64, scratch_operands = 0 : i64, tpu.core_type = #tpu.core_type<tc>, window_params = [{transform_indices = @transform_0, window_bounds = array<i64: 512, 64>}, {pipeline_mode = #tpu.pipeline_mode<synchronous>, transform_indices = @transform_1, window_bounds = array<i64: 1, 64>}, {pipeline_mode = #tpu.pipeline_mode<synchronous>, transform_indices = @transform_2, window_bounds = array<i64: 1, 64>}, {transform_indices = @transform_3, window_bounds = array<i64: 512, 64>}]} {
    %c0 = arith.constant 0 : index
    %c0_0 = arith.constant 0 : index
    %0 = vector.load %arg1[%c0, %c0_0] : memref<512x64xbf16, #tpu.memory_space<vmem>>, vector<512x64xbf16>
    %1 = arith.extf %0 : vector<512x64xbf16> to vector<512x64xf32>
    %c0_1 = arith.constant 0 : index
    %c0_2 = arith.constant 0 : index
    %2 = vector.load %arg2[%c0_1, %c0_2] : memref<1x64xf32, #tpu.memory_space<vmem>>, vector<1x64xf32>
    %3 = vector.broadcast %2 : vector<1x64xf32> to vector<512x64xf32>
    %4 = arith.mulf %1, %3 : vector<512x64xf32>
    %c0_3 = arith.constant 0 : index
    %c0_4 = arith.constant 0 : index
    %5 = vector.load %arg3[%c0_3, %c0_4] : memref<1x64xf32, #tpu.memory_space<vmem>>, vector<1x64xf32>
    %6 = vector.broadcast %5 : vector<1x64xf32> to vector<512x64xf32>
    %7 = arith.addf %4, %6 : vector<512x64xf32>
    %cst = arith.constant 0.000000e+00 : f32
    %8 = vector.broadcast %cst : f32 to vector<512x64xf32>
    %9 = arith.cmpf oge, %7, %8 : vector<512x64xf32>
    %cst_5 = arith.constant 2.000000e-01 : f32
    %10 = vector.broadcast %cst_5 : f32 to vector<512x64xf32>
    %11 = arith.mulf %10, %7 : vector<512x64xf32>
    %12 = arith.select %9, %7, %11 : vector<512x64xi1>, vector<512x64xf32>
    %13 = arith.truncf %12 : vector<512x64xf32> to vector<512x64xbf16>
    %c0_6 = arith.constant 0 : index
    %c0_7 = arith.constant 0 : index
    %14 = vector.load %arg4[%c0_6, %c0_7] : memref<512x64xbf16, #tpu.memory_space<vmem>>, vector<512x64xbf16>
    tpu.vector_store %arg4[%c0_6, %c0_7], %13 {strides = array<i32>} : memref<512x64xbf16, #tpu.memory_space<vmem>>, vector<512x64xbf16>,
    return
  }
  func.func @transform_0(%arg0: i32) -> (i32, i32) {
    %c0_i32 = arith.constant 0 : i32
    %c0_i32_0 = arith.constant 0 : i32
    return %arg0, %c0_i32 : i32, i32
  }
  func.func @transform_1(%arg0: i32) -> (i32, i32) {
    %c0_i32 = arith.constant 0 : i32
    %c0_i32_0 = arith.constant 0 : i32
    %c0_i32_1 = arith.constant 0 : i32
    return %c0_i32, %c0_i32_0 : i32, i32
  }
  func.func @transform_2(%arg0: i32) -> (i32, i32) {
    %c0_i32 = arith.constant 0 : i32
    %c0_i32_0 = arith.constant 0 : i32
    %c0_i32_1 = arith.constant 0 : i32
    return %c0_i32, %c0_i32_0 : i32, i32
  }
  func.func @transform_3(%arg0: i32) -> (i32, i32) {
    %c0_i32 = arith.constant 0 : i32
    %c0_i32_0 = arith.constant 0 : i32
    return %arg0, %c0_i32 : i32, i32
  }
}

module attributes {stable_mosaic.version = 11 : i64} {
  func.func @_mm_tanh_kernel(%arg0: i32, %arg1: i32, %arg2: memref<512x64xbf16, #tpu.memory_space<vmem>>, %arg3: memref<64x12xbf16, #tpu.memory_space<vmem>>, %arg4: memref<1x12xf32, #tpu.memory_space<vmem>>, %arg5: memref<512x12xf32, #tpu.memory_space<vmem>>, %arg6: memref<512x12xf32, #tpu.memory_space<vmem>>) attributes {dimension_semantics = [#tpu.dimension_semantics<parallel>, #tpu.dimension_semantics<arbitrary>], iteration_bounds = array<i64: 36, 1>, scalar_prefetch = 0 : i64, scratch_operands = 1 : i64, tpu.core_type = #tpu.core_type<tc>, window_params = [{transform_indices = @transform_0, window_bounds = array<i64: 512, 64>}, {transform_indices = @transform_1, window_bounds = array<i64: 64, 12>}, {pipeline_mode = #tpu.pipeline_mode<synchronous>, transform_indices = @transform_2, window_bounds = array<i64: 1, 12>}, {transform_indices = @transform_3, window_bounds = array<i64: 512, 12>}]} {
    %c0_i32 = arith.constant 0 : i32
    %0 = arith.cmpi eq, %arg1, %c0_i32 : i32
    %1 = arith.extui %0 : i1 to i32
    %c0_i32_0 = arith.constant 0 : i32
    %2 = arith.cmpi ne, %1, %c0_i32_0 : i32
    scf.if %2 {
      %cst_10 = arith.constant 0.000000e+00 : f32
      %12 = vector.broadcast %cst_10 : f32 to vector<512x12xf32>
      %c0_11 = arith.constant 0 : index
      %c0_12 = arith.constant 0 : index
      %13 = vector.load %arg6[%c0_11, %c0_12] : memref<512x12xf32, #tpu.memory_space<vmem>>, vector<512x12xf32>
      tpu.vector_store %arg6[%c0_11, %c0_12], %12 {strides = array<i32>} : memref<512x12xf32, #tpu.memory_space<vmem>>, vector<512x12xf32>,
    } else {
    }
    %c0 = arith.constant 0 : index
    %c0_1 = arith.constant 0 : index
    %3 = vector.load %arg6[%c0, %c0_1] : memref<512x12xf32, #tpu.memory_space<vmem>>, vector<512x12xf32>
    %c0_2 = arith.constant 0 : index
    %c0_3 = arith.constant 0 : index
    %4 = vector.load %arg2[%c0_2, %c0_3] : memref<512x64xbf16, #tpu.memory_space<vmem>>, vector<512x64xbf16>
    %c0_4 = arith.constant 0 : index
    %c0_5 = arith.constant 0 : index
    %5 = vector.load %arg3[%c0_4, %c0_5] : memref<64x12xbf16, #tpu.memory_space<vmem>>, vector<64x12xbf16>
    %cst = arith.constant dense<0.000000e+00> : vector<512x12xf32>
    %6 = tpu.matmul %4, %5, %cst {dimension_numbers = #tpu.dot_dimension_numbers<[1], [0], [0], [1], [0, 0, 1, 1], [], []>} : vector<512x64xbf16>, vector<64x12xbf16>, vector<512x12xf32> -> vector<512x12xf32>
    %7 = arith.addf %3, %6 : vector<512x12xf32>
    %c0_6 = arith.constant 0 : index
    %c0_7 = arith.constant 0 : index
    %8 = vector.load %arg6[%c0_6, %c0_7] : memref<512x12xf32, #tpu.memory_space<vmem>>, vector<512x12xf32>
    tpu.vector_store %arg6[%c0_6, %c0_7], %7 {strides = array<i32>} : memref<512x12xf32, #tpu.memory_space<vmem>>, vector<512x12xf32>,
    %c0_i32_8 = arith.constant 0 : i32
    %9 = arith.cmpi eq, %arg1, %c0_i32_8 : i32
    %10 = arith.extui %9 : i1 to i32
    %c0_i32_9 = arith.constant 0 : i32
    %11 = arith.cmpi ne, %10, %c0_i32_9 : i32
    scf.if %11 {
      %c0_10 = arith.constant 0 : index
      %c0_11 = arith.constant 0 : index
      %12 = vector.load %arg6[%c0_10, %c0_11] : memref<512x12xf32, #tpu.memory_space<vmem>>, vector<512x12xf32>
      %c0_12 = arith.constant 0 : index
      %c0_13 = arith.constant 0 : index
      %13 = vector.load %arg4[%c0_12, %c0_13] : memref<1x12xf32, #tpu.memory_space<vmem>>, vector<1x12xf32>
      %14 = vector.broadcast %13 : vector<1x12xf32> to vector<512x12xf32>
      %15 = arith.addf %12, %14 : vector<512x12xf32>
      %16 = math.tanh %15 : vector<512x12xf32>
      %c0_14 = arith.constant 0 : index
      %c0_15 = arith.constant 0 : index
      %17 = vector.load %arg5[%c0_14, %c0_15] : memref<512x12xf32, #tpu.memory_space<vmem>>, vector<512x12xf32>
      tpu.vector_store %arg5[%c0_14, %c0_15], %16 {strides = array<i32>} : memref<512x12xf32, #tpu.memory_space<vmem>>, vector<512x12xf32>,
    } else {
    }
    return
  }
  func.func @transform_0(%arg0: i32, %arg1: i32) -> (i32, i32) {
    %c0_i32 = arith.constant 0 : i32
    return %arg0, %arg1 : i32, i32
  }
  func.func @transform_1(%arg0: i32, %arg1: i32) -> (i32, i32) {
    %c0_i32 = arith.constant 0 : i32
    %c0_i32_0 = arith.constant 0 : i32
    return %arg1, %c0_i32 : i32, i32
  }
  func.func @transform_2(%arg0: i32, %arg1: i32) -> (i32, i32) {
    %c0_i32 = arith.constant 0 : i32
    %c0_i32_0 = arith.constant 0 : i32
    %c0_i32_1 = arith.constant 0 : i32
    return %c0_i32, %c0_i32_0 : i32, i32
  }
  func.func @transform_3(%arg0: i32, %arg1: i32) -> (i32, i32) {
    %c0_i32 = arith.constant 0 : i32
    %c0_i32_0 = arith.constant 0 : i32
    return %arg0, %c0_i32 : i32, i32
  }
}

</mosaic_0001>

<bundles_post_ra>
// kernel: tile.147
= control target key start
LH: loop header
LB: loop body
LE: loop exit
PB: predicated region body
PF: predicated region fallthrough
CT: control target
= control target key end

     0   :  { %s37_s8 = smov 3   ;;  %s38_s9 = smov 6   ;;  %vm7_vm0 = vcmask 23552   ;;  %vm13_vm1 = vcmask 97352   ;;  %vm19_vm2 = vcmask 72752   ;;  %vm25_vm3 = vcmask 48152   ;;  %s55_s0 = inlined_call_operand.vmem [shape: f32[4,3], index: 0, kind: input, shape index: {}]   ;;  %s56_s1 = inlined_call_operand.vmem [shape: f32[1,12], index: 1, kind: output, shape index: {}]  }
   0x1   :  { %v4_v0 = vld [vmem:[%s55_s0] sm:$0xf]  ;;  %s36_s0 = smov 9  }
   0x2   :  { %5 = vst [vmem:[#allocation1] sm:$0xf] %v4_v0 }
   0x9   :  { %v10_v1 = vld [vmem:[#allocation1 + $0x3] sm:$0x1]   ;;  %v22_v2 = vld [vmem:[#allocation1 + $0x1] sm:$0x1]   ;;  %v16_v3 = vld [vmem:[#allocation1 + $0x2] sm:$0x1]  }
   0xa   :  { %11 = vrot.lane.b32.xlu0 %v10_v1, %s36_s0  ;;  %23 = vrot.lane.b32.xlu1 %v22_v2, %s37_s8  ;;  %v6_v4 = vld [vmem:[#allocation1] sm:$0x1]  }
   0xb   :  { %8 = vst.msk [vmem:[#allocation0] sm:$0x1] %vm7_vm0, %v6_v4  }
  0x12   :  { %17 = vrot.lane.b32.xlu0 %v16_v3, %s38_s9 }
  0x7c   :  { %v12_v5 = vpop.permute.xlu0 %11   ;;  %v24_v6 = vpop.permute.xlu1 %23  }
  0x7d   :  { %14 = vst.msk [vmem:[#allocation0] sm:$0x1] %vm13_vm1, %v12_v5  }
  0x84   :  { %v18_v7 = vpop.permute.xlu0 %17  }
  0x85   :  { %20 = vst.msk [vmem:[#allocation0] sm:$0x1] %vm19_vm2, %v18_v7  }
  0x86   :  { %26 = vst.msk [vmem:[#allocation0] sm:$0x1] %vm25_vm3, %v24_v6  }
  0x8d   :  { %v29_v8 = vld [vmem:[#allocation0] sm:$0x1] }
  0x8e   :  { %32 = vst [vmem:[%s56_s1] sm:$0x1] %v29_v8 }

// kernel: tile.90
= control target key start
LH: loop header
LB: loop body
LE: loop exit
PB: predicated region body
PF: predicated region fallthrough
CT: control target
= control target key end

     0   :  { %2 = vsyncpa [#allocation1], 0  ;;  %s48_s8 = smov [#allocation0]   ;;  %s65_s0 = inlined_call_operand.hbm [shape: f32[64], index: 0, kind: input, shape index: {}]   ;;  %s66_s1 = inlined_call_operand.vmem [shape: f32[4,64], index: 1, kind: output, shape index: {}]  }
   0x1   :  { %s8_s0 = sshll.u32 %s65_s0, 4  ;;  %s10_s9 = sshll.u32 %s48_s8, 4  ;;  %s9_s0 = int_to_ptr.hbm [resolvable:$true] %s8_s0  ;;  %s11_s9 = int_to_ptr.vmem [resolvable:$true] %s10_s9 }
   0x2   :  { %13 = dma.hbm_to_vmem [thread:$0]  %s9_s0, 16, %s11_s9, [#allocation1]  }
   0x3   :  { %46 = dma.done.wait [#allocation1], 16  }
   0x4   :  { %47 = vsyncadd [#allocation1], 4294967280  ;;  %v18_v0 = vld [vmem:[#allocation0] ss:$0 sm:$0xff] }
   0x5   :  { %19 = vst [vmem:[%s66_s1] sm:$0xf] %v18_v0 }
   0x6   :  { %20 = vsyncpa [#allocation1], 1 }

// kernel: tile.146
= control target key start
LH: loop header
LB: loop body
LE: loop exit
PB: predicated region body
PF: predicated region fallthrough
CT: control target
= control target key end

     0   :  { %2 = vsyncpa [#allocation1], 0  ;;  %s48_s8 = smov [#allocation0]   ;;  %s65_s0 = inlined_call_operand.hbm [shape: f32[3], index: 0, kind: input, shape index: {}]   ;;  %s66_s1 = inlined_call_operand.vmem [shape: f32[4,3], index: 1, kind: output, shape index: {}]  }
   0x1   :  { %s8_s0 = sshll.u32 %s65_s0, 4  ;;  %s10_s9 = sshll.u32 %s48_s8, 4  ;;  %s9_s0 = int_to_ptr.hbm [resolvable:$true] %s8_s0  ;;  %s11_s9 = int_to_ptr.vmem [resolvable:$true] %s10_s9 }
   0x2   :  { %13 = dma.hbm_to_vmem [thread:$0]  %s9_s0, 16, %s11_s9, [#allocation1]  }
   0x3   :  { %46 = dma.done.wait [#allocation1], 16  }
   0x4   :  { %47 = vsyncadd [#allocation1], 4294967280  ;;  %v18_v0 = vld [vmem:[#allocation0] ss:$0 sm:$0xff] }
   0x5   :  { %19 = vst [vmem:[%s66_s1] sm:$0xf] %v18_v0 }
   0x6   :  { %20 = vsyncpa [#allocation1], 1 }

// kernel: tile.105
= control target key start
LH: loop header
LB: loop body
LE: loop exit
PB: predicated region body
PF: predicated region fallthrough
CT: control target
= control target key end

     0   :  { %s37_s8 = smov 32   ;;  %s38_s9 = smov 64   ;;  %vm7_vm0 = vcmask 261120   ;;  %vm13_vm1 = vcmask 1048320   ;;  %vm19_vm2 = vcmask 785920   ;;  %vm25_vm3 = vcmask 523520   ;;  %s55_s0 = inlined_call_operand.vmem [shape: f32[4,32], index: 0, kind: input, shape index: {}]   ;;  %s56_s1 = inlined_call_operand.vmem [shape: f32[1,128], index: 1, kind: output, shape index: {}]  }
   0x1   :  { %v4_v0 = vld [vmem:[%s55_s0] sm:$0xf]  ;;  %s36_s0 = smov 96  }
   0x2   :  { %5 = vst [vmem:[#allocation1] sm:$0xf] %v4_v0 }
   0x9   :  { %v10_v1 = vld [vmem:[#allocation1 + $0x3] sm:$0x1]   ;;  %v22_v2 = vld [vmem:[#allocation1 + $0x1] sm:$0x1]   ;;  %v16_v3 = vld [vmem:[#allocation1 + $0x2] sm:$0x1]  }
   0xa   :  { %11 = vrot.lane.b32.xlu0 %v10_v1, %s36_s0  ;;  %23 = vrot.lane.b32.xlu1 %v22_v2, %s37_s8  ;;  %v6_v4 = vld [vmem:[#allocation1] sm:$0x1]  }
   0xb   :  { %8 = vst.msk [vmem:[#allocation0] sm:$0x1] %vm7_vm0, %v6_v4  }
  0x12   :  { %17 = vrot.lane.b32.xlu0 %v16_v3, %s38_s9 }
  0x7c   :  { %v12_v5 = vpop.permute.xlu0 %11   ;;  %v24_v6 = vpop.permute.xlu1 %23  }
  0x7d   :  { %14 = vst.msk [vmem:[#allocation0] sm:$0x1] %vm13_vm1, %v12_v5  }
  0x84   :  { %v18_v7 = vpop.permute.xlu0 %17  }
  0x85   :  { %20 = vst.msk [vmem:[#allocation0] sm:$0x1] %vm19_vm2, %v18_v7  }
  0x86   :  { %26 = vst.msk [vmem:[#allocation0] sm:$0x1] %vm25_vm3, %v24_v6  }
  0x8d   :  { %v29_v8 = vld [vmem:[#allocation0] sm:$0x1] }
  0x8e   :  { %32 = vst [vmem:[%s56_s1] sm:$0x1] %v29_v8 }

// kernel: tile.91
= control target key start
LH: loop header
LB: loop body
LE: loop exit
PB: predicated region body
PF: predicated region fallthrough
CT: control target
= control target key end

     0   :  { %s6_s8 = smov 3  ;;  %vm8_vm0 = vcmask 523264   ;;  %s31_s9 = smov 64   ;;  %vm15_vm1 = vcmask 1048064   ;;  %s51_s0 = inlined_call_operand.vmem [shape: f32[4,64], index: 0, kind: input, shape index: {}]   ;;  %s52_s1 = inlined_call_operand.vmem [shape: f32[1,256], index: 1, kind: output, shape index: {}]  }
   0x1   :  { %v4_v0 = vld [vmem:[%s51_s0] sm:$0xf]  ;;  %s11_s0 = smov 3 }
   0x2   :  { %5 = vst [vmem:[#allocation1] sm:$0xf] %v4_v0 }
   0x9   :  { %v12_v1 = vld [vmem:[#allocation1 + $0x1] ss:$2 sm:%s11_s0]   ;;  %v7_v2 = vld [vmem:[#allocation1] ss:$2 sm:%s6_s8]  }
   0xa   :  { %13 = vrot.lane.b32.xlu0 %v12_v1, %s31_s9  ;;  %9 = vst.msk [vmem:[#allocation0] ss:$8 sm:$0x3] %vm8_vm0, %v7_v2  }
  0x7c   :  { %v14_v3 = vpop.permute.xlu0 %13  }
  0x7d   :  { %16 = vst.msk [vmem:[#allocation0] ss:$8 sm:$0x3] %vm15_vm1, %v14_v3  }
  0x84   :  { %v19_v4 = vld [vmem:[#allocation0] sm:$0x1]  ;;  %v24_v5 = vld [vmem:[#allocation0 + $0x8] sm:$0x1] }
  0x85   :  { %22 = vst [vmem:[%s52_s1] sm:$0x1] %v19_v4 }
  0x86   :  { %29 = vst [vmem:[%s52_s1 + $0x1] sm:$0x1] %v24_v5 }

// kernel: tile.104
= control target key start
LH: loop header
LB: loop body
LE: loop exit
PB: predicated region body
PF: predicated region fallthrough
CT: control target
= control target key end

     0   :  { %2 = vsyncpa [#allocation1], 0  ;;  %s48_s8 = smov [#allocation0]   ;;  %s65_s0 = inlined_call_operand.hbm [shape: f32[32], index: 0, kind: input, shape index: {}]   ;;  %s66_s1 = inlined_call_operand.vmem [shape: f32[4,32], index: 1, kind: output, shape index: {}]  }
   0x1   :  { %s8_s0 = sshll.u32 %s65_s0, 4  ;;  %s10_s9 = sshll.u32 %s48_s8, 4  ;;  %s9_s0 = int_to_ptr.hbm [resolvable:$true] %s8_s0  ;;  %s11_s9 = int_to_ptr.vmem [resolvable:$true] %s10_s9 }
   0x2   :  { %13 = dma.hbm_to_vmem [thread:$0]  %s9_s0, 16, %s11_s9, [#allocation1]  }
   0x3   :  { %46 = dma.done.wait [#allocation1], 16  }
   0x4   :  { %47 = vsyncadd [#allocation1], 4294967280  ;;  %v18_v0 = vld [vmem:[#allocation0] ss:$0 sm:$0xff] }
   0x5   :  { %19 = vst [vmem:[%s66_s1] sm:$0xf] %v18_v0 }
   0x6   :  { %20 = vsyncpa [#allocation1], 1 }

// kernel: tile.118
= control target key start
LH: loop header
LB: loop body
LE: loop exit
PB: predicated region body
PF: predicated region fallthrough
CT: control target
= control target key end

     0   :  { %2 = vsyncpa [#allocation1], 0  ;;  %s48_s8 = smov [#allocation0]   ;;  %s65_s0 = inlined_call_operand.hbm [shape: f32[16], index: 0, kind: input, shape index: {}]   ;;  %s66_s1 = inlined_call_operand.vmem [shape: f32[4,16], index: 1, kind: output, shape index: {}]  }
   0x1   :  { %s8_s0 = sshll.u32 %s65_s0, 4  ;;  %s10_s9 = sshll.u32 %s48_s8, 4  ;;  %s9_s0 = int_to_ptr.hbm [resolvable:$true] %s8_s0  ;;  %s11_s9 = int_to_ptr.vmem [resolvable:$true] %s10_s9 }
   0x2   :  { %13 = dma.hbm_to_vmem [thread:$0]  %s9_s0, 16, %s11_s9, [#allocation1]  }
   0x3   :  { %46 = dma.done.wait [#allocation1], 16  }
   0x4   :  { %47 = vsyncadd [#allocation1], 4294967280  ;;  %v18_v0 = vld [vmem:[#allocation0] ss:$0 sm:$0xff] }
   0x5   :  { %19 = vst [vmem:[%s66_s1] sm:$0xf] %v18_v0 }
   0x6   :  { %20 = vsyncpa [#allocation1], 1 }

// kernel: tile.119
= control target key start
LH: loop header
LB: loop body
LE: loop exit
PB: predicated region body
PF: predicated region fallthrough
CT: control target
= control target key end

     0   :  { %s37_s8 = smov 16   ;;  %s38_s9 = smov 32   ;;  %vm7_vm0 = vcmask 130048   ;;  %vm13_vm1 = vcmask 523648   ;;  %vm19_vm2 = vcmask 392448   ;;  %vm25_vm3 = vcmask 261248   ;;  %s55_s0 = inlined_call_operand.vmem [shape: f32[4,16], index: 0, kind: input, shape index: {}]   ;;  %s56_s1 = inlined_call_operand.vmem [shape: f32[1,64], index: 1, kind: output, shape index: {}]  }
   0x1   :  { %v4_v0 = vld [vmem:[%s55_s0] sm:$0xf]  ;;  %s36_s0 = smov 48  }
   0x2   :  { %5 = vst [vmem:[#allocation1] sm:$0xf] %v4_v0 }
   0x9   :  { %v10_v1 = vld [vmem:[#allocation1 + $0x3] sm:$0x1]   ;;  %v22_v2 = vld [vmem:[#allocation1 + $0x1] sm:$0x1]   ;;  %v16_v3 = vld [vmem:[#allocation1 + $0x2] sm:$0x1]  }
   0xa   :  { %11 = vrot.lane.b32.xlu0 %v10_v1, %s36_s0  ;;  %23 = vrot.lane.b32.xlu1 %v22_v2, %s37_s8  ;;  %v6_v4 = vld [vmem:[#allocation1] sm:$0x1]  }
   0xb   :  { %8 = vst.msk [vmem:[#allocation0] sm:$0x1] %vm7_vm0, %v6_v4  }
  0x12   :  { %17 = vrot.lane.b32.xlu0 %v16_v3, %s38_s9 }
  0x7c   :  { %v12_v5 = vpop.permute.xlu0 %11   ;;  %v24_v6 = vpop.permute.xlu1 %23  }
  0x7d   :  { %14 = vst.msk [vmem:[#allocation0] sm:$0x1] %vm13_vm1, %v12_v5  }
  0x84   :  { %v18_v7 = vpop.permute.xlu0 %17  }
  0x85   :  { %20 = vst.msk [vmem:[#allocation0] sm:$0x1] %vm19_vm2, %v18_v7  }
  0x86   :  { %26 = vst.msk [vmem:[#allocation0] sm:$0x1] %vm25_vm3, %v24_v6  }
  0x8d   :  { %v29_v8 = vld [vmem:[#allocation0] sm:$0x1] }
  0x8e   :  { %32 = vst [vmem:[%s56_s1] sm:$0x1] %v29_v8 }

// kernel: tile.76
= control target key start
LH: loop header
LB: loop body
LE: loop exit
PB: predicated region body
PF: predicated region fallthrough
CT: control target
= control target key end

     0   :  { %2 = vsyncpa [#allocation1], 0  ;;  %s51_s8 = smov [#allocation0]   ;;  %s71_s0 = inlined_call_operand.hbm [shape: f32[128], index: 0, kind: input, shape index: {}]   ;;  %s72_s1 = inlined_call_operand.vmem [shape: f32[16,128], index: 1, kind: output, shape index: {}]  }
   0x1   :  { %s8_s0 = sshll.u32 %s71_s0, 4  ;;  %s10_s9 = sshll.u32 %s51_s8, 4  ;;  %s9_s0 = int_to_ptr.hbm [resolvable:$true] %s8_s0  ;;  %s11_s9 = int_to_ptr.vmem [resolvable:$true] %s10_s9 }
   0x2   :  { %13 = dma.hbm_to_vmem [thread:$0]  %s9_s0, 16, %s11_s9, [#allocation1]  }
   0x3   :  { %49 = dma.done.wait [#allocation1], 16  }
   0x4   :  { %50 = vsyncadd [#allocation1], 4294967280  ;;  %v18_v0 = vld [vmem:[#allocation0] ss:$0 sm:$0xff] }
   0x5   :  { %19 = vst [vmem:[%s72_s1] sm:$0xff] %v18_v0 }
   0x6   :  { %23 = vst [vmem:[%s72_s1 + $0x8] sm:$0xff] %v18_v0 }
   0x7   :  { %22 = vsyncpa [#allocation1], 1 }

// kernel: tile.85
= control target key start
LH: loop header
LB: loop body
LE: loop exit
PB: predicated region body
PF: predicated region fallthrough
CT: control target
= control target key end

     0   :  { %s28_s0 = inlined_call_operand.vmem [shape: f32[128], index: 0, kind: input, shape index: {}]   ;;  %s29_s1 = inlined_call_operand.vmem [shape: f32[16,128], index: 1, kind: output, shape index: {}]  }
   0x1   :  { %v4_v0 = vld [vmem:[%s28_s0] ss:$0 sm:$0xff] }
   0x2   :  { %5 = vst [vmem:[%s29_s1] sm:$0xff] %v4_v0 }
   0x3   :  { %8 = vst [vmem:[%s29_s1 + $0x8] sm:$0xff] %v4_v0 }

// kernel: a_call__.12
= control target key start
LH: loop header
LB: loop body
LE: loop exit
PB: predicated region body
PF: predicated region fallthrough
CT: control target
= control target key end

     0   :  { %s626_s0 = inlined_call_operand.vmem [shape: bf16[16,2048], index: 0, kind: input, shape index: {}]   ;;  %s627_s1 = inlined_call_operand.vmem [shape: f32[1,2048], index: 1, kind: input, shape index: {}]   ;;  %s628_s2 = inlined_call_operand.vmem [shape: f32[1,2048], index: 2, kind: input, shape index: {}]   ;;  %s629_s3 = inlined_call_operand.vmem [shape: bf16[16,2048], index: 3, kind: output, shape index: {}]  }
   0x1   :  { %v14_v0 = vld [vmem:[%s626_s0] sm:$0xff]  ;;  %v15_v7 = vld [vmem:[%s626_s0 + $0x8] sm:$0xff]  ;;  %v16_v8 = vld [vmem:[%s626_s0 + $0x10] sm:$0xff] }
   0x2   :  { %v356_v1 = vld [vmem:[%s627_s1] sm:$0xff]  ;;  %v30_v3 = vunpack.c.l.bf16 %v14_v0  ;;  %v31_v4 = vunpack.c.h.bf16 %v14_v0  ;;  %v32_v11 = vunpack.c.l.bf16 %v15_v7  ;;  %v33_v12 = vunpack.c.h.bf16 %v15_v7  ;;  %v17_v29 = vld [vmem:[%s626_s0 + $0x18] sm:$0xff]  ;;  %v421_v51 = vld [vmem:[%s627_s1 + $0x8] sm:$0xff] }
   0x3   :  { %v361_v2 = vld [vmem:[%s628_s2] sm:$0xff]  ;;  %v66_v5 = vperm.slane %v356_v1, 0  ;;  %v67_v6 = vperm.slane %v356_v1, 1  ;;  %v68_v15 = vperm.slane %v356_v1, 2  ;;  %v69_v16 = vperm.slane %v356_v1, 3  ;;  %v430_v58 = vld [vmem:[%s628_s2 + $0x8] sm:$0xff] }
   0x4   :  { %v134_v9 = vperm.slane %v361_v2, 0  ;;  %v135_v10 = vperm.slane %v361_v2, 1  ;;  %v136_v17 = vperm.slane %v361_v2, 2  ;;  %v137_v18 = vperm.slane %v361_v2, 3  ;;  %v18_v50 = vld [vmem:[%s626_s0 + $0x20] sm:$0xff]  ;;  %v19_v7 = vld [vmem:[%s626_s0 + $0x28] sm:$0xff] }
   0x5   :  { %v98_v13 = vmul.f32 %v66_v5, %v30_v3  ;;  %v99_v14 = vmul.f32 %v67_v6, %v31_v4  ;;  %v34_v19 = vunpack.c.l.bf16 %v16_v8  ;;  %v35_v20 = vunpack.c.h.bf16 %v16_v8 }
   0x6   :  { %v100_v23 = vmul.f32 %v68_v15, %v32_v11  ;;  %v101_v24 = vmul.f32 %v69_v16, %v33_v12  ;;  %v70_v25 = vperm.slane %v356_v1, 4  ;;  %v71_v26 = vperm.slane %v356_v1, 5 }
   0x7   :  { %v166_v21 = vadd.f32 %v134_v9, %v98_v13  ;;  %v167_v22 = vadd.f32 %v135_v10, %v99_v14  ;;  %v138_v27 = vperm.slane %v361_v2, 4  ;;  %v139_v28 = vperm.slane %v361_v2, 5 }
   0x8   :  { %v168_v32 = vadd.f32 %v136_v17, %v100_v23  ;;  %v169_v33 = vadd.f32 %v137_v18, %v101_v24  ;;  %v102_v34 = vmul.f32 %v70_v25, %v34_v19  ;;  %v103_v35 = vmul.f32 %v71_v26, %v35_v20 }
   0x9   :  { %vm198_vm0 = vcmp.ge.f32.partialorder %v166_v21, 0.0  ;;  %vm199_vm1 = vcmp.ge.f32.partialorder %v167_v22, 0.0  ;;  %v230_v30 = vmul.f32 0.2, %v166_v21  ;;  %v231_v31 = vmul.f32 0.2, %v167_v22 }
   0xa   :  { %v36_v38 = vunpack.c.l.bf16 %v17_v29  ;;  %v37_v39 = vunpack.c.h.bf16 %v17_v29  ;;  %vm200_vm2 = vcmp.ge.f32.partialorder %v168_v32, 0.0  ;;  %vm201_vm3 = vcmp.ge.f32.partialorder %v169_v33, 0.0 }
   0xb   :  { %v262_v36 = vsel %vm198_vm0, %v166_v21, %v230_v30  ;;  %v263_v37 = vsel %vm199_vm1, %v167_v22, %v231_v31  ;;  %v232_v41 = vmul.f32 0.2, %v168_v32  ;;  %v233_v42 = vmul.f32 0.2, %v169_v33 }
   0xc   :  { %v294_v40 = vpack.c.bf16 %v263_v37, %v262_v36  ;;  %v170_v43 = vadd.f32 %v138_v27, %v102_v34  ;;  %v171_v44 = vadd.f32 %v139_v28, %v103_v35  ;;  %v72_v45 = vperm.slane %v356_v1, 6 }
   0xd   :  { %v264_v46 = vsel %vm200_vm2, %v168_v32, %v232_v41  ;;  %v73_v47 = vperm.slane %v356_v1, 7  ;;  %v140_v48 = vperm.slane %v361_v2, 6  ;;  %v141_v49 = vperm.slane %v361_v2, 7  ;;  %v20_v32 = vld [vmem:[%s626_s0 + $0x30] sm:$0xff] }
   0xe   :  { %310 = vst [vmem:[%s629_s3] sm:$0xff] %v294_v40  ;;  %v265_v52 = vsel %vm201_vm3, %v169_v33, %v233_v42  ;;  %vm202_vm4 = vcmp.ge.f32.partialorder %v170_v43, 0.0  ;;  %vm203_vm5 = vcmp.ge.f32.partialorder %v171_v44, 0.0  ;;  %v234_v53 = vmul.f32 0.2, %v170_v43 }
   0xf   :  { %v295_v54 = vpack.c.bf16 %v265_v52, %v264_v46  ;;  %v235_v55 = vmul.f32 0.2, %v171_v44  ;;  %v104_v56 = vmul.f32 %v72_v45, %v36_v38  ;;  %v105_v57 = vmul.f32 %v73_v47, %v37_v39  ;;  %v21_v52 = vld [vmem:[%s626_s0 + $0x38] sm:$0xff] }
  0x10   :  { %v266_v59 = vsel %vm202_vm4, %v170_v43, %v234_v53  ;;  %v38_v60 = vunpack.c.l.bf16 %v18_v50  ;;  %v39_v61 = vunpack.c.h.bf16 %v18_v50  ;;  %v74_v62 = vperm.slane %v421_v51, 0 }
  0x11   :  { %311 = vst [vmem:[%s629_s3 + $0x8] sm:$0xff] %v295_v54  ;;  %v267_v63 = vsel %vm203_vm5, %v171_v44, %v235_v55  ;;  %v172_v0 = vadd.f32 %v140_v48, %v104_v56  ;;  %v173_v3 = vadd.f32 %v141_v49, %v105_v57  ;;  %v75_v4 = vperm.slane %v421_v51, 1 }
  0x12   :  { %v296_v8 = vpack.c.bf16 %v267_v63, %v266_v59  ;;  %v106_v11 = vmul.f32 %v74_v62, %v38_v60  ;;  %v142_v12 = vperm.slane %v430_v58, 0  ;;  %v143_v13 = vperm.slane %v430_v58, 1 }
  0x13   :  { %vm204_vm6 = vcmp.ge.f32.partialorder %v172_v0, 0.0  ;;  %vm205_vm7 = vcmp.ge.f32.partialorder %v173_v3, 0.0  ;;  %v236_v14 = vmul.f32 0.2, %v172_v0  ;;  %v237_v19 = vmul.f32 0.2, %v173_v3 }
  0x14   :  { %312 = vst [vmem:[%s629_s3 + $0x10] sm:$0xff] %v296_v8  ;;  %v107_v20 = vmul.f32 %v75_v4, %v39_v61  ;;  %v174_v21 = vadd.f32 %v142_v12, %v106_v11  ;;  %v40_v22 = vunpack.c.l.bf16 %v19_v7  ;;  %v41_v23 = vunpack.c.h.bf16 %v19_v7 }
  0x15   :  { %v268_v24 = vsel %vm204_vm6, %v172_v0, %v236_v14  ;;  %v269_v29 = vsel %vm205_vm7, %v173_v3, %v237_v19  ;;  %v76_v30 = vperm.slane %v421_v51, 2  ;;  %v77_v31 = vperm.slane %v421_v51, 3 }
  0x16   :  { %v297_v33 = vpack.c.bf16 %v269_v29, %v268_v24  ;;  %v175_v34 = vadd.f32 %v143_v13, %v107_v20  ;;  %vm206_vm8 = vcmp.ge.f32.partialorder %v174_v21, 0.0  ;;  %v238_v35 = vmul.f32 0.2, %v174_v21 }
  0x17   :  { %v108_v36 = vmul.f32 %v76_v30, %v40_v22  ;;  %v109_v37 = vmul.f32 %v77_v31, %v41_v23  ;;  %v144_v38 = vperm.slane %v430_v58, 2  ;;  %v145_v39 = vperm.slane %v430_v58, 3  ;;  %v22_v22 = vld [vmem:[%s626_s0 + $0x40] sm:$0xff] }
  0x18   :  { %313 = vst [vmem:[%s629_s3 + $0x18] sm:$0xff] %v297_v33  ;;  %vm207_vm9 = vcmp.ge.f32.partialorder %v175_v34, 0.0  ;;  %v239_v40 = vmul.f32 0.2, %v175_v34  ;;  %v270_v41 = vsel %vm206_vm8, %v174_v21, %v238_v35  ;;  %v42_v42 = vunpack.c.l.bf16 %v20_v32  ;;  %v23_v33 = vld [vmem:[%s626_s0 + $0x48] sm:$0xff] }
  0x19   :  { %v176_v43 = vadd.f32 %v144_v38, %v108_v36  ;;  %v177_v44 = vadd.f32 %v145_v39, %v109_v37  ;;  %v43_v46 = vunpack.c.h.bf16 %v20_v32  ;;  %v78_v50 = vperm.slane %v421_v51, 4 }
  0x1a   :  { %v271_v53 = vsel %vm207_vm9, %v175_v34, %v239_v40  ;;  %v79_v54 = vperm.slane %v421_v51, 5  ;;  %v146_v55 = vperm.slane %v430_v58, 4  ;;  %v147_v56 = vperm.slane %v430_v58, 5 }
  0x1b   :  { %v298_v57 = vpack.c.bf16 %v271_v53, %v270_v41  ;;  %vm208_vm10 = vcmp.ge.f32.partialorder %v176_v43, 0.0  ;;  %vm209_vm11 = vcmp.ge.f32.partialorder %v177_v44, 0.0  ;;  %v240_v59 = vmul.f32 0.2, %v176_v43 }
  0x1c   :  { %v241_v60 = vmul.f32 0.2, %v177_v44  ;;  %v110_v61 = vmul.f32 %v78_v50, %v42_v42  ;;  %v111_v63 = vmul.f32 %v79_v54, %v43_v46  ;;  %v44_v0 = vunpack.c.l.bf16 %v21_v52 }
  0x1d   :  { %314 = vst [vmem:[%s629_s3 + $0x20] sm:$0xff] %v298_v57  ;;  %v272_v3 = vsel %vm208_vm10, %v176_v43, %v240_v59  ;;  %v45_v7 = vunpack.c.h.bf16 %v21_v52  ;;  %v80_v8 = vperm.slane %v421_v51, 6  ;;  %v81_v11 = vperm.slane %v421_v51, 7  ;;  %v24_v52 = vld [vmem:[%s626_s0 + $0x50] sm:$0xff] }
  0x1e   :  { %v273_v14 = vsel %vm209_vm11, %v177_v44, %v241_v60  ;;  %v178_v19 = vadd.f32 %v146_v55, %v110_v61  ;;  %v179_v20 = vadd.f32 %v147_v56, %v111_v63  ;;  %v148_v21 = vperm.slane %v430_v58, 6 }
  0x1f   :  { %v299_v23 = vpack.c.bf16 %v273_v14, %v272_v3  ;;  %v112_v24 = vmul.f32 %v80_v8, %v44_v0  ;;  %v113_v29 = vmul.f32 %v81_v11, %v45_v7  ;;  %v149_v32 = vperm.slane %v430_v58, 7 }
  0x20   :  { %vm210_vm12 = vcmp.ge.f32.partialorder %v178_v19, 0.0  ;;  %vm211_vm13 = vcmp.ge.f32.partialorder %v179_v20, 0.0  ;;  %v242_v34 = vmul.f32 0.2, %v178_v19  ;;  %v243_v35 = vmul.f32 0.2, %v179_v20 }
  0x21   :  { %315 = vst [vmem:[%s629_s3 + $0x28] sm:$0xff] %v299_v23  ;;  %v180_v36 = vadd.f32 %v148_v21, %v112_v24  ;;  %v181_v37 = vadd.f32 %v149_v32, %v113_v29  ;;  %v46_v40 = vunpack.c.l.bf16 %v22_v22  ;;  %v47_v41 = vunpack.c.h.bf16 %v22_v22 }
  0x22   :  { %v274_v42 = vsel %vm210_vm12, %v178_v19, %v242_v34  ;;  %v275_v43 = vsel %vm211_vm13, %v179_v20, %v243_v35  ;;  %v48_v44 = vunpack.c.l.bf16 %v23_v33  ;;  %v49_v46 = vunpack.c.h.bf16 %v23_v33  ;;  %v26_v34 = vld [vmem:[%s626_s0 + $0x60] sm:$0xff] }
  0x23   :  { %v300_v53 = vpack.c.bf16 %v275_v43, %v274_v42  ;;  %vm212_vm14 = vcmp.ge.f32.partialorder %v180_v36, 0.0  ;;  %vm213_vm15 = vcmp.ge.f32.partialorder %v181_v37, 0.0  ;;  %v244_v57 = vmul.f32 0.2, %v180_v36 }
  0x24   :  { %v245_v59 = vmul.f32 0.2, %v181_v37  ;;  %v114_v60 = vmul.f32 %v66_v5, %v46_v40  ;;  %v115_v61 = vmul.f32 %v67_v6, %v47_v41  ;;  %v116_v63 = vmul.f32 %v68_v15, %v48_v44 }
  0x25   :  { %316 = vst [vmem:[%s629_s3 + $0x30] sm:$0xff] %v300_v53  ;;  %v276_v0 = vsel %vm212_vm14, %v180_v36, %v244_v57  ;;  %v117_v3 = vmul.f32 %v69_v16, %v49_v46  ;;  %v50_v7 = vunpack.c.l.bf16 %v24_v52  ;;  %v51_v14 = vunpack.c.h.bf16 %v24_v52  ;;  %v28_v52 = vld [vmem:[%s626_s0 + $0x70] sm:$0xff] }
  0x26   :  { %v277_v19 = vsel %vm213_vm15, %v181_v37, %v245_v59  ;;  %v182_v5 = vadd.f32 %v134_v9, %v114_v60  ;;  %v183_v6 = vadd.f32 %v135_v10, %v115_v61  ;;  %v184_v15 = vadd.f32 %v136_v17, %v116_v63 }
  0x27   :  { %v301_v20 = vpack.c.bf16 %v277_v19, %v276_v0  ;;  %v185_v22 = vadd.f32 %v137_v18, %v117_v3  ;;  %v118_v23 = vmul.f32 %v70_v25, %v50_v7  ;;  %v119_v16 = vmul.f32 %v71_v26, %v51_v14  ;;  %v25_v18 = vld [vmem:[%s626_s0 + $0x58] sm:$0xff] }
  0x28   :  { %vm214_vm0 = vcmp.ge.f32.partialorder %v182_v5, 0.0  ;;  %vm215_vm1 = vcmp.ge.f32.partialorder %v183_v6, 0.0  ;;  %v246_v24 = vmul.f32 0.2, %v182_v5  ;;  %v247_v9 = vmul.f32 0.2, %v183_v6 }
  0x29   :  { %317 = vst [vmem:[%s629_s3 + $0x38] sm:$0xff] %v301_v20  ;;  %vm216_vm2 = vcmp.ge.f32.partialorder %v184_v15, 0.0  ;;  %vm217_vm3 = vcmp.ge.f32.partialorder %v185_v22, 0.0  ;;  %v248_v10 = vmul.f32 0.2, %v184_v15  ;;  %v186_v17 = vadd.f32 %v138_v27, %v118_v23  ;;  %v27_v27 = vld [vmem:[%s626_s0 + $0x68] sm:$0xff] }
  0x2a   :  { %v278_v25 = vsel %vm214_vm0, %v182_v5, %v246_v24  ;;  %v279_v26 = vsel %vm215_vm1, %v183_v6, %v247_v9  ;;  %v249_v29 = vmul.f32 0.2, %v185_v22  ;;  %v187_v33 = vadd.f32 %v139_v28, %v119_v16 }
  0x2b   :  { %v302_v35 = vpack.c.bf16 %v279_v26, %v278_v25  ;;  %v280_v36 = vsel %vm216_vm2, %v184_v15, %v248_v10  ;;  %vm218_vm4 = vcmp.ge.f32.partialorder %v186_v17, 0.0  ;;  %v250_v37 = vmul.f32 0.2, %v186_v17 }
  0x2c   :  { %v281_v40 = vsel %vm217_vm3, %v185_v22, %v249_v29  ;;  %vm219_vm5 = vcmp.ge.f32.partialorder %v187_v33, 0.0  ;;  %v251_v41 = vmul.f32 0.2, %v187_v33  ;;  %v52_v42 = vunpack.c.l.bf16 %v25_v18 }
  0x2d   :  { %318 = vst [vmem:[%s629_s3 + $0x40] sm:$0xff] %v302_v35  ;;  %v303_v28 = vpack.c.bf16 %v281_v40, %v280_v36  ;;  %v282_v43 = vsel %vm218_vm4, %v186_v17, %v250_v37  ;;  %v53_v44 = vunpack.c.h.bf16 %v25_v18  ;;  %v54_v46 = vunpack.c.l.bf16 %v26_v34 }
  0x2e   :  { %v283_v53 = vsel %vm219_vm5, %v187_v33, %v251_v41  ;;  %v120_v57 = vmul.f32 %v72_v45, %v52_v42  ;;  %v55_v59 = vunpack.c.h.bf16 %v26_v34  ;;  %v56_v60 = vunpack.c.l.bf16 %v27_v27 }
  0x2f   :  { %319 = vst [vmem:[%s629_s3 + $0x48] sm:$0xff] %v303_v28  ;;  %v304_v61 = vpack.c.bf16 %v283_v53, %v282_v43  ;;  %v121_v63 = vmul.f32 %v73_v47, %v53_v44  ;;  %v122_v0 = vmul.f32 %v74_v62, %v54_v46  ;;  %v57_v3 = vunpack.c.h.bf16 %v27_v27 }
  0x30   :  { %v188_v7 = vadd.f32 %v140_v48, %v120_v57  ;;  %v123_v45 = vmul.f32 %v75_v4, %v55_v59  ;;  %v124_v14 = vmul.f32 %v76_v30, %v56_v60  ;;  %v58_v19 = vunpack.c.l.bf16 %v28_v52 }
  0x31   :  { %320 = vst [vmem:[%s629_s3 + $0x50] sm:$0xff] %v304_v61  ;;  %v189_v1 = vadd.f32 %v141_v49, %v121_v63  ;;  %v190_v47 = vadd.f32 %v142_v12, %v122_v0  ;;  %v125_v48 = vmul.f32 %v77_v31, %v57_v3  ;;  %v59_v62 = vunpack.c.h.bf16 %v28_v52 }
  0x32   :  { %vm220_vm6 = vcmp.ge.f32.partialorder %v188_v7, 0.0  ;;  %v252_v4 = vmul.f32 0.2, %v188_v7  ;;  %v191_v30 = vadd.f32 %v143_v13, %v123_v45  ;;  %v192_v5 = vadd.f32 %v144_v38, %v124_v14  ;;  %v29_v13 = vld [vmem:[%s626_s0 + $0x78] sm:$0xff] }
  0x33   :  { %vm221_vm7 = vcmp.ge.f32.partialorder %v189_v1, 0.0  ;;  %v253_v6 = vmul.f32 0.2, %v189_v1  ;;  %vm222_vm8 = vcmp.ge.f32.partialorder %v190_v47, 0.0  ;;  %v254_v2 = vmul.f32 0.2, %v190_v47 }
  0x34   :  { %v284_v49 = vsel %vm220_vm6, %v188_v7, %v252_v4  ;;  %vm223_vm9 = vcmp.ge.f32.partialorder %v191_v30, 0.0  ;;  %v255_v15 = vmul.f32 0.2, %v191_v30  ;;  %v193_v12 = vadd.f32 %v145_v39, %v125_v48 }
  0x35   :  { %v285_v31 = vsel %vm221_vm7, %v189_v1, %v253_v6  ;;  %v286_v20 = vsel %vm222_vm8, %v190_v47, %v254_v2  ;;  %vm224_vm10 = vcmp.ge.f32.partialorder %v192_v5, 0.0  ;;  %v256_v22 = vmul.f32 0.2, %v192_v5 }
  0x36   :  { %v305_v23 = vpack.c.bf16 %v285_v31, %v284_v49  ;;  %v287_v38 = vsel %vm223_vm9, %v191_v30, %v255_v15  ;;  %vm225_vm11 = vcmp.ge.f32.partialorder %v193_v12, 0.0  ;;  %v257_v16 = vmul.f32 0.2, %v193_v12 }
  0x37   :  { %v306_v24 = vpack.c.bf16 %v287_v38, %v286_v20  ;;  %v288_v9 = vsel %vm224_vm10, %v192_v5, %v256_v22  ;;  %v126_v10 = vmul.f32 %v78_v50, %v58_v19  ;;  %v127_v39 = vmul.f32 %v79_v54, %v59_v62 }
  0x38   :  { %321 = vst [vmem:[%s629_s3 + $0x58] sm:$0xff] %v305_v23  ;;  %v289_v17 = vsel %vm225_vm11, %v193_v12, %v257_v16  ;;  %v60_v18 = vunpack.c.l.bf16 %v29_v13  ;;  %v61_v25 = vunpack.c.h.bf16 %v29_v13 }
  0x39   :  { %322 = vst [vmem:[%s629_s3 + $0x60] sm:$0xff] %v306_v24  ;;  %v307_v26 = vpack.c.bf16 %v289_v17, %v288_v9  ;;  %v194_v29 = vadd.f32 %v146_v55, %v126_v10  ;;  %v195_v50 = vadd.f32 %v147_v56, %v127_v39 }
  0x3a   :  { %v128_v54 = vmul.f32 %v80_v8, %v60_v18  ;;  %v129_v33 = vmul.f32 %v81_v11, %v61_v25 }
  0x3b   :  { %323 = vst [vmem:[%s629_s3 + $0x68] sm:$0xff] %v307_v26  ;;  %vm226_vm12 = vcmp.ge.f32.partialorder %v194_v29, 0.0  ;;  %vm227_vm13 = vcmp.ge.f32.partialorder %v195_v50, 0.0  ;;  %v258_v34 = vmul.f32 0.2, %v194_v29 }
  0x3c   :  { %v259_v35 = vmul.f32 0.2, %v195_v50  ;;  %v196_v55 = vadd.f32 %v148_v21, %v128_v54  ;;  %v197_v56 = vadd.f32 %v149_v32, %v129_v33 }
  0x3d   :  { %v290_v36 = vsel %vm226_vm12, %v194_v29, %v258_v34 }
  0x3e   :  { %v291_v37 = vsel %vm227_vm13, %v195_v50, %v259_v35  ;;  %vm228_vm14 = vcmp.ge.f32.partialorder %v196_v55, 0.0  ;;  %vm229_vm15 = vcmp.ge.f32.partialorder %v197_v56, 0.0  ;;  %v260_v51 = vmul.f32 0.2, %v196_v55 }
  0x3f   :  { %v308_v8 = vpack.c.bf16 %v291_v37, %v290_v36  ;;  %v261_v11 = vmul.f32 0.2, %v197_v56 }
  0x40   :  { %v292_v27 = vsel %vm228_vm14, %v196_v55, %v260_v51 }
  0x41   :  { %324 = vst [vmem:[%s629_s3 + $0x70] sm:$0xff] %v308_v8  ;;  %v293_v40 = vsel %vm229_vm15, %v197_v56, %v261_v11 }
  0x42   :  { %v309_v41 = vpack.c.bf16 %v293_v40, %v292_v27 }
  0x44   :  { %325 = vst [vmem:[%s629_s3 + $0x78] sm:$0xff] %v309_v41 }

// kernel: tile.99
= control target key start
LH: loop header
LB: loop body
LE: loop exit
PB: predicated region body
PF: predicated region fallthrough
CT: control target
= control target key end

     0   :  { %s22_s0 = inlined_call_operand.vmem [shape: f32[64], index: 0, kind: input, shape index: {}]   ;;  %s23_s1 = inlined_call_operand.vmem [shape: f32[4,64], index: 1, kind: output, shape index: {}]  }
   0x1   :  { %v4_v0 = vld [vmem:[%s22_s0] ss:$0 sm:$0xff] }
   0x2   :  { %5 = vst [vmem:[%s23_s1] sm:$0xf] %v4_v0 }

// kernel: a_call__.11
= control target key start
LH: loop header
LB: loop body
LE: loop exit
PB: predicated region body
PF: predicated region fallthrough
CT: control target
= control target key end

     0   :  { %11 = vsyncpa [#allocation4], 0  ;;  %s1310_s21 = smov [#allocation3]   ;;  %s1311_s23 = smov 1024   ;;  %s1583_s0 = inlined_call_operand.vmem [shape: bf16[16,32], index: 0, kind: input, shape index: {}]   ;;  %s1584_s1 = inlined_call_operand.hbm [shape: bf16[32,2048], index: 1, kind: input, shape index: {}]   ;;  %s1585_s2 = inlined_call_operand.vmem [shape: f32[1,2048], index: 2, kind: input, shape index: {}]   ;;  %s1586_s3 = inlined_call_operand.vmem [shape: bf16[16,2048], index: 3, kind: output, shape index: {0}]   ;;  %s1587_s4 = inlined_call_operand.vmem [shape: f32[1,1,2048], index: 4, kind: output, shape index: {1}]   ;;  %s1588_s5 = inlined_call_operand.vmem [shape: f32[1,1,2048], index: 5, kind: output, shape index: {2}]  }
   0x1   :  { %s18_s20 = sshll.u32 %s1584_s1, 4  ;;  %s20_s22 = sshll.u32 %s1310_s21, 4  ;;  %s19_s20 = int_to_ptr.hbm [resolvable:$true] %s18_s20  ;;  %s21_s22 = int_to_ptr.vmem [resolvable:$true] %s20_s22 }
   0x2   :  { %s1312_s24 = smov 64  }
   0x3   :  { %26 = dma.hbm_to_vmem [thread:$0]  %s19_s20, 4096, %s21_s22, [#allocation4], %s1311_s23, %s1311_s23, %s1312_s24  }
   0x4   :  { %1308 = dma.done.wait [#allocation4], 4096  }
   0x5   :  { %1309 = vsyncadd [#allocation4], 4294963200  ;;  %v1170_v0 = vld [vmem:[#allocation3 + $0x80] sm:$0xf]  ;;  %v1265_v2 = vld [vmem:[#allocation3 + $0x84] sm:$0xf] }
   0x6   :  { %v1273_v1 = vld [vmem:[#allocation3 + $0xbc] sm:$0xf0]  ;;  %v1172_v4 = vld [vmem:[#allocation3 + $0xc0] sm:$0xf0]  ;;  %v1178_v5 = vld [vmem:[#allocation3 + $0x88] sm:$0xf] }
   0x7   :  { %v1171_v3 = vor.u32 %v1273_v1, %v1170_v0  ;;  %v1274_v6 = vld [vmem:[#allocation3 + $0xc4] sm:$0xf0]  ;;  %v1175_v7 = vor.u32 %v1265_v2, %v1172_v4  ;;  %v1266_v9 = vld [vmem:[#allocation3 + $0x8c] sm:$0xf]  ;;  %v1106_v11 = vld [vmem:[#allocation3] sm:$0xf] }
   0x8   :  { %v1179_v8 = vor.u32 %v1274_v6, %v1178_v5  ;;  %v1180_v10 = vld [vmem:[#allocation3 + $0xc8] sm:$0xf0]  ;;  %v1257_v13 = vld [vmem:[#allocation3 + $0x3c] sm:$0xf0]  ;;  %v1249_v14 = vld [vmem:[#allocation3 + $0x4] sm:$0xf] }
   0x9   :  { %311 = vmatpush.bf16.msra.mxu0 %v1171_v3  ;;  %v1183_v12 = vor.u32 %v1266_v9, %v1180_v10  ;;  %v1108_v15 = vld [vmem:[#allocation3 + $0x40] sm:$0xf0]  ;;  %325 = vmatpush.bf16.msra.mxu1 %v1175_v7  ;;  %v1107_v16 = vor.u32 %v1257_v13, %v1106_v11  ;;  %v1114_v18 = vld [vmem:[#allocation3 + $0x8] sm:$0xf]  ;;  %v1250_v20 = vld [vmem:[#allocation3 + $0xc] sm:$0xf] }
   0xa   :  { %339 = vmatpush.bf16.msra.mxu2 %v1179_v8  ;;  %v1111_v17 = vor.u32 %v1249_v14, %v1108_v15  ;;  %v1258_v19 = vld [vmem:[#allocation3 + $0x44] sm:$0xf0]  ;;  %v1116_v22 = vld [vmem:[#allocation3 + $0x48] sm:$0xf0]  ;;  %v1349_v23 = vld [vmem:[%s1583_s0] sm:$0xff]  ;;  %vm301_vm0 = vcmask 261120  }
   0xb   :  { %353 = vmatpush.bf16.msra.mxu3 %v1183_v12  ;;  %v1115_v21 = vor.u32 %v1258_v19, %v1114_v18  ;;  %v1194_v24 = vld [vmem:[#allocation3 + $0x98] sm:$0xf]  ;;  %v1119_v25 = vor.u32 %v1250_v20, %v1116_v22  ;;  %v1268_v27 = vld [vmem:[#allocation3 + $0x9c] sm:$0xf]  ;;  %v1186_v31 = vld [vmem:[#allocation3 + $0x90] sm:$0xf] }
   0xc   :  { %v1276_v26 = vld [vmem:[#allocation3 + $0xd4] sm:$0xf0]  ;;  %v1196_v28 = vld [vmem:[#allocation3 + $0xd8] sm:$0xf0]  ;;  %v1275_v32 = vld [vmem:[#allocation3 + $0xcc] sm:$0xf0] }
   0xd   :  { %312 = vmatpush.bf16.msra.mxu0 %v1107_v16  ;;  %v1195_v29 = vor.u32 %v1276_v26, %v1194_v24  ;;  %v1199_v30 = vor.u32 %v1268_v27, %v1196_v28  ;;  %v1267_v33 = vld [vmem:[#allocation3 + $0x94] sm:$0xf]  ;;  %326 = vmatpush.bf16.msra.mxu1 %v1111_v17  ;;  %v1187_v34 = vor.u32 %v1275_v32, %v1186_v31  ;;  %v1130_v36 = vld [vmem:[#allocation3 + $0x18] sm:$0xf]  ;;  %v1252_v40 = vld [vmem:[#allocation3 + $0x1c] sm:$0xf] }
   0xe   :  { %340 = vmatpush.bf16.msra.mxu2 %v1115_v21  ;;  %v1188_v35 = vld [vmem:[#allocation3 + $0xd0] sm:$0xf0]  ;;  %v1260_v37 = vld [vmem:[#allocation3 + $0x54] sm:$0xf0]  ;;  %v1132_v41 = vld [vmem:[#allocation3 + $0x58] sm:$0xf0] }
   0xf   :  { %354 = vmatpush.bf16.msra.mxu3 %v1119_v25  ;;  %v1191_v38 = vor.u32 %v1267_v33, %v1188_v35  ;;  %v1131_v39 = vor.u32 %v1260_v37, %v1130_v36  ;;  %v1122_v42 = vld [vmem:[#allocation3 + $0x10] sm:$0xf]  ;;  %v1135_v43 = vor.u32 %v1252_v40, %v1132_v41  ;;  %v1251_v45 = vld [vmem:[#allocation3 + $0x14] sm:$0xf]  ;;  %v1210_v47 = vld [vmem:[#allocation3 + $0xa8] sm:$0xf] }
  0x10   :  { %1232 = vmatmul.msk.bf16.vlgmr.msra.gmra.mxu0 %vm301_vm0, %v1349_v23  ;;  %v1259_v44 = vld [vmem:[#allocation3 + $0x4c] sm:$0xf0]  ;;  %v1124_v46 = vld [vmem:[#allocation3 + $0x50] sm:$0xf0]  ;;  %1233 = vmatmul.msk.bf16.vlgmr.msra.gmra.mxu1 %vm301_vm0, %v1349_v23  ;;  %v1278_v48 = vld [vmem:[#allocation3 + $0xe4] sm:$0xf0] }
  0x11   :  { %1234 = vmatmul.msk.bf16.vlgmr.msra.gmra.mxu2 %vm301_vm0, %v1349_v23  ;;  %v1270_v49 = vld [vmem:[#allocation3 + $0xac] sm:$0xf]  ;;  %367 = vmatpush.bf16.msrb.mxu0 %v1187_v34  ;;  %v1123_v50 = vor.u32 %v1259_v44, %v1122_v42  ;;  %v1211_v51 = vor.u32 %v1278_v48, %v1210_v47  ;;  %v1202_v53 = vld [vmem:[#allocation3 + $0xa0] sm:$0xf]  ;;  %v1127_v55 = vor.u32 %v1251_v45, %v1124_v46  ;;  %v1269_v58 = vld [vmem:[#allocation3 + $0xa4] sm:$0xf] }
  0x12   :  { %395 = vmatpush.bf16.msrb.mxu2 %v1195_v29  ;;  %1235 = vmatmul.msk.bf16.vlgmr.msra.gmra.mxu3 %vm301_vm0, %v1349_v23  ;;  %v1212_v52 = vld [vmem:[#allocation3 + $0xe8] sm:$0xf0]  ;;  %v1277_v54 = vld [vmem:[#allocation3 + $0xdc] sm:$0xf0]  ;;  %v1204_v59 = vld [vmem:[#allocation3 + $0xe0] sm:$0xf0] }
  0x13   :  { %409 = vmatpush.bf16.msrb.mxu3 %v1199_v30  ;;  %381 = vmatpush.bf16.msrb.mxu1 %v1191_v38  ;;  %v1215_v56 = vor.u32 %v1270_v49, %v1212_v52  ;;  %v1203_v57 = vor.u32 %v1277_v54, %v1202_v53  ;;  %v1146_v60 = vld [vmem:[#allocation3 + $0x28] sm:$0xf]  ;;  %v1207_v61 = vor.u32 %v1269_v58, %v1204_v59  ;;  %v1254_v63 = vld [vmem:[#allocation3 + $0x2c] sm:$0xf]  ;;  %v1138_v3 = vld [vmem:[#allocation3 + $0x20] sm:$0xf] }
  0x14   :  { %v1262_v62 = vld [vmem:[#allocation3 + $0x64] sm:$0xf0]  ;;  %v1148_v0 = vld [vmem:[#allocation3 + $0x68] sm:$0xf0]  ;;  %v1261_v4 = vld [vmem:[#allocation3 + $0x5c] sm:$0xf0] }
  0x15   :  { %v1147_v1 = vor.u32 %v1262_v62, %v1146_v60  ;;  %v1151_v2 = vor.u32 %v1254_v63, %v1148_v0  ;;  %v1253_v5 = vld [vmem:[#allocation3 + $0x24] sm:$0xf]  ;;  %368 = vmatpush.bf16.msrb.mxu0 %v1123_v50  ;;  %v1139_v7 = vor.u32 %v1261_v4, %v1138_v3  ;;  %v1226_v9 = vld [vmem:[#allocation3 + $0xb8] sm:$0xf]  ;;  %v1272_v11 = vld [vmem:[#allocation3 + $0xbc] sm:$0xf] }
  0x16   :  { %396 = vmatpush.bf16.msrb.mxu2 %v1131_v39  ;;  %v1140_v6 = vld [vmem:[#allocation3 + $0x60] sm:$0xf0]  ;;  %v1280_v10 = vld [vmem:[#allocation3 + $0xf4] sm:$0xf0]  ;;  %v1228_v12 = vld [vmem:[#allocation3 + $0xf8] sm:$0xf0] }
  0x17   :  { %410 = vmatpush.bf16.msrb.mxu3 %v1135_v43  ;;  %382 = vmatpush.bf16.msrb.mxu1 %v1127_v55  ;;  %v1143_v8 = vor.u32 %v1253_v5, %v1140_v6  ;;  %v1218_v13 = vld [vmem:[#allocation3 + $0xb0] sm:$0xf]  ;;  %v1271_v15 = vld [vmem:[#allocation3 + $0xb4] sm:$0xf]  ;;  %v1227_v17 = vor.u32 %v1280_v10, %v1226_v9  ;;  %v1231_v18 = vor.u32 %v1272_v11, %v1228_v12  ;;  %v1162_v20 = vld [vmem:[#allocation3 + $0x38] sm:$0xf] }
  0x18   :  { %v1279_v14 = vld [vmem:[#allocation3 + $0xec] sm:$0xf0]  ;;  %v1220_v16 = vld [vmem:[#allocation3 + $0xf0] sm:$0xf0]  ;;  %v1264_v21 = vld [vmem:[#allocation3 + $0x74] sm:$0xf0] }
  0x19   :  { %423 = vmatpush.bf16.msra.mxu0 %v1203_v57  ;;  %v1219_v19 = vor.u32 %v1279_v14, %v1218_v13  ;;  %v1256_v22 = vld [vmem:[#allocation3 + $0x3c] sm:$0xf]  ;;  %v1223_v24 = vor.u32 %v1271_v15, %v1220_v16  ;;  %v1154_v26 = vld [vmem:[#allocation3 + $0x30] sm:$0xf]  ;;  %v1255_v28 = vld [vmem:[#allocation3 + $0x34] sm:$0xf]  ;;  %v1163_v30 = vor.u32 %v1264_v21, %v1162_v20 }
  0x1a   :  { %451 = vmatpush.bf16.msra.mxu2 %v1211_v51  ;;  %v1164_v25 = vld [vmem:[#allocation3 + $0x78] sm:$0xf0]  ;;  %v1263_v27 = vld [vmem:[#allocation3 + $0x6c] sm:$0xf0]  ;;  %v1156_v29 = vld [vmem:[#allocation3 + $0x70] sm:$0xf0] }
  0x1b   :  { %465 = vmatpush.bf16.msra.mxu3 %v1215_v56  ;;  %437 = vmatpush.bf16.msra.mxu1 %v1207_v61  ;;  %v1167_v31 = vor.u32 %v1256_v22, %v1164_v25  ;;  %v1155_v32 = vor.u32 %v1263_v27, %v1154_v26  ;;  %v1159_v33 = vor.u32 %v1255_v28, %v1156_v29  ;;  %v1386_v34 = vld [vmem:[%s1585_s2] sm:$0xff]  ;;  %vm870_vm1 = vcmask 1040384  }
  0x1c   :  { %v632_v35 = vperm.slane %v1386_v34, 0  ;;  %v633_v36 = vperm.slane %v1386_v34, 1  ;;  %v634_v42 = vperm.slane %v1386_v34, 2  ;;  %v635_v43 = vperm.slane %v1386_v34, 3 }
  0x1d   :  { %424 = vmatpush.bf16.msra.mxu0 %v1139_v7  ;;  %v636_v21 = vperm.slane %v1386_v34, 4  ;;  %vm872_vm2 = vcmask 1042434   ;;  %vm874_vm3 = vcmask 1041408   ;;  %vm876_vm4 = vcmask 1044484  }
  0x1e   :  { %452 = vmatpush.bf16.msra.mxu2 %v1147_v1  ;;  %vm878_vm5 = vcmask 1046534   ;;  %vm880_vm6 = vcmask 1045508   ;;  %vm882_vm7 = vcmask 1043456  }
  0x1f   :  { %466 = vmatpush.bf16.msra.mxu3 %v1151_v2  ;;  %438 = vmatpush.bf16.msra.mxu1 %v1143_v8 }
  0x20   :  { %1236 = vmatmul.msk.bf16.vlgmr.msrb.gmra.mxu0 %vm301_vm0, %v1349_v23  ;;  %1237 = vmatmul.msk.bf16.vlgmr.msrb.gmra.mxu1 %vm301_vm0, %v1349_v23 }
  0x21   :  { %1238 = vmatmul.msk.bf16.vlgmr.msrb.gmra.mxu2 %vm301_vm0, %v1349_v23  ;;  %479 = vmatpush.bf16.msrb.mxu0 %v1219_v19 }
  0x22   :  { %1239 = vmatmul.msk.bf16.vlgmr.msrb.gmra.mxu3 %vm301_vm0, %v1349_v23  ;;  %507 = vmatpush.bf16.msrb.mxu2 %v1227_v17 }
  0x23   :  { %521 = vmatpush.bf16.msrb.mxu3 %v1231_v18  ;;  %493 = vmatpush.bf16.msrb.mxu1 %v1223_v24 }
  0x25   :  { %480 = vmatpush.bf16.msrb.mxu0 %v1155_v32 }
  0x26   :  { %508 = vmatpush.bf16.msrb.mxu2 %v1163_v30 }
  0x27   :  { %522 = vmatpush.bf16.msrb.mxu3 %v1167_v31  ;;  %494 = vmatpush.bf16.msrb.mxu1 %v1159_v33 }
  0x30   :  { %1240 = vmatmul.msk.bf16.vlgmr.msra.gmra.mxu0 %vm301_vm0, %v1349_v23  ;;  %1241 = vmatmul.msk.bf16.vlgmr.msra.gmra.mxu1 %vm301_vm0, %v1349_v23 }
  0x31   :  { %1242 = vmatmul.msk.bf16.vlgmr.msra.gmra.mxu2 %vm301_vm0, %v1349_v23 }
  0x32   :  { %1243 = vmatmul.msk.bf16.vlgmr.msra.gmra.mxu3 %vm301_vm0, %v1349_v23 }
  0x40   :  { %1244 = vmatmul.msk.bf16.vlgmr.msrb.gmra.mxu0 %vm301_vm0, %v1349_v23  ;;  %1245 = vmatmul.msk.bf16.vlgmr.msrb.gmra.mxu1 %vm301_vm0, %v1349_v23 }
  0x41   :  { %1246 = vmatmul.msk.bf16.vlgmr.msrb.gmra.mxu2 %vm301_vm0, %v1349_v23 }
  0x42   :  { %1247 = vmatmul.msk.bf16.vlgmr.msrb.gmra.mxu3 %vm301_vm0, %v1349_v23 }
  0x8d   :  { %v314_v37 = vpop.f32.mrf.mxu0  ;;  %v328_v39 = vpop.f32.mrf.mxu1 }
  0x8e   :  { %v664_v38 = vadd.f32 %v632_v35, %v314_v37  ;;  %v665_v40 = vadd.f32 %v633_v36, %v328_v39  ;;  %v895_v44 = vmul.f32 %v314_v37, %v314_v37  ;;  %v896_v48 = vmul.f32 %v328_v39, %v328_v39 }
  0x90   :  { %v696_v41 = vpack.c.bf16 %v665_v40, %v664_v38  ;;  %v638_v40 = vperm.slane %v1386_v34, 6 }
  0x92   :  { %712 = vst [vmem:[%s1586_s3] sm:$0xff] %v696_v41 }
  0x94   :  { %v342_v23 = vpop.f32.mrf.mxu2 }
  0x95   :  { %v666_v45 = vadd.f32 %v634_v42, %v342_v23  ;;  %v356_v46 = vpop.f32.mrf.mxu3  ;;  %v316_v47 = vpop.f32.mrf.mxu0  ;;  %v897_v10 = vmul.f32 %v342_v23, %v342_v23 }
  0x96   :  { %v667_v49 = vadd.f32 %v635_v43, %v356_v46  ;;  %v680_v50 = vadd.f32 %v632_v35, %v316_v47  ;;  %v728_v51 = vadd.f32 %v316_v47, %v314_v37  ;;  %v330_v52 = vpop.f32.mrf.mxu1  ;;  %v911_v53 = vmul.f32 %v316_v47, %v316_v47 }
  0x97   :  { %v681_v54 = vadd.f32 %v633_v36, %v330_v52  ;;  %v735_v55 = vadd.f32 %v330_v52, %v328_v39  ;;  %v912_v56 = vmul.f32 %v330_v52, %v330_v52  ;;  %v898_v24 = vmul.f32 %v356_v46, %v356_v46 }
  0x98   :  { %v697_v57 = vpack.c.bf16 %v667_v49, %v666_v45  ;;  %v729_v58 = vrot.slane %v728_v51, 4  ;;  %v927_v59 = vadd.f32 %v911_v53, %v895_v44  ;;  %v637_v35 = vperm.slane %v1386_v34, 5 }
  0x99   :  { %v704_v60 = vpack.c.bf16 %v681_v54, %v680_v50  ;;  %v736_v61 = vrot.slane %v735_v55, 4  ;;  %v934_v62 = vadd.f32 %v912_v56, %v896_v48  ;;  %v639_v52 = vperm.slane %v1386_v34, 7 }
  0x9a   :  { %713 = vst [vmem:[%s1586_s3 + $0x8] sm:$0xff] %v697_v57  ;;  %v730_v63 = vadd.f32 %v729_v58, %v728_v51  ;;  %v928_v0 = vrot.slane %v927_v59, 4 }
  0x9b   :  { %720 = vst [vmem:[%s1586_s3 + $0x40] sm:$0xff] %v704_v60  ;;  %v737_v1 = vadd.f32 %v736_v61, %v735_v55  ;;  %v935_v2 = vrot.slane %v934_v62, 4 }
  0x9c   :  { %v731_v3 = vrot.slane %v730_v63, 2  ;;  %v344_v4 = vpop.f32.mrf.mxu2  ;;  %v929_v5 = vadd.f32 %v928_v0, %v927_v59 }
  0x9d   :  { %v738_v6 = vrot.slane %v737_v1, 2  ;;  %v936_v7 = vadd.f32 %v935_v2, %v934_v62  ;;  %v682_v8 = vadd.f32 %v634_v42, %v344_v4  ;;  %v358_v9 = vpop.f32.mrf.mxu3  ;;  %v742_v11 = vadd.f32 %v344_v4, %v342_v23  ;;  %v370_v14 = vpop.f32.mrf.mxu0 }
  0x9e   :  { %v913_v12 = vmul.f32 %v344_v4, %v344_v4  ;;  %v683_v13 = vadd.f32 %v635_v43, %v358_v9  ;;  %v749_v17 = vadd.f32 %v358_v9, %v356_v46  ;;  %v384_v22 = vpop.f32.mrf.mxu1  ;;  %v732_v25 = vadd.f32 %v731_v3, %v730_v63 }
  0x9f   :  { %v739_v15 = vadd.f32 %v738_v6, %v737_v1  ;;  %v937_v16 = vrot.slane %v936_v7, 2  ;;  %v743_v18 = vrot.slane %v742_v11, 4  ;;  %v930_v26 = vrot.slane %v929_v5, 2 }
  0xa0   :  { %v941_v19 = vadd.f32 %v913_v12, %v897_v10  ;;  %v705_v20 = vpack.c.bf16 %v683_v13, %v682_v8  ;;  %v750_v27 = vrot.slane %v749_v17, 4  ;;  %v914_v31 = vmul.f32 %v358_v9, %v358_v9 }
  0xa1   :  { %v740_v28 = vrot.slane %v739_v15, 1  ;;  %v744_v29 = vadd.f32 %v743_v18, %v742_v11  ;;  %v938_v32 = vadd.f32 %v937_v16, %v936_v7  ;;  %v733_v41 = vrot.slane %v732_v25, 1 }
  0xa2   :  { %v942_v30 = vrot.slane %v941_v19, 4  ;;  %721 = vst [vmem:[%s1586_s3 + $0x48] sm:$0xff] %v705_v20  ;;  %v751_v33 = vadd.f32 %v750_v27, %v749_v17  ;;  %v948_v38 = vadd.f32 %v914_v31, %v898_v24  ;;  %v1407_v42 = vadd.f32 %v930_v26, %v929_v5 }
  0xa3   :  { %v745_v36 = vrot.slane %v744_v29, 2  ;;  %v668_v23 = vadd.f32 %v636_v21, %v370_v14  ;;  %v741_v44 = vadd.f32 %v740_v28, %v739_v15  ;;  %v939_v49 = vrot.slane %v938_v32, 1 }
  0xa4   :  { %v943_v37 = vadd.f32 %v942_v30, %v941_v19  ;;  %v398_v39 = vpop.f32.mrf.mxu2  ;;  %v752_v43 = vrot.slane %v751_v33, 2  ;;  %v949_v47 = vrot.slane %v948_v38, 4  ;;  %v669_v51 = vadd.f32 %v637_v35, %v384_v22 }
  0xa5   :  { %v746_v45 = vadd.f32 %v745_v36, %v744_v29  ;;  %v1409_v48 = vpop.f32.mrf.mxu3  ;;  %v372_v56 = vpop.f32.mrf.mxu0  ;;  %v670_v59 = vadd.f32 %v638_v40, %v398_v39  ;;  %v734_v60 = vadd.f32 %v733_v41, %v732_v25  ;;  %v932_v61 = vrot.slane %v1407_v42, 1 }
  0xa6   :  { %v944_v46 = vrot.slane %v943_v37, 2  ;;  %v753_v50 = vadd.f32 %v752_v43, %v751_v33  ;;  %v950_v55 = vadd.f32 %v949_v47, %v948_v38  ;;  %v698_v58 = vpack.c.bf16 %v669_v51, %v668_v23  ;;  %v386_v63 = vpop.f32.mrf.mxu1 }
  0xa7   :  { %v747_v53 = vrot.slane %v746_v45, 1  ;;  %v856_v62 = vrot.slane %v741_v44, 7  ;;  %v1415_v0 = vadd.f32 %v939_v49, %v938_v32  ;;  %v671_v2 = vadd.f32 %v639_v52, %v1409_v48 }
  0xa8   :  { %v945_v54 = vadd.f32 %v944_v46, %v943_v37  ;;  %v754_v57 = vrot.slane %v753_v50, 1  ;;  %714 = vst [vmem:[%s1586_s3 + $0x10] sm:$0xff] %v698_v58  ;;  %v684_v3 = vadd.f32 %v636_v21, %v372_v56  ;;  %v951_v5 = vrot.slane %v950_v55, 2 }
  0xa9   :  { %v748_v1 = vadd.f32 %v747_v53, %v746_v45  ;;  %v899_v6 = vmul.f32 %v370_v14, %v370_v14  ;;  %v756_v7 = vadd.f32 %v372_v56, %v370_v14  ;;  %v699_v9 = vpack.c.bf16 %v671_v2, %v670_v59 }
  0xaa   :  { %v946_v4 = vrot.slane %v945_v54, 1  ;;  %v755_v8 = vadd.f32 %v754_v57, %v753_v50  ;;  %v915_v10 = vmul.f32 %v372_v56, %v372_v56  ;;  %v685_v11 = vadd.f32 %v637_v35, %v386_v63 }
  0xab   :  { %v1422_v12 = vsel %vm870_vm1, %v734_v60, %v856_v62  ;;  %v900_v13 = vmul.f32 %v384_v22, %v384_v22  ;;  %v757_v15 = vrot.slane %v756_v7, 4  ;;  %v763_v16 = vadd.f32 %v386_v63, %v384_v22  ;;  %715 = vst [vmem:[%s1586_s3 + $0x18] sm:$0xff] %v699_v9 }
  0xac   :  { %v400_v17 = vpop.f32.mrf.mxu2  ;;  %v857_v18 = vrot.slane %v748_v1, 6  ;;  %v901_v19 = vmul.f32 %v398_v39, %v398_v39  ;;  %v955_v20 = vadd.f32 %v915_v10, %v899_v6  ;;  %v706_v21 = vpack.c.bf16 %v685_v11, %v684_v3 }
  0xad   :  { %v1427_v14 = vadd.f32 %v946_v4, %v945_v54  ;;  %v952_v24 = vadd.f32 %v951_v5, %v950_v55  ;;  %v758_v25 = vadd.f32 %v757_v15, %v756_v7  ;;  %v764_v26 = vrot.slane %v763_v16, 4  ;;  %v414_v27 = vpop.f32.mrf.mxu3  ;;  %v426_v57 = vpop.f32.mrf.mxu0 }
  0xae   :  { %v858_v28 = vrot.slane %v755_v8, 5  ;;  %v956_v29 = vrot.slane %v955_v20, 4  ;;  %722 = vst [vmem:[%s1586_s3 + $0x50] sm:$0xff] %v706_v21  ;;  %v916_v22 = vmul.f32 %v386_v63, %v386_v63  ;;  %v770_v30 = vadd.f32 %v400_v17, %v398_v39  ;;  %v1441_v3 = vpop.f32.mrf.mxu1 }
  0xaf   :  { %v759_v31 = vrot.slane %v758_v25, 2  ;;  %v765_v32 = vadd.f32 %v764_v26, %v763_v16  ;;  %v686_v33 = vadd.f32 %v638_v40, %v400_v17  ;;  %v917_v35 = vmul.f32 %v400_v17, %v400_v17 }
  0xb0   :  { %v957_v36 = vadd.f32 %v956_v29, %v955_v20  ;;  %v962_v37 = vadd.f32 %v916_v22, %v900_v13  ;;  %v771_v38 = vrot.slane %v770_v30, 4  ;;  %v687_v41 = vadd.f32 %v639_v52, %v414_v27  ;;  %v1450_v13 = vld [vmem:[%s1585_s2 + $0x8] sm:$0xff] }
  0xb1   :  { %v953_v43 = vrot.slane %v952_v24, 1  ;;  %v760_v23 = vadd.f32 %v759_v31, %v758_v25  ;;  %v766_v44 = vrot.slane %v765_v32, 2  ;;  %v969_v45 = vadd.f32 %v917_v35, %v901_v19 }
  0xb2   :  { %v873_v46 = vsel %vm872_vm2, %v857_v18, %v858_v28  ;;  %v958_v47 = vrot.slane %v957_v36, 2  ;;  %v963_v49 = vrot.slane %v962_v37, 4  ;;  %v772_v50 = vadd.f32 %v771_v38, %v770_v30 }
  0xb3   :  { %v761_v39 = vrot.slane %v760_v23, 1  ;;  %v767_v51 = vadd.f32 %v766_v44, %v765_v32  ;;  %v970_v53 = vrot.slane %v969_v45, 4  ;;  %v707_v54 = vpack.c.bf16 %v687_v41, %v686_v33 }
  0xb4   :  { %v959_v34 = vadd.f32 %v958_v47, %v957_v36  ;;  %v964_v40 = vadd.f32 %v963_v49, %v962_v37  ;;  %v773_v55 = vrot.slane %v772_v50, 2  ;;  %v777_v56 = vadd.f32 %v414_v27, %v1409_v48  ;;  %v1457_v21 = vpop.f32.mrf.mxu2 }
  0xb5   :  { %v1436_v52 = vadd.f32 %v953_v43, %v952_v24  ;;  %v762_v58 = vadd.f32 %v761_v39, %v760_v23  ;;  %v768_v59 = vrot.slane %v767_v51, 1  ;;  %v971_v60 = vadd.f32 %v970_v53, %v969_v45  ;;  %723 = vst [vmem:[%s1586_s3 + $0x58] sm:$0xff] %v707_v54  ;;  %v428_v37 = vpop.f32.mrf.mxu0 }
  0xb6   :  { %v960_v62 = vrot.slane %v959_v34, 1  ;;  %v965_v63 = vrot.slane %v964_v40, 2  ;;  %v774_v1 = vadd.f32 %v773_v55, %v772_v50  ;;  %v778_v2 = vrot.slane %v777_v56, 4  ;;  %v442_v49 = vpop.f32.mrf.mxu1 }
  0xb7   :  { %v1055_v4 = vrot.slane %v1415_v0, 7  ;;  %v902_v5 = vmul.f32 %v1409_v48, %v1409_v48  ;;  %v769_v6 = vadd.f32 %v768_v59, %v767_v51  ;;  %v972_v7 = vrot.slane %v971_v60, 2 }
  0xb8   :  { %v1056_v8 = vrot.slane %v1427_v14, 6  ;;  %v966_v9 = vadd.f32 %v965_v63, %v964_v40  ;;  %v775_v10 = vrot.slane %v774_v1, 1  ;;  %v779_v11 = vadd.f32 %v778_v2, %v777_v56 }
  0xb9   :  { %v875_v15 = vsel %vm874_vm3, %v1422_v12, %v873_v46  ;;  %v1057_v16 = vrot.slane %v1436_v52, 5  ;;  %v918_v17 = vmul.f32 %v414_v27, %v414_v27  ;;  %v859_v48 = vrot.slane %v762_v58, 4  ;;  %v1460_v12 = vpop.f32.mrf.mxu3 }
  0xba   :  { %v1455_v18 = vadd.f32 %v960_v62, %v959_v34  ;;  %v860_v19 = vrot.slane %v769_v6, 3  ;;  %v780_v20 = vrot.slane %v779_v11, 2  ;;  %v967_v24 = vrot.slane %v966_v9, 1 }
  0xbb   :  { %v973_v25 = vadd.f32 %v972_v7, %v971_v60  ;;  %v976_v26 = vadd.f32 %v918_v17, %v902_v5  ;;  %v640_v28 = vperm.slane %v1450_v13, 0  ;;  %v776_v29 = vadd.f32 %v775_v10, %v774_v1 }
  0xbc   :  { %v781_v22 = vadd.f32 %v780_v20, %v779_v11  ;;  %v641_v31 = vperm.slane %v1450_v13, 1  ;;  %v1058_v32 = vrot.slane %v1455_v18, 4  ;;  %v877_v33 = vsel %vm876_vm4, %v859_v48, %v860_v19  ;;  %v456_v5 = vpop.f32.mrf.mxu2 }
  0xbd   :  { %v977_v27 = vrot.slane %v976_v26, 4  ;;  %v672_v30 = vadd.f32 %v640_v28, %v426_v57  ;;  %v642_v36 = vperm.slane %v1450_v13, 2  ;;  %v968_v38 = vadd.f32 %v967_v24, %v966_v9 }
  0xbe   :  { %v782_v35 = vrot.slane %v781_v22, 1  ;;  %v974_v41 = vrot.slane %v973_v25, 1  ;;  %v673_v23 = vadd.f32 %v641_v31, %v1441_v3  ;;  %v861_v44 = vrot.slane %v776_v29, 2 }
  0xbf   :  { %v978_v43 = vadd.f32 %v977_v27, %v976_v26  ;;  %v674_v46 = vadd.f32 %v642_v36, %v1457_v21  ;;  %v643_v47 = vperm.slane %v1450_v13, 3  ;;  %v903_v39 = vmul.f32 %v426_v57, %v426_v57 }
  0xc0   :  { %v783_v45 = vadd.f32 %v782_v35, %v781_v22  ;;  %v700_v51 = vpack.c.bf16 %v673_v23, %v672_v30  ;;  %v688_v53 = vadd.f32 %v640_v28, %v428_v37  ;;  %v784_v40 = vadd.f32 %v428_v37, %v426_v57  ;;  %v482_v35 = vpop.f32.mrf.mxu0 }
  0xc1   :  { %v979_v50 = vrot.slane %v978_v43, 2  ;;  %v675_v34 = vadd.f32 %v643_v47, %v1460_v12  ;;  %v919_v55 = vmul.f32 %v428_v37, %v428_v37  ;;  %v975_v56 = vadd.f32 %v974_v41, %v973_v25  ;;  %v470_v18 = vpop.f32.mrf.mxu3 }
  0xc2   :  { %v862_v54 = vrot.slane %v783_v45, 1  ;;  %716 = vst [vmem:[%s1586_s3 + $0x20] sm:$0xff] %v700_v51  ;;  %v689_v59 = vadd.f32 %v641_v31, %v442_v49  ;;  %v791_v60 = vadd.f32 %v442_v49, %v1441_v3  ;;  %v920_v2 = vmul.f32 %v442_v49, %v442_v49 }
  0xc3   :  { %v980_v58 = vadd.f32 %v979_v50, %v978_v43  ;;  %v701_v63 = vpack.c.bf16 %v675_v34, %v674_v46  ;;  %v983_v1 = vadd.f32 %v919_v55, %v903_v39  ;;  %v1059_v6 = vrot.slane %v968_v38, 3 }
  0xc4   :  { %v879_v62 = vsel %vm878_vm5, %v861_v44, %v862_v54  ;;  %v708_v9 = vpack.c.bf16 %v689_v59, %v688_v53  ;;  %v904_v11 = vmul.f32 %v1441_v3, %v1441_v3  ;;  %v785_v17 = vrot.slane %v784_v40, 4  ;;  %v1515_v49 = vpop.f32.mrf.mxu2 }
  0xc5   :  { %v881_v7 = vsel %vm880_vm6, %v877_v33, %v879_v62  ;;  %v981_v57 = vrot.slane %v980_v58, 1  ;;  %717 = vst [vmem:[%s1586_s3 + $0x28] sm:$0xff] %v701_v63  ;;  %v792_v48 = vrot.slane %v791_v60, 4  ;;  %v1060_v19 = vrot.slane %v975_v56, 2 }
  0xc6   :  { %v883_v10 = vsel %vm882_vm7, %v875_v15, %v881_v7  ;;  %v984_v24 = vrot.slane %v983_v1, 4  ;;  %v690_v25 = vadd.f32 %v642_v36, %v456_v5  ;;  %v933_v15 = vadd.f32 %v932_v61, %v1407_v42  ;;  %724 = vst [vmem:[%s1586_s3 + $0x60] sm:$0xff] %v708_v9 }
  0xc7   :  { %893 = vst [vmem:[%s1587_s4] sm:$0xff] %v883_v10  ;;  %v982_v20 = vadd.f32 %v981_v57, %v980_v58  ;;  %v990_v3 = vadd.f32 %v920_v2, %v904_v11  ;;  %v1070_v26 = vsel %vm872_vm2, %v1056_v8, %v1057_v16  ;;  %v691_v29 = vadd.f32 %v643_v47, %v470_v18 }
  0xc8   :  { %v1069_v22 = vsel %vm870_vm1, %v933_v15, %v1055_v4  ;;  %v1072_v27 = vsel %vm876_vm4, %v1058_v32, %v1059_v6  ;;  %v786_v42 = vadd.f32 %v785_v17, %v784_v40  ;;  %v793_v61 = vadd.f32 %v792_v48, %v791_v60  ;;  %v496_v4 = vpop.f32.mrf.mxu1  ;;  %v484_v62 = vpop.f32.mrf.mxu0 }
  0xc9   :  { %v1061_v28 = vrot.slane %v982_v20, 1  ;;  %v985_v31 = vadd.f32 %v984_v24, %v983_v1  ;;  %v798_v33 = vadd.f32 %v456_v5, %v1457_v21  ;;  %v709_v52 = vpack.c.bf16 %v691_v29, %v690_v25  ;;  %v1524_v56 = vpop.f32.mrf.mxu3 }
  0xca   :  { %v1071_v14 = vsel %vm874_vm3, %v1069_v22, %v1070_v26  ;;  %v991_v16 = vrot.slane %v990_v3, 4  ;;  %v921_v36 = vmul.f32 %v456_v5, %v456_v5  ;;  %v905_v32 = vmul.f32 %v1457_v21, %v1457_v21 }
  0xcb   :  { %v1073_v30 = vsel %vm878_vm5, %v1060_v19, %v1061_v28  ;;  %725 = vst [vmem:[%s1586_s3 + $0x68] sm:$0xff] %v709_v52  ;;  %v787_v37 = vrot.slane %v786_v42, 2  ;;  %v794_v38 = vrot.slane %v793_v61, 2  ;;  %v986_v41 = vrot.slane %v985_v31, 2 }
  0xcc   :  { %v1074_v8 = vsel %vm880_vm6, %v1072_v27, %v1073_v30  ;;  %v799_v43 = vrot.slane %v798_v33, 4  ;;  %v992_v23 = vadd.f32 %v991_v16, %v990_v3  ;;  %v997_v44 = vadd.f32 %v921_v36, %v905_v32  ;;  %v512_v22 = vpop.f32.mrf.mxu2 }
  0xcd   :  { %v1075_v0 = vsel %vm882_vm7, %v1071_v14, %v1074_v8  ;;  %v644_v45 = vperm.slane %v1450_v13, 4  ;;  %v805_v46 = vadd.f32 %v470_v18, %v1460_v12  ;;  %v922_v47 = vmul.f32 %v470_v18, %v470_v18 }
  0xce   :  { %1085 = vst [vmem:[%s1588_s5] sm:$0xff] %v1075_v0  ;;  %v1517_v50 = vadd.f32 %v787_v37, %v786_v42  ;;  %v795_v39 = vadd.f32 %v794_v38, %v793_v61  ;;  %v906_v51 = vmul.f32 %v1460_v12, %v1460_v12  ;;  %v1521_v21 = vadd.f32 %v986_v41, %v985_v31 }
  0xcf   :  { %v800_v53 = vadd.f32 %v799_v43, %v798_v33  ;;  %v993_v54 = vrot.slane %v992_v23, 2  ;;  %v998_v34 = vrot.slane %v997_v44, 4  ;;  %v676_v40 = vadd.f32 %v644_v45, %v482_v35 }
  0xd0   :  { %v645_v55 = vperm.slane %v1450_v13, 5  ;;  %v806_v58 = vrot.slane %v805_v46, 4  ;;  %v1004_v59 = vadd.f32 %v922_v47, %v906_v51  ;;  %v646_v60 = vperm.slane %v1450_v13, 6  ;;  %v498_v57 = vpop.f32.mrf.mxu1 }
  0xd1   :  { %v789_v63 = vrot.slane %v1517_v50, 1  ;;  %v796_v1 = vrot.slane %v795_v39, 1  ;;  %v988_v12 = vrot.slane %v1521_v21, 1  ;;  %v801_v5 = vrot.slane %v800_v53, 2  ;;  %v526_v0 = vpop.f32.mrf.mxu3 }
  0xd2   :  { %v677_v2 = vadd.f32 %v645_v55, %v496_v4  ;;  %v678_v6 = vadd.f32 %v646_v60, %v1515_v49  ;;  %v647_v7 = vperm.slane %v1450_v13, 7  ;;  %v1531_v9 = vadd.f32 %v993_v54, %v992_v23 }
  0xd3   :  { %v999_v10 = vadd.f32 %v998_v34, %v997_v44  ;;  %v692_v17 = vadd.f32 %v644_v45, %v484_v62  ;;  %v807_v48 = vadd.f32 %v806_v58, %v805_v46  ;;  %v1005_v18 = vrot.slane %v1004_v59, 4 }
  0xd4   :  { %v702_v11 = vpack.c.bf16 %v677_v2, %v676_v40  ;;  %v679_v19 = vadd.f32 %v647_v7, %v1524_v56  ;;  %v812_v20 = vadd.f32 %v484_v62, %v482_v35  ;;  %v907_v24 = vmul.f32 %v482_v35, %v482_v35 }
  0xd5   :  { %v923_v25 = vmul.f32 %v484_v62, %v484_v62  ;;  %v693_v15 = vadd.f32 %v645_v55, %v498_v57  ;;  %v819_v3 = vadd.f32 %v498_v57, %v496_v4  ;;  %v908_v13 = vmul.f32 %v496_v4, %v496_v4 }
  0xd6   :  { %718 = vst [vmem:[%s1586_s3 + $0x30] sm:$0xff] %v702_v11  ;;  %v703_v26 = vpack.c.bf16 %v679_v19, %v678_v6  ;;  %v813_v28 = vrot.slane %v812_v20, 4  ;;  %v924_v29 = vmul.f32 %v498_v57, %v498_v57  ;;  %v1537_v27 = vadd.f32 %v796_v1, %v795_v39 }
  0xd7   :  { %v1011_v42 = vadd.f32 %v923_v25, %v907_v24  ;;  %v710_v61 = vpack.c.bf16 %v693_v15, %v692_v17  ;;  %v820_v30 = vrot.slane %v819_v3, 4  ;;  %v1000_v31 = vrot.slane %v999_v10, 2 }
  0xd8   :  { %v1006_v33 = vadd.f32 %v1005_v18, %v1004_v59  ;;  %719 = vst [vmem:[%s1586_s3 + $0x38] sm:$0xff] %v703_v26  ;;  %v814_v52 = vadd.f32 %v813_v28, %v812_v20  ;;  %v1018_v35 = vadd.f32 %v924_v29, %v908_v13  ;;  %v808_v14 = vrot.slane %v807_v48, 2 }
  0xd9   :  { %v1012_v8 = vrot.slane %v1011_v42, 4  ;;  %726 = vst [vmem:[%s1586_s3 + $0x70] sm:$0xff] %v710_v61  ;;  %v821_v16 = vadd.f32 %v820_v30, %v819_v3  ;;  %v826_v36 = vadd.f32 %v512_v22, %v1515_v49  ;;  %v802_v4 = vadd.f32 %v801_v5, %v800_v53 }
  0xda   :  { %v815_v32 = vrot.slane %v814_v52, 2  ;;  %v1019_v37 = vrot.slane %v1018_v35, 4  ;;  %v694_v38 = vadd.f32 %v646_v60, %v512_v22  ;;  %v925_v44 = vmul.f32 %v512_v22, %v512_v22 }
  0xdb   :  { %v1013_v41 = vadd.f32 %v1012_v8, %v1011_v42  ;;  %v822_v43 = vrot.slane %v821_v16, 2  ;;  %v827_v23 = vrot.slane %v826_v36, 4  ;;  %v1007_v45 = vrot.slane %v1006_v33, 2 }
  0xdc   :  { %v909_v46 = vmul.f32 %v1515_v49, %v1515_v49  ;;  %v1020_v47 = vadd.f32 %v1019_v37, %v1018_v35  ;;  %v695_v39 = vadd.f32 %v647_v7, %v526_v0  ;;  %v995_v51 = vrot.slane %v1531_v9, 1 }
  0xdd   :  { %v1001_v54 = vadd.f32 %v1000_v31, %v999_v10  ;;  %v809_v34 = vadd.f32 %v808_v14, %v807_v48  ;;  %v828_v40 = vadd.f32 %v827_v23, %v826_v36  ;;  %v1014_v55 = vrot.slane %v1013_v41, 2 }
  0xde   :  { %v1021_v53 = vrot.slane %v1020_v47, 2  ;;  %v1025_v58 = vadd.f32 %v925_v44, %v909_v46  ;;  %v711_v59 = vpack.c.bf16 %v695_v39, %v694_v38  ;;  %v816_v60 = vadd.f32 %v815_v32, %v814_v52 }
  0xdf   :  { %v823_v62 = vadd.f32 %v822_v43, %v821_v16  ;;  %v829_v1 = vrot.slane %v828_v40, 2  ;;  %v833_v2 = vadd.f32 %v526_v0, %v1524_v56  ;;  %v1008_v5 = vadd.f32 %v1007_v45, %v1006_v33 }
  0xe0   :  { %v910_v49 = vmul.f32 %v1524_v56, %v1524_v56  ;;  %v1026_v6 = vrot.slane %v1025_v58, 4  ;;  %727 = vst [vmem:[%s1586_s3 + $0x78] sm:$0xff] %v711_v59  ;;  %v926_v7 = vmul.f32 %v526_v0, %v526_v0  ;;  %v803_v57 = vrot.slane %v802_v4, 1 }
  0xe1   :  { %v810_v10 = vrot.slane %v809_v34, 1  ;;  %v830_v11 = vadd.f32 %v829_v1, %v828_v40  ;;  %v834_v17 = vrot.slane %v833_v2, 4  ;;  %v1015_v48 = vadd.f32 %v1014_v55, %v1013_v41 }
  0xe2   :  { %v1022_v18 = vadd.f32 %v1021_v53, %v1020_v47  ;;  %v1027_v19 = vadd.f32 %v1026_v6, %v1025_v58  ;;  %v1032_v20 = vadd.f32 %v926_v7, %v910_v49  ;;  %v817_v24 = vrot.slane %v816_v60, 1 }
  0xe3   :  { %v824_v25 = vrot.slane %v823_v62, 1  ;;  %v831_v15 = vrot.slane %v830_v11, 1  ;;  %v835_v3 = vadd.f32 %v834_v17, %v833_v2  ;;  %v1002_v13 = vrot.slane %v1001_v54, 1 }
  0xe4   :  { %v1009_v56 = vrot.slane %v1008_v5, 1  ;;  %v1028_v26 = vrot.slane %v1027_v19, 2  ;;  %v1033_v28 = vrot.slane %v1032_v20, 4  ;;  %v863_v29 = vrot.slane %v1537_v27, 7 }
  0xe5   :  { %v804_v22 = vadd.f32 %v803_v57, %v802_v4  ;;  %v811_v42 = vadd.f32 %v810_v10, %v809_v34  ;;  %v836_v61 = vrot.slane %v835_v3, 2  ;;  %v1016_v30 = vrot.slane %v1015_v48, 1 }
  0xe6   :  { %v1023_v31 = vrot.slane %v1022_v18, 1  ;;  %v1029_v33 = vadd.f32 %v1028_v26, %v1027_v19  ;;  %v1034_v52 = vadd.f32 %v1033_v28, %v1032_v20  ;;  %v818_v35 = vadd.f32 %v817_v24, %v816_v60 }
  0xe7   :  { %v825_v14 = vadd.f32 %v824_v25, %v823_v62  ;;  %v832_v8 = vadd.f32 %v831_v15, %v830_v11  ;;  %v837_v16 = vadd.f32 %v836_v61, %v835_v3  ;;  %v1003_v36 = vadd.f32 %v1002_v13, %v1001_v54 }
  0xe8   :  { %v1010_v0 = vadd.f32 %v1009_v56, %v1008_v5  ;;  %v1030_v32 = vrot.slane %v1029_v33, 1  ;;  %v1035_v37 = vrot.slane %v1034_v52, 2  ;;  %v996_v38 = vadd.f32 %v995_v51, %v1531_v9 }
  0xe9   :  { %v864_v41 = vrot.slane %v804_v22, 6  ;;  %v865_v43 = vrot.slane %v811_v42, 5  ;;  %v838_v27 = vrot.slane %v837_v16, 1  ;;  %v1017_v4 = vadd.f32 %v1016_v30, %v1015_v48 }
  0xea   :  { %v1024_v23 = vadd.f32 %v1023_v31, %v1022_v18  ;;  %v1031_v44 = vadd.f32 %v1030_v32, %v1029_v33  ;;  %v1036_v45 = vadd.f32 %v1035_v37, %v1034_v52  ;;  %v866_v46 = vrot.slane %v818_v35, 4 }
  0xeb   :  { %v867_v47 = vrot.slane %v825_v14, 3  ;;  %v868_v39 = vrot.slane %v832_v8, 2  ;;  %v839_v34 = vadd.f32 %v838_v27, %v837_v16  ;;  %v1063_v40 = vrot.slane %v1003_v36, 6 }
  0xec   :  { %v1064_v55 = vrot.slane %v1010_v0, 5  ;;  %v1037_v53 = vrot.slane %v1036_v45, 1  ;;  %v790_v54 = vadd.f32 %v789_v63, %v1517_v50  ;;  %v1062_v58 = vrot.slane %v996_v38, 7 }
  0xed   :  { %v885_v9 = vsel %vm872_vm2, %v864_v41, %v865_v43  ;;  %v869_v51 = vrot.slane %v839_v34, 1  ;;  %v1065_v59 = vrot.slane %v1017_v4, 4  ;;  %v1066_v60 = vrot.slane %v1024_v23, 3 }
  0xee   :  { %v1067_v62 = vrot.slane %v1031_v44, 2  ;;  %v1038_v1 = vadd.f32 %v1037_v53, %v1036_v45  ;;  %v989_v2 = vadd.f32 %v988_v12, %v1521_v21  ;;  %v884_v5 = vsel %vm870_vm1, %v790_v54, %v863_v29 }
  0xef   :  { %v887_v49 = vsel %vm876_vm4, %v866_v46, %v867_v47  ;;  %v888_v6 = vsel %vm878_vm5, %v868_v39, %v869_v51  ;;  %v886_v50 = vsel %vm874_vm3, %v884_v5, %v885_v9  ;;  %v1077_v63 = vsel %vm872_vm2, %v1063_v40, %v1064_v55 }
  0xf0   :  { %v889_v7 = vsel %vm880_vm6, %v887_v49, %v888_v6  ;;  %v1068_v57 = vrot.slane %v1038_v1, 1  ;;  %v1076_v11 = vsel %vm870_vm1, %v989_v2, %v1062_v58  ;;  %v1079_v17 = vsel %vm876_vm4, %v1065_v59, %v1066_v60 }
  0xf1   :  { %v890_v10 = vsel %vm882_vm7, %v886_v50, %v889_v7  ;;  %v1078_v12 = vsel %vm874_vm3, %v1076_v11, %v1077_v63 }
  0xf2   :  { %894 = vst [vmem:[%s1587_s4 + $0x8] sm:$0xff] %v890_v10  ;;  %v1080_v21 = vsel %vm878_vm5, %v1067_v62, %v1068_v57 }
  0xf3   :  { %v1081_v48 = vsel %vm880_vm6, %v1079_v17, %v1080_v21 }
  0xf4   :  { %v1082_v18 = vsel %vm882_vm7, %v1078_v12, %v1081_v48 }
  0xf5   :  { %1086 = vst [vmem:[%s1588_s5 + $0x8] sm:$0xff] %v1082_v18 }
  0xf6   :  { %1099 = vsyncpa [#allocation4], 1 }

// kernel: a_call__.14
= control target key start
LH: loop header
LB: loop body
LE: loop exit
PB: predicated region body
PF: predicated region fallthrough
CT: control target
= control target key end

     0   :  { %s264_s0 = inlined_call_operand.vmem [shape: bf16[64,256], index: 0, kind: input, shape index: {}]   ;;  %s265_s1 = inlined_call_operand.vmem [shape: f32[1,256], index: 1, kind: input, shape index: {}]   ;;  %s266_s2 = inlined_call_operand.vmem [shape: f32[1,256], index: 2, kind: input, shape index: {}]   ;;  %s267_s3 = inlined_call_operand.vmem [shape: bf16[64,256], index: 3, kind: output, shape index: {}]  }
   0x1   :  { %v14_v0 = vld [vmem:[%s264_s0] sm:$0xff]  ;;  %v15_v7 = vld [vmem:[%s264_s0 + $0x8] sm:$0xff]  ;;  %v16_v8 = vld [vmem:[%s264_s0 + $0x10] sm:$0xff] }
   0x2   :  { %v38_v1 = vld [vmem:[%s265_s1] sm:$0x3]  ;;  %v22_v3 = vunpack.c.l.bf16 %v14_v0  ;;  %v23_v4 = vunpack.c.h.bf16 %v14_v0  ;;  %v17_v9 = vld [vmem:[%s264_s0 + $0x18] sm:$0xff]  ;;  %v24_v12 = vunpack.c.l.bf16 %v15_v7  ;;  %v25_v13 = vunpack.c.h.bf16 %v15_v7  ;;  %v19_v43 = vld [vmem:[%s264_s0 + $0x28] sm:$0xff] }
   0x3   :  { %v60_v2 = vld [vmem:[%s266_s2] sm:$0x3]  ;;  %v179_v5 = vperm.slane %v38_v1, 0  ;;  %v181_v6 = vperm.slane %v38_v1, 1  ;;  %v26_v16 = vunpack.c.l.bf16 %v16_v8  ;;  %v27_v17 = vunpack.c.h.bf16 %v16_v8  ;;  %v20_v53 = vld [vmem:[%s264_s0 + $0x30] sm:$0xff]  ;;  %v21_v61 = vld [vmem:[%s264_s0 + $0x38] sm:$0xff] }
   0x4   :  { %v192_v10 = vperm.slane %v60_v2, 0  ;;  %v194_v11 = vperm.slane %v60_v2, 1  ;;  %v28_v20 = vunpack.c.l.bf16 %v17_v9  ;;  %v29_v21 = vunpack.c.h.bf16 %v17_v9  ;;  %v18_v42 = vld [vmem:[%s264_s0 + $0x20] sm:$0xff] }
   0x5   :  { %v44_v14 = vmul.f32 %v179_v5, %v22_v3  ;;  %v45_v15 = vmul.f32 %v181_v6, %v23_v4  ;;  %v46_v18 = vmul.f32 %v179_v5, %v24_v12  ;;  %v47_v19 = vmul.f32 %v181_v6, %v25_v13 }
   0x6   :  { %v48_v24 = vmul.f32 %v179_v5, %v26_v16  ;;  %v49_v25 = vmul.f32 %v181_v6, %v27_v17  ;;  %v50_v28 = vmul.f32 %v179_v5, %v28_v20  ;;  %v51_v29 = vmul.f32 %v181_v6, %v29_v21 }
   0x7   :  { %v66_v22 = vadd.f32 %v192_v10, %v44_v14  ;;  %v67_v23 = vadd.f32 %v194_v11, %v45_v15  ;;  %v68_v26 = vadd.f32 %v192_v10, %v46_v18  ;;  %v69_v27 = vadd.f32 %v194_v11, %v47_v19 }
   0x8   :  { %v70_v36 = vadd.f32 %v192_v10, %v48_v24  ;;  %v71_v37 = vadd.f32 %v194_v11, %v49_v25  ;;  %v72_v41 = vadd.f32 %v192_v10, %v50_v28  ;;  %v73_v47 = vadd.f32 %v194_v11, %v51_v29 }
   0x9   :  { %vm82_vm0 = vcmp.ge.f32.partialorder %v66_v22, 0.0  ;;  %vm83_vm1 = vcmp.ge.f32.partialorder %v67_v23, 0.0  ;;  %v98_v30 = vmul.f32 0.2, %v66_v22  ;;  %v99_v31 = vmul.f32 0.2, %v67_v23 }
   0xa   :  { %vm84_vm2 = vcmp.ge.f32.partialorder %v68_v26, 0.0  ;;  %vm85_vm3 = vcmp.ge.f32.partialorder %v69_v27, 0.0  ;;  %v100_v32 = vmul.f32 0.2, %v68_v26  ;;  %v101_v33 = vmul.f32 0.2, %v69_v27 }
   0xb   :  { %v114_v34 = vsel %vm82_vm0, %v66_v22, %v98_v30  ;;  %v115_v35 = vsel %vm83_vm1, %v67_v23, %v99_v31  ;;  %vm86_vm4 = vcmp.ge.f32.partialorder %v70_v36, 0.0  ;;  %vm87_vm5 = vcmp.ge.f32.partialorder %v71_v37, 0.0 }
   0xc   :  { %v130_v38 = vpack.c.bf16 %v115_v35, %v114_v34  ;;  %v116_v39 = vsel %vm84_vm2, %v68_v26, %v100_v32  ;;  %v117_v40 = vsel %vm85_vm3, %v69_v27, %v101_v33  ;;  %v102_v45 = vmul.f32 0.2, %v70_v36 }
   0xd   :  { %v131_v44 = vpack.c.bf16 %v117_v40, %v116_v39  ;;  %v103_v46 = vmul.f32 0.2, %v71_v37  ;;  %vm88_vm6 = vcmp.ge.f32.partialorder %v72_v41, 0.0  ;;  %v104_v48 = vmul.f32 0.2, %v72_v41 }
   0xe   :  { %138 = vst [vmem:[%s267_s3] sm:$0xff] %v130_v38  ;;  %v118_v49 = vsel %vm86_vm4, %v70_v36, %v102_v45  ;;  %v30_v50 = vunpack.c.l.bf16 %v18_v42  ;;  %v31_v51 = vunpack.c.h.bf16 %v18_v42  ;;  %v32_v52 = vunpack.c.l.bf16 %v19_v43 }
   0xf   :  { %139 = vst [vmem:[%s267_s3 + $0x8] sm:$0xff] %v131_v44  ;;  %v119_v54 = vsel %vm87_vm5, %v71_v37, %v103_v46  ;;  %vm89_vm7 = vcmp.ge.f32.partialorder %v73_v47, 0.0  ;;  %v105_v55 = vmul.f32 0.2, %v73_v47  ;;  %v120_v56 = vsel %vm88_vm6, %v72_v41, %v104_v48 }
  0x10   :  { %v132_v57 = vpack.c.bf16 %v119_v54, %v118_v49  ;;  %v52_v58 = vmul.f32 %v179_v5, %v30_v50  ;;  %v53_v59 = vmul.f32 %v181_v6, %v31_v51  ;;  %v33_v60 = vunpack.c.h.bf16 %v19_v43 }
  0x11   :  { %v121_v62 = vsel %vm89_vm7, %v73_v47, %v105_v55  ;;  %v54_v63 = vmul.f32 %v179_v5, %v32_v52  ;;  %v34_v0 = vunpack.c.l.bf16 %v20_v53  ;;  %v35_v1 = vunpack.c.h.bf16 %v20_v53 }
  0x12   :  { %140 = vst [vmem:[%s267_s3 + $0x10] sm:$0xff] %v132_v57  ;;  %v133_v2 = vpack.c.bf16 %v121_v62, %v120_v56  ;;  %v74_v3 = vadd.f32 %v192_v10, %v52_v58  ;;  %v75_v4 = vadd.f32 %v194_v11, %v53_v59  ;;  %v55_v7 = vmul.f32 %v181_v6, %v33_v60 }
  0x13   :  { %v76_v8 = vadd.f32 %v192_v10, %v54_v63  ;;  %v56_v9 = vmul.f32 %v179_v5, %v34_v0  ;;  %v57_v12 = vmul.f32 %v181_v6, %v35_v1  ;;  %v36_v13 = vunpack.c.l.bf16 %v21_v61 }
  0x14   :  { %141 = vst [vmem:[%s267_s3 + $0x18] sm:$0xff] %v133_v2  ;;  %vm90_vm8 = vcmp.ge.f32.partialorder %v74_v3, 0.0  ;;  %vm91_vm9 = vcmp.ge.f32.partialorder %v75_v4, 0.0  ;;  %v106_v14 = vmul.f32 0.2, %v74_v3  ;;  %v77_v15 = vadd.f32 %v194_v11, %v55_v7 }
  0x15   :  { %v107_v16 = vmul.f32 0.2, %v75_v4  ;;  %vm92_vm10 = vcmp.ge.f32.partialorder %v76_v8, 0.0  ;;  %v108_v17 = vmul.f32 0.2, %v76_v8  ;;  %v78_v18 = vadd.f32 %v192_v10, %v56_v9 }
  0x16   :  { %v122_v19 = vsel %vm90_vm8, %v74_v3, %v106_v14  ;;  %vm93_vm11 = vcmp.ge.f32.partialorder %v77_v15, 0.0  ;;  %v109_v20 = vmul.f32 0.2, %v77_v15  ;;  %v79_v21 = vadd.f32 %v194_v11, %v57_v12 }
  0x17   :  { %v123_v22 = vsel %vm91_vm9, %v75_v4, %v107_v16  ;;  %v124_v23 = vsel %vm92_vm10, %v76_v8, %v108_v17  ;;  %vm94_vm12 = vcmp.ge.f32.partialorder %v78_v18, 0.0  ;;  %v110_v24 = vmul.f32 0.2, %v78_v18 }
  0x18   :  { %v134_v25 = vpack.c.bf16 %v123_v22, %v122_v19  ;;  %v125_v26 = vsel %vm93_vm11, %v77_v15, %v109_v20  ;;  %vm95_vm13 = vcmp.ge.f32.partialorder %v79_v21, 0.0  ;;  %v111_v27 = vmul.f32 0.2, %v79_v21 }
  0x19   :  { %v135_v28 = vpack.c.bf16 %v125_v26, %v124_v23  ;;  %v126_v29 = vsel %vm94_vm12, %v78_v18, %v110_v24  ;;  %v37_v30 = vunpack.c.h.bf16 %v21_v61  ;;  %v58_v31 = vmul.f32 %v179_v5, %v36_v13 }
  0x1a   :  { %142 = vst [vmem:[%s267_s3 + $0x20] sm:$0xff] %v134_v25  ;;  %v127_v32 = vsel %vm95_vm13, %v79_v21, %v111_v27 }
  0x1b   :  { %143 = vst [vmem:[%s267_s3 + $0x28] sm:$0xff] %v135_v28  ;;  %v136_v33 = vpack.c.bf16 %v127_v32, %v126_v29  ;;  %v59_v34 = vmul.f32 %v181_v6, %v37_v30  ;;  %v80_v35 = vadd.f32 %v192_v10, %v58_v31 }
  0x1d   :  { %144 = vst [vmem:[%s267_s3 + $0x30] sm:$0xff] %v136_v33  ;;  %v81_v5 = vadd.f32 %v194_v11, %v59_v34  ;;  %vm96_vm14 = vcmp.ge.f32.partialorder %v80_v35, 0.0  ;;  %v112_v36 = vmul.f32 0.2, %v80_v35 }
  0x1f   :  { %vm97_vm15 = vcmp.ge.f32.partialorder %v81_v5, 0.0  ;;  %v113_v37 = vmul.f32 0.2, %v81_v5  ;;  %v128_v38 = vsel %vm96_vm14, %v80_v35, %v112_v36 }
  0x21   :  { %v129_v39 = vsel %vm97_vm15, %v81_v5, %v113_v37 }
  0x22   :  { %v137_v40 = vpack.c.bf16 %v129_v39, %v128_v38 }
  0x24   :  { %145 = vst [vmem:[%s267_s3 + $0x38] sm:$0xff] %v137_v40 }

// kernel: a_call__.13
= control target key start
LH: loop header
LB: loop body
LE: loop exit
PB: predicated region body
PF: predicated region fallthrough
CT: control target
= control target key end

     0   :  { %11 = vsyncpa [#allocation5], 0  ;;  %s1714_s0 = inlined_call_operand.vmem [shape: bf16[64,512], index: 0, kind: input, shape index: {}]   ;;  %s1715_s1 = inlined_call_operand.hbm [shape: bf16[512,256], index: 1, kind: input, shape index: {}]   ;;  %s1716_s2 = inlined_call_operand.vmem [shape: f32[1,256], index: 2, kind: input, shape index: {}]   ;;  %s1717_s3 = inlined_call_operand.vmem [shape: bf16[64,256], index: 3, kind: output, shape index: {0}]   ;;  %s1718_s4 = inlined_call_operand.vmem [shape: f32[1,1,256], index: 4, kind: output, shape index: {1}]   ;;  %s1719_s5 = inlined_call_operand.vmem [shape: f32[1,1,256], index: 5, kind: output, shape index: {2}]  }
   0x1   :  { %13 = vsyncpa [#allocation5 + $0x1], 0  ;;  %s1485_s18 = smov 0   ;;  %s1487_s19 = smov 0  }
   0x2   :  { %s1489_s20 = smov 0   ;;  %s1491_s21 = smov 0  }
   0x3   :  { %s1493_s22 = smov 0   ;;  %s1495_s23 = smov 0  }
   0x4 LB: > { %s1095_s24 = sadd.s32 4294967295, %s1450_s23   ;;  %s28_s25 = sadd.s32 1, %s1446_s22  ;;  %s1450_s23 = sphi %s1495_s23, %s19_s23   ;;  %s1446_s22 = sphi %s1493_s22, %s1726_s22   ;;  %s1442_s21 = sphi %s1491_s21, %s1725_s21   ;;  %s1438_s20 = sphi %s1489_s20, %s1724_s20   ;;  %s1434_s19 = sphi %s1487_s19, %s1723_s19   ;;  %s1430_s18 = sphi %s1485_s18, %s1722_s18  }
   0x5   : > { %p29_p0 = scmp.ge.s32.totalorder %s28_s25, 2  ;;  %s40_s26 = sadd.s32 1, %s1438_s20 }
   0x6   : > { %p47_p1 = scmp.ne.s32.totalorder %s1438_s20, %s1434_s19  ;;  %p48_p2 = scmp.eq.s32.totalorder %s1450_s23, 0 }
   0x7   : > { %s1728_s25 = smov (%p29_p0, %s28_s25), 0  ;;  %p79_p4 = scmp.ne.s32.totalorder %s1434_s19, %s1430_s18 }
   0x8   : > { %p1521_p3 = por %p48_p2, %p47_p1  ;;  %s36_s28 = ssub.s32 %s1446_s22, %s1728_s25 }
   0x9   : > { %p80_p5 = scmp.eq.s32.totalorder %s1095_s24, 0  ;;  %p38_p6 = scmp.eq.s32.totalorder %s36_s28, 0 }
   0xa   : > { %p1097_p8 = scmp.ge.s32.totalorder %s1450_s23, 2 }
   0xb   : > { %p1528_p7 = por %p80_p5, %p79_p4 }
   0xc   : > { %s1533_s30 = scalar_select %p38_p6, %s1438_s20, %s40_s26  }
   0xd   : > { %201 = sbr.rel (%p1097_p8) target bundleno = 36 (0x24), region = 20 }
  0x12   : > { %204 = sbr.rel (!%p1521_p3) target bundleno = 30 (0x1e), region = 24  ;;  %s206_s6 = sand.u32 (%p1521_p3), 1, %s1438_s20  }
  0x13   : > { %s1276_s7 = sshll.u32 (%p1521_p3), %s1446_s22, 3  ;;  %s1098_s8 = sshll.u32 (%p1521_p3), %s206_s6, 6 }
  0x14   : > { %s214_s11 = scalar_lea.vmem (%p1521_p3), %s1714_s0, %s1276_s7  ;;  %s208_s12 = scalar_lea.vmem (%p1521_p3), [#allocation3], %s1098_s8 }
  0x15   : > { %v257_v0 = vld [vmem:[%s214_s11] sm:$0xff] (%p1521_p3)  ;;  %v259_v1 = vld [vmem:[%s214_s11 + $0x10] sm:$0xff] (%p1521_p3) }
  0x16   : > { %v261_v2 = vld [vmem:[%s214_s11 + $0x20] sm:$0xff] (%p1521_p3)  ;;  %258 = vst [vmem:[%s208_s12] sm:$0xff] (%p1521_p3), %v257_v0  ;;  %v263_v3 = vld [vmem:[%s214_s11 + $0x30] sm:$0xff] (%p1521_p3) }
  0x17   : > { %260 = vst [vmem:[%s208_s12 + $0x8] sm:$0xff] %v259_v1  ;;  %v265_v4 = vld [vmem:[%s214_s11 + $0x40] sm:$0xff]  ;;  %v267_v5 = vld [vmem:[%s214_s11 + $0x50] sm:$0xff] }
  0x18   : > { %262 = vst [vmem:[%s208_s12 + $0x10] sm:$0xff] %v261_v2  ;;  %v269_v6 = vld [vmem:[%s214_s11 + $0x60] sm:$0xff]  ;;  %v271_v7 = vld [vmem:[%s214_s11 + $0x70] sm:$0xff] }
  0x19   : > { %264 = vst [vmem:[%s208_s12 + $0x18] sm:$0xff] %v263_v3 }
  0x1a   : > { %266 = vst [vmem:[%s208_s12 + $0x20] sm:$0xff] %v265_v4 }
  0x1b   : > { %268 = vst [vmem:[%s208_s12 + $0x28] sm:$0xff] %v267_v5 }
  0x1c   : > { %270 = vst [vmem:[%s208_s12 + $0x30] sm:$0xff] %v269_v6 }
  0x1d   : > { %272 = vst [vmem:[%s208_s12 + $0x38] sm:$0xff] %v271_v7 }
  0x1e PF: > { %s279_s13 = sand.u32 1, %s1438_s20   ;;  %s1278_s14 = sshll.u32 %s1446_s22, 8 }
  0x1f   : > { %s1101_s15 = sshll.u32 %s279_s13, 8  ;;  %s289_s18 = scalar_lea.hbm %s1715_s1, %s1278_s14 }
  0x20   : > { %s290_s24 = sshll.u32 %s289_s18, 4  ;;  %s283_s26 = scalar_lea.vmem [#allocation4], %s1101_s15  ;;  %s291_s24 = int_to_ptr.hbm [resolvable:$true] %s290_s24 }
  0x21   : > { %s292_s28 = sshll.u32 %s283_s26, 4  ;;  %s280_s6 = scalar_lea.sflag [#allocation5], %s279_s13  ;;  %s293_s28 = int_to_ptr.vmem [resolvable:$true] %s292_s28 }
  0x22   : > { %s1452_s7 = smov 128   ;;  %s1453_s8 = smov 8  }
  0x23   : > { %1319 = dma.hbm_to_vmem [thread:$0]  (%p1521_p3), %s291_s24, 4096, %s293_s28, %s280_s6, %s1452_s7, %s1452_s7, %s1453_s8  }
  0x24 PF: > { %p1105_p9 = scmp.ge.s32.totalorder %s1450_s23, 1  ;;  %p300_p10 = scmp.lt.s32.totalorder %s1450_s23, 3 }
  0x26   : > { %p301_p11 = pnand %p1105_p9, %p300_p10 }
  0x27   : > { %s307_s9 = sand.u32 (!%p301_p11), 1, %s1434_s19  }
  0x28   : > { %304 = sbr.rel (%p301_p11) target bundleno = 336 (0x150), region = 66  ;;  %s1106_s10 = sshll.u32 (!%p301_p11), %s307_s9, 6 }
  0x29   : > { %s1107_s11 = sshll.u32 (!%p301_p11), %s307_s9, 8  ;;  %s1553_s12 = scalar_lea.vmem (!%p301_p11), [#allocation3], %s1106_s10 }
  0x2a   : > { %s314_s14 = scalar_lea.sflag (!%p301_p11), [#allocation5], %s307_s9  ;;  %s1555_s13 = scalar_lea.vmem (!%p301_p11), [#allocation4], %s1107_s11 }
  0x2d   : > { %1425 = dma.done.wait (%p1528_p7), %s314_s14, 4096  }
  0x2e   : > { %1427 = vsyncadd (%p1528_p7), %s314_s14, 4294963200  ;;  %p1108_p12 = scmp.ne.s32.totalorder %s1442_s21, 0 }
  0x30   : > { %379 = sbr.rel (%p1108_p12) target bundleno = 70 (0x46), region = 78 }
  0x35   : > { %v1454_v8 = vmov 0.0  }
  0x36   : > { %380 = vst [vmem:[#allocation2 + $0x30] sm:$0xff] %v1454_v8 }
  0x37   : > { %381 = vst [vmem:[#allocation2] sm:$0xff] %v1454_v8 }
  0x38   : > { %382 = vst [vmem:[#allocation2 + $0x58] sm:$0xff] %v1454_v8 }
  0x39   : > { %383 = vst [vmem:[#allocation2 + $0x18] sm:$0xff] %v1454_v8 }
  0x3a   : > { %384 = vst [vmem:[#allocation2 + $0x50] sm:$0xff] %v1454_v8 }
  0x3b   : > { %385 = vst [vmem:[#allocation2 + $0x68] sm:$0xff] %v1454_v8 }
  0x3c   : > { %386 = vst [vmem:[#allocation2 + $0x8] sm:$0xff] %v1454_v8 }
  0x3d   : > { %387 = vst [vmem:[#allocation2 + $0x48] sm:$0xff] %v1454_v8 }
  0x3e   : > { %388 = vst [vmem:[#allocation2 + $0x40] sm:$0xff] %v1454_v8 }
  0x3f   : > { %389 = vst [vmem:[#allocation2 + $0x20] sm:$0xff] %v1454_v8 }
  0x40   : > { %390 = vst [vmem:[#allocation2 + $0x10] sm:$0xff] %v1454_v8 }
  0x41   : > { %391 = vst [vmem:[#allocation2 + $0x38] sm:$0xff] %v1454_v8 }
  0x42   : > { %392 = vst [vmem:[#allocation2 + $0x60] sm:$0xff] %v1454_v8 }
  0x43   : > { %393 = vst [vmem:[#allocation2 + $0x70] sm:$0xff] %v1454_v8 }
  0x44   : > { %394 = vst [vmem:[#allocation2 + $0x78] sm:$0xff] %v1454_v8 }
  0x45   : > { %395 = vst [vmem:[#allocation2 + $0x28] sm:$0xff] %v1454_v8 }
  0x46 PF: > { %v1199_v9 = vld [vmem:[%s1555_s13 + $0x70] sm:$0xf]  ;;  %v1302_v10 = vld [vmem:[%s1555_s13 + $0x74] sm:$0xf0]  ;;  %v1301_v14 = vld [vmem:[%s1555_s13 + $0x74] sm:$0xf] }
  0x47   : > { %v1263_v11 = vld [vmem:[%s1555_s13 + $0xf0] sm:$0xf]  ;;  %v1200_v12 = vor.u32 %v1302_v10, %v1199_v9  ;;  %v1318_v13 = vld [vmem:[%s1555_s13 + $0xf4] sm:$0xf0]  ;;  %v1201_v15 = vld [vmem:[%s1555_s13 + $0x78] sm:$0xf0] }
  0x48   : > { %v1264_v16 = vor.u32 %v1318_v13, %v1263_v11  ;;  %v1204_v17 = vor.u32 %v1301_v14, %v1201_v15  ;;  %v1317_v18 = vld [vmem:[%s1555_s13 + $0xf4] sm:$0xf]  ;;  %v1265_v19 = vld [vmem:[%s1555_s13 + $0xf8] sm:$0xf0]  ;;  %v1191_v20 = vld [vmem:[%s1555_s13 + $0x60] sm:$0xf] }
  0x49   : > { %652 = vmatpush.bf16.msra.mxu0 %v1200_v12  ;;  %v1268_v21 = vor.u32 %v1317_v18, %v1265_v19  ;;  %v1300_v22 = vld [vmem:[%s1555_s13 + $0x64] sm:$0xf0]  ;;  %v1255_v23 = vld [vmem:[%s1555_s13 + $0xe0] sm:$0xf]  ;;  %v1299_v27 = vld [vmem:[%s1555_s13 + $0x64] sm:$0xf] }
  0x4a   : > { %v1316_v24 = vld [vmem:[%s1555_s13 + $0xe4] sm:$0xf0]  ;;  %681 = vmatpush.bf16.msra.mxu1 %v1264_v16  ;;  %710 = vmatpush.bf16.msra.mxu2 %v1204_v17  ;;  %v1192_v25 = vor.u32 %v1300_v22, %v1191_v20  ;;  %v1193_v28 = vld [vmem:[%s1555_s13 + $0x68] sm:$0xf0]  ;;  %v1315_v29 = vld [vmem:[%s1555_s13 + $0xe4] sm:$0xf] }
  0x4b   : > { %v1256_v26 = vor.u32 %v1316_v24, %v1255_v23  ;;  %739 = vmatpush.bf16.msra.mxu3 %v1268_v21  ;;  %v1196_v30 = vor.u32 %v1299_v27, %v1193_v28  ;;  %v1257_v31 = vld [vmem:[%s1555_s13 + $0xe8] sm:$0xf0]  ;;  %v1183_v32 = vld [vmem:[%s1555_s13 + $0x50] sm:$0xf]  ;;  %v1298_v33 = vld [vmem:[%s1555_s13 + $0x54] sm:$0xf0] }
  0x4c   : > { %v1260_v34 = vor.u32 %v1315_v29, %v1257_v31  ;;  %v1247_v35 = vld [vmem:[%s1555_s13 + $0xd0] sm:$0xf]  ;;  %v1314_v36 = vld [vmem:[%s1555_s13 + $0xd4] sm:$0xf0]  ;;  %v1297_v37 = vld [vmem:[%s1555_s13 + $0x54] sm:$0xf]  ;;  %v1184_v38 = vor.u32 %v1298_v33, %v1183_v32 }
  0x4d   : > { %653 = vmatpush.bf16.msra.mxu0 %v1192_v25  ;;  %v1185_v39 = vld [vmem:[%s1555_s13 + $0x58] sm:$0xf0]  ;;  %v1313_v40 = vld [vmem:[%s1555_s13 + $0xd4] sm:$0xf]  ;;  %v1248_v42 = vor.u32 %v1314_v36, %v1247_v35  ;;  %v1175_v44 = vld [vmem:[%s1555_s13 + $0x40] sm:$0xf] }
  0x4e   : > { %v1249_v41 = vld [vmem:[%s1555_s13 + $0xd8] sm:$0xf0]  ;;  %682 = vmatpush.bf16.msra.mxu1 %v1256_v26  ;;  %711 = vmatpush.bf16.msra.mxu2 %v1196_v30  ;;  %v1188_v43 = vor.u32 %v1297_v37, %v1185_v39  ;;  %v1296_v45 = vld [vmem:[%s1555_s13 + $0x44] sm:$0xf0]  ;;  %v1239_v46 = vld [vmem:[%s1555_s13 + $0xc0] sm:$0xf] }
  0x4f   : > { %740 = vmatpush.bf16.msra.mxu3 %v1260_v34  ;;  %v1252_v47 = vor.u32 %v1313_v40, %v1249_v41  ;;  %v1312_v48 = vld [vmem:[%s1555_s13 + $0xc4] sm:$0xf0]  ;;  %v1295_v49 = vld [vmem:[%s1555_s13 + $0x44] sm:$0xf]  ;;  %v1177_v50 = vld [vmem:[%s1555_s13 + $0x48] sm:$0xf0]  ;;  %v1176_v53 = vor.u32 %v1296_v45, %v1175_v44 }
  0x50   : > { %v1311_v51 = vld [vmem:[%s1555_s13 + $0xc4] sm:$0xf]  ;;  %v1241_v52 = vld [vmem:[%s1555_s13 + $0xc8] sm:$0xf0]  ;;  %v1240_v54 = vor.u32 %v1312_v48, %v1239_v46  ;;  %v1180_v55 = vor.u32 %v1295_v49, %v1177_v50  ;;  %v1167_v56 = vld [vmem:[%s1555_s13 + $0x30] sm:$0xf] }
  0x51   : > { %654 = vmatpush.bf16.msra.mxu0 %v1184_v38  ;;  %v1294_v57 = vld [vmem:[%s1555_s13 + $0x34] sm:$0xf0]  ;;  %v1231_v58 = vld [vmem:[%s1555_s13 + $0xb0] sm:$0xf]  ;;  %v1244_v59 = vor.u32 %v1311_v51, %v1241_v52  ;;  %v1293_v61 = vld [vmem:[%s1555_s13 + $0x34] sm:$0xf] }
  0x52   : > { %683 = vmatpush.bf16.msra.mxu1 %v1248_v42  ;;  %712 = vmatpush.bf16.msra.mxu2 %v1188_v43  ;;  %v1310_v60 = vld [vmem:[%s1555_s13 + $0xb4] sm:$0xf0]  ;;  %v1169_v62 = vld [vmem:[%s1555_s13 + $0x38] sm:$0xf0]  ;;  %v1309_v63 = vld [vmem:[%s1555_s13 + $0xb4] sm:$0xf]  ;;  %v1168_v1 = vor.u32 %v1294_v57, %v1167_v56 }
  0x53   : > { %741 = vmatpush.bf16.msra.mxu3 %v1252_v47  ;;  %v1233_v0 = vld [vmem:[%s1555_s13 + $0xb8] sm:$0xf0]  ;;  %v1232_v2 = vor.u32 %v1310_v60, %v1231_v58  ;;  %v1172_v3 = vor.u32 %v1293_v61, %v1169_v62  ;;  %v1159_v4 = vld [vmem:[%s1555_s13 + $0x20] sm:$0xf]  ;;  %v1292_v5 = vld [vmem:[%s1555_s13 + $0x24] sm:$0xf0] }
  0x54   : > { %v1223_v6 = vld [vmem:[%s1555_s13 + $0xa0] sm:$0xf]  ;;  %v1236_v7 = vor.u32 %v1309_v63, %v1233_v0  ;;  %v1308_v8 = vld [vmem:[%s1555_s13 + $0xa4] sm:$0xf0]  ;;  %v1291_v9 = vld [vmem:[%s1555_s13 + $0x24] sm:$0xf]  ;;  %v1160_v13 = vor.u32 %v1292_v5, %v1159_v4 }
  0x55   : > { %655 = vmatpush.bf16.msra.mxu0 %v1176_v53  ;;  %v1161_v10 = vld [vmem:[%s1555_s13 + $0x28] sm:$0xf0]  ;;  %v1307_v11 = vld [vmem:[%s1555_s13 + $0xa4] sm:$0xf]  ;;  %v1224_v14 = vor.u32 %v1308_v8, %v1223_v6  ;;  %v1151_v16 = vld [vmem:[%s1555_s13 + $0x10] sm:$0xf] }
  0x56   : > { %684 = vmatpush.bf16.msra.mxu1 %v1240_v54  ;;  %713 = vmatpush.bf16.msra.mxu2 %v1180_v55  ;;  %v1225_v12 = vld [vmem:[%s1555_s13 + $0xa8] sm:$0xf0]  ;;  %v1164_v15 = vor.u32 %v1291_v9, %v1161_v10  ;;  %v1290_v17 = vld [vmem:[%s1555_s13 + $0x14] sm:$0xf0]  ;;  %v1215_v18 = vld [vmem:[%s1555_s13 + $0x90] sm:$0xf] }
  0x57   : > { %742 = vmatpush.bf16.msra.mxu3 %v1244_v59  ;;  %v1228_v19 = vor.u32 %v1307_v11, %v1225_v12  ;;  %v1306_v20 = vld [vmem:[%s1555_s13 + $0x94] sm:$0xf0]  ;;  %v1289_v21 = vld [vmem:[%s1555_s13 + $0x14] sm:$0xf]  ;;  %v1153_v22 = vld [vmem:[%s1555_s13 + $0x18] sm:$0xf0]  ;;  %v1152_v25 = vor.u32 %v1290_v17, %v1151_v16 }
  0x58   : > { %v1305_v23 = vld [vmem:[%s1555_s13 + $0x94] sm:$0xf]  ;;  %v1217_v24 = vld [vmem:[%s1555_s13 + $0x98] sm:$0xf0]  ;;  %v1216_v26 = vor.u32 %v1306_v20, %v1215_v18  ;;  %v1156_v27 = vor.u32 %v1289_v21, %v1153_v22  ;;  %v1143_v28 = vld [vmem:[%s1555_s13] sm:$0xf] }
  0x59   : > { %656 = vmatpush.bf16.msra.mxu0 %v1168_v1  ;;  %v1288_v29 = vld [vmem:[%s1555_s13 + $0x4] sm:$0xf0]  ;;  %v1207_v30 = vld [vmem:[%s1555_s13 + $0x80] sm:$0xf]  ;;  %v1220_v31 = vor.u32 %v1305_v23, %v1217_v24  ;;  %v1287_v33 = vld [vmem:[%s1555_s13 + $0x4] sm:$0xf] }
  0x5a   : > { %685 = vmatpush.bf16.msra.mxu1 %v1232_v2  ;;  %714 = vmatpush.bf16.msra.mxu2 %v1172_v3  ;;  %v1304_v32 = vld [vmem:[%s1555_s13 + $0x84] sm:$0xf0]  ;;  %v1145_v34 = vld [vmem:[%s1555_s13 + $0x8] sm:$0xf0]  ;;  %v1303_v35 = vld [vmem:[%s1555_s13 + $0x84] sm:$0xf]  ;;  %v1144_v37 = vor.u32 %v1288_v29, %v1143_v28 }
  0x5b   : > { %743 = vmatpush.bf16.msra.mxu3 %v1236_v7  ;;  %v1209_v36 = vld [vmem:[%s1555_s13 + $0x88] sm:$0xf0]  ;;  %v1111_v38 = vld [vmem:[%s1553_s12] sm:$0xf]  ;;  %v1280_v39 = vld [vmem:[%s1553_s12 + $0x4] sm:$0xf0]  ;;  %v1208_v40 = vor.u32 %v1304_v32, %v1207_v30  ;;  %v1148_v41 = vor.u32 %v1287_v33, %v1145_v34 }
  0x5c   : > { %v1279_v42 = vld [vmem:[%s1553_s12 + $0x4] sm:$0xf]  ;;  %v1113_v43 = vld [vmem:[%s1553_s12 + $0x8] sm:$0xf0]  ;;  %v1212_v44 = vor.u32 %v1303_v35, %v1209_v36  ;;  %v1112_v45 = vor.u32 %v1280_v39, %v1111_v38  ;;  %v1119_v47 = vld [vmem:[%s1553_s12 + $0x10] sm:$0xf] }
  0x5d   : > { %657 = vmatpush.bf16.msra.mxu0 %v1160_v13  ;;  %v1116_v46 = vor.u32 %v1279_v42, %v1113_v43  ;;  %v1282_v48 = vld [vmem:[%s1553_s12 + $0x14] sm:$0xf0]  ;;  %v1281_v49 = vld [vmem:[%s1553_s12 + $0x14] sm:$0xf]  ;;  %v1121_v50 = vld [vmem:[%s1553_s12 + $0x18] sm:$0xf0] }
  0x5e   : > { %686 = vmatpush.bf16.msra.mxu1 %v1224_v14  ;;  %715 = vmatpush.bf16.msra.mxu2 %v1164_v15  ;;  %v1120_v51 = vor.u32 %v1282_v48, %v1119_v47  ;;  %v1124_v52 = vor.u32 %v1281_v49, %v1121_v50  ;;  %v1127_v53 = vld [vmem:[%s1553_s12 + $0x20] sm:$0xf]  ;;  %v1284_v54 = vld [vmem:[%s1553_s12 + $0x24] sm:$0xf0]  ;;  %v1283_v55 = vld [vmem:[%s1553_s12 + $0x24] sm:$0xf] }
  0x5f   : > { %744 = vmatpush.bf16.msra.mxu3 %v1228_v19  ;;  %v1129_v56 = vld [vmem:[%s1553_s12 + $0x28] sm:$0xf0]  ;;  %v1128_v57 = vor.u32 %v1284_v54, %v1127_v53  ;;  %v1135_v59 = vld [vmem:[%s1553_s12 + $0x30] sm:$0xf]  ;;  %v1286_v60 = vld [vmem:[%s1553_s12 + $0x34] sm:$0xf0] }
  0x60   : > { %v1132_v58 = vor.u32 %v1283_v55, %v1129_v56  ;;  %v1285_v61 = vld [vmem:[%s1553_s12 + $0x34] sm:$0xf]  ;;  %v1137_v62 = vld [vmem:[%s1553_s12 + $0x38] sm:$0xf0]  ;;  %v1136_v63 = vor.u32 %v1286_v60, %v1135_v59  ;;  %v397_v7 = vld [vmem:[#allocation2] sm:$0xff]  ;;  %p1269_p13 = scmp.ne.s32.totalorder %s1442_s21, 1 }
  0x61   : > { %658 = vmatpush.bf16.msra.mxu0 %v1152_v25  ;;  %v1140_v0 = vor.u32 %v1285_v61, %v1137_v62  ;;  %v396_v2 = vld [vmem:[#allocation2 + $0x30] sm:$0xff]  ;;  %v398_v11 = vld [vmem:[#allocation2 + $0x58] sm:$0xff]  ;;  %v405_v47 = vld [vmem:[#allocation2 + $0x20] sm:$0xff] }
  0x62   : > { %687 = vmatpush.bf16.msra.mxu1 %v1216_v26  ;;  %716 = vmatpush.bf16.msra.mxu2 %v1156_v27  ;;  %v399_v17 = vld [vmem:[#allocation2 + $0x18] sm:$0xff]  ;;  %v400_v21 = vld [vmem:[#allocation2 + $0x50] sm:$0xff]  ;;  %v401_v27 = vld [vmem:[#allocation2 + $0x68] sm:$0xff] }
  0x63   : > { %745 = vmatpush.bf16.msra.mxu3 %v1220_v31  ;;  %v402_v31 = vld [vmem:[#allocation2 + $0x8] sm:$0xff]  ;;  %v408_v61 = vld [vmem:[#allocation2 + $0x60] sm:$0xff] }
  0x65   : > { %659 = vmatpush.bf16.msra.mxu0 %v1144_v37  ;;  %v403_v37 = vld [vmem:[#allocation2 + $0x48] sm:$0xff] }
  0x66   : > { %688 = vmatpush.bf16.msra.mxu1 %v1208_v40  ;;  %717 = vmatpush.bf16.msra.mxu2 %v1148_v41  ;;  %v404_v41 = vld [vmem:[#allocation2 + $0x40] sm:$0xff] }
  0x67   : > { %746 = vmatpush.bf16.msra.mxu3 %v1212_v44 }
  0x68   : > { %660 = vmatmul.bf16.vlgmr.msra.gmra.mxu0 %v1112_v45 }
  0x69   : > { %689 = vmatmul.bf16.vlgmr.msra.gmra.mxu1 %v1116_v46  ;;  %718 = vmatmul.bf16.vlgmr.msra.gmra.mxu2 %v1112_v45 }
  0x6a   : > { %747 = vmatmul.bf16.vlgmr.msra.gmra.mxu3 %v1116_v46 }
  0x78   : > { %665 = vmatmul.bf16.gmra.mxu0 %v1120_v51 }
  0x79   : > { %694 = vmatmul.bf16.gmra.mxu1 %v1124_v52  ;;  %723 = vmatmul.bf16.gmra.mxu2 %v1120_v51  ;;  %v406_v51 = vld [vmem:[#allocation2 + $0x10] sm:$0xff] }
  0x7a   : > { %752 = vmatmul.bf16.gmra.mxu3 %v1124_v52 }
  0x88   : > { %670 = vmatmul.bf16.gmra.mxu0 %v1128_v57 }
  0x89   : > { %699 = vmatmul.bf16.gmra.mxu1 %v1132_v58  ;;  %728 = vmatmul.bf16.gmra.mxu2 %v1128_v57  ;;  %v407_v57 = vld [vmem:[#allocation2 + $0x38] sm:$0xff] }
  0x8a   : > { %757 = vmatmul.bf16.gmra.mxu3 %v1132_v58 }
  0x98   : > { %675 = vmatmul.bf16.gmra.mxu0 %v1136_v63 }
  0x99   : > { %704 = vmatmul.bf16.gmra.mxu1 %v1140_v0  ;;  %733 = vmatmul.bf16.gmra.mxu2 %v1136_v63 }
  0x9a   : > { %762 = vmatmul.bf16.gmra.mxu3 %v1140_v0 }
  0xe5   : > { %v661_v1 = vpop.f32.mrf.mxu0 }
  0xe6   : > { %v690_v3 = vpop.f32.mrf.mxu1 }
  0xe7   : > { %v691_v4 = vadd.f32 %v690_v3, %v661_v1  ;;  %v409_v3 = vld [vmem:[#allocation2 + $0x70] sm:$0xff] }
  0xe9   : > { %v768_v5 = vadd.f32 %v691_v4, %v396_v2 }
  0xeb   : > { %784 = vst [vmem:[#allocation2 + $0x30] sm:$0xff] %v768_v5 }
  0xec   : > { %v719_v6 = vpop.f32.mrf.mxu2 }
  0xed   : > { %v748_v8 = vpop.f32.mrf.mxu3  ;;  %v663_v9 = vpop.f32.mrf.mxu0 }
  0xee   : > { %v749_v10 = vadd.f32 %v748_v8, %v719_v6  ;;  %v692_v12 = vpop.f32.mrf.mxu1 }
  0xef   : > { %v693_v13 = vadd.f32 %v692_v12, %v663_v9 }
  0xf0   : > { %v769_v14 = vadd.f32 %v749_v10, %v397_v7  ;;  %v410_v7 = vld [vmem:[#allocation2 + $0x78] sm:$0xff] }
  0xf1   : > { %v770_v15 = vadd.f32 %v693_v13, %v398_v11  ;;  %v411_v13 = vld [vmem:[#allocation2 + $0x28] sm:$0xff] }
  0xf2   : > { %785 = vst [vmem:[#allocation2] sm:$0xff] %v769_v14 }
  0xf3   : > { %786 = vst [vmem:[#allocation2 + $0x58] sm:$0xff] %v770_v15 }
  0xf4   : > { %v721_v16 = vpop.f32.mrf.mxu2 }
  0xf5   : > { %v750_v18 = vpop.f32.mrf.mxu3  ;;  %v666_v19 = vpop.f32.mrf.mxu0 }
  0xf6   : > { %v751_v20 = vadd.f32 %v750_v18, %v721_v16  ;;  %v695_v22 = vpop.f32.mrf.mxu1 }
  0xf7   : > { %v696_v23 = vadd.f32 %v695_v22, %v666_v19 }
  0xf8   : > { %v771_v24 = vadd.f32 %v751_v20, %v399_v17 }
  0xf9   : > { %v772_v25 = vadd.f32 %v696_v23, %v400_v21 }
  0xfa   : > { %787 = vst [vmem:[#allocation2 + $0x18] sm:$0xff] %v771_v24 }
  0xfb   : > { %788 = vst [vmem:[#allocation2 + $0x50] sm:$0xff] %v772_v25 }
  0xfc   : > { %v724_v26 = vpop.f32.mrf.mxu2 }
  0xfd   : > { %v753_v28 = vpop.f32.mrf.mxu3  ;;  %v668_v29 = vpop.f32.mrf.mxu0 }
  0xfe   : > { %v754_v30 = vadd.f32 %v753_v28, %v724_v26  ;;  %v697_v32 = vpop.f32.mrf.mxu1 }
  0xff   : > { %v698_v33 = vadd.f32 %v697_v32, %v668_v29 }
 0x100   : > { %v773_v34 = vadd.f32 %v754_v30, %v401_v27 }
 0x101   : > { %v774_v35 = vadd.f32 %v698_v33, %v402_v31 }
 0x102   : > { %789 = vst [vmem:[#allocation2 + $0x68] sm:$0xff] %v773_v34 }
 0x103   : > { %790 = vst [vmem:[#allocation2 + $0x8] sm:$0xff] %v774_v35 }
 0x104   : > { %v726_v36 = vpop.f32.mrf.mxu2 }
 0x105   : > { %v755_v38 = vpop.f32.mrf.mxu3  ;;  %v671_v39 = vpop.f32.mrf.mxu0 }
 0x106   : > { %v756_v40 = vadd.f32 %v755_v38, %v726_v36  ;;  %v700_v42 = vpop.f32.mrf.mxu1 }
 0x107   : > { %v701_v43 = vadd.f32 %v700_v42, %v671_v39 }
 0x108   : > { %v775_v44 = vadd.f32 %v756_v40, %v403_v37 }
 0x109   : > { %v776_v45 = vadd.f32 %v701_v43, %v404_v41 }
 0x10a   : > { %791 = vst [vmem:[#allocation2 + $0x48] sm:$0xff] %v775_v44 }
 0x10b   : > { %792 = vst [vmem:[#allocation2 + $0x40] sm:$0xff] %v776_v45 }
 0x10c   : > { %v729_v46 = vpop.f32.mrf.mxu2 }
 0x10d   : > { %v758_v48 = vpop.f32.mrf.mxu3  ;;  %v673_v49 = vpop.f32.mrf.mxu0 }
 0x10e   : > { %v759_v50 = vadd.f32 %v758_v48, %v729_v46  ;;  %v702_v52 = vpop.f32.mrf.mxu1 }
 0x10f   : > { %v703_v53 = vadd.f32 %v702_v52, %v673_v49 }
 0x110   : > { %v777_v54 = vadd.f32 %v759_v50, %v405_v47 }
 0x111   : > { %v778_v55 = vadd.f32 %v703_v53, %v406_v51 }
 0x112   : > { %793 = vst [vmem:[#allocation2 + $0x20] sm:$0xff] %v777_v54 }
 0x113   : > { %794 = vst [vmem:[#allocation2 + $0x10] sm:$0xff] %v778_v55 }
 0x114   : > { %v731_v56 = vpop.f32.mrf.mxu2 }
 0x115   : > { %v760_v58 = vpop.f32.mrf.mxu3  ;;  %v676_v59 = vpop.f32.mrf.mxu0 }
 0x116   : > { %v761_v60 = vadd.f32 %v760_v58, %v731_v56  ;;  %v705_v62 = vpop.f32.mrf.mxu1 }
 0x117   : > { %v706_v63 = vadd.f32 %v705_v62, %v676_v59 }
 0x118   : > { %v779_v0 = vadd.f32 %v761_v60, %v407_v57 }
 0x119   : > { %v780_v1 = vadd.f32 %v706_v63, %v408_v61 }
 0x11a   : > { %795 = vst [vmem:[#allocation2 + $0x38] sm:$0xff] %v779_v0 }
 0x11b   : > { %796 = vst [vmem:[#allocation2 + $0x60] sm:$0xff] %v780_v1 }
 0x11c   : > { %v734_v2 = vpop.f32.mrf.mxu2 }
 0x11d   : > { %v763_v4 = vpop.f32.mrf.mxu3  ;;  %v678_v5 = vpop.f32.mrf.mxu0 }
 0x11e   : > { %v764_v6 = vadd.f32 %v763_v4, %v734_v2  ;;  %v707_v8 = vpop.f32.mrf.mxu1 }
 0x11f   : > { %v708_v9 = vadd.f32 %v707_v8, %v678_v5 }
 0x120   : > { %v781_v10 = vadd.f32 %v764_v6, %v409_v3 }
 0x121   : > { %v782_v11 = vadd.f32 %v708_v9, %v410_v7 }
 0x122   : > { %797 = vst [vmem:[#allocation2 + $0x70] sm:$0xff] %v781_v10 }
 0x123   : > { %798 = vst [vmem:[#allocation2 + $0x78] sm:$0xff] %v782_v11 }
 0x124   : > { %v736_v12 = vpop.f32.mrf.mxu2 }
 0x125   : > { %v765_v14 = vpop.f32.mrf.mxu3 }
 0x126   : > { %v766_v15 = vadd.f32 %v765_v14, %v736_v12  ;;  %803 = sbr.rel (%p1269_p13) target bundleno = 336 (0x150), region = 82 }
 0x128   : > { %v783_v16 = vadd.f32 %v766_v15, %v411_v13 }
 0x12a   : > { %799 = vst [vmem:[#allocation2 + $0x28] sm:$0xff] %v783_v16 }
 0x12b   : > { %v804_v17 = vld [vmem:[#allocation2 + $0x30] sm:$0xff]  ;;  %v805_v18 = vld [vmem:[#allocation2] sm:$0xff]  ;;  %v806_v24 = vld [vmem:[#allocation2 + $0x58] sm:$0xff]  ;;  %vm887_vm0 = vcmask 1040384  }
 0x12c   : > { %v820_v19 = vld [vmem:[%s1716_s2] sm:$0x3]  ;;  %v895_v22 = vmul.f32 %v804_v17, %v804_v17  ;;  %v896_v23 = vmul.f32 %v805_v18, %v805_v18  ;;  %v807_v25 = vld [vmem:[#allocation2 + $0x18] sm:$0xff]  ;;  %v858_v26 = vadd.f32 %v806_v24, %v804_v17  ;;  %v897_v28 = vmul.f32 %v806_v24, %v806_v24  ;;  %v808_v34 = vld [vmem:[#allocation2 + $0x50] sm:$0xff] }
 0x12d   : > { %v1646_v20 = vperm.slane %v820_v19, 0  ;;  %v1648_v21 = vperm.slane %v820_v19, 1  ;;  %v871_v27 = vadd.f32 %v807_v25, %v805_v18  ;;  %v898_v29 = vmul.f32 %v807_v25, %v807_v25  ;;  %v809_v35 = vld [vmem:[#allocation2 + $0x68] sm:$0xff]  ;;  %v812_v54 = vld [vmem:[#allocation2 + $0x40] sm:$0xff]  ;;  %v814_v0 = vld [vmem:[#allocation2 + $0x10] sm:$0xff] }
 0x12e   : > { %v911_v36 = vadd.f32 %v897_v28, %v895_v22  ;;  %v810_v40 = vld [vmem:[#allocation2 + $0x8] sm:$0xff]  ;;  %v859_v43 = vadd.f32 %v858_v26, %v808_v34  ;;  %v899_v47 = vmul.f32 %v808_v34, %v808_v34  ;;  %v900_v48 = vmul.f32 %v809_v35, %v809_v35  ;;  %v813_v55 = vld [vmem:[#allocation2 + $0x20] sm:$0xff]  ;;  %v815_v5 = vld [vmem:[#allocation2 + $0x38] sm:$0xff] }
 0x12f   : > { %v826_v30 = vadd.f32 %v1646_v20, %v804_v17  ;;  %v827_v31 = vadd.f32 %v1648_v21, %v805_v18  ;;  %v828_v32 = vadd.f32 %v1646_v20, %v806_v24  ;;  %v829_v33 = vadd.f32 %v1648_v21, %v807_v25  ;;  %v811_v45 = vld [vmem:[#allocation2 + $0x48] sm:$0xff]  ;;  %v816_v10 = vld [vmem:[#allocation2 + $0x60] sm:$0xff]  ;;  %v817_v15 = vld [vmem:[#allocation2 + $0x70] sm:$0xff] }
 0x130   : > { %v924_v37 = vadd.f32 %v898_v29, %v896_v23  ;;  %v830_v38 = vadd.f32 %v1646_v20, %v808_v34  ;;  %v831_v39 = vadd.f32 %v1648_v21, %v809_v35  ;;  %v872_v44 = vadd.f32 %v871_v27, %v809_v35  ;;  %v818_v26 = vld [vmem:[#allocation2 + $0x78] sm:$0xff] }
 0x131   : > { %v842_v41 = vpack.c.bf16 %v827_v31, %v826_v30  ;;  %v843_v42 = vpack.c.bf16 %v829_v33, %v828_v32  ;;  %v832_v49 = vadd.f32 %v1646_v20, %v810_v40  ;;  %v833_v50 = vadd.f32 %v1648_v21, %v811_v45  ;;  %v819_v27 = vld [vmem:[#allocation2 + $0x28] sm:$0xff] }
 0x132   : > { %v844_v46 = vpack.c.bf16 %v831_v39, %v830_v38  ;;  %v860_v51 = vadd.f32 %v859_v43, %v810_v40  ;;  %v873_v52 = vadd.f32 %v872_v44, %v811_v45  ;;  %v901_v53 = vmul.f32 %v810_v40, %v810_v40 }
 0x133   : > { %850 = vst [vmem:[%s1717_s3] sm:$0xff] %v842_v41  ;;  %v912_v56 = vadd.f32 %v911_v36, %v899_v47  ;;  %v925_v57 = vadd.f32 %v924_v37, %v900_v48  ;;  %v902_v58 = vmul.f32 %v811_v45, %v811_v45  ;;  %v834_v59 = vadd.f32 %v1646_v20, %v812_v54 }
 0x134   : > { %851 = vst [vmem:[%s1717_s3 + $0x8] sm:$0xff] %v843_v42  ;;  %v845_v60 = vpack.c.bf16 %v833_v50, %v832_v49  ;;  %v835_v61 = vadd.f32 %v1648_v21, %v813_v55  ;;  %v861_v62 = vadd.f32 %v860_v51, %v812_v54  ;;  %v874_v63 = vadd.f32 %v873_v52, %v813_v55 }
 0x135   : > { %852 = vst [vmem:[%s1717_s3 + $0x10] sm:$0xff] %v844_v46  ;;  %v913_v1 = vadd.f32 %v912_v56, %v901_v53  ;;  %v926_v2 = vadd.f32 %v925_v57, %v902_v58  ;;  %v903_v3 = vmul.f32 %v812_v54, %v812_v54  ;;  %v904_v4 = vmul.f32 %v813_v55, %v813_v55 }
 0x136   : > { %853 = vst [vmem:[%s1717_s3 + $0x18] sm:$0xff] %v845_v60  ;;  %v846_v6 = vpack.c.bf16 %v835_v61, %v834_v59  ;;  %v836_v7 = vadd.f32 %v1646_v20, %v814_v0  ;;  %v837_v8 = vadd.f32 %v1648_v21, %v815_v5  ;;  %v862_v9 = vadd.f32 %v861_v62, %v814_v0 }
 0x137   : > { %v914_v11 = vadd.f32 %v913_v1, %v903_v3  ;;  %v927_v12 = vadd.f32 %v926_v2, %v904_v4  ;;  %v875_v13 = vadd.f32 %v874_v63, %v815_v5  ;;  %v905_v14 = vmul.f32 %v814_v0, %v814_v0 }
 0x138   : > { %854 = vst [vmem:[%s1717_s3 + $0x20] sm:$0xff] %v846_v6  ;;  %v847_v16 = vpack.c.bf16 %v837_v8, %v836_v7  ;;  %v906_v17 = vmul.f32 %v815_v5, %v815_v5  ;;  %v838_v18 = vadd.f32 %v1646_v20, %v816_v10  ;;  %v839_v19 = vadd.f32 %v1648_v21, %v817_v15 }
 0x139   : > { %v915_v22 = vadd.f32 %v914_v11, %v905_v14  ;;  %v863_v23 = vadd.f32 %v862_v9, %v816_v10  ;;  %v876_v24 = vadd.f32 %v875_v13, %v817_v15  ;;  %v907_v25 = vmul.f32 %v816_v10, %v816_v10 }
 0x13a   : > { %855 = vst [vmem:[%s1717_s3 + $0x28] sm:$0xff] %v847_v16  ;;  %v928_v28 = vadd.f32 %v927_v12, %v906_v17  ;;  %v848_v29 = vpack.c.bf16 %v839_v19, %v838_v18  ;;  %v908_v30 = vmul.f32 %v817_v15, %v817_v15  ;;  %v840_v31 = vadd.f32 %v1646_v20, %v818_v26 }
 0x13b   : > { %v916_v32 = vadd.f32 %v915_v22, %v907_v25  ;;  %v841_v33 = vadd.f32 %v1648_v21, %v819_v27  ;;  %v864_v34 = vadd.f32 %v863_v23, %v818_v26  ;;  %v877_v35 = vadd.f32 %v876_v24, %v819_v27 }
 0x13c   : > { %856 = vst [vmem:[%s1717_s3 + $0x30] sm:$0xff] %v848_v29  ;;  %v929_v36 = vadd.f32 %v928_v28, %v908_v30  ;;  %v909_v37 = vmul.f32 %v818_v26, %v818_v26  ;;  %v910_v38 = vmul.f32 %v819_v27, %v819_v27  ;;  %v890_v56 = vlaneseq }
 0x13d   : > { %v849_v39 = vpack.c.bf16 %v841_v33, %v840_v31  ;;  %v865_v40 = vrot.slane %v864_v34, 4  ;;  %v878_v41 = vrot.slane %v877_v35, 4 }
 0x13e   : > { %v917_v42 = vadd.f32 %v916_v32, %v909_v37  ;;  %v930_v43 = vadd.f32 %v929_v36, %v910_v38  ;;  %vm892_vm1 = vcmp.lt.s32.totalorder %v890_v56, 256 }
 0x13f   : > { %857 = vst [vmem:[%s1717_s3 + $0x38] sm:$0xff] %v849_v39  ;;  %v866_v20 = vadd.f32 %v865_v40, %v864_v34  ;;  %v879_v21 = vadd.f32 %v878_v41, %v877_v35 }
 0x140   : > { %v918_v44 = vrot.slane %v917_v42, 4  ;;  %v931_v45 = vrot.slane %v930_v43, 4 }
 0x141   : > { %v867_v46 = vrot.slane %v866_v20, 2  ;;  %v880_v47 = vrot.slane %v879_v21, 2 }
 0x142   : > { %v919_v48 = vadd.f32 %v918_v44, %v917_v42  ;;  %v932_v49 = vadd.f32 %v931_v45, %v930_v43 }
 0x143   : > { %v868_v50 = vadd.f32 %v867_v46, %v866_v20  ;;  %v881_v51 = vadd.f32 %v880_v47, %v879_v21 }
 0x144   : > { %v920_v52 = vrot.slane %v919_v48, 2  ;;  %v933_v53 = vrot.slane %v932_v49, 2 }
 0x145   : > { %v869_v54 = vrot.slane %v868_v50, 1  ;;  %v882_v55 = vrot.slane %v881_v51, 1 }
 0x146   : > { %v921_v57 = vadd.f32 %v920_v52, %v919_v48  ;;  %v934_v58 = vadd.f32 %v933_v53, %v932_v49 }
 0x147   : > { %v870_v59 = vadd.f32 %v869_v54, %v868_v50  ;;  %v883_v60 = vadd.f32 %v882_v55, %v881_v51 }
 0x148   : > { %v922_v61 = vrot.slane %v921_v57, 1  ;;  %v935_v62 = vrot.slane %v934_v58, 1 }
 0x149   : > { %v886_v63 = vrot.slane %v883_v60, 7 }
 0x14a   : > { %v923_v0 = vadd.f32 %v922_v61, %v921_v57  ;;  %v936_v1 = vadd.f32 %v935_v62, %v934_v58 }
 0x14b   : > { %v888_v2 = vsel %vm887_vm0, %v870_v59, %v886_v63 }
 0x14c   : > { %894 = vst.msk [vmem:[%s1718_s4] sm:$0x3] %vm892_vm1, %v888_v2  ;;  %v939_v3 = vrot.slane %v936_v1, 7 }
 0x14e   : > { %v940_v4 = vsel %vm887_vm0, %v923_v0, %v939_v3 }
 0x14f   : > { %942 = vst.msk [vmem:[%s1719_s5] sm:$0x3] %vm892_vm1, %v940_v4 }
 0x150 PF: > { %s19_s23 = sadd.s32 1, %s1450_s23   ;;  %s1722_s18 = smov %s1434_s19 }
 0x151   : > { %p16_p0 = scmp.ge.s32.totalorder %s19_s23, 4   ;;  %s1723_s19 = smov %s1438_s20 }
 0x152   : > { %s1724_s20 = smov %s1533_s30  ;;  %s1725_s21 = smov %s1446_s22 }
 0x153   : > { %s1726_s22 = smov %s1728_s25  ;;  %18 = sbr.rel (!%p16_p0) target bundleno = 4 (0x4), region = 150 }
 0x158   :  { %995 = vsyncpa [#allocation5], 1 }
 0x159   :  { %997 = vsyncpa [#allocation5 + $0x1], 1 }

// kernel: a_call__.15
= control target key start
LH: loop header
LB: loop body
LE: loop exit
PB: predicated region body
PF: predicated region fallthrough
CT: control target
= control target key end

     0   :  { %11 = vsyncpa [#allocation4], 0  ;;  %s1085_s18 = smov 0   ;;  %s1087_s19 = smov 0   ;;  %s1164_s0 = inlined_call_operand.vmem [shape: bf16[256,256], index: 0, kind: input, shape index: {}]   ;;  %s1165_s1 = inlined_call_operand.hbm [shape: bf16[256,128], index: 1, kind: input, shape index: {}]   ;;  %s1166_s2 = inlined_call_operand.vmem [shape: f32[1,128], index: 2, kind: input, shape index: {}]   ;;  %s1167_s3 = inlined_call_operand.vmem [shape: bf16[256,128], index: 3, kind: output, shape index: {0}]   ;;  %s1168_s4 = inlined_call_operand.vmem [shape: f32[4,1,128], index: 4, kind: output, shape index: {1}]   ;;  %s1169_s5 = inlined_call_operand.vmem [shape: f32[4,1,128], index: 5, kind: output, shape index: {2}]  }
   0x1   :  { %s1089_s20 = smov 0  }
   0x2 LB: > { %s782_s21 = sadd.s32 4294967295, %s1050_s20   ;;  %s29_s22 = sadd.s32 1, %s1046_s19  ;;  %s1050_s20 = sphi %s1089_s20, %s17_s20   ;;  %s1046_s19 = sphi %s1087_s19, %s1171_s19   ;;  %s1042_s18 = sphi %s1085_s18, %s1170_s18  }
   0x3   : > { %p31_p0 = scmp.ge.s32.totalorder %s29_s22, 4  ;;  %p784_p1 = scmp.ge.s32.totalorder %s1050_s20, 1 }
   0x4   : > { %p187_p2 = scmp.lt.s32.totalorder %s1050_s20, 5  ;;  %p964_p4 = scmp.eq.s32.totalorder %s782_s21, 0 }
   0x5   : > { %s1173_s22 = smov (%p31_p0, %s29_s22), 0  ;;  %s201_s25 = sshll.u32 %s1165_s1, 4  ;;  %s202_s25 = int_to_ptr.hbm [resolvable:$true] %s201_s25 }
   0x6   : > { %p188_p3 = pnand %p784_p1, %p187_p2  ;;  %s1052_s26 = smov [#allocation3]  }
   0x7   : > { %s203_s27 = sshll.u32 %s1052_s26, 4  ;;  %s1053_s28 = smov 64   ;;  %s204_s27 = int_to_ptr.vmem [resolvable:$true] %s203_s27 }
   0x8   : > { %p960_p5 = pneg %p188_p3  ;;  %s1054_s29 = smov 4  }
   0x9   : > { %237 = sbr.rel (%p188_p3) target bundleno = 225 (0xe1), region = 32 }
   0xa   : > { %p961_p6 = pnand %p964_p4, %p960_p5 }
   0xc   : > { %963 = dma.hbm_to_vmem [thread:$0]  (!%p961_p6), %s202_s25, 2048, %s204_s27, [#allocation4], %s1053_s28, %s1053_s28, %s1054_s29  }
   0xe   : > { %1037 = dma.done.wait (%p964_p4), [#allocation4], 2048  }
   0xf   : > { %1039 = vsyncadd (%p964_p4), [#allocation4], 4294965248  ;;  %v908_v0 = vld [vmem:[#allocation3 + $0x38] sm:$0xff]  ;;  %v907_v2 = vld [vmem:[#allocation3 + $0x30] sm:$0xff]  ;;  %s789_s30 = sshll.u32 %s1042_s18, 3  ;;  %p296_p8 = scmp.lt.s32.totalorder %s1042_s18, 3 }
  0x10   : > { %v916_v1 = vld [vmem:[#allocation3 + $0x78] sm:$0xff]  ;;  %498 = vmatpush.bf16.msra.mxu0 %v908_v0  ;;  %940 = vmatpush.bf16.msra.mxu2 %v908_v0  ;;  %v915_v3 = vld [vmem:[#allocation3 + $0x70] sm:$0xff]  ;;  %v906_v4 = vld [vmem:[#allocation3 + $0x28] sm:$0xff]  ;;  %p279_p7 = scmp.lt.s32.totalorder %s789_s30, 31 }
  0x11   : > { %527 = vmatpush.bf16.msra.mxu1 %v916_v1  ;;  %948 = vmatpush.bf16.msra.mxu3 %v916_v1  ;;  %v914_v5 = vld [vmem:[#allocation3 + $0x68] sm:$0xff]  ;;  %v905_v6 = vld [vmem:[#allocation3 + $0x20] sm:$0xff]  ;;  %v904_v8 = vld [vmem:[#allocation3 + $0x18] sm:$0xff]  ;;  %s1177_s18 = smov (!%p296_p8, %s1042_s18), 3 }
  0x12   : > { %v913_v7 = vld [vmem:[#allocation3 + $0x60] sm:$0xff]  ;;  %v912_v9 = vld [vmem:[#allocation3 + $0x58] sm:$0xff]  ;;  %s1175_s30 = smov (!%p279_p7, %s789_s30), 31  ;;  %v903_v10 = vld [vmem:[#allocation3 + $0x10] sm:$0xff]  ;;  %s298_s21 = scalar_lea.vmem %s1168_s4, %s1177_s18 }
  0x13   : > { %v911_v11 = vld [vmem:[#allocation3 + $0x50] sm:$0xff]  ;;  %s892_s6 = sshll.u32 %s1175_s30, 3  ;;  %v902_v12 = vld [vmem:[#allocation3 + $0x8] sm:$0xff]  ;;  %v901_v14 = vld [vmem:[#allocation3] sm:$0xff]  ;;  %s793_s12 = sshll.u32 %s1175_s30, 2 }
  0x14   : > { %499 = vmatpush.bf16.msra.mxu0 %v907_v2  ;;  %941 = vmatpush.bf16.msra.mxu2 %v907_v2  ;;  %s1116_s9 = scalar_lea.vmem %s1164_s0, %s892_s6  ;;  %v910_v13 = vld [vmem:[#allocation3 + $0x48] sm:$0xff]  ;;  %v909_v15 = vld [vmem:[#allocation3 + $0x40] sm:$0xff]  ;;  %s1141_s15 = scalar_lea.vmem %s1167_s3, %s793_s12 }
  0x15   : > { %528 = vmatpush.bf16.msra.mxu1 %v915_v3  ;;  %949 = vmatpush.bf16.msra.mxu3 %v915_v3  ;;  %v796_v16 = vld [vmem:[%s1116_s9] sm:$0xf]  ;;  %v894_v17 = vld [vmem:[%s1116_s9 + $0x4] sm:$0xf0]  ;;  %v893_v20 = vld [vmem:[%s1116_s9 + $0x4] sm:$0xf]  ;;  %s301_s25 = scalar_lea.vmem %s1169_s5, %s1177_s18 }
  0x16   : > { %v812_v18 = vld [vmem:[%s1116_s9 + $0x20] sm:$0xf]  ;;  %v898_v19 = vld [vmem:[%s1116_s9 + $0x24] sm:$0xf0]  ;;  %v798_v21 = vld [vmem:[%s1116_s9 + $0x8] sm:$0xf0]  ;;  %v797_v24 = vor.u32 %v894_v17, %v796_v16 }
  0x17   : > { %v897_v22 = vld [vmem:[%s1116_s9 + $0x24] sm:$0xf]  ;;  %v814_v23 = vld [vmem:[%s1116_s9 + $0x28] sm:$0xf0]  ;;  %v813_v25 = vor.u32 %v898_v19, %v812_v18  ;;  %v801_v26 = vor.u32 %v893_v20, %v798_v21  ;;  %v804_v28 = vld [vmem:[%s1116_s9 + $0x10] sm:$0xf] }
  0x18   : > { %500 = vmatpush.bf16.msra.mxu0 %v906_v4  ;;  %942 = vmatpush.bf16.msra.mxu2 %v906_v4  ;;  %v817_v27 = vor.u32 %v897_v22, %v814_v23  ;;  %v896_v29 = vld [vmem:[%s1116_s9 + $0x14] sm:$0xf0]  ;;  %v820_v30 = vld [vmem:[%s1116_s9 + $0x30] sm:$0xf]  ;;  %v895_v32 = vld [vmem:[%s1116_s9 + $0x14] sm:$0xf] }
  0x19   : > { %529 = vmatpush.bf16.msra.mxu1 %v914_v5  ;;  %950 = vmatpush.bf16.msra.mxu3 %v914_v5  ;;  %v900_v31 = vld [vmem:[%s1116_s9 + $0x34] sm:$0xf0]  ;;  %v806_v33 = vld [vmem:[%s1116_s9 + $0x18] sm:$0xf0]  ;;  %v899_v34 = vld [vmem:[%s1116_s9 + $0x34] sm:$0xf]  ;;  %v805_v36 = vor.u32 %v896_v29, %v804_v28 }
  0x1a   : > { %v822_v35 = vld [vmem:[%s1116_s9 + $0x38] sm:$0xf0]  ;;  %v821_v37 = vor.u32 %v900_v31, %v820_v30  ;;  %v809_v38 = vor.u32 %v895_v32, %v806_v33  ;;  %v993_v45 = vld [vmem:[%s1166_s2] ss:$0 sm:$0xff] }
  0x1b   : > { %v825_v39 = vor.u32 %v899_v34, %v822_v35 }
  0x1c   : > { %501 = vmatpush.bf16.msra.mxu0 %v905_v6  ;;  %943 = vmatpush.bf16.msra.mxu2 %v905_v6 }
  0x1d   : > { %530 = vmatpush.bf16.msra.mxu1 %v913_v7  ;;  %951 = vmatpush.bf16.msra.mxu3 %v913_v7 }
  0x20   : > { %502 = vmatpush.bf16.msra.mxu0 %v904_v8  ;;  %944 = vmatpush.bf16.msra.mxu2 %v904_v8 }
  0x21   : > { %531 = vmatpush.bf16.msra.mxu1 %v912_v9  ;;  %952 = vmatpush.bf16.msra.mxu3 %v912_v9 }
  0x24   : > { %503 = vmatpush.bf16.msra.mxu0 %v903_v10  ;;  %945 = vmatpush.bf16.msra.mxu2 %v903_v10 }
  0x25   : > { %532 = vmatpush.bf16.msra.mxu1 %v911_v11  ;;  %953 = vmatpush.bf16.msra.mxu3 %v911_v11 }
  0x28   : > { %504 = vmatpush.bf16.msra.mxu0 %v902_v12  ;;  %946 = vmatpush.bf16.msra.mxu2 %v902_v12 }
  0x29   : > { %533 = vmatpush.bf16.msra.mxu1 %v910_v13  ;;  %954 = vmatpush.bf16.msra.mxu3 %v910_v13 }
  0x2c   : > { %505 = vmatpush.bf16.msra.mxu0 %v901_v14  ;;  %947 = vmatpush.bf16.msra.mxu2 %v901_v14 }
  0x2d   : > { %534 = vmatpush.bf16.msra.mxu1 %v909_v15  ;;  %955 = vmatpush.bf16.msra.mxu3 %v909_v15 }
  0x2f   : > { %506 = vmatmul.bf16.vlgmr.msra.gmra.mxu0 %v797_v24  ;;  %516 = vmatmul.bf16.vlgmr.msra.gmra.mxu2 %v813_v25 }
  0x30   : > { %535 = vmatmul.bf16.vlgmr.msra.gmra.mxu1 %v801_v26  ;;  %545 = vmatmul.bf16.vlgmr.msra.gmra.mxu3 %v817_v27 }
  0x3f   : > { %511 = vmatmul.bf16.gmra.mxu0 %v805_v36  ;;  %521 = vmatmul.bf16.gmra.mxu2 %v821_v37 }
  0x40   : > { %540 = vmatmul.bf16.gmra.mxu1 %v809_v38  ;;  %550 = vmatmul.bf16.gmra.mxu3 %v825_v39 }
  0xac   : > { %v507_v40 = vpop.f32.mrf.mxu0 }
  0xad   : > { %v536_v41 = vpop.f32.mrf.mxu1 }
  0xae   : > { %v537_v44 = vadd.f32 %v536_v41, %v507_v40 }
  0xb0   : > { %v587_v49 = vadd.f32 %v993_v45, %v537_v44  ;;  %v625_v1 = vmul.f32 %v537_v44, %v537_v44 }
  0xb2   : > { %v517_v42 = vpop.f32.mrf.mxu2 }
  0xb3   : > { %v546_v43 = vpop.f32.mrf.mxu3 }
  0xb4   : > { %v509_v46 = vpop.f32.mrf.mxu0  ;;  %v547_v51 = vadd.f32 %v546_v43, %v517_v42 }
  0xb5   : > { %v538_v47 = vpop.f32.mrf.mxu1 }
  0xb6   : > { %v539_v48 = vadd.f32 %v538_v47, %v509_v46  ;;  %v591_v58 = vadd.f32 %v993_v45, %v547_v51  ;;  %v629_v15 = vmul.f32 %v547_v51, %v547_v51 }
  0xb8   : > { %v588_v50 = vadd.f32 %v993_v45, %v539_v48  ;;  %v626_v62 = vmul.f32 %v539_v48, %v539_v48  ;;  %v611_v2 = vadd.f32 %v539_v48, %v537_v44 }
  0xba   : > { %v920_v52 = vpack.c.bf16 %v588_v50, %v587_v49  ;;  %v519_v53 = vpop.f32.mrf.mxu2  ;;  %v633_v6 = vadd.f32 %v626_v62, %v625_v1 }
  0xbb   : > { %v548_v54 = vpop.f32.mrf.mxu3 }
  0xbc   : > { %921 = vst [vmem:[%s1141_s15] sm:$0xff] %v920_v52   ;;  %v549_v55 = vadd.f32 %v548_v54, %v519_v53  ;;  %v512_v56 = vpop.f32.mrf.mxu0 }
  0xbd   : > { %v541_v57 = vpop.f32.mrf.mxu1 }
  0xbe   : > { %v592_v59 = vadd.f32 %v993_v45, %v549_v55  ;;  %v542_v61 = vadd.f32 %v541_v57, %v512_v56  ;;  %v630_v21 = vmul.f32 %v549_v55, %v549_v55 }
  0xc0   : > { %v930_v60 = vpack.c.bf16 %v592_v59, %v591_v58  ;;  %v627_v3 = vmul.f32 %v542_v61, %v542_v61  ;;  %v612_v7 = vadd.f32 %v611_v2, %v542_v61  ;;  %v589_v9 = vadd.f32 %v993_v45, %v542_v61 }
  0xc2   : > { %938 = vst [vmem:[%s1141_s15 + $0x10] sm:$0xff] %v930_v60   ;;  %v522_v63 = vpop.f32.mrf.mxu2  ;;  %v634_v10 = vadd.f32 %v633_v6, %v627_v3 }
  0xc3   : > { %v551_v0 = vpop.f32.mrf.mxu3 }
  0xc4   : > { %v514_v4 = vpop.f32.mrf.mxu0  ;;  %v552_v14 = vadd.f32 %v551_v0, %v522_v63 }
  0xc5   : > { %v543_v5 = vpop.f32.mrf.mxu1 }
  0xc6   : > { %v544_v8 = vadd.f32 %v543_v5, %v514_v4  ;;  %v593_v25 = vadd.f32 %v993_v45, %v552_v14  ;;  %v631_v26 = vmul.f32 %v552_v14, %v552_v14 }
  0xc8   : > { %v590_v11 = vadd.f32 %v993_v45, %v544_v8  ;;  %v613_v12 = vadd.f32 %v612_v7, %v544_v8  ;;  %v628_v13 = vmul.f32 %v544_v8, %v544_v8 }
  0xca   : > { %v925_v16 = vpack.c.bf16 %v590_v11, %v589_v9  ;;  %v614_v17 = vadd.f32 %v613_v12, %v547_v51  ;;  %v635_v18 = vadd.f32 %v634_v10, %v628_v13  ;;  %v524_v19 = vpop.f32.mrf.mxu2 }
  0xcb   : > { %v553_v20 = vpop.f32.mrf.mxu3 }
  0xcc   : > { %937 = vst [vmem:[%s1141_s15 + $0x8] sm:$0xff] %v925_v16   ;;  %v636_v22 = vadd.f32 %v635_v18, %v629_v15  ;;  %v554_v23 = vadd.f32 %v553_v20, %v524_v19  ;;  %v615_v24 = vadd.f32 %v614_v17, %v549_v55 }
  0xce   : > { %v594_v27 = vadd.f32 %v993_v45, %v554_v23  ;;  %v616_v28 = vadd.f32 %v615_v24, %v552_v14  ;;  %v637_v29 = vadd.f32 %v636_v22, %v630_v21  ;;  %v632_v32 = vmul.f32 %v554_v23, %v554_v23 }
  0xd0   : > { %v935_v30 = vpack.c.bf16 %v594_v27, %v593_v25  ;;  %v617_v31 = vadd.f32 %v616_v28, %v554_v23  ;;  %v638_v33 = vadd.f32 %v637_v29, %v631_v26 }
  0xd2   : > { %939 = vst [vmem:[%s1141_s15 + $0x18] sm:$0xff] %v935_v30   ;;  %v618_v34 = vrot.slane %v617_v31, 4  ;;  %v639_v35 = vadd.f32 %v638_v33, %v632_v32 }
  0xd4   : > { %v619_v36 = vadd.f32 %v618_v34, %v617_v31  ;;  %v640_v37 = vrot.slane %v639_v35, 4 }
  0xd6   : > { %v620_v38 = vrot.slane %v619_v36, 2  ;;  %v641_v39 = vadd.f32 %v640_v37, %v639_v35 }
  0xd8   : > { %v621_v40 = vadd.f32 %v620_v38, %v619_v36  ;;  %v642_v41 = vrot.slane %v641_v39, 2 }
  0xda   : > { %v622_v42 = vrot.slane %v621_v40, 1  ;;  %v643_v43 = vadd.f32 %v642_v41, %v641_v39 }
  0xdc   : > { %v623_v44 = vadd.f32 %v622_v42, %v621_v40  ;;  %v644_v45 = vrot.slane %v643_v43, 1 }
  0xde   : > { %624 = vst [vmem:[%s298_s21] sm:$0x1] %v623_v44  ;;  %v645_v46 = vadd.f32 %v644_v45, %v643_v43 }
  0xe0   : > { %646 = vst [vmem:[%s301_s25] sm:$0x1] %v645_v46 }
  0xe1 PF: > { %s17_s20 = sadd.s32 1, %s1050_s20   ;;  %s1170_s18 = smov %s1046_s19 }
  0xe2   : > { %p14_p9 = scmp.ge.s32.totalorder %s17_s20, 6   ;;  %s1171_s19 = smov %s1173_s22 }
  0xe4   :  { %16 = sbr.rel (!%p14_p9) target bundleno = 2 (0x2), region = 100 }
  0xe9   :  { %693 = vsyncpa [#allocation4], 1 }
  0xea   :  { %695 = vsyncpa [#allocation4 + $0x1], 1 }

// kernel: tile.113
= control target key start
LH: loop header
LB: loop body
LE: loop exit
PB: predicated region body
PF: predicated region fallthrough
CT: control target
= control target key end

     0   :  { %s22_s0 = inlined_call_operand.vmem [shape: f32[32], index: 0, kind: input, shape index: {}]   ;;  %s23_s1 = inlined_call_operand.vmem [shape: f32[4,32], index: 1, kind: output, shape index: {}]  }
   0x1   :  { %v4_v0 = vld [vmem:[%s22_s0] ss:$0 sm:$0xff] }
   0x2   :  { %5 = vst [vmem:[%s23_s1] sm:$0xf] %v4_v0 }

// kernel: a_call__.16
= control target key start
LH: loop header
LB: loop body
LE: loop exit
PB: predicated region body
PF: predicated region fallthrough
CT: control target
= control target key end

     0   :  { %s680_s0 = inlined_call_operand.vmem [shape: bf16[256,128], index: 0, kind: input, shape index: {}]   ;;  %s681_s1 = inlined_call_operand.vmem [shape: f32[1,128], index: 1, kind: input, shape index: {}]   ;;  %s682_s2 = inlined_call_operand.vmem [shape: f32[1,128], index: 2, kind: input, shape index: {}]   ;;  %s683_s3 = inlined_call_operand.vmem [shape: bf16[256,128], index: 3, kind: output, shape index: {}]  }
   0x1   :  { %v315_v0 = vld [vmem:[%s680_s0] sm:$0xff]   ;;  %v458_v5 = vld [vmem:[%s680_s0 + $0x8] sm:$0xff]   ;;  %v459_v8 = vld [vmem:[%s680_s0 + $0x10] sm:$0xff]  }
   0x2   :  { %v516_v1 = vld [vmem:[%s681_s1] ss:$0 sm:$0xff]  ;;  %v316_v2 = vunpack.c.l.bf16 %v315_v0  ;;  %v317_v3 = vunpack.c.h.bf16 %v315_v0  ;;  %v320_v6 = vunpack.c.l.bf16 %v458_v5  ;;  %v321_v7 = vunpack.c.h.bf16 %v458_v5  ;;  %v460_v9 = vld [vmem:[%s680_s0 + $0x18] sm:$0xff]   ;;  %v462_v39 = vld [vmem:[%s680_s0 + $0x28] sm:$0xff]  }
   0x3   :  { %v521_v4 = vld [vmem:[%s682_s2] ss:$0 sm:$0xff]  ;;  %v324_v12 = vunpack.c.l.bf16 %v459_v8  ;;  %v325_v13 = vunpack.c.h.bf16 %v459_v8  ;;  %v328_v16 = vunpack.c.l.bf16 %v460_v9  ;;  %v329_v17 = vunpack.c.h.bf16 %v460_v9  ;;  %v463_v49 = vld [vmem:[%s680_s0 + $0x30] sm:$0xff]   ;;  %v464_v57 = vld [vmem:[%s680_s0 + $0x38] sm:$0xff]  }
   0x4   :  { %v82_v10 = vmul.f32 %v516_v1, %v316_v2  ;;  %v83_v11 = vmul.f32 %v516_v1, %v317_v3  ;;  %v84_v14 = vmul.f32 %v516_v1, %v320_v6  ;;  %v85_v15 = vmul.f32 %v516_v1, %v321_v7  ;;  %v461_v38 = vld [vmem:[%s680_s0 + $0x20] sm:$0xff]  }
   0x5   :  { %v86_v20 = vmul.f32 %v516_v1, %v324_v12  ;;  %v87_v21 = vmul.f32 %v516_v1, %v325_v13  ;;  %v88_v24 = vmul.f32 %v516_v1, %v328_v16  ;;  %v89_v25 = vmul.f32 %v516_v1, %v329_v17 }
   0x6   :  { %v118_v18 = vadd.f32 %v521_v4, %v82_v10  ;;  %v119_v19 = vadd.f32 %v521_v4, %v83_v11  ;;  %v120_v22 = vadd.f32 %v521_v4, %v84_v14  ;;  %v121_v23 = vadd.f32 %v521_v4, %v85_v15 }
   0x7   :  { %v122_v32 = vadd.f32 %v521_v4, %v86_v20  ;;  %v123_v33 = vadd.f32 %v521_v4, %v87_v21  ;;  %v124_v37 = vadd.f32 %v521_v4, %v88_v24  ;;  %v125_v43 = vadd.f32 %v521_v4, %v89_v25  ;;  %v466_v20 = vld [vmem:[%s680_s0 + $0x48] sm:$0xff]  }
   0x8   :  { %vm150_vm0 = vcmp.ge.f32.partialorder %v118_v18, 0.0  ;;  %vm151_vm1 = vcmp.ge.f32.partialorder %v119_v19, 0.0  ;;  %v182_v26 = vmul.f32 0.2, %v118_v18  ;;  %v183_v27 = vmul.f32 0.2, %v119_v19 }
   0x9   :  { %vm152_vm2 = vcmp.ge.f32.partialorder %v120_v22, 0.0  ;;  %vm153_vm3 = vcmp.ge.f32.partialorder %v121_v23, 0.0  ;;  %v184_v28 = vmul.f32 0.2, %v120_v22  ;;  %v185_v29 = vmul.f32 0.2, %v121_v23 }
   0xa   :  { %v214_v30 = vsel %vm150_vm0, %v118_v18, %v182_v26  ;;  %v215_v31 = vsel %vm151_vm1, %v119_v19, %v183_v27  ;;  %vm154_vm4 = vcmp.ge.f32.partialorder %v122_v32, 0.0  ;;  %vm155_vm5 = vcmp.ge.f32.partialorder %v123_v33, 0.0  ;;  %v465_v19 = vld [vmem:[%s680_s0 + $0x40] sm:$0xff]  }
   0xb   :  { %v381_v34 = vpack.c.bf16 %v215_v31, %v214_v30  ;;  %v216_v35 = vsel %vm152_vm2, %v120_v22, %v184_v28  ;;  %v217_v36 = vsel %vm153_vm3, %v121_v23, %v185_v29  ;;  %v186_v41 = vmul.f32 0.2, %v122_v32  ;;  %v467_v28 = vld [vmem:[%s680_s0 + $0x50] sm:$0xff]  }
   0xc   :  { %v386_v40 = vpack.c.bf16 %v217_v36, %v216_v35  ;;  %v187_v42 = vmul.f32 0.2, %v123_v33  ;;  %vm156_vm6 = vcmp.ge.f32.partialorder %v124_v37, 0.0  ;;  %v188_v44 = vmul.f32 0.2, %v124_v37 }
   0xd   :  { %382 = vst [vmem:[%s683_s3] sm:$0xff] %v381_v34   ;;  %v218_v45 = vsel %vm154_vm4, %v122_v32, %v186_v41  ;;  %v332_v46 = vunpack.c.l.bf16 %v461_v38  ;;  %v333_v47 = vunpack.c.h.bf16 %v461_v38  ;;  %v336_v48 = vunpack.c.l.bf16 %v462_v39 }
   0xe   :  { %473 = vst [vmem:[%s683_s3 + $0x8] sm:$0xff] %v386_v40   ;;  %v219_v50 = vsel %vm155_vm5, %v123_v33, %v187_v42  ;;  %vm157_vm7 = vcmp.ge.f32.partialorder %v125_v43, 0.0  ;;  %v189_v51 = vmul.f32 0.2, %v125_v43  ;;  %v220_v52 = vsel %vm156_vm6, %v124_v37, %v188_v44 }
   0xf   :  { %v391_v53 = vpack.c.bf16 %v219_v50, %v218_v45  ;;  %v90_v54 = vmul.f32 %v516_v1, %v332_v46  ;;  %v91_v55 = vmul.f32 %v516_v1, %v333_v47  ;;  %v337_v56 = vunpack.c.h.bf16 %v462_v39 }
  0x10   :  { %v221_v58 = vsel %vm157_vm7, %v125_v43, %v189_v51  ;;  %v92_v59 = vmul.f32 %v516_v1, %v336_v48  ;;  %v340_v60 = vunpack.c.l.bf16 %v463_v49  ;;  %v341_v61 = vunpack.c.h.bf16 %v463_v49 }
  0x11   :  { %474 = vst [vmem:[%s683_s3 + $0x10] sm:$0xff] %v391_v53   ;;  %v396_v62 = vpack.c.bf16 %v221_v58, %v220_v52  ;;  %v126_v63 = vadd.f32 %v521_v4, %v90_v54  ;;  %v127_v0 = vadd.f32 %v521_v4, %v91_v55  ;;  %v93_v2 = vmul.f32 %v516_v1, %v337_v56  ;;  %v468_v55 = vld [vmem:[%s680_s0 + $0x58] sm:$0xff]   ;;  %v469_v56 = vld [vmem:[%s680_s0 + $0x60] sm:$0xff]  }
  0x12   :  { %v128_v3 = vadd.f32 %v521_v4, %v92_v59  ;;  %v94_v5 = vmul.f32 %v516_v1, %v340_v60  ;;  %v95_v6 = vmul.f32 %v516_v1, %v341_v61  ;;  %v344_v7 = vunpack.c.l.bf16 %v464_v57 }
  0x13   :  { %475 = vst [vmem:[%s683_s3 + $0x18] sm:$0xff] %v396_v62   ;;  %vm158_vm8 = vcmp.ge.f32.partialorder %v126_v63, 0.0  ;;  %vm159_vm9 = vcmp.ge.f32.partialorder %v127_v0, 0.0  ;;  %v190_v8 = vmul.f32 0.2, %v126_v63  ;;  %v129_v9 = vadd.f32 %v521_v4, %v93_v2  ;;  %v470_v2 = vld [vmem:[%s680_s0 + $0x68] sm:$0xff]  }
  0x14   :  { %v191_v10 = vmul.f32 0.2, %v127_v0  ;;  %vm160_vm10 = vcmp.ge.f32.partialorder %v128_v3, 0.0  ;;  %v192_v11 = vmul.f32 0.2, %v128_v3  ;;  %v130_v12 = vadd.f32 %v521_v4, %v94_v5 }
  0x15   :  { %v222_v13 = vsel %vm158_vm8, %v126_v63, %v190_v8  ;;  %vm161_vm11 = vcmp.ge.f32.partialorder %v129_v9, 0.0  ;;  %v193_v14 = vmul.f32 0.2, %v129_v9  ;;  %v131_v15 = vadd.f32 %v521_v4, %v95_v6 }
  0x16   :  { %v223_v16 = vsel %vm159_vm9, %v127_v0, %v191_v10  ;;  %v224_v17 = vsel %vm160_vm10, %v128_v3, %v192_v11  ;;  %vm162_vm12 = vcmp.ge.f32.partialorder %v130_v12, 0.0  ;;  %v194_v18 = vmul.f32 0.2, %v130_v12 }
  0x17   :  { %v401_v21 = vpack.c.bf16 %v223_v16, %v222_v13  ;;  %v225_v22 = vsel %vm161_vm11, %v129_v9, %v193_v14  ;;  %vm163_vm13 = vcmp.ge.f32.partialorder %v131_v15, 0.0  ;;  %v195_v23 = vmul.f32 0.2, %v131_v15 }
  0x18   :  { %v406_v24 = vpack.c.bf16 %v225_v22, %v224_v17  ;;  %v226_v25 = vsel %vm162_vm12, %v130_v12, %v194_v18  ;;  %v345_v26 = vunpack.c.h.bf16 %v464_v57  ;;  %v96_v27 = vmul.f32 %v516_v1, %v344_v7 }
  0x19   :  { %476 = vst [vmem:[%s683_s3 + $0x20] sm:$0xff] %v401_v21   ;;  %v227_v29 = vsel %vm163_vm13, %v131_v15, %v195_v23  ;;  %v348_v30 = vunpack.c.l.bf16 %v465_v19  ;;  %v349_v31 = vunpack.c.h.bf16 %v465_v19  ;;  %v352_v32 = vunpack.c.l.bf16 %v466_v20 }
  0x1a   :  { %477 = vst [vmem:[%s683_s3 + $0x28] sm:$0xff] %v406_v24   ;;  %v411_v33 = vpack.c.bf16 %v227_v29, %v226_v25  ;;  %v97_v34 = vmul.f32 %v516_v1, %v345_v26  ;;  %v132_v35 = vadd.f32 %v521_v4, %v96_v27  ;;  %v353_v36 = vunpack.c.h.bf16 %v466_v20 }
  0x1b   :  { %v98_v37 = vmul.f32 %v516_v1, %v348_v30  ;;  %v99_v38 = vmul.f32 %v516_v1, %v349_v31  ;;  %v100_v39 = vmul.f32 %v516_v1, %v352_v32  ;;  %v356_v40 = vunpack.c.l.bf16 %v467_v28 }
  0x1c   :  { %478 = vst [vmem:[%s683_s3 + $0x30] sm:$0xff] %v411_v33   ;;  %v133_v41 = vadd.f32 %v521_v4, %v97_v34  ;;  %vm164_vm14 = vcmp.ge.f32.partialorder %v132_v35, 0.0  ;;  %v196_v42 = vmul.f32 0.2, %v132_v35  ;;  %v101_v43 = vmul.f32 %v516_v1, %v353_v36 }
  0x1d   :  { %v134_v44 = vadd.f32 %v521_v4, %v98_v37  ;;  %v135_v45 = vadd.f32 %v521_v4, %v99_v38  ;;  %v136_v46 = vadd.f32 %v521_v4, %v100_v39  ;;  %v357_v47 = vunpack.c.h.bf16 %v467_v28  ;;  %v471_v28 = vld [vmem:[%s680_s0 + $0x70] sm:$0xff]   ;;  %v472_v39 = vld [vmem:[%s680_s0 + $0x78] sm:$0xff]  }
  0x1e   :  { %vm165_vm15 = vcmp.ge.f32.partialorder %v133_v41, 0.0  ;;  %v197_v48 = vmul.f32 0.2, %v133_v41  ;;  %v228_v49 = vsel %vm164_vm14, %v132_v35, %v196_v42  ;;  %v137_v50 = vadd.f32 %v521_v4, %v101_v43 }
  0x1f   :  { %vm166_vm0 = vcmp.ge.f32.partialorder %v134_v44, 0.0  ;;  %vm167_vm1 = vcmp.ge.f32.partialorder %v135_v45, 0.0  ;;  %v198_v51 = vmul.f32 0.2, %v134_v44  ;;  %v199_v52 = vmul.f32 0.2, %v135_v45 }
  0x20   :  { %v229_v53 = vsel %vm165_vm15, %v133_v41, %v197_v48  ;;  %vm168_vm2 = vcmp.ge.f32.partialorder %v136_v46, 0.0  ;;  %vm169_vm3 = vcmp.ge.f32.partialorder %v137_v50, 0.0  ;;  %v200_v54 = vmul.f32 0.2, %v136_v46 }
  0x21   :  { %v416_v57 = vpack.c.bf16 %v229_v53, %v228_v49  ;;  %v230_v58 = vsel %vm166_vm0, %v134_v44, %v198_v51  ;;  %v231_v59 = vsel %vm167_vm1, %v135_v45, %v199_v52  ;;  %v201_v60 = vmul.f32 0.2, %v137_v50 }
  0x22   :  { %v421_v61 = vpack.c.bf16 %v231_v59, %v230_v58  ;;  %v232_v62 = vsel %vm168_vm2, %v136_v46, %v200_v54  ;;  %v102_v63 = vmul.f32 %v516_v1, %v356_v40  ;;  %v103_v0 = vmul.f32 %v516_v1, %v357_v47 }
  0x23   :  { %479 = vst [vmem:[%s683_s3 + $0x38] sm:$0xff] %v416_v57   ;;  %v233_v3 = vsel %vm169_vm3, %v137_v50, %v201_v60  ;;  %v360_v5 = vunpack.c.l.bf16 %v468_v55  ;;  %v361_v6 = vunpack.c.h.bf16 %v468_v55  ;;  %v364_v7 = vunpack.c.l.bf16 %v469_v56 }
  0x24   :  { %480 = vst [vmem:[%s683_s3 + $0x40] sm:$0xff] %v421_v61   ;;  %v426_v8 = vpack.c.bf16 %v233_v3, %v232_v62  ;;  %v138_v9 = vadd.f32 %v521_v4, %v102_v63  ;;  %v139_v10 = vadd.f32 %v521_v4, %v103_v0  ;;  %v365_v11 = vunpack.c.h.bf16 %v469_v56 }
  0x25   :  { %v104_v12 = vmul.f32 %v516_v1, %v360_v5  ;;  %v105_v13 = vmul.f32 %v516_v1, %v361_v6  ;;  %v106_v14 = vmul.f32 %v516_v1, %v364_v7  ;;  %v368_v15 = vunpack.c.l.bf16 %v470_v2 }
  0x26   :  { %481 = vst [vmem:[%s683_s3 + $0x48] sm:$0xff] %v426_v8   ;;  %vm170_vm4 = vcmp.ge.f32.partialorder %v138_v9, 0.0  ;;  %vm171_vm5 = vcmp.ge.f32.partialorder %v139_v10, 0.0  ;;  %v202_v16 = vmul.f32 0.2, %v138_v9  ;;  %v107_v17 = vmul.f32 %v516_v1, %v365_v11 }
  0x27   :  { %v203_v18 = vmul.f32 0.2, %v139_v10  ;;  %v140_v19 = vadd.f32 %v521_v4, %v104_v12  ;;  %v141_v20 = vadd.f32 %v521_v4, %v105_v13  ;;  %v142_v21 = vadd.f32 %v521_v4, %v106_v14 }
  0x28   :  { %v234_v22 = vsel %vm170_vm4, %v138_v9, %v202_v16  ;;  %v143_v23 = vadd.f32 %v521_v4, %v107_v17  ;;  %v369_v24 = vunpack.c.h.bf16 %v470_v2  ;;  %v108_v25 = vmul.f32 %v516_v1, %v368_v15 }
  0x29   :  { %v235_v26 = vsel %vm171_vm5, %v139_v10, %v203_v18  ;;  %vm172_vm6 = vcmp.ge.f32.partialorder %v140_v19, 0.0  ;;  %vm173_vm7 = vcmp.ge.f32.partialorder %v141_v20, 0.0  ;;  %v204_v27 = vmul.f32 0.2, %v140_v19 }
  0x2a   :  { %v431_v29 = vpack.c.bf16 %v235_v26, %v234_v22  ;;  %v205_v30 = vmul.f32 0.2, %v141_v20  ;;  %vm174_vm8 = vcmp.ge.f32.partialorder %v142_v21, 0.0  ;;  %vm175_vm9 = vcmp.ge.f32.partialorder %v143_v23, 0.0 }
  0x2b   :  { %v236_v31 = vsel %vm172_vm6, %v140_v19, %v204_v27  ;;  %v206_v32 = vmul.f32 0.2, %v142_v21  ;;  %v207_v33 = vmul.f32 0.2, %v143_v23  ;;  %v109_v34 = vmul.f32 %v516_v1, %v369_v24 }
  0x2c   :  { %482 = vst [vmem:[%s683_s3 + $0x50] sm:$0xff] %v431_v29   ;;  %v237_v35 = vsel %vm173_vm7, %v141_v20, %v205_v30  ;;  %v144_v36 = vadd.f32 %v521_v4, %v108_v25  ;;  %v372_v37 = vunpack.c.l.bf16 %v471_v28  ;;  %v373_v38 = vunpack.c.h.bf16 %v471_v28 }
  0x2d   :  { %v436_v40 = vpack.c.bf16 %v237_v35, %v236_v31  ;;  %v238_v41 = vsel %vm174_vm8, %v142_v21, %v206_v32  ;;  %v239_v42 = vsel %vm175_vm9, %v143_v23, %v207_v33  ;;  %v145_v43 = vadd.f32 %v521_v4, %v109_v34 }
  0x2e   :  { %v441_v44 = vpack.c.bf16 %v239_v42, %v238_v41  ;;  %vm176_vm10 = vcmp.ge.f32.partialorder %v144_v36, 0.0  ;;  %v208_v45 = vmul.f32 0.2, %v144_v36  ;;  %v110_v46 = vmul.f32 %v516_v1, %v372_v37 }
  0x2f   :  { %483 = vst [vmem:[%s683_s3 + $0x58] sm:$0xff] %v436_v40   ;;  %vm177_vm11 = vcmp.ge.f32.partialorder %v145_v43, 0.0  ;;  %v209_v47 = vmul.f32 0.2, %v145_v43  ;;  %v111_v48 = vmul.f32 %v516_v1, %v373_v38  ;;  %v376_v49 = vunpack.c.l.bf16 %v472_v39 }
  0x30   :  { %484 = vst [vmem:[%s683_s3 + $0x60] sm:$0xff] %v441_v44   ;;  %v240_v50 = vsel %vm176_vm10, %v144_v36, %v208_v45  ;;  %v146_v51 = vadd.f32 %v521_v4, %v110_v46  ;;  %v377_v52 = vunpack.c.h.bf16 %v472_v39 }
  0x31   :  { %v241_v53 = vsel %vm177_vm11, %v145_v43, %v209_v47  ;;  %v147_v54 = vadd.f32 %v521_v4, %v111_v48  ;;  %v112_v55 = vmul.f32 %v516_v1, %v376_v49 }
  0x32   :  { %v446_v56 = vpack.c.bf16 %v241_v53, %v240_v50  ;;  %vm178_vm12 = vcmp.ge.f32.partialorder %v146_v51, 0.0  ;;  %v210_v57 = vmul.f32 0.2, %v146_v51  ;;  %v113_v58 = vmul.f32 %v516_v1, %v377_v52 }
  0x33   :  { %vm179_vm13 = vcmp.ge.f32.partialorder %v147_v54, 0.0  ;;  %v211_v59 = vmul.f32 0.2, %v147_v54  ;;  %v148_v60 = vadd.f32 %v521_v4, %v112_v55 }
  0x34   :  { %485 = vst [vmem:[%s683_s3 + $0x68] sm:$0xff] %v446_v56   ;;  %v242_v61 = vsel %vm178_vm12, %v146_v51, %v210_v57  ;;  %v149_v62 = vadd.f32 %v521_v4, %v113_v58 }
  0x35   :  { %v243_v63 = vsel %vm179_vm13, %v147_v54, %v211_v59  ;;  %vm180_vm14 = vcmp.ge.f32.partialorder %v148_v60, 0.0  ;;  %v212_v0 = vmul.f32 0.2, %v148_v60 }
  0x36   :  { %v451_v2 = vpack.c.bf16 %v243_v63, %v242_v61  ;;  %vm181_vm15 = vcmp.ge.f32.partialorder %v149_v62, 0.0  ;;  %v213_v3 = vmul.f32 0.2, %v149_v62 }
  0x37   :  { %v244_v5 = vsel %vm180_vm14, %v148_v60, %v212_v0 }
  0x38   :  { %486 = vst [vmem:[%s683_s3 + $0x70] sm:$0xff] %v451_v2   ;;  %v245_v1 = vsel %vm181_vm15, %v149_v62, %v213_v3 }
  0x39   :  { %v456_v6 = vpack.c.bf16 %v245_v1, %v244_v5 }
  0x3b   :  { %487 = vst [vmem:[%s683_s3 + $0x78] sm:$0xff] %v456_v6  }

// kernel: a_call__.17
= control target key start
LH: loop header
LB: loop body
LE: loop exit
PB: predicated region body
PF: predicated region fallthrough
CT: control target
= control target key end

     0   :  { %s1384_s18 = smov 0   ;;  %s1386_s19 = smov 0   ;;  %s1888_s0 = inlined_call_operand.vmem [shape: bf16[1280,128], index: 0, kind: input, shape index: {}]   ;;  %s1889_s1 = inlined_call_operand.vmem [shape: bf16[128,64], index: 1, kind: input, shape index: {}]   ;;  %s1890_s2 = inlined_call_operand.vmem [shape: f32[1,64], index: 2, kind: input, shape index: {}]   ;;  %s1891_s3 = inlined_call_operand.vmem [shape: bf16[1280,64], index: 3, kind: output, shape index: {0}]   ;;  %s1892_s4 = inlined_call_operand.vmem [shape: f32[5,1,64], index: 4, kind: output, shape index: {1}]   ;;  %s1893_s5 = inlined_call_operand.vmem [shape: f32[5,1,64], index: 5, kind: output, shape index: {2}]  }
   0x1   :  { %s1388_s20 = smov 0  }
   0x2 LB: > { %s28_s21 = sadd.s32 1, %s1347_s19  ;;  %p1152_p0 = scmp.ge.s32.totalorder %s1351_s20, 1  ;;  %s1351_s20 = sphi %s1388_s20, %s16_s20   ;;  %s1347_s19 = sphi %s1386_s19, %s1895_s19   ;;  %s1343_s18 = sphi %s1384_s18, %s1894_s18  }
   0x3   : > { %p30_p1 = scmp.ge.s32.totalorder %s28_s21, 5  ;;  %p221_p2 = scmp.lt.s32.totalorder %s1351_s20, 6 }
   0x5   : > { %s1897_s21 = smov (%p30_p1, %s28_s21), 0  ;;  %p222_p3 = pnand %p1152_p0, %p221_p2 }
   0x6   : > { %s1153_s30 = sshll.u32 (!%p222_p3), %s1343_s18, 5  ;;  %p284_p5 = scmp.lt.s32.totalorder (!%p222_p3), %s1343_s18, 4 }
   0x7   : > { %225 = sbr.rel (%p222_p3) target bundleno = 302 (0x12e), region = 32  ;;  %p264_p4 = scmp.lt.s32.totalorder (!%p222_p3), %s1153_s30, 159 }
   0xc   : > { %v1278_v0 = vld [vmem:[%s1889_s1 + $0x38] sm:$0xff]  ;;  %v1277_v1 = vld [vmem:[%s1889_s1 + $0x30] sm:$0xff]  ;;  %v1276_v2 = vld [vmem:[%s1889_s1 + $0x28] sm:$0xff]  ;;  %s1899_s30 = smov (!%p264_p4, %s1153_s30), 159  ;;  %vm294_vm0 = vcmask 523264   ;;  %v1353_v16 = vmov 0.0  }
   0xd   : > { %551 = vmatpush.bf16.msra.mxu0 %v1278_v0  ;;  %1279 = vmatpush.bf16.msra.mxu1 %v1278_v0  ;;  %v1275_v3 = vld [vmem:[%s1889_s1 + $0x20] sm:$0xff]  ;;  %v1274_v4 = vld [vmem:[%s1889_s1 + $0x18] sm:$0xff]  ;;  %v1273_v5 = vld [vmem:[%s1889_s1 + $0x10] sm:$0xff]  ;;  %s1154_s12 = sshll.u32 %s1899_s30, 2  ;;  %295 = vst.msk [vmem:[#allocation2] sm:$0xff] %vm294_vm0, %v1353_v16  ;;  %vm808_vm1 = vcmask 519168  }
   0xe   : > { %1280 = vmatpush.bf16.msra.mxu2 %v1278_v0  ;;  %1281 = vmatpush.bf16.msra.mxu3 %v1278_v0  ;;  %v1272_v6 = vld [vmem:[%s1889_s1 + $0x8] sm:$0xff]  ;;  %v1271_v7 = vld [vmem:[%s1889_s1] sm:$0xff]  ;;  %s1437_s17 = scalar_lea.vmem %s1888_s0, %s1154_s12  ;;  %296 = vst.msk [vmem:[#allocation2 + $0x8] sm:$0xff] %vm294_vm0, %v1353_v16  ;;  %s1507_s26 = scalar_lea.vmem %s1891_s3, %s1154_s12  ;;  %vm910_vm2 = vcmask 516096  }
   0xf   : > { %v1255_v8 = vld [vmem:[%s1437_s17] sm:$0xff]  ;;  %v1256_v12 = vld [vmem:[%s1437_s17 + $0x8] sm:$0xff]  ;;  %297 = vst.msk [vmem:[#allocation2 + $0x10] sm:$0xff] %vm294_vm0, %v1353_v16  ;;  %v1257_v17 = vld [vmem:[%s1437_s17 + $0x10] sm:$0xff]  ;;  %s1901_s18 = smov (!%p284_p5, %s1343_s18), 4 }
  0x10   : > { %v1259_v9 = vld [vmem:[%s1437_s17 + $0x20] sm:$0xff]  ;;  %v1260_v13 = vld [vmem:[%s1437_s17 + $0x28] sm:$0xff]  ;;  %298 = vst.msk [vmem:[#allocation2 + $0x18] sm:$0xff] %vm294_vm0, %v1353_v16  ;;  %v1261_v18 = vld [vmem:[%s1437_s17 + $0x30] sm:$0xff]  ;;  %s286_s29 = scalar_lea.vmem %s1892_s4, %s1901_s18  ;;  %s289_s7 = scalar_lea.vmem %s1893_s5, %s1901_s18 }
  0x11   : > { %552 = vmatpush.bf16.msra.mxu0 %v1277_v1  ;;  %1282 = vmatpush.bf16.msra.mxu1 %v1277_v1  ;;  %v1263_v10 = vld [vmem:[%s1437_s17 + $0x40] sm:$0xff]  ;;  %v1264_v14 = vld [vmem:[%s1437_s17 + $0x48] sm:$0xff]  ;;  %299 = vst.msk [vmem:[#allocation2 + $0x20] sm:$0xff] %vm294_vm0, %v1353_v16  ;;  %v1265_v19 = vld [vmem:[%s1437_s17 + $0x50] sm:$0xff] }
  0x12   : > { %1283 = vmatpush.bf16.msra.mxu2 %v1277_v1  ;;  %1284 = vmatpush.bf16.msra.mxu3 %v1277_v1  ;;  %v1267_v11 = vld [vmem:[%s1437_s17 + $0x60] sm:$0xff]  ;;  %v1268_v15 = vld [vmem:[%s1437_s17 + $0x68] sm:$0xff]  ;;  %300 = vst.msk [vmem:[#allocation2 + $0x28] sm:$0xff] %vm294_vm0, %v1353_v16  ;;  %v1269_v20 = vld [vmem:[%s1437_s17 + $0x70] sm:$0xff] }
  0x13   : > { %301 = vst.msk [vmem:[#allocation2 + $0x30] sm:$0xff] %vm294_vm0, %v1353_v16  ;;  %v1258_v21 = vld [vmem:[%s1437_s17 + $0x18] sm:$0xff]  ;;  %v1492_v34 = vld [vmem:[%s1890_s2] ss:$0 sm:$0xff] }
  0x14   : > { %302 = vst.msk [vmem:[#allocation2 + $0x38] sm:$0xff] %vm294_vm0, %v1353_v16  ;;  %v1262_v22 = vld [vmem:[%s1437_s17 + $0x38] sm:$0xff]  ;;  %v327_v25 = vld [vmem:[#allocation2] sm:$0xff] }
  0x15   : > { %553 = vmatpush.bf16.msra.mxu0 %v1276_v2  ;;  %1285 = vmatpush.bf16.msra.mxu1 %v1276_v2  ;;  %303 = vst.msk [vmem:[#allocation2 + $0x40] sm:$0xff] %vm294_vm0, %v1353_v16  ;;  %v1266_v23 = vld [vmem:[%s1437_s17 + $0x58] sm:$0xff]  ;;  %v328_v32 = vld [vmem:[#allocation2 + $0x8] sm:$0xff] }
  0x16   : > { %1286 = vmatpush.bf16.msra.mxu2 %v1276_v2  ;;  %1287 = vmatpush.bf16.msra.mxu3 %v1276_v2  ;;  %304 = vst.msk [vmem:[#allocation2 + $0x48] sm:$0xff] %vm294_vm0, %v1353_v16  ;;  %v1270_v24 = vld [vmem:[%s1437_s17 + $0x78] sm:$0xff]  ;;  %v329_v49 = vld [vmem:[#allocation2 + $0x10] sm:$0xff] }
  0x17   : > { %305 = vst.msk [vmem:[#allocation2 + $0x50] sm:$0xff] %vm294_vm0, %v1353_v16 }
  0x18   : > { %306 = vst.msk [vmem:[#allocation2 + $0x58] sm:$0xff] %vm294_vm0, %v1353_v16 }
  0x19   : > { %554 = vmatpush.bf16.msra.mxu0 %v1275_v3  ;;  %1288 = vmatpush.bf16.msra.mxu1 %v1275_v3  ;;  %307 = vst.msk [vmem:[#allocation2 + $0x60] sm:$0xff] %vm294_vm0, %v1353_v16 }
  0x1a   : > { %1289 = vmatpush.bf16.msra.mxu2 %v1275_v3  ;;  %1290 = vmatpush.bf16.msra.mxu3 %v1275_v3  ;;  %308 = vst.msk [vmem:[#allocation2 + $0x68] sm:$0xff] %vm294_vm0, %v1353_v16 }
  0x1b   : > { %309 = vst.msk [vmem:[#allocation2 + $0x70] sm:$0xff] %vm294_vm0, %v1353_v16 }
  0x1c   : > { %310 = vst.msk [vmem:[#allocation2 + $0x78] sm:$0xff] %vm294_vm0, %v1353_v16  ;;  %v335_v26 = vld [vmem:[#allocation2 + $0x40] sm:$0xff] }
  0x1d   : > { %555 = vmatpush.bf16.msra.mxu0 %v1274_v4  ;;  %1291 = vmatpush.bf16.msra.mxu1 %v1274_v4  ;;  %311 = vst.msk [vmem:[#allocation2 + $0x80] sm:$0xff] %vm294_vm0, %v1353_v16  ;;  %v336_v33 = vld [vmem:[#allocation2 + $0x48] sm:$0xff] }
  0x1e   : > { %1292 = vmatpush.bf16.msra.mxu2 %v1274_v4  ;;  %1293 = vmatpush.bf16.msra.mxu3 %v1274_v4  ;;  %312 = vst.msk [vmem:[#allocation2 + $0x88] sm:$0xff] %vm294_vm0, %v1353_v16  ;;  %v337_v50 = vld [vmem:[#allocation2 + $0x50] sm:$0xff] }
  0x1f   : > { %313 = vst.msk [vmem:[#allocation2 + $0x90] sm:$0xff] %vm294_vm0, %v1353_v16 }
  0x20   : > { %314 = vst.msk [vmem:[#allocation2 + $0x98] sm:$0xff] %vm294_vm0, %v1353_v16 }
  0x21   : > { %556 = vmatpush.bf16.msra.mxu0 %v1273_v5  ;;  %1294 = vmatpush.bf16.msra.mxu1 %v1273_v5  ;;  %315 = vst.msk [vmem:[#allocation2 + $0xa0] sm:$0xff] %vm294_vm0, %v1353_v16 }
  0x22   : > { %1295 = vmatpush.bf16.msra.mxu2 %v1273_v5  ;;  %1296 = vmatpush.bf16.msra.mxu3 %v1273_v5  ;;  %316 = vst.msk [vmem:[#allocation2 + $0xa8] sm:$0xff] %vm294_vm0, %v1353_v16 }
  0x23   : > { %317 = vst.msk [vmem:[#allocation2 + $0xb0] sm:$0xff] %vm294_vm0, %v1353_v16 }
  0x24   : > { %318 = vst.msk [vmem:[#allocation2 + $0xb8] sm:$0xff] %vm294_vm0, %v1353_v16  ;;  %v343_v31 = vld [vmem:[#allocation2 + $0x80] sm:$0xff] }
  0x25   : > { %557 = vmatpush.bf16.msra.mxu0 %v1272_v6  ;;  %1297 = vmatpush.bf16.msra.mxu1 %v1272_v6  ;;  %319 = vst.msk [vmem:[#allocation2 + $0xc0] sm:$0xff] %vm294_vm0, %v1353_v16  ;;  %v344_v47 = vld [vmem:[#allocation2 + $0x88] sm:$0xff] }
  0x26   : > { %1298 = vmatpush.bf16.msra.mxu2 %v1272_v6  ;;  %1299 = vmatpush.bf16.msra.mxu3 %v1272_v6  ;;  %320 = vst.msk [vmem:[#allocation2 + $0xc8] sm:$0xff] %vm294_vm0, %v1353_v16  ;;  %v345_v6 = vld [vmem:[#allocation2 + $0x90] sm:$0xff] }
  0x27   : > { %321 = vst.msk [vmem:[#allocation2 + $0xd0] sm:$0xff] %vm294_vm0, %v1353_v16 }
  0x28   : > { %322 = vst.msk [vmem:[#allocation2 + $0xd8] sm:$0xff] %vm294_vm0, %v1353_v16 }
  0x29   : > { %558 = vmatpush.bf16.msra.mxu0 %v1271_v7  ;;  %1300 = vmatpush.bf16.msra.mxu1 %v1271_v7  ;;  %323 = vst.msk [vmem:[#allocation2 + $0xe0] sm:$0xff] %vm294_vm0, %v1353_v16 }
  0x2a   : > { %1301 = vmatpush.bf16.msra.mxu2 %v1271_v7  ;;  %1302 = vmatpush.bf16.msra.mxu3 %v1271_v7  ;;  %324 = vst.msk [vmem:[#allocation2 + $0xe8] sm:$0xff] %vm294_vm0, %v1353_v16 }
  0x2b   : > { %325 = vst.msk [vmem:[#allocation2 + $0xf0] sm:$0xff] %vm294_vm0, %v1353_v16 }
  0x2c   : > { %559 = vmatmul.bf16.vlgmr.msra.gmra.mxu0 %v1255_v8  ;;  %579 = vmatmul.bf16.vlgmr.msra.gmra.mxu1 %v1259_v9  ;;  %326 = vst.msk [vmem:[#allocation2 + $0xf8] sm:$0xff] %vm294_vm0, %v1353_v16  ;;  %v351_v55 = vld [vmem:[#allocation2 + $0xc0] sm:$0xff]  ;;  %v330_v8 = vld [vmem:[#allocation2 + $0x18] sm:$0xff] }
  0x2d   : > { %599 = vmatmul.bf16.vlgmr.msra.gmra.mxu2 %v1263_v10  ;;  %619 = vmatmul.bf16.vlgmr.msra.gmra.mxu3 %v1267_v11  ;;  %v352_v63 = vld [vmem:[#allocation2 + $0xc8] sm:$0xff]  ;;  %v338_v9 = vld [vmem:[#allocation2 + $0x58] sm:$0xff] }
  0x3c   : > { %564 = vmatmul.bf16.gmra.mxu0 %v1256_v12  ;;  %584 = vmatmul.bf16.gmra.mxu1 %v1260_v13 }
  0x3d   : > { %604 = vmatmul.bf16.gmra.mxu2 %v1264_v14  ;;  %624 = vmatmul.bf16.gmra.mxu3 %v1268_v15 }
  0x4c   : > { %569 = vmatmul.bf16.gmra.mxu0 %v1257_v17  ;;  %589 = vmatmul.bf16.gmra.mxu1 %v1261_v18 }
  0x4d   : > { %609 = vmatmul.bf16.gmra.mxu2 %v1265_v19  ;;  %629 = vmatmul.bf16.gmra.mxu3 %v1269_v20 }
  0x5c   : > { %574 = vmatmul.bf16.gmra.mxu0 %v1258_v21  ;;  %594 = vmatmul.bf16.gmra.mxu1 %v1262_v22 }
  0x5d   : > { %614 = vmatmul.bf16.gmra.mxu2 %v1266_v23  ;;  %634 = vmatmul.bf16.gmra.mxu3 %v1270_v24 }
  0xa9   : > { %v560_v27 = vpop.f32.mrf.mxu0  ;;  %v580_v28 = vpop.f32.mrf.mxu1 }
  0xaa   : > { %v640_v29 = vadd.f32 %v560_v27, %v327_v25  ;;  %v648_v30 = vadd.f32 %v580_v28, %v335_v26  ;;  %v331_v28 = vld [vmem:[#allocation2 + $0x20] sm:$0xff] }
  0xac   : > { %673 = vst.msk [vmem:[#allocation2] sm:$0xff] %vm294_vm0, %v640_v29  ;;  %v339_v29 = vld [vmem:[#allocation2 + $0x60] sm:$0xff] }
  0xad   : > { %681 = vst.msk [vmem:[#allocation2 + $0x40] sm:$0xff] %vm294_vm0, %v648_v30 }
  0xb0   : > { %v600_v35 = vpop.f32.mrf.mxu2  ;;  %v620_v41 = vpop.f32.mrf.mxu3 }
  0xb1   : > { %v562_v36 = vpop.f32.mrf.mxu0  ;;  %v582_v37 = vpop.f32.mrf.mxu1  ;;  %v656_v38 = vadd.f32 %v600_v35, %v343_v31  ;;  %v664_v59 = vadd.f32 %v620_v41, %v351_v55  ;;  %v346_v31 = vld [vmem:[#allocation2 + $0x98] sm:$0xff]  ;;  %v332_v55 = vld [vmem:[#allocation2 + $0x28] sm:$0xff] }
  0xb2   : > { %v641_v39 = vadd.f32 %v562_v36, %v328_v32  ;;  %v649_v40 = vadd.f32 %v582_v37, %v336_v33 }
  0xb3   : > { %v1494_v42 = vld [vmem:[#allocation2] sm:$0xff]  ;;  %689 = vst.msk [vmem:[#allocation2 + $0x80] sm:$0xff] %vm294_vm0, %v656_v38 }
  0xb4   : > { %v744_v43 = vadd.f32 %v1492_v34, %v1494_v42  ;;  %674 = vst.msk [vmem:[#allocation2 + $0x8] sm:$0xff] %vm294_vm0, %v641_v39  ;;  %v1500_v44 = vld [vmem:[#allocation2 + $0x40] sm:$0xff] }
  0xb5   : > { %v752_v45 = vadd.f32 %v1492_v34, %v1500_v44  ;;  %682 = vst.msk [vmem:[#allocation2 + $0x48] sm:$0xff] %vm294_vm0, %v649_v40 }
  0xb6   : > { %v776_v46 = vpack.c.bf16 %v744_v43, %v744_v43  ;;  %697 = vst.msk [vmem:[#allocation2 + $0xc0] sm:$0xff] %vm294_vm0, %v664_v59 }
  0xb7   : > { %v784_v48 = vpack.c.bf16 %v752_v45, %v752_v45 }
  0xb8   : > { %809 = vst.msk [vmem:[%s1507_s26] sm:$0xf] %vm808_vm1, %v776_v46  ;;  %v602_v51 = vpop.f32.mrf.mxu2  ;;  %v622_v60 = vpop.f32.mrf.mxu3 }
  0xb9   : > { %817 = vst.msk [vmem:[%s1507_s26 + $0x20] sm:$0xf] %vm808_vm1, %v784_v48  ;;  %v565_v52 = vpop.f32.mrf.mxu0  ;;  %v585_v53 = vpop.f32.mrf.mxu1  ;;  %v657_v54 = vadd.f32 %v602_v51, %v344_v47  ;;  %v665_v2 = vadd.f32 %v622_v60, %v352_v63  ;;  %v354_v60 = vld [vmem:[#allocation2 + $0xd8] sm:$0xff] }
  0xba   : > { %v642_v56 = vadd.f32 %v565_v52, %v329_v49  ;;  %v650_v57 = vadd.f32 %v585_v53, %v337_v50  ;;  %v1516_v58 = vld [vmem:[#allocation2 + $0x80] sm:$0xff] }
  0xbb   : > { %v1518_v61 = vld [vmem:[#allocation2 + $0x8] sm:$0xff]  ;;  %v760_v62 = vadd.f32 %v1492_v34, %v1516_v58  ;;  %690 = vst.msk [vmem:[#allocation2 + $0x88] sm:$0xff] %vm294_vm0, %v657_v54  ;;  %v347_v53 = vld [vmem:[#allocation2 + $0xa0] sm:$0xff] }
  0xbc   : > { %v745_v0 = vadd.f32 %v1492_v34, %v1518_v61  ;;  %675 = vst.msk [vmem:[#allocation2 + $0x10] sm:$0xff] %vm294_vm0, %v642_v56  ;;  %v1526_v1 = vld [vmem:[#allocation2 + $0x48] sm:$0xff] }
  0xbd   : > { %v753_v3 = vadd.f32 %v1492_v34, %v1526_v1  ;;  %683 = vst.msk [vmem:[#allocation2 + $0x50] sm:$0xff] %vm294_vm0, %v650_v57  ;;  %v792_v5 = vpack.c.bf16 %v760_v62, %v760_v62  ;;  %v1554_v23 = vld [vmem:[#allocation2 + $0xc0] sm:$0xff]  ;;  %v340_v56 = vld [vmem:[#allocation2 + $0x68] sm:$0xff]  ;;  %v353_v57 = vld [vmem:[#allocation2 + $0xd0] sm:$0xff] }
  0xbe   : > { %v777_v4 = vpack.c.bf16 %v745_v0, %v745_v0  ;;  %698 = vst.msk [vmem:[#allocation2 + $0xc8] sm:$0xff] %vm294_vm0, %v665_v2  ;;  %v768_v30 = vadd.f32 %v1492_v34, %v1554_v23 }
  0xbf   : > { %v785_v7 = vpack.c.bf16 %v753_v3, %v753_v3  ;;  %825 = vst.msk [vmem:[%s1507_s26 + $0x40] sm:$0xf] %vm808_vm1, %v792_v5 }
  0xc0   : > { %810 = vst.msk [vmem:[%s1507_s26 + $0x4] sm:$0xf] %vm808_vm1, %v777_v4  ;;  %v605_v10 = vpop.f32.mrf.mxu2  ;;  %v625_v17 = vpop.f32.mrf.mxu3  ;;  %v800_v37 = vpack.c.bf16 %v768_v30, %v768_v30 }
  0xc1   : > { %818 = vst.msk [vmem:[%s1507_s26 + $0x24] sm:$0xf] %vm808_vm1, %v785_v7  ;;  %v567_v11 = vpop.f32.mrf.mxu0  ;;  %v587_v12 = vpop.f32.mrf.mxu1  ;;  %v658_v13 = vadd.f32 %v605_v10, %v345_v6  ;;  %v666_v4 = vadd.f32 %v625_v17, %v353_v57  ;;  %v333_v17 = vld [vmem:[#allocation2 + $0x30] sm:$0xff] }
  0xc2   : > { %v643_v14 = vadd.f32 %v567_v11, %v330_v8  ;;  %v651_v15 = vadd.f32 %v587_v12, %v338_v9  ;;  %v1539_v16 = vld [vmem:[#allocation2 + $0x88] sm:$0xff]  ;;  %833 = vst.msk [vmem:[%s1507_s26 + $0x60] sm:$0xf] %vm808_vm1, %v800_v37 }
  0xc3   : > { %v1541_v18 = vld [vmem:[#allocation2 + $0x10] sm:$0xff]  ;;  %v761_v19 = vadd.f32 %v1492_v34, %v1539_v16  ;;  %691 = vst.msk [vmem:[#allocation2 + $0x90] sm:$0xff] %vm294_vm0, %v658_v13 }
  0xc4   : > { %v746_v20 = vadd.f32 %v1492_v34, %v1541_v18  ;;  %676 = vst.msk [vmem:[#allocation2 + $0x18] sm:$0xff] %vm294_vm0, %v643_v14  ;;  %v1549_v21 = vld [vmem:[#allocation2 + $0x50] sm:$0xff]  ;;  %v348_v14 = vld [vmem:[#allocation2 + $0xa8] sm:$0xff] }
  0xc5   : > { %v754_v22 = vadd.f32 %v1492_v34, %v1549_v21  ;;  %684 = vst.msk [vmem:[#allocation2 + $0x58] sm:$0xff] %vm294_vm0, %v651_v15  ;;  %v793_v25 = vpack.c.bf16 %v761_v19, %v761_v19  ;;  %v1556_v26 = vld [vmem:[#allocation2 + $0xc8] sm:$0xff]  ;;  %v341_v19 = vld [vmem:[#allocation2 + $0x70] sm:$0xff] }
  0xc6   : > { %v778_v24 = vpack.c.bf16 %v746_v20, %v746_v20  ;;  %v769_v33 = vadd.f32 %v1492_v34, %v1556_v26  ;;  %699 = vst.msk [vmem:[#allocation2 + $0xd0] sm:$0xff] %vm294_vm0, %v666_v4 }
  0xc7   : > { %v786_v27 = vpack.c.bf16 %v754_v22, %v754_v22  ;;  %826 = vst.msk [vmem:[%s1507_s26 + $0x44] sm:$0xf] %vm808_vm1, %v793_v25 }
  0xc8   : > { %811 = vst.msk [vmem:[%s1507_s26 + $0x8] sm:$0xf] %vm808_vm1, %v778_v24  ;;  %v607_v32 = vpop.f32.mrf.mxu2  ;;  %v627_v43 = vpop.f32.mrf.mxu3  ;;  %v801_v47 = vpack.c.bf16 %v769_v33, %v769_v33  ;;  %v356_v33 = vld [vmem:[#allocation2 + $0xe8] sm:$0xff] }
  0xc9   : > { %819 = vst.msk [vmem:[%s1507_s26 + $0x28] sm:$0xf] %vm808_vm1, %v786_v27  ;;  %v570_v35 = vpop.f32.mrf.mxu0  ;;  %v590_v36 = vpop.f32.mrf.mxu1  ;;  %v659_v41 = vadd.f32 %v607_v32, %v346_v31  ;;  %v667_v7 = vadd.f32 %v627_v43, %v354_v60 }
  0xca   : > { %v644_v38 = vadd.f32 %v570_v35, %v331_v28  ;;  %v652_v39 = vadd.f32 %v590_v36, %v339_v29  ;;  %v1568_v40 = vld [vmem:[#allocation2 + $0x90] sm:$0xff]  ;;  %834 = vst.msk [vmem:[%s1507_s26 + $0x64] sm:$0xf] %vm808_vm1, %v801_v47  ;;  %v355_v28 = vld [vmem:[#allocation2 + $0xe0] sm:$0xff]  ;;  %v912_v36 = vmul.f32 %v1494_v42, %v1494_v42  ;;  %v914_v47 = vmul.f32 %v1541_v18, %v1541_v18 }
  0xcb   : > { %v1570_v45 = vld [vmem:[#allocation2 + $0x18] sm:$0xff]  ;;  %v762_v46 = vadd.f32 %v1492_v34, %v1568_v40  ;;  %692 = vst.msk [vmem:[#allocation2 + $0x98] sm:$0xff] %vm294_vm0, %v659_v41  ;;  %v913_v41 = vmul.f32 %v1518_v61, %v1518_v61 }
  0xcc   : > { %v747_v48 = vadd.f32 %v1492_v34, %v1570_v45  ;;  %677 = vst.msk [vmem:[#allocation2 + $0x20] sm:$0xff] %vm294_vm0, %v644_v38  ;;  %v1579_v49 = vld [vmem:[#allocation2 + $0x58] sm:$0xff] }
  0xcd   : > { %v755_v50 = vadd.f32 %v1492_v34, %v1579_v49  ;;  %685 = vst.msk [vmem:[#allocation2 + $0x60] sm:$0xff] %vm294_vm0, %v652_v39  ;;  %v794_v52 = vpack.c.bf16 %v762_v46, %v762_v46 }
  0xce   : > { %v779_v51 = vpack.c.bf16 %v747_v48, %v747_v48  ;;  %700 = vst.msk [vmem:[#allocation2 + $0xd8] sm:$0xff] %vm294_vm0, %v667_v7 }
  0xcf   : > { %v787_v54 = vpack.c.bf16 %v755_v50, %v755_v50  ;;  %827 = vst.msk [vmem:[%s1507_s26 + $0x48] sm:$0xf] %vm808_vm1, %v794_v52  ;;  %v1637_v50 = vld [vmem:[#allocation2 + $0xd0] sm:$0xff] }
  0xd0   : > { %812 = vst.msk [vmem:[%s1507_s26 + $0xc] sm:$0xf] %vm808_vm1, %v779_v51  ;;  %v610_v59 = vpop.f32.mrf.mxu2  ;;  %v630_v5 = vpop.f32.mrf.mxu3  ;;  %v842_v51 = vsel %vm294_vm0, %v1518_v61, 0.0  ;;  %v770_v60 = vadd.f32 %v1492_v34, %v1637_v50  ;;  %v945_v61 = vsel %vm294_vm0, %v913_v41, 0.0 }
  0xd1   : > { %820 = vst.msk [vmem:[%s1507_s26 + $0x2c] sm:$0xf] %vm808_vm1, %v787_v54  ;;  %v572_v62 = vpop.f32.mrf.mxu0  ;;  %v592_v63 = vpop.f32.mrf.mxu1  ;;  %v660_v0 = vadd.f32 %v610_v59, %v347_v53  ;;  %v668_v32 = vadd.f32 %v630_v5, %v355_v28  ;;  %v334_v59 = vld [vmem:[#allocation2 + $0x38] sm:$0xff]  ;;  %v947_v5 = vsel %vm294_vm0, %v914_v47, 0.0 }
  0xd2   : > { %v645_v2 = vadd.f32 %v572_v62, %v332_v55  ;;  %v653_v3 = vadd.f32 %v592_v63, %v340_v56  ;;  %v1604_v11 = vld [vmem:[#allocation2 + $0x98] sm:$0xff]  ;;  %v841_v55 = vsel %vm294_vm0, %v1494_v42, 0.0  ;;  %v944_v56 = vsel %vm294_vm0, %v912_v36, 0.0 }
  0xd3   : > { %v1593_v6 = vld [vmem:[#allocation2 + $0x20] sm:$0xff]  ;;  %693 = vst.msk [vmem:[#allocation2 + $0xa0] sm:$0xff] %vm294_vm0, %v660_v0  ;;  %v763_v13 = vadd.f32 %v1492_v34, %v1604_v11  ;;  %v342_v62 = vld [vmem:[#allocation2 + $0x78] sm:$0xff]  ;;  %v844_v63 = vsel %vm294_vm0, %v1541_v18, 0.0  ;;  %v915_v42 = vmul.f32 %v1570_v45, %v1570_v45  ;;  %v843_v4 = vadd.f32 %v842_v51, %v841_v55 }
  0xd4   : > { %v748_v8 = vadd.f32 %v1492_v34, %v1593_v6  ;;  %678 = vst.msk [vmem:[#allocation2 + $0x28] sm:$0xff] %vm294_vm0, %v645_v2  ;;  %v1599_v9 = vld [vmem:[#allocation2 + $0x60] sm:$0xff]  ;;  %v349_v2 = vld [vmem:[#allocation2 + $0xb0] sm:$0xff]  ;;  %v916_v7 = vmul.f32 %v1593_v6, %v1593_v6 }
  0xd5   : > { %v756_v10 = vadd.f32 %v1492_v34, %v1599_v9  ;;  %686 = vst.msk [vmem:[#allocation2 + $0x68] sm:$0xff] %vm294_vm0, %v653_v3  ;;  %v795_v20 = vpack.c.bf16 %v763_v13, %v763_v13  ;;  %v1641_v54 = vld [vmem:[#allocation2 + $0xd8] sm:$0xff]  ;;  %v949_v28 = vsel %vm294_vm0, %v915_v42, 0.0 }
  0xd6   : > { %v780_v12 = vpack.c.bf16 %v748_v8, %v748_v8  ;;  %701 = vst.msk [vmem:[#allocation2 + $0xe0] sm:$0xff] %vm294_vm0, %v668_v32  ;;  %v771_v0 = vadd.f32 %v1492_v34, %v1641_v54  ;;  %v802_v8 = vpack.c.bf16 %v770_v60, %v770_v60  ;;  %v951_v36 = vsel %vm294_vm0, %v916_v7, 0.0 }
  0xd7   : > { %v788_v15 = vpack.c.bf16 %v756_v10, %v756_v10  ;;  %828 = vst.msk [vmem:[%s1507_s26 + $0x4c] sm:$0xf] %vm808_vm1, %v795_v20  ;;  %v946_v20 = vadd.f32 %v945_v61, %v944_v56 }
  0xd8   : > { %813 = vst.msk [vmem:[%s1507_s26 + $0x10] sm:$0xf] %vm808_vm1, %v780_v12  ;;  %v612_v22 = vpop.f32.mrf.mxu2  ;;  %v632_v35 = vpop.f32.mrf.mxu3  ;;  %v846_v12 = vsel %vm294_vm0, %v1570_v45, 0.0  ;;  %v848_v45 = vsel %vm294_vm0, %v1593_v6, 0.0 }
  0xd9   : > { %821 = vst.msk [vmem:[%s1507_s26 + $0x30] sm:$0xf] %vm808_vm1, %v788_v15  ;;  %v575_v24 = vpop.f32.mrf.mxu0  ;;  %v595_v25 = vpop.f32.mrf.mxu1  ;;  %v661_v27 = vadd.f32 %v612_v22, %v348_v14  ;;  %v669_v39 = vadd.f32 %v632_v35, %v356_v33  ;;  %v845_v22 = vadd.f32 %v844_v63, %v843_v4  ;;  %v948_v33 = vadd.f32 %v947_v5, %v946_v20 }
  0xda   : > { %v646_v29 = vadd.f32 %v575_v24, %v333_v17  ;;  %v654_v30 = vadd.f32 %v595_v25, %v341_v19  ;;  %v1616_v31 = vld [vmem:[#allocation2 + $0xa0] sm:$0xff]  ;;  %v803_v17 = vpack.c.bf16 %v771_v0, %v771_v0  ;;  %835 = vst.msk [vmem:[%s1507_s26 + $0x68] sm:$0xf] %vm808_vm1, %v802_v8  ;;  %v357_v0 = vld [vmem:[#allocation2 + $0xf0] sm:$0xff] }
  0xdb   : > { %v1620_v37 = vld [vmem:[#allocation2 + $0x28] sm:$0xff]  ;;  %v764_v38 = vadd.f32 %v1492_v34, %v1616_v31  ;;  %694 = vst.msk [vmem:[#allocation2 + $0xa8] sm:$0xff] %vm294_vm0, %v661_v27  ;;  %v847_v35 = vadd.f32 %v846_v12, %v845_v22 }
  0xdc   : > { %v749_v43 = vadd.f32 %v1492_v34, %v1620_v37  ;;  %679 = vst.msk [vmem:[#allocation2 + $0x30] sm:$0xff] %vm294_vm0, %v646_v29  ;;  %v1630_v46 = vld [vmem:[#allocation2 + $0x68] sm:$0xff]  ;;  %v917_v29 = vmul.f32 %v1620_v37, %v1620_v37 }
  0xdd   : > { %v757_v48 = vadd.f32 %v1492_v34, %v1630_v46  ;;  %687 = vst.msk [vmem:[#allocation2 + $0x70] sm:$0xff] %vm294_vm0, %v654_v30  ;;  %v796_v53 = vpack.c.bf16 %v764_v38, %v764_v38  ;;  %v1687_v6 = vld [vmem:[#allocation2 + $0xe0] sm:$0xff] }
  0xde   : > { %v781_v52 = vpack.c.bf16 %v749_v43, %v749_v43  ;;  %702 = vst.msk [vmem:[#allocation2 + $0xe8] sm:$0xff] %vm294_vm0, %v669_v39  ;;  %v850_v39 = vsel %vm294_vm0, %v1620_v37, 0.0  ;;  %v772_v56 = vadd.f32 %v1492_v34, %v1687_v6  ;;  %v953_v37 = vsel %vm294_vm0, %v917_v29, 0.0 }
  0xdf   : > { %v789_v57 = vpack.c.bf16 %v757_v48, %v757_v48  ;;  %829 = vst.msk [vmem:[%s1507_s26 + $0x50] sm:$0xf] %vm808_vm1, %v796_v53  ;;  %v350_v48 = vld [vmem:[#allocation2 + $0xb8] sm:$0xff]  ;;  %v849_v53 = vadd.f32 %v848_v45, %v847_v35 }
  0xe0   : > { %814 = vst.msk [vmem:[%s1507_s26 + $0x14] sm:$0xf] %vm808_vm1, %v781_v52  ;;  %v615_v3 = vpop.f32.mrf.mxu2  ;;  %v635_v19 = vpop.f32.mrf.mxu3  ;;  %v950_v52 = vadd.f32 %v949_v28, %v948_v33  ;;  %v804_v63 = vpack.c.bf16 %v772_v56, %v772_v56  ;;  %v921_v28 = vmul.f32 %v1526_v1, %v1526_v1 }
  0xe1   : > { %822 = vst.msk [vmem:[%s1507_s26 + $0x34] sm:$0xf] %vm808_vm1, %v789_v57  ;;  %v577_v18 = vpop.f32.mrf.mxu0  ;;  %v597_v10 = vpop.f32.mrf.mxu1  ;;  %v662_v27 = vadd.f32 %v615_v3, %v349_v2  ;;  %v851_v61 = vadd.f32 %v850_v39, %v849_v53  ;;  %v358_v2 = vld [vmem:[#allocation2 + $0xf8] sm:$0xff]  ;;  %v670_v5 = vadd.f32 %v635_v19, %v357_v0  ;;  %v922_v39 = vmul.f32 %v1549_v21, %v1549_v21 }
  0xe2   : > { %v647_v13 = vadd.f32 %v577_v18, %v334_v59  ;;  %v655_v14 = vadd.f32 %v597_v10, %v342_v62  ;;  %v1668_v15 = vld [vmem:[#allocation2 + $0xa8] sm:$0xff]  ;;  %836 = vst.msk [vmem:[%s1507_s26 + $0x6c] sm:$0xf] %vm808_vm1, %v803_v17  ;;  %v952_v62 = vadd.f32 %v951_v36, %v950_v52  ;;  %v961_v52 = vsel %vm294_vm0, %v921_v28, 0.0 }
  0xe3   : > { %v714_v24 = vld [vmem:[#allocation2 + $0x30] sm:$0xff]  ;;  %v765_v25 = vadd.f32 %v1492_v34, %v1668_v15  ;;  %695 = vst.msk [vmem:[#allocation2 + $0xb0] sm:$0xff] %vm294_vm0, %v662_v27  ;;  %v856_v27 = vsel %vm294_vm0, %v1500_v44, 0.0  ;;  %v864_v0 = vsel %vm294_vm0, %v1599_v9, 0.0 }
  0xe4   : > { %v750_v30 = vadd.f32 %v1492_v34, %v714_v24  ;;  %680 = vst.msk [vmem:[#allocation2 + $0x38] sm:$0xff] %vm294_vm0, %v647_v13  ;;  %v1681_v32 = vld [vmem:[#allocation2 + $0x70] sm:$0xff]  ;;  %v918_v43 = vmul.f32 %v714_v24, %v714_v24  ;;  %v852_v57 = vsel %vm294_vm0, %v714_v24, 0.0  ;;  %v954_v18 = vadd.f32 %v953_v37, %v952_v62 }
  0xe5   : > { %v758_v38 = vadd.f32 %v1492_v34, %v1681_v32  ;;  %688 = vst.msk [vmem:[#allocation2 + $0x78] sm:$0xff] %vm294_vm0, %v655_v14  ;;  %v797_v47 = vpack.c.bf16 %v765_v25, %v765_v25  ;;  %v1693_v51 = vld [vmem:[#allocation2 + $0xe8] sm:$0xff]  ;;  %v853_v8 = vadd.f32 %v852_v57, %v851_v61  ;;  %v920_v13 = vmul.f32 %v1500_v44, %v1500_v44 }
  0xe6   : > { %v782_v41 = vpack.c.bf16 %v750_v30, %v750_v30  ;;  %v773_v60 = vadd.f32 %v1492_v34, %v1693_v51  ;;  %v955_v3 = vsel %vm294_vm0, %v918_v43, 0.0  ;;  %837 = vst.msk [vmem:[%s1507_s26 + $0x70] sm:$0xf] %vm808_vm1, %v804_v63  ;;  %v858_v44 = vsel %vm294_vm0, %v1526_v1, 0.0 }
  0xe7   : > { %v790_v55 = vpack.c.bf16 %v758_v38, %v758_v38  ;;  %830 = vst.msk [vmem:[%s1507_s26 + $0x54] sm:$0xf] %vm808_vm1, %v797_v47  ;;  %v956_v19 = vadd.f32 %v955_v3, %v954_v18  ;;  %v959_v38 = vsel %vm294_vm0, %v920_v13, 0.0  ;;  %v923_v43 = vmul.f32 %v1579_v49, %v1579_v49 }
  0xe8   : > { %815 = vst.msk [vmem:[%s1507_s26 + $0x18] sm:$0xf] %vm808_vm1, %v782_v41  ;;  %v617_v59 = vpop.f32.mrf.mxu2  ;;  %v805_v4 = vpack.c.bf16 %v773_v60, %v773_v60  ;;  %v637_v7 = vpop.f32.mrf.mxu3  ;;  %v860_v1 = vsel %vm294_vm0, %v1549_v21, 0.0  ;;  %v963_v57 = vsel %vm294_vm0, %v922_v39, 0.0  ;;  %v924_v60 = vmul.f32 %v1599_v9, %v1599_v9 }
  0xe9   : > { %823 = vst.msk [vmem:[%s1507_s26 + $0x38] sm:$0xf] %vm808_vm1, %v790_v55  ;;  %v663_v42 = vadd.f32 %v617_v59, %v350_v48  ;;  %v671_v12 = vadd.f32 %v637_v7, %v358_v2  ;;  %v862_v59 = vsel %vm294_vm0, %v1579_v49, 0.0  ;;  %v965_v21 = vsel %vm294_vm0, %v923_v43, 0.0 }
  0xea   : > { %838 = vst.msk [vmem:[%s1507_s26 + $0x74] sm:$0xf] %vm808_vm1, %v805_v4  ;;  %v1727_v30 = vld [vmem:[#allocation2 + $0xb0] sm:$0xff]  ;;  %v925_v49 = vmul.f32 %v1630_v46, %v1630_v46  ;;  %v866_v9 = vsel %vm294_vm0, %v1630_v46, 0.0  ;;  %v874_v39 = vsel %vm294_vm0, %v1539_v16, 0.0 }
  0xeb   : > { %v715_v10 = vld [vmem:[#allocation2 + $0x38] sm:$0xff]  ;;  %696 = vst.msk [vmem:[#allocation2 + $0xb8] sm:$0xff] %vm294_vm0, %v663_v42  ;;  %v766_v41 = vadd.f32 %v1492_v34, %v1727_v30 }
  0xec   : > { %v751_v14 = vadd.f32 %v1492_v34, %v715_v10  ;;  %v854_v17 = vsel %vm294_vm0, %v715_v10, 0.0  ;;  %v919_v20 = vmul.f32 %v715_v10, %v715_v10  ;;  %v1715_v22 = vld [vmem:[#allocation2 + $0x78] sm:$0xff]  ;;  %703 = vst.msk [vmem:[#allocation2 + $0xf0] sm:$0xff] %vm294_vm0, %v670_v5  ;;  %v926_v10 = vmul.f32 %v1681_v32, %v1681_v32 }
  0xed   : > { %v855_v24 = vadd.f32 %v854_v17, %v853_v8  ;;  %v759_v25 = vadd.f32 %v1492_v34, %v1715_v22  ;;  %704 = vst.msk [vmem:[#allocation2 + $0xf8] sm:$0xff] %vm294_vm0, %v671_v12  ;;  %v798_v53 = vpack.c.bf16 %v766_v41, %v766_v41  ;;  %v967_v8 = vsel %vm294_vm0, %v924_v60, 0.0 }
  0xee   : > { %v783_v45 = vpack.c.bf16 %v751_v14, %v751_v14  ;;  %v957_v29 = vsel %vm294_vm0, %v919_v20, 0.0  ;;  %v969_v20 = vsel %vm294_vm0, %v925_v49, 0.0  ;;  %v870_v28 = vsel %vm294_vm0, %v1715_v22, 0.0 }
  0xef   : > { %v857_v33 = vadd.f32 %v856_v27, %v855_v24  ;;  %v958_v35 = vadd.f32 %v957_v29, %v956_v19  ;;  %v791_v36 = vpack.c.bf16 %v759_v25, %v759_v25  ;;  %831 = vst.msk [vmem:[%s1507_s26 + $0x58] sm:$0xf] %vm808_vm1, %v798_v53  ;;  %v868_v19 = vsel %vm294_vm0, %v1681_v32, 0.0 }
  0xf0   : > { %816 = vst.msk [vmem:[%s1507_s26 + $0x1c] sm:$0xf] %vm808_vm1, %v783_v45  ;;  %v928_v25 = vmul.f32 %v1516_v58, %v1516_v58  ;;  %v971_v27 = vsel %vm294_vm0, %v926_v10, 0.0  ;;  %v872_v32 = vsel %vm294_vm0, %v1516_v58, 0.0  ;;  %v876_v58 = vsel %vm294_vm0, %v1568_v40, 0.0 }
  0xf1   : > { %v859_v47 = vadd.f32 %v858_v44, %v857_v33  ;;  %v960_v48 = vadd.f32 %v959_v38, %v958_v35  ;;  %824 = vst.msk [vmem:[%s1507_s26 + $0x3c] sm:$0xf] %vm808_vm1, %v791_v36  ;;  %v929_v33 = vmul.f32 %v1539_v16, %v1539_v16  ;;  %v878_v16 = vsel %vm294_vm0, %v1604_v11, 0.0 }
  0xf2   : > { %v1747_v37 = vld [vmem:[#allocation2 + $0xb8] sm:$0xff]  ;;  %v975_v44 = vsel %vm294_vm0, %v928_v25, 0.0  ;;  %v933_v60 = vmul.f32 %v1668_v15, %v1668_v15  ;;  %v939_v25 = vmul.f32 %v1641_v54, %v1641_v54 }
  0xf3   : > { %v861_v55 = vadd.f32 %v860_v1, %v859_v47  ;;  %v962_v56 = vadd.f32 %v961_v52, %v960_v48  ;;  %v767_v62 = vadd.f32 %v1492_v34, %v1747_v37  ;;  %v1759_v42 = vld [vmem:[#allocation2 + $0xf0] sm:$0xff]  ;;  %v977_v47 = vsel %vm294_vm0, %v929_v33, 0.0 }
  0xf4   : > { %v774_v3 = vadd.f32 %v1492_v34, %v1759_v42  ;;  %v1767_v4 = vld [vmem:[#allocation2 + $0xf8] sm:$0xff]  ;;  %v931_v48 = vmul.f32 %v1604_v11, %v1604_v11  ;;  %v882_v11 = vsel %vm294_vm0, %v1668_v15, 0.0 }
  0xf5   : > { %v964_v61 = vadd.f32 %v963_v57, %v962_v56  ;;  %v863_v63 = vadd.f32 %v862_v59, %v861_v55  ;;  %v799_v2 = vpack.c.bf16 %v767_v62, %v767_v62  ;;  %v775_v18 = vadd.f32 %v1492_v34, %v1767_v4 }
  0xf6   : > { %v806_v12 = vpack.c.bf16 %v774_v3, %v774_v3  ;;  %v927_v34 = vmul.f32 %v1715_v22, %v1715_v22  ;;  %v930_v22 = vmul.f32 %v1568_v40, %v1568_v40  ;;  %v932_v55 = vmul.f32 %v1616_v31, %v1616_v31 }
  0xf7   : > { %v865_v5 = vadd.f32 %v864_v0, %v863_v63  ;;  %v966_v7 = vadd.f32 %v965_v21, %v964_v61  ;;  %832 = vst.msk [vmem:[%s1507_s26 + $0x5c] sm:$0xf] %vm808_vm1, %v799_v2  ;;  %v807_v17 = vpack.c.bf16 %v775_v18, %v775_v18  ;;  %v981_v59 = vsel %vm294_vm0, %v931_v48, 0.0 }
  0xf8   : > { %839 = vst.msk [vmem:[%s1507_s26 + $0x78] sm:$0xf] %vm808_vm1, %v806_v12  ;;  %v973_v35 = vsel %vm294_vm0, %v927_v34, 0.0  ;;  %v979_v53 = vsel %vm294_vm0, %v930_v22, 0.0  ;;  %v880_v40 = vsel %vm294_vm0, %v1616_v31, 0.0  ;;  %v983_v61 = vsel %vm294_vm0, %v932_v55, 0.0 }
  0xf9   : > { %v867_v13 = vadd.f32 %v866_v9, %v865_v5  ;;  %v968_v14 = vadd.f32 %v967_v8, %v966_v7  ;;  %840 = vst.msk [vmem:[%s1507_s26 + $0x7c] sm:$0xf] %vm808_vm1, %v807_v17  ;;  %v934_v63 = vmul.f32 %v1727_v30, %v1727_v30  ;;  %v985_v2 = vsel %vm294_vm0, %v933_v60, 0.0 }
  0xfa   : > { %v884_v31 = vsel %vm294_vm0, %v1727_v30, 0.0  ;;  %v935_v3 = vmul.f32 %v1747_v37, %v1747_v37  ;;  %v936_v18 = vmul.f32 %v1554_v23, %v1554_v23  ;;  %v886_v8 = vsel %vm294_vm0, %v1747_v37, 0.0 }
  0xfb   : > { %v869_v46 = vadd.f32 %v868_v19, %v867_v13  ;;  %v970_v24 = vadd.f32 %v969_v20, %v968_v14  ;;  %v987_v15 = vsel %vm294_vm0, %v934_v63, 0.0  ;;  %v888_v12 = vsel %vm294_vm0, %v1554_v23, 0.0 }
  0xfc   : > { %v937_v30 = vmul.f32 %v1556_v26, %v1556_v26  ;;  %v989_v13 = vsel %vm294_vm0, %v935_v3, 0.0  ;;  %v991_v20 = vsel %vm294_vm0, %v936_v18, 0.0  ;;  %v890_v19 = vsel %vm294_vm0, %v1556_v26, 0.0 }
  0xfd   : > { %v972_v45 = vadd.f32 %v971_v27, %v970_v24  ;;  %v871_v29 = vadd.f32 %v870_v28, %v869_v46  ;;  %v938_v37 = vmul.f32 %v1637_v50, %v1637_v50  ;;  %v892_v23 = vsel %vm294_vm0, %v1637_v50, 0.0 }
  0xfe   : > { %v993_v24 = vsel %vm294_vm0, %v937_v30, 0.0  ;;  %v894_v26 = vsel %vm294_vm0, %v1641_v54, 0.0  ;;  %v896_v50 = vsel %vm294_vm0, %v1687_v6, 0.0  ;;  %v898_v54 = vsel %vm294_vm0, %v1693_v51, 0.0 }
  0xff   : > { %v873_v36 = vadd.f32 %v872_v32, %v871_v29  ;;  %v974_v38 = vadd.f32 %v973_v35, %v972_v45  ;;  %v995_v45 = vsel %vm294_vm0, %v938_v37, 0.0  ;;  %v940_v29 = vmul.f32 %v1687_v6, %v1687_v6 }
 0x100   : > { %v997_v35 = vsel %vm294_vm0, %v939_v25, 0.0  ;;  %v942_v22 = vmul.f32 %v1759_v42, %v1759_v42  ;;  %v900_v6 = vsel %vm294_vm0, %v1759_v42, 0.0 }
 0x101   : > { %v875_v41 = vadd.f32 %v874_v39, %v873_v36  ;;  %v976_v43 = vadd.f32 %v975_v44, %v974_v38  ;;  %v941_v36 = vmul.f32 %v1693_v51, %v1693_v51  ;;  %v999_v39 = vsel %vm294_vm0, %v940_v29, 0.0 }
 0x102   : > { %v902_v51 = vsel %vm294_vm0, %v1767_v4, 0.0 }
 0x103   : > { %v978_v52 = vadd.f32 %v977_v47, %v976_v43  ;;  %v877_v1 = vadd.f32 %v876_v58, %v875_v41  ;;  %v1001_v47 = vsel %vm294_vm0, %v941_v36, 0.0  ;;  %v943_v58 = vmul.f32 %v1767_v4, %v1767_v4 }
 0x105   : > { %v879_v56 = vadd.f32 %v878_v16, %v877_v1  ;;  %v980_v57 = vadd.f32 %v979_v53, %v978_v52  ;;  %v1003_v1 = vsel %vm294_vm0, %v942_v22, 0.0  ;;  %v1005_v55 = vsel %vm294_vm0, %v943_v58, 0.0 }
 0x107   : > { %v881_v62 = vadd.f32 %v880_v40, %v879_v56  ;;  %v982_v21 = vadd.f32 %v981_v59, %v980_v57 }
 0x109   : > { %v883_v0 = vadd.f32 %v882_v11, %v881_v62  ;;  %v984_v49 = vadd.f32 %v983_v61, %v982_v21 }
 0x10b   : > { %v986_v5 = vadd.f32 %v985_v2, %v984_v49  ;;  %v885_v7 = vadd.f32 %v884_v31, %v883_v0 }
 0x10d   : > { %v988_v9 = vadd.f32 %v987_v15, %v986_v5  ;;  %v887_v10 = vadd.f32 %v886_v8, %v885_v7 }
 0x10f   : > { %v889_v14 = vadd.f32 %v888_v12, %v887_v10  ;;  %v990_v17 = vadd.f32 %v989_v13, %v988_v9 }
 0x111   : > { %v891_v34 = vadd.f32 %v890_v19, %v889_v14  ;;  %v992_v46 = vadd.f32 %v991_v20, %v990_v17 }
 0x113   : > { %v994_v27 = vadd.f32 %v993_v24, %v992_v46  ;;  %v893_v28 = vadd.f32 %v892_v23, %v891_v34 }
 0x115   : > { %v895_v32 = vadd.f32 %v894_v26, %v893_v28  ;;  %v996_v33 = vadd.f32 %v995_v45, %v994_v27 }
 0x117   : > { %v897_v38 = vadd.f32 %v896_v50, %v895_v32  ;;  %v998_v44 = vadd.f32 %v997_v35, %v996_v33 }
 0x119   : > { %v899_v41 = vadd.f32 %v898_v54, %v897_v38  ;;  %v1000_v43 = vadd.f32 %v999_v39, %v998_v44 }
 0x11b   : > { %v1002_v48 = vadd.f32 %v1001_v47, %v1000_v43  ;;  %v901_v52 = vadd.f32 %v900_v6, %v899_v41 }
 0x11d   : > { %v1004_v53 = vadd.f32 %v1003_v1, %v1002_v48  ;;  %v903_v16 = vadd.f32 %v902_v51, %v901_v52 }
 0x11f   : > { %v904_v56 = vrot.slane %v903_v16, 4  ;;  %v1006_v57 = vadd.f32 %v1005_v55, %v1004_v53 }
 0x121   : > { %v905_v59 = vadd.f32 %v904_v56, %v903_v16  ;;  %v1007_v42 = vrot.slane %v1006_v57, 4 }
 0x123   : > { %v906_v40 = vrot.slane %v905_v59, 2  ;;  %v1008_v60 = vadd.f32 %v1007_v42, %v1006_v57 }
 0x125   : > { %v907_v62 = vadd.f32 %v906_v40, %v905_v59  ;;  %v1009_v21 = vrot.slane %v1008_v60, 2 }
 0x127   : > { %v908_v61 = vrot.slane %v907_v62, 1  ;;  %v1010_v11 = vadd.f32 %v1009_v21, %v1008_v60 }
 0x129   : > { %v909_v4 = vadd.f32 %v908_v61, %v907_v62  ;;  %v1011_v63 = vrot.slane %v1010_v11, 1 }
 0x12b   : > { %911 = vst.msk [vmem:[%s286_s29] sm:$0x1] %vm910_vm2, %v909_v4  ;;  %v1012_v0 = vadd.f32 %v1011_v63, %v1010_v11 }
 0x12d   : > { %1013 = vst.msk [vmem:[%s289_s7] sm:$0x1] %vm910_vm2, %v1012_v0 }
 0x12e PF: > { %s16_s20 = sadd.s32 1, %s1351_s20   ;;  %s1894_s18 = smov %s1347_s19 }
 0x12f   : > { %p13_p6 = scmp.ge.s32.totalorder %s16_s20, 7   ;;  %s1895_s19 = smov %s1897_s21 }
 0x131   :  { %15 = sbr.rel (!%p13_p6) target bundleno = 2 (0x2), region = 97 }

// kernel: tile.127
= control target key start
LH: loop header
LB: loop body
LE: loop exit
PB: predicated region body
PF: predicated region fallthrough
CT: control target
= control target key end

     0   :  { %s22_s0 = inlined_call_operand.vmem [shape: f32[16], index: 0, kind: input, shape index: {}]   ;;  %s23_s1 = inlined_call_operand.vmem [shape: f32[4,16], index: 1, kind: output, shape index: {}]  }
   0x1   :  { %v4_v0 = vld [vmem:[%s22_s0] ss:$0 sm:$0xff] }
   0x2   :  { %5 = vst [vmem:[%s23_s1] sm:$0xf] %v4_v0 }

// kernel: a_call__.18
= control target key start
LH: loop header
LB: loop body
LE: loop exit
PB: predicated region body
PF: predicated region fallthrough
CT: control target
= control target key end

     0   :  { %s655_s12 = smov 0   ;;  %s837_s0 = inlined_call_operand.vmem [shape: bf16[1280,64], index: 0, kind: input, shape index: {}]   ;;  %s838_s1 = inlined_call_operand.vmem [shape: f32[1,64], index: 1, kind: input, shape index: {}]   ;;  %s839_s2 = inlined_call_operand.vmem [shape: f32[1,64], index: 2, kind: input, shape index: {}]   ;;  %s840_s3 = inlined_call_operand.vmem [shape: bf16[1280,64], index: 3, kind: output, shape index: {}]  }
   0x1 LB: > { %s527_s13 = sadd.s32 4294967295, %s633_s12   ;;  %p531_p0 = scmp.ge.s32.totalorder %s633_s12, 1  ;;  %s633_s12 = sphi %s655_s12, %s13_s12  }
   0x2   : > { %p138_p1 = scmp.lt.s32.totalorder %s633_s12, 6 }
   0x4   : > { %p139_p2 = pnand %p531_p0, %p138_p1 }
   0x5   : > { %s532_s14 = sshll.u32 (!%p139_p2), %s527_s13, 5 }
   0x6   : > { %142 = sbr.rel (%p139_p2) target bundleno = 78 (0x4e), region = 32  ;;  %p163_p3 = scmp.lt.s32.totalorder (!%p139_p2), %s532_s14, 159 }
   0xb   : > { %s842_s14 = smov (!%p163_p3, %s532_s14), 159  ;;  %v676_v0 = vld [vmem:[%s838_s1] ss:$0 sm:$0xff]  ;;  %vm438_vm0 = vcmask 519168  }
   0xc   : > { %s533_s15 = sshll.u32 %s842_s14, 2  ;;  %v684_v5 = vld [vmem:[%s839_s2] ss:$0 sm:$0xff] }
   0xd   : > { %s671_s18 = scalar_lea.vmem %s837_s0, %s533_s15  ;;  %s708_s25 = scalar_lea.vmem %s840_s3, %s533_s15 }
   0xe   : > { %v539_v1 = vld [vmem:[%s671_s18] sm:$0xff]   ;;  %v602_v2 = vld [vmem:[%s671_s18 + $0x8] sm:$0xff]   ;;  %v603_v3 = vld [vmem:[%s671_s18 + $0x10] sm:$0xff]  }
   0xf   : > { %v540_v4 = vunpack.c.l.bf16 %v539_v1  ;;  %v541_v6 = vunpack.c.h.bf16 %v539_v1  ;;  %v544_v7 = vunpack.c.l.bf16 %v602_v2  ;;  %v545_v8 = vunpack.c.h.bf16 %v602_v2  ;;  %v604_v9 = vld [vmem:[%s671_s18 + $0x18] sm:$0xff]   ;;  %v605_v41 = vld [vmem:[%s671_s18 + $0x20] sm:$0xff]   ;;  %v606_v45 = vld [vmem:[%s671_s18 + $0x28] sm:$0xff]  }
  0x10   : > { %v548_v10 = vunpack.c.l.bf16 %v603_v3  ;;  %v549_v11 = vunpack.c.h.bf16 %v603_v3  ;;  %v552_v12 = vunpack.c.l.bf16 %v604_v9  ;;  %v553_v13 = vunpack.c.h.bf16 %v604_v9  ;;  %v607_v46 = vld [vmem:[%s671_s18 + $0x30] sm:$0xff]   ;;  %v608_v61 = vld [vmem:[%s671_s18 + $0x38] sm:$0xff]  }
  0x11   : > { %v242_v14 = vmul.f32 %v676_v0, %v540_v4  ;;  %v243_v15 = vmul.f32 %v676_v0, %v541_v6  ;;  %v244_v16 = vmul.f32 %v676_v0, %v544_v7  ;;  %v245_v17 = vmul.f32 %v676_v0, %v545_v8 }
  0x12   : > { %v246_v18 = vmul.f32 %v676_v0, %v548_v10  ;;  %v247_v19 = vmul.f32 %v676_v0, %v549_v11  ;;  %v248_v20 = vmul.f32 %v676_v0, %v552_v12  ;;  %v249_v21 = vmul.f32 %v676_v0, %v553_v13 }
  0x13   : > { %v278_v22 = vadd.f32 %v684_v5, %v242_v14  ;;  %v279_v23 = vadd.f32 %v684_v5, %v243_v15  ;;  %v280_v24 = vadd.f32 %v684_v5, %v244_v16  ;;  %v281_v25 = vadd.f32 %v684_v5, %v245_v17 }
  0x14   : > { %v282_v26 = vadd.f32 %v684_v5, %v246_v18  ;;  %v283_v27 = vadd.f32 %v684_v5, %v247_v19  ;;  %v284_v28 = vadd.f32 %v684_v5, %v248_v20  ;;  %v285_v29 = vadd.f32 %v684_v5, %v249_v21 }
  0x15   : > { %vm310_vm1 = vcmp.ge.f32.partialorder %v278_v22, 0.0  ;;  %v342_v30 = vmul.f32 0.2, %v278_v22  ;;  %vm311_vm2 = vcmp.ge.f32.partialorder %v279_v23, 0.0  ;;  %v343_v31 = vmul.f32 0.2, %v279_v23 }
  0x16   : > { %vm312_vm3 = vcmp.ge.f32.partialorder %v280_v24, 0.0  ;;  %v344_v32 = vmul.f32 0.2, %v280_v24  ;;  %vm313_vm4 = vcmp.ge.f32.partialorder %v281_v25, 0.0  ;;  %v345_v33 = vmul.f32 0.2, %v281_v25 }
  0x17   : > { %v374_v34 = vsel %vm310_vm1, %v278_v22, %v342_v30  ;;  %v375_v35 = vsel %vm311_vm2, %v279_v23, %v343_v31  ;;  %vm314_vm5 = vcmp.ge.f32.partialorder %v282_v26, 0.0  ;;  %v346_v36 = vmul.f32 0.2, %v282_v26  ;;  %v609_v23 = vld [vmem:[%s671_s18 + $0x40] sm:$0xff]  }
  0x18   : > { %v406_v37 = vpack.c.bf16 %v374_v34, %v374_v34  ;;  %v407_v38 = vpack.c.bf16 %v375_v35, %v375_v35  ;;  %v376_v39 = vsel %vm312_vm3, %v280_v24, %v344_v32  ;;  %v377_v40 = vsel %vm313_vm4, %v281_v25, %v345_v33 }
  0x19   : > { %v408_v42 = vpack.c.bf16 %v376_v39, %v376_v39  ;;  %v409_v43 = vpack.c.bf16 %v377_v40, %v377_v40  ;;  %v378_v44 = vsel %vm314_vm5, %v282_v26, %v346_v36  ;;  %vm315_vm6 = vcmp.ge.f32.partialorder %v283_v27, 0.0 }
  0x1a   : > { %439 = vst.msk [vmem:[%s708_s25] sm:$0xf] %vm438_vm0, %v406_v37  ;;  %v410_v47 = vpack.c.bf16 %v378_v44, %v378_v44  ;;  %v347_v48 = vmul.f32 0.2, %v283_v27  ;;  %vm316_vm7 = vcmp.ge.f32.partialorder %v284_v28, 0.0  ;;  %vm317_vm8 = vcmp.ge.f32.partialorder %v285_v29, 0.0 }
  0x1b   : > { %440 = vst.msk [vmem:[%s708_s25 + $0x4] sm:$0xf] %vm438_vm0, %v407_v38  ;;  %v348_v49 = vmul.f32 0.2, %v284_v28  ;;  %v349_v50 = vmul.f32 0.2, %v285_v29  ;;  %v556_v51 = vunpack.c.l.bf16 %v605_v41  ;;  %v557_v52 = vunpack.c.h.bf16 %v605_v41 }
  0x1c   : > { %441 = vst.msk [vmem:[%s708_s25 + $0x8] sm:$0xf] %vm438_vm0, %v408_v42  ;;  %v379_v53 = vsel %vm315_vm6, %v283_v27, %v347_v48  ;;  %v560_v54 = vunpack.c.l.bf16 %v606_v45  ;;  %v561_v55 = vunpack.c.h.bf16 %v606_v45  ;;  %v564_v56 = vunpack.c.l.bf16 %v607_v46 }
  0x1d   : > { %442 = vst.msk [vmem:[%s708_s25 + $0xc] sm:$0xf] %vm438_vm0, %v409_v43  ;;  %v411_v57 = vpack.c.bf16 %v379_v53, %v379_v53  ;;  %v380_v58 = vsel %vm316_vm7, %v284_v28, %v348_v49  ;;  %v381_v59 = vsel %vm317_vm8, %v285_v29, %v349_v50  ;;  %v250_v60 = vmul.f32 %v676_v0, %v556_v51  ;;  %v610_v28 = vld [vmem:[%s671_s18 + $0x48] sm:$0xff]  }
  0x1e   : > { %443 = vst.msk [vmem:[%s708_s25 + $0x10] sm:$0xf] %vm438_vm0, %v410_v47  ;;  %v412_v62 = vpack.c.bf16 %v380_v58, %v380_v58  ;;  %v413_v63 = vpack.c.bf16 %v381_v59, %v381_v59  ;;  %v251_v1 = vmul.f32 %v676_v0, %v557_v52  ;;  %v252_v2 = vmul.f32 %v676_v0, %v560_v54  ;;  %v611_v54 = vld [vmem:[%s671_s18 + $0x50] sm:$0xff]   ;;  %v612_v58 = vld [vmem:[%s671_s18 + $0x58] sm:$0xff]  }
  0x1f   : > { %444 = vst.msk [vmem:[%s708_s25 + $0x14] sm:$0xf] %vm438_vm0, %v411_v57  ;;  %v286_v3 = vadd.f32 %v684_v5, %v250_v60  ;;  %v253_v4 = vmul.f32 %v676_v0, %v561_v55  ;;  %v254_v6 = vmul.f32 %v676_v0, %v564_v56  ;;  %v565_v7 = vunpack.c.h.bf16 %v607_v46 }
  0x20   : > { %445 = vst.msk [vmem:[%s708_s25 + $0x18] sm:$0xf] %vm438_vm0, %v412_v62  ;;  %v287_v8 = vadd.f32 %v684_v5, %v251_v1  ;;  %v288_v9 = vadd.f32 %v684_v5, %v252_v2  ;;  %v568_v10 = vunpack.c.l.bf16 %v608_v61  ;;  %v569_v11 = vunpack.c.h.bf16 %v608_v61 }
  0x21   : > { %446 = vst.msk [vmem:[%s708_s25 + $0x1c] sm:$0xf] %vm438_vm0, %v413_v63  ;;  %vm318_vm9 = vcmp.ge.f32.partialorder %v286_v3, 0.0  ;;  %v350_v12 = vmul.f32 0.2, %v286_v3  ;;  %v289_v13 = vadd.f32 %v684_v5, %v253_v4  ;;  %v290_v14 = vadd.f32 %v684_v5, %v254_v6 }
  0x22   : > { %vm319_vm10 = vcmp.ge.f32.partialorder %v287_v8, 0.0  ;;  %v351_v15 = vmul.f32 0.2, %v287_v8  ;;  %vm320_vm11 = vcmp.ge.f32.partialorder %v288_v9, 0.0  ;;  %v352_v16 = vmul.f32 0.2, %v288_v9 }
  0x23   : > { %v382_v17 = vsel %vm318_vm9, %v286_v3, %v350_v12  ;;  %vm321_vm12 = vcmp.ge.f32.partialorder %v289_v13, 0.0  ;;  %v353_v18 = vmul.f32 0.2, %v289_v13  ;;  %vm322_vm13 = vcmp.ge.f32.partialorder %v290_v14, 0.0 }
  0x24   : > { %v414_v19 = vpack.c.bf16 %v382_v17, %v382_v17  ;;  %v383_v20 = vsel %vm319_vm10, %v287_v8, %v351_v15  ;;  %v384_v21 = vsel %vm320_vm11, %v288_v9, %v352_v16  ;;  %v354_v22 = vmul.f32 0.2, %v290_v14  ;;  %v614_v15 = vld [vmem:[%s671_s18 + $0x68] sm:$0xff]  }
  0x25   : > { %v415_v24 = vpack.c.bf16 %v383_v20, %v383_v20  ;;  %v416_v25 = vpack.c.bf16 %v384_v21, %v384_v21  ;;  %v385_v26 = vsel %vm321_vm12, %v289_v13, %v353_v18  ;;  %v255_v27 = vmul.f32 %v676_v0, %v565_v7  ;;  %v613_v7 = vld [vmem:[%s671_s18 + $0x60] sm:$0xff]  }
  0x26   : > { %447 = vst.msk [vmem:[%s708_s25 + $0x20] sm:$0xf] %vm438_vm0, %v414_v19  ;;  %v417_v29 = vpack.c.bf16 %v385_v26, %v385_v26  ;;  %v386_v30 = vsel %vm322_vm13, %v290_v14, %v354_v22  ;;  %v256_v31 = vmul.f32 %v676_v0, %v568_v10  ;;  %v257_v32 = vmul.f32 %v676_v0, %v569_v11 }
  0x27   : > { %448 = vst.msk [vmem:[%s708_s25 + $0x24] sm:$0xf] %vm438_vm0, %v415_v24  ;;  %v418_v33 = vpack.c.bf16 %v386_v30, %v386_v30  ;;  %v291_v34 = vadd.f32 %v684_v5, %v255_v27  ;;  %v572_v35 = vunpack.c.l.bf16 %v609_v23  ;;  %v573_v36 = vunpack.c.h.bf16 %v609_v23 }
  0x28   : > { %449 = vst.msk [vmem:[%s708_s25 + $0x28] sm:$0xf] %vm438_vm0, %v416_v25  ;;  %v292_v37 = vadd.f32 %v684_v5, %v256_v31  ;;  %v293_v38 = vadd.f32 %v684_v5, %v257_v32  ;;  %v576_v39 = vunpack.c.l.bf16 %v610_v28  ;;  %v577_v40 = vunpack.c.h.bf16 %v610_v28 }
  0x29   : > { %450 = vst.msk [vmem:[%s708_s25 + $0x2c] sm:$0xf] %vm438_vm0, %v417_v29  ;;  %vm323_vm14 = vcmp.ge.f32.partialorder %v291_v34, 0.0  ;;  %v355_v41 = vmul.f32 0.2, %v291_v34  ;;  %v258_v42 = vmul.f32 %v676_v0, %v572_v35  ;;  %v259_v43 = vmul.f32 %v676_v0, %v573_v36 }
  0x2a   : > { %451 = vst.msk [vmem:[%s708_s25 + $0x30] sm:$0xf] %vm438_vm0, %v418_v33  ;;  %vm324_vm15 = vcmp.ge.f32.partialorder %v292_v37, 0.0  ;;  %v356_v44 = vmul.f32 0.2, %v292_v37  ;;  %vm325_vm1 = vcmp.ge.f32.partialorder %v293_v38, 0.0  ;;  %v260_v45 = vmul.f32 %v676_v0, %v576_v39 }
  0x2b   : > { %v387_v46 = vsel %vm323_vm14, %v291_v34, %v355_v41  ;;  %v357_v47 = vmul.f32 0.2, %v293_v38  ;;  %v294_v48 = vadd.f32 %v684_v5, %v258_v42  ;;  %v295_v49 = vadd.f32 %v684_v5, %v259_v43 }
  0x2c   : > { %v419_v50 = vpack.c.bf16 %v387_v46, %v387_v46  ;;  %v388_v51 = vsel %vm324_vm15, %v292_v37, %v356_v44  ;;  %v296_v52 = vadd.f32 %v684_v5, %v260_v45  ;;  %v261_v53 = vmul.f32 %v676_v0, %v577_v40  ;;  %v615_v40 = vld [vmem:[%s671_s18 + $0x70] sm:$0xff]  }
  0x2d   : > { %v420_v55 = vpack.c.bf16 %v388_v51, %v388_v51  ;;  %v389_v56 = vsel %vm325_vm1, %v293_v38, %v357_v47  ;;  %vm326_vm2 = vcmp.ge.f32.partialorder %v294_v48, 0.0  ;;  %v358_v57 = vmul.f32 0.2, %v294_v48  ;;  %v616_v51 = vld [vmem:[%s671_s18 + $0x78] sm:$0xff]  }
  0x2e   : > { %452 = vst.msk [vmem:[%s708_s25 + $0x34] sm:$0xf] %vm438_vm0, %v419_v50  ;;  %v421_v59 = vpack.c.bf16 %v389_v56, %v389_v56  ;;  %vm327_vm3 = vcmp.ge.f32.partialorder %v295_v49, 0.0  ;;  %v359_v60 = vmul.f32 0.2, %v295_v49  ;;  %vm328_vm4 = vcmp.ge.f32.partialorder %v296_v52, 0.0 }
  0x2f   : > { %453 = vst.msk [vmem:[%s708_s25 + $0x38] sm:$0xf] %vm438_vm0, %v420_v55  ;;  %v390_v61 = vsel %vm326_vm2, %v294_v48, %v358_v57  ;;  %v360_v62 = vmul.f32 0.2, %v296_v52  ;;  %v297_v63 = vadd.f32 %v684_v5, %v261_v53  ;;  %v580_v1 = vunpack.c.l.bf16 %v611_v54 }
  0x30   : > { %454 = vst.msk [vmem:[%s708_s25 + $0x3c] sm:$0xf] %vm438_vm0, %v421_v59  ;;  %v422_v2 = vpack.c.bf16 %v390_v61, %v390_v61  ;;  %v391_v3 = vsel %vm327_vm3, %v295_v49, %v359_v60  ;;  %v581_v4 = vunpack.c.h.bf16 %v611_v54  ;;  %v584_v6 = vunpack.c.l.bf16 %v612_v58 }
  0x31   : > { %v423_v8 = vpack.c.bf16 %v391_v3, %v391_v3  ;;  %v392_v9 = vsel %vm328_vm4, %v296_v52, %v360_v62  ;;  %vm329_vm5 = vcmp.ge.f32.partialorder %v297_v63, 0.0  ;;  %v361_v10 = vmul.f32 0.2, %v297_v63 }
  0x32   : > { %455 = vst.msk [vmem:[%s708_s25 + $0x40] sm:$0xf] %vm438_vm0, %v422_v2  ;;  %v424_v11 = vpack.c.bf16 %v392_v9, %v392_v9  ;;  %v262_v12 = vmul.f32 %v676_v0, %v580_v1  ;;  %v263_v13 = vmul.f32 %v676_v0, %v581_v4  ;;  %v264_v14 = vmul.f32 %v676_v0, %v584_v6 }
  0x33   : > { %456 = vst.msk [vmem:[%s708_s25 + $0x44] sm:$0xf] %vm438_vm0, %v423_v8  ;;  %v393_v16 = vsel %vm329_vm5, %v297_v63, %v361_v10  ;;  %v585_v17 = vunpack.c.h.bf16 %v612_v58  ;;  %v588_v18 = vunpack.c.l.bf16 %v613_v7  ;;  %v589_v19 = vunpack.c.h.bf16 %v613_v7 }
  0x34   : > { %457 = vst.msk [vmem:[%s708_s25 + $0x48] sm:$0xf] %vm438_vm0, %v424_v11  ;;  %v425_v20 = vpack.c.bf16 %v393_v16, %v393_v16  ;;  %v298_v21 = vadd.f32 %v684_v5, %v262_v12  ;;  %v299_v22 = vadd.f32 %v684_v5, %v263_v13  ;;  %v300_v23 = vadd.f32 %v684_v5, %v264_v14 }
  0x35   : > { %v265_v24 = vmul.f32 %v676_v0, %v585_v17  ;;  %v266_v25 = vmul.f32 %v676_v0, %v588_v18  ;;  %v267_v26 = vmul.f32 %v676_v0, %v589_v19  ;;  %v592_v27 = vunpack.c.l.bf16 %v614_v15 }
  0x36   : > { %458 = vst.msk [vmem:[%s708_s25 + $0x4c] sm:$0xf] %vm438_vm0, %v425_v20  ;;  %vm330_vm6 = vcmp.ge.f32.partialorder %v298_v21, 0.0  ;;  %v362_v28 = vmul.f32 0.2, %v298_v21  ;;  %vm331_vm7 = vcmp.ge.f32.partialorder %v299_v22, 0.0  ;;  %v593_v29 = vunpack.c.h.bf16 %v614_v15 }
  0x37   : > { %v363_v30 = vmul.f32 0.2, %v299_v22  ;;  %vm332_vm8 = vcmp.ge.f32.partialorder %v300_v23, 0.0  ;;  %v364_v31 = vmul.f32 0.2, %v300_v23  ;;  %v301_v32 = vadd.f32 %v684_v5, %v265_v24 }
  0x38   : > { %v394_v33 = vsel %vm330_vm6, %v298_v21, %v362_v28  ;;  %v302_v34 = vadd.f32 %v684_v5, %v266_v25  ;;  %v303_v35 = vadd.f32 %v684_v5, %v267_v26  ;;  %v268_v36 = vmul.f32 %v676_v0, %v592_v27 }
  0x39   : > { %v426_v37 = vpack.c.bf16 %v394_v33, %v394_v33  ;;  %v395_v38 = vsel %vm331_vm7, %v299_v22, %v363_v30  ;;  %v396_v39 = vsel %vm332_vm8, %v300_v23, %v364_v31  ;;  %vm333_vm9 = vcmp.ge.f32.partialorder %v301_v32, 0.0 }
  0x3a   : > { %v427_v41 = vpack.c.bf16 %v395_v38, %v395_v38  ;;  %v428_v42 = vpack.c.bf16 %v396_v39, %v396_v39  ;;  %v365_v43 = vmul.f32 0.2, %v301_v32  ;;  %vm334_vm10 = vcmp.ge.f32.partialorder %v302_v34, 0.0 }
  0x3b   : > { %459 = vst.msk [vmem:[%s708_s25 + $0x50] sm:$0xf] %vm438_vm0, %v426_v37  ;;  %v366_v44 = vmul.f32 0.2, %v302_v34  ;;  %vm335_vm11 = vcmp.ge.f32.partialorder %v303_v35, 0.0  ;;  %v304_v45 = vadd.f32 %v684_v5, %v268_v36  ;;  %v269_v46 = vmul.f32 %v676_v0, %v593_v29 }
  0x3c   : > { %460 = vst.msk [vmem:[%s708_s25 + $0x54] sm:$0xf] %vm438_vm0, %v427_v41  ;;  %v397_v47 = vsel %vm333_vm9, %v301_v32, %v365_v43  ;;  %v367_v48 = vmul.f32 0.2, %v303_v35  ;;  %v596_v49 = vunpack.c.l.bf16 %v615_v40  ;;  %v597_v50 = vunpack.c.h.bf16 %v615_v40 }
  0x3d   : > { %461 = vst.msk [vmem:[%s708_s25 + $0x58] sm:$0xf] %vm438_vm0, %v428_v42  ;;  %v429_v52 = vpack.c.bf16 %v397_v47, %v397_v47  ;;  %v398_v53 = vsel %vm334_vm10, %v302_v34, %v366_v44  ;;  %vm336_vm12 = vcmp.ge.f32.partialorder %v304_v45, 0.0  ;;  %v368_v54 = vmul.f32 0.2, %v304_v45 }
  0x3e   : > { %v430_v55 = vpack.c.bf16 %v398_v53, %v398_v53  ;;  %v399_v56 = vsel %vm335_vm11, %v303_v35, %v367_v48  ;;  %v305_v57 = vadd.f32 %v684_v5, %v269_v46  ;;  %v270_v58 = vmul.f32 %v676_v0, %v596_v49 }
  0x3f   : > { %462 = vst.msk [vmem:[%s708_s25 + $0x5c] sm:$0xf] %vm438_vm0, %v429_v52  ;;  %v431_v59 = vpack.c.bf16 %v399_v56, %v399_v56  ;;  %v400_v60 = vsel %vm336_vm12, %v304_v45, %v368_v54  ;;  %v271_v61 = vmul.f32 %v676_v0, %v597_v50  ;;  %v600_v62 = vunpack.c.l.bf16 %v616_v51 }
  0x40   : > { %463 = vst.msk [vmem:[%s708_s25 + $0x60] sm:$0xf] %vm438_vm0, %v430_v55  ;;  %v432_v63 = vpack.c.bf16 %v400_v60, %v400_v60  ;;  %vm337_vm13 = vcmp.ge.f32.partialorder %v305_v57, 0.0  ;;  %v369_v1 = vmul.f32 0.2, %v305_v57  ;;  %v306_v2 = vadd.f32 %v684_v5, %v270_v58 }
  0x41   : > { %464 = vst.msk [vmem:[%s708_s25 + $0x64] sm:$0xf] %vm438_vm0, %v431_v59  ;;  %v307_v3 = vadd.f32 %v684_v5, %v271_v61  ;;  %v272_v4 = vmul.f32 %v676_v0, %v600_v62  ;;  %v601_v6 = vunpack.c.h.bf16 %v616_v51 }
  0x42   : > { %465 = vst.msk [vmem:[%s708_s25 + $0x68] sm:$0xf] %vm438_vm0, %v432_v63  ;;  %v401_v7 = vsel %vm337_vm13, %v305_v57, %v369_v1  ;;  %vm338_vm14 = vcmp.ge.f32.partialorder %v306_v2, 0.0  ;;  %v370_v8 = vmul.f32 0.2, %v306_v2 }
  0x43   : > { %v433_v9 = vpack.c.bf16 %v401_v7, %v401_v7  ;;  %vm339_vm15 = vcmp.ge.f32.partialorder %v307_v3, 0.0  ;;  %v371_v10 = vmul.f32 0.2, %v307_v3  ;;  %v308_v11 = vadd.f32 %v684_v5, %v272_v4 }
  0x44   : > { %v402_v12 = vsel %vm338_vm14, %v306_v2, %v370_v8  ;;  %v273_v13 = vmul.f32 %v676_v0, %v601_v6 }
  0x45   : > { %466 = vst.msk [vmem:[%s708_s25 + $0x6c] sm:$0xf] %vm438_vm0, %v433_v9  ;;  %v434_v14 = vpack.c.bf16 %v402_v12, %v402_v12  ;;  %v403_v15 = vsel %vm339_vm15, %v307_v3, %v371_v10  ;;  %vm340_vm1 = vcmp.ge.f32.partialorder %v308_v11, 0.0  ;;  %v372_v16 = vmul.f32 0.2, %v308_v11 }
  0x46   : > { %v435_v17 = vpack.c.bf16 %v403_v15, %v403_v15  ;;  %v309_v18 = vadd.f32 %v684_v5, %v273_v13 }
  0x47   : > { %467 = vst.msk [vmem:[%s708_s25 + $0x70] sm:$0xf] %vm438_vm0, %v434_v14  ;;  %v404_v19 = vsel %vm340_vm1, %v308_v11, %v372_v16 }
  0x48   : > { %468 = vst.msk [vmem:[%s708_s25 + $0x74] sm:$0xf] %vm438_vm0, %v435_v17  ;;  %v436_v20 = vpack.c.bf16 %v404_v19, %v404_v19  ;;  %vm341_vm2 = vcmp.ge.f32.partialorder %v309_v18, 0.0  ;;  %v373_v21 = vmul.f32 0.2, %v309_v18 }
  0x4a   : > { %469 = vst.msk [vmem:[%s708_s25 + $0x78] sm:$0xf] %vm438_vm0, %v436_v20  ;;  %v405_v0 = vsel %vm341_vm2, %v309_v18, %v373_v21 }
  0x4b   : > { %v437_v22 = vpack.c.bf16 %v405_v0, %v405_v0 }
  0x4d   : > { %470 = vst.msk [vmem:[%s708_s25 + $0x7c] sm:$0xf] %vm438_vm0, %v437_v22 }
  0x4e PF: > { %s13_s12 = sadd.s32 1, %s633_s12  }
  0x4f   : > { %p10_p4 = scmp.ge.s32.totalorder %s13_s12, 7  }
  0x51   :  { %12 = sbr.rel (!%p10_p4) target bundleno = 1 (0x1), region = 62 }

// kernel: a_call__.19
= control target key start
LH: loop header
LB: loop body
LE: loop exit
PB: predicated region body
PF: predicated region fallthrough
CT: control target
= control target key end

     0   :  { %s2122_s18 = smov 0   ;;  %s2124_s19 = smov 0   ;;  %s3132_s0 = inlined_call_operand.vmem [shape: bf16[4608,64], index: 0, kind: input, shape index: {}]   ;;  %s3133_s1 = inlined_call_operand.vmem [shape: bf16[64,64], index: 1, kind: input, shape index: {}]   ;;  %s3134_s2 = inlined_call_operand.vmem [shape: f32[1,64], index: 2, kind: input, shape index: {}]   ;;  %s3135_s3 = inlined_call_operand.vmem [shape: bf16[4608,64], index: 3, kind: output, shape index: {0}]   ;;  %s3136_s4 = inlined_call_operand.vmem [shape: f32[9,1,64], index: 4, kind: output, shape index: {1}]   ;;  %s3137_s5 = inlined_call_operand.vmem [shape: f32[9,1,64], index: 5, kind: output, shape index: {2}]  }
   0x1   :  { %s2126_s20 = smov 0  }
   0x2 LB: > { %s28_s21 = sadd.s32 1, %s2085_s19  ;;  %p1809_p0 = scmp.ge.s32.totalorder %s2089_s20, 1  ;;  %s2089_s20 = sphi %s2126_s20, %s16_s20   ;;  %s2085_s19 = sphi %s2124_s19, %s3139_s19   ;;  %s2081_s18 = sphi %s2122_s18, %s3138_s18  }
   0x3   : > { %p30_p1 = scmp.ge.s32.totalorder %s28_s21, 9  ;;  %p221_p2 = scmp.lt.s32.totalorder %s2089_s20, 10 }
   0x5   : > { %s3141_s21 = smov (%p30_p1, %s28_s21), 0  ;;  %p222_p3 = pnand %p1809_p0, %p221_p2 }
   0x6   : > { %s1810_s24 = sshll.u32 (!%p222_p3), %s2081_s18, 6  ;;  %p284_p5 = scmp.lt.s32.totalorder (!%p222_p3), %s2081_s18, 8 }
   0x7   : > { %225 = sbr.rel (%p222_p3) target bundleno = 398 (0x18e), region = 32  ;;  %p264_p4 = scmp.lt.s32.totalorder (!%p222_p3), %s1810_s24, 575 }
   0xc   : > { %v2027_v0 = vld [vmem:[%s3133_s1 + $0x18] sm:$0xff]  ;;  %v2026_v1 = vld [vmem:[%s3133_s1 + $0x10] sm:$0xff]  ;;  %s3143_s24 = smov (!%p264_p4, %s1810_s24), 575  ;;  %v2025_v2 = vld [vmem:[%s3133_s1 + $0x8] sm:$0xff]  ;;  %vm295_vm0 = vcmask 523264   ;;  %v2091_v24 = vmov 0.0  }
   0xd   : > { %781 = vmatpush.bf16.msra.mxu0 %v2027_v0  ;;  %2028 = vmatpush.bf16.msra.mxu1 %v2027_v0  ;;  %s1811_s29 = sshll.u32 %s3143_s24, 2  ;;  %v2024_v3 = vld [vmem:[%s3133_s1] sm:$0xff]  ;;  %296 = vst.msk [vmem:[#allocation2] sm:$0xff] %vm295_vm0, %v2091_v24  ;;  %vm1273_vm1 = vcmask 519168   ;;  %s3145_s18 = smov (!%p284_p5, %s2081_s18), 8  ;;  %vm1471_vm2 = vcmask 516096  }
   0xe   : > { %2029 = vmatpush.bf16.msra.mxu2 %v2027_v0  ;;  %2030 = vmatpush.bf16.msra.mxu3 %v2027_v0  ;;  %s2163_s9 = scalar_lea.vmem %s3132_s0, %s1811_s29  ;;  %297 = vst.msk [vmem:[#allocation2 + $0x8] sm:$0xff] %vm295_vm0, %v2091_v24  ;;  %v2325_v37 = vld [vmem:[%s3134_s2] ss:$0 sm:$0xff]  ;;  %s2343_s14 = scalar_lea.vmem %s3135_s3, %s1811_s29 }
   0xf   : > { %v1992_v4 = vld [vmem:[%s2163_s9] sm:$0xff]  ;;  %v1993_v6 = vld [vmem:[%s2163_s9 + $0x8] sm:$0xff]  ;;  %v1994_v9 = vld [vmem:[%s2163_s9 + $0x10] sm:$0xff]  ;;  %298 = vst.msk [vmem:[#allocation2 + $0x10] sm:$0xff] %vm295_vm0, %v2091_v24  ;;  %s286_s23 = scalar_lea.vmem %s3136_s4, %s3145_s18  ;;  %s289_s26 = scalar_lea.vmem %s3137_s5, %s3145_s18 }
  0x10   : > { %v2000_v5 = vld [vmem:[%s2163_s9 + $0x40] sm:$0xff]  ;;  %v2001_v7 = vld [vmem:[%s2163_s9 + $0x48] sm:$0xff]  ;;  %v2002_v10 = vld [vmem:[%s2163_s9 + $0x50] sm:$0xff]  ;;  %299 = vst.msk [vmem:[#allocation2 + $0x18] sm:$0xff] %vm295_vm0, %v2091_v24 }
  0x11   : > { %782 = vmatpush.bf16.msra.mxu0 %v2026_v1  ;;  %2031 = vmatpush.bf16.msra.mxu1 %v2026_v1  ;;  %v2008_v8 = vld [vmem:[%s2163_s9 + $0x80] sm:$0xff]  ;;  %v2009_v11 = vld [vmem:[%s2163_s9 + $0x88] sm:$0xff]  ;;  %v1995_v12 = vld [vmem:[%s2163_s9 + $0x18] sm:$0xff]  ;;  %300 = vst.msk [vmem:[#allocation2 + $0x20] sm:$0xff] %vm295_vm0, %v2091_v24 }
  0x12   : > { %2032 = vmatpush.bf16.msra.mxu2 %v2026_v1  ;;  %2033 = vmatpush.bf16.msra.mxu3 %v2026_v1  ;;  %v2003_v13 = vld [vmem:[%s2163_s9 + $0x58] sm:$0xff]  ;;  %v2010_v14 = vld [vmem:[%s2163_s9 + $0x90] sm:$0xff]  ;;  %v2016_v15 = vld [vmem:[%s2163_s9 + $0xc0] sm:$0xff]  ;;  %301 = vst.msk [vmem:[#allocation2 + $0x28] sm:$0xff] %vm295_vm0, %v2091_v24 }
  0x13   : > { %v1996_v16 = vld [vmem:[%s2163_s9 + $0x20] sm:$0xff]  ;;  %v2011_v18 = vld [vmem:[%s2163_s9 + $0x98] sm:$0xff]  ;;  %v2017_v19 = vld [vmem:[%s2163_s9 + $0xc8] sm:$0xff]  ;;  %302 = vst.msk [vmem:[#allocation2 + $0x30] sm:$0xff] %vm295_vm0, %v2091_v24 }
  0x14   : > { %v2004_v17 = vld [vmem:[%s2163_s9 + $0x60] sm:$0xff]  ;;  %v1997_v20 = vld [vmem:[%s2163_s9 + $0x28] sm:$0xff]  ;;  %v2018_v23 = vld [vmem:[%s2163_s9 + $0xd0] sm:$0xff]  ;;  %303 = vst.msk [vmem:[#allocation2 + $0x38] sm:$0xff] %vm295_vm0, %v2091_v24 }
  0x15   : > { %783 = vmatpush.bf16.msra.mxu0 %v2025_v2  ;;  %2034 = vmatpush.bf16.msra.mxu1 %v2025_v2  ;;  %v2005_v21 = vld [vmem:[%s2163_s9 + $0x68] sm:$0xff]  ;;  %v2012_v22 = vld [vmem:[%s2163_s9 + $0xa0] sm:$0xff]  ;;  %304 = vst.msk [vmem:[#allocation2 + $0x40] sm:$0xff] %vm295_vm0, %v2091_v24  ;;  %v1998_v25 = vld [vmem:[%s2163_s9 + $0x30] sm:$0xff] }
  0x16   : > { %2035 = vmatpush.bf16.msra.mxu2 %v2025_v2  ;;  %2036 = vmatpush.bf16.msra.mxu3 %v2025_v2  ;;  %305 = vst.msk [vmem:[#allocation2 + $0x48] sm:$0xff] %vm295_vm0, %v2091_v24  ;;  %v2006_v26 = vld [vmem:[%s2163_s9 + $0x70] sm:$0xff]  ;;  %v2013_v27 = vld [vmem:[%s2163_s9 + $0xa8] sm:$0xff]  ;;  %v2019_v28 = vld [vmem:[%s2163_s9 + $0xd8] sm:$0xff] }
  0x17   : > { %306 = vst.msk [vmem:[#allocation2 + $0x50] sm:$0xff] %vm295_vm0, %v2091_v24  ;;  %v1999_v29 = vld [vmem:[%s2163_s9 + $0x38] sm:$0xff]  ;;  %v360_v31 = vld [vmem:[#allocation2] sm:$0xff]  ;;  %v2014_v32 = vld [vmem:[%s2163_s9 + $0xb0] sm:$0xff] }
  0x18   : > { %307 = vst.msk [vmem:[#allocation2 + $0x58] sm:$0xff] %vm295_vm0, %v2091_v24  ;;  %v2007_v30 = vld [vmem:[%s2163_s9 + $0x78] sm:$0xff]  ;;  %v2020_v33 = vld [vmem:[%s2163_s9 + $0xe0] sm:$0xff]  ;;  %v2021_v44 = vld [vmem:[%s2163_s9 + $0xe8] sm:$0xff] }
  0x19   : > { %784 = vmatpush.bf16.msra.mxu0 %v2024_v3  ;;  %2037 = vmatpush.bf16.msra.mxu1 %v2024_v3  ;;  %308 = vst.msk [vmem:[#allocation2 + $0x60] sm:$0xff] %vm295_vm0, %v2091_v24  ;;  %v2015_v43 = vld [vmem:[%s2163_s9 + $0xb8] sm:$0xff]  ;;  %v361_v45 = vld [vmem:[#allocation2 + $0x8] sm:$0xff]  ;;  %v362_v46 = vld [vmem:[#allocation2 + $0x10] sm:$0xff] }
  0x1a   : > { %2038 = vmatpush.bf16.msra.mxu2 %v2024_v3  ;;  %2039 = vmatpush.bf16.msra.mxu3 %v2024_v3  ;;  %309 = vst.msk [vmem:[#allocation2 + $0x68] sm:$0xff] %vm295_vm0, %v2091_v24  ;;  %v363_v55 = vld [vmem:[#allocation2 + $0x18] sm:$0xff] }
  0x1b   : > { %310 = vst.msk [vmem:[#allocation2 + $0x70] sm:$0xff] %vm295_vm0, %v2091_v24 }
  0x1c   : > { %1958 = vmatmul.msk.bf16.vlgmr.msra.gmra.mxu0 %vm295_vm0, %v1992_v4  ;;  %1966 = vmatmul.msk.bf16.vlgmr.msra.gmra.mxu1 %vm295_vm0, %v2000_v5  ;;  %311 = vst.msk [vmem:[#allocation2 + $0x78] sm:$0xff] %vm295_vm0, %v2091_v24 }
  0x1d   : > { %1974 = vmatmul.msk.bf16.vlgmr.msra.gmra.mxu2 %vm295_vm0, %v2008_v8  ;;  %1982 = vmatmul.msk.bf16.vlgmr.msra.gmra.mxu3 %vm295_vm0, %v2016_v15  ;;  %312 = vst.msk [vmem:[#allocation2 + $0x80] sm:$0xff] %vm295_vm0, %v2091_v24 }
  0x1e   : > { %313 = vst.msk [vmem:[#allocation2 + $0x88] sm:$0xff] %vm295_vm0, %v2091_v24 }
  0x1f   : > { %314 = vst.msk [vmem:[#allocation2 + $0x90] sm:$0xff] %vm295_vm0, %v2091_v24 }
  0x20   : > { %315 = vst.msk [vmem:[#allocation2 + $0x98] sm:$0xff] %vm295_vm0, %v2091_v24 }
  0x21   : > { %316 = vst.msk [vmem:[#allocation2 + $0xa0] sm:$0xff] %vm295_vm0, %v2091_v24 }
  0x22   : > { %317 = vst.msk [vmem:[#allocation2 + $0xa8] sm:$0xff] %vm295_vm0, %v2091_v24 }
  0x23   : > { %318 = vst.msk [vmem:[#allocation2 + $0xb0] sm:$0xff] %vm295_vm0, %v2091_v24 }
  0x24   : > { %319 = vst.msk [vmem:[#allocation2 + $0xb8] sm:$0xff] %vm295_vm0, %v2091_v24  ;;  %v376_v48 = vld [vmem:[#allocation2 + $0x80] sm:$0xff] }
  0x25   : > { %320 = vst.msk [vmem:[#allocation2 + $0xc0] sm:$0xff] %vm295_vm0, %v2091_v24  ;;  %v377_v50 = vld [vmem:[#allocation2 + $0x88] sm:$0xff] }
  0x26   : > { %321 = vst.msk [vmem:[#allocation2 + $0xc8] sm:$0xff] %vm295_vm0, %v2091_v24  ;;  %v378_v56 = vld [vmem:[#allocation2 + $0x90] sm:$0xff] }
  0x27   : > { %322 = vst.msk [vmem:[#allocation2 + $0xd0] sm:$0xff] %vm295_vm0, %v2091_v24  ;;  %v379_v60 = vld [vmem:[#allocation2 + $0x98] sm:$0xff] }
  0x28   : > { %323 = vst.msk [vmem:[#allocation2 + $0xd8] sm:$0xff] %vm295_vm0, %v2091_v24 }
  0x29   : > { %324 = vst.msk [vmem:[#allocation2 + $0xe0] sm:$0xff] %vm295_vm0, %v2091_v24 }
  0x2a   : > { %325 = vst.msk [vmem:[#allocation2 + $0xe8] sm:$0xff] %vm295_vm0, %v2091_v24 }
  0x2b   : > { %326 = vst.msk [vmem:[#allocation2 + $0xf0] sm:$0xff] %vm295_vm0, %v2091_v24 }
  0x2c   : > { %1959 = vmatmul.msk.bf16.gmra.mxu0 %vm295_vm0, %v1993_v6  ;;  %1967 = vmatmul.msk.bf16.gmra.mxu1 %vm295_vm0, %v2001_v7  ;;  %327 = vst.msk [vmem:[#allocation2 + $0xf8] sm:$0xff] %vm295_vm0, %v2091_v24  ;;  %v2022_v6 = vld [vmem:[%s2163_s9 + $0xf0] sm:$0xff] }
  0x2d   : > { %1975 = vmatmul.msk.bf16.gmra.mxu2 %vm295_vm0, %v2009_v11  ;;  %1983 = vmatmul.msk.bf16.gmra.mxu3 %vm295_vm0, %v2017_v19  ;;  %328 = vst.msk [vmem:[#allocation2 + $0x100] sm:$0xff] %vm295_vm0, %v2091_v24 }
  0x2e   : > { %329 = vst.msk [vmem:[#allocation2 + $0x108] sm:$0xff] %vm295_vm0, %v2091_v24 }
  0x2f   : > { %330 = vst.msk [vmem:[#allocation2 + $0x110] sm:$0xff] %vm295_vm0, %v2091_v24 }
  0x30   : > { %331 = vst.msk [vmem:[#allocation2 + $0x118] sm:$0xff] %vm295_vm0, %v2091_v24 }
  0x31   : > { %332 = vst.msk [vmem:[#allocation2 + $0x120] sm:$0xff] %vm295_vm0, %v2091_v24 }
  0x32   : > { %333 = vst.msk [vmem:[#allocation2 + $0x128] sm:$0xff] %vm295_vm0, %v2091_v24 }
  0x33   : > { %334 = vst.msk [vmem:[#allocation2 + $0x130] sm:$0xff] %vm295_vm0, %v2091_v24 }
  0x34   : > { %335 = vst.msk [vmem:[#allocation2 + $0x138] sm:$0xff] %vm295_vm0, %v2091_v24 }
  0x35   : > { %336 = vst.msk [vmem:[#allocation2 + $0x140] sm:$0xff] %vm295_vm0, %v2091_v24 }
  0x36   : > { %337 = vst.msk [vmem:[#allocation2 + $0x148] sm:$0xff] %vm295_vm0, %v2091_v24 }
  0x37   : > { %338 = vst.msk [vmem:[#allocation2 + $0x150] sm:$0xff] %vm295_vm0, %v2091_v24 }
  0x38   : > { %339 = vst.msk [vmem:[#allocation2 + $0x158] sm:$0xff] %vm295_vm0, %v2091_v24 }
  0x39   : > { %340 = vst.msk [vmem:[#allocation2 + $0x160] sm:$0xff] %vm295_vm0, %v2091_v24 }
  0x3a   : > { %341 = vst.msk [vmem:[#allocation2 + $0x168] sm:$0xff] %vm295_vm0, %v2091_v24 }
  0x3b   : > { %342 = vst.msk [vmem:[#allocation2 + $0x170] sm:$0xff] %vm295_vm0, %v2091_v24 }
  0x3c   : > { %1960 = vmatmul.msk.bf16.gmra.mxu0 %vm295_vm0, %v1994_v9  ;;  %1968 = vmatmul.msk.bf16.gmra.mxu1 %vm295_vm0, %v2002_v10  ;;  %343 = vst.msk [vmem:[#allocation2 + $0x178] sm:$0xff] %vm295_vm0, %v2091_v24 }
  0x3d   : > { %1976 = vmatmul.msk.bf16.gmra.mxu2 %vm295_vm0, %v2010_v14  ;;  %1984 = vmatmul.msk.bf16.gmra.mxu3 %vm295_vm0, %v2018_v23  ;;  %344 = vst.msk [vmem:[#allocation2 + $0x180] sm:$0xff] %vm295_vm0, %v2091_v24 }
  0x3e   : > { %345 = vst.msk [vmem:[#allocation2 + $0x188] sm:$0xff] %vm295_vm0, %v2091_v24 }
  0x3f   : > { %346 = vst.msk [vmem:[#allocation2 + $0x190] sm:$0xff] %vm295_vm0, %v2091_v24 }
  0x40   : > { %347 = vst.msk [vmem:[#allocation2 + $0x198] sm:$0xff] %vm295_vm0, %v2091_v24 }
  0x41   : > { %348 = vst.msk [vmem:[#allocation2 + $0x1a0] sm:$0xff] %vm295_vm0, %v2091_v24 }
  0x42   : > { %349 = vst.msk [vmem:[#allocation2 + $0x1a8] sm:$0xff] %vm295_vm0, %v2091_v24 }
  0x43   : > { %350 = vst.msk [vmem:[#allocation2 + $0x1b0] sm:$0xff] %vm295_vm0, %v2091_v24 }
  0x44   : > { %351 = vst.msk [vmem:[#allocation2 + $0x1b8] sm:$0xff] %vm295_vm0, %v2091_v24 }
  0x45   : > { %352 = vst.msk [vmem:[#allocation2 + $0x1c0] sm:$0xff] %vm295_vm0, %v2091_v24 }
  0x46   : > { %353 = vst.msk [vmem:[#allocation2 + $0x1c8] sm:$0xff] %vm295_vm0, %v2091_v24 }
  0x47   : > { %354 = vst.msk [vmem:[#allocation2 + $0x1d0] sm:$0xff] %vm295_vm0, %v2091_v24 }
  0x48   : > { %355 = vst.msk [vmem:[#allocation2 + $0x1d8] sm:$0xff] %vm295_vm0, %v2091_v24 }
  0x49   : > { %356 = vst.msk [vmem:[#allocation2 + $0x1e0] sm:$0xff] %vm295_vm0, %v2091_v24 }
  0x4a   : > { %357 = vst.msk [vmem:[#allocation2 + $0x1e8] sm:$0xff] %vm295_vm0, %v2091_v24 }
  0x4b   : > { %358 = vst.msk [vmem:[#allocation2 + $0x1f0] sm:$0xff] %vm295_vm0, %v2091_v24 }
  0x4c   : > { %1961 = vmatmul.msk.bf16.gmra.mxu0 %vm295_vm0, %v1995_v12  ;;  %1969 = vmatmul.msk.bf16.gmra.mxu1 %vm295_vm0, %v2003_v13  ;;  %359 = vst.msk [vmem:[#allocation2 + $0x1f8] sm:$0xff] %vm295_vm0, %v2091_v24  ;;  %v364_v12 = vld [vmem:[#allocation2 + $0x20] sm:$0xff] }
  0x4d   : > { %1977 = vmatmul.msk.bf16.gmra.mxu2 %vm295_vm0, %v2011_v18  ;;  %1985 = vmatmul.msk.bf16.gmra.mxu3 %vm295_vm0, %v2019_v28 }
  0x5c   : > { %1962 = vmatmul.msk.bf16.gmra.mxu0 %vm295_vm0, %v1996_v16  ;;  %1970 = vmatmul.msk.bf16.gmra.mxu1 %vm295_vm0, %v2004_v17 }
  0x5d   : > { %1978 = vmatmul.msk.bf16.gmra.mxu2 %vm295_vm0, %v2012_v22  ;;  %1986 = vmatmul.msk.bf16.gmra.mxu3 %vm295_vm0, %v2020_v33 }
  0x6c   : > { %1963 = vmatmul.msk.bf16.gmra.mxu0 %vm295_vm0, %v1997_v20  ;;  %1971 = vmatmul.msk.bf16.gmra.mxu1 %vm295_vm0, %v2005_v21 }
  0x6d   : > { %1979 = vmatmul.msk.bf16.gmra.mxu2 %vm295_vm0, %v2013_v27  ;;  %1987 = vmatmul.msk.bf16.gmra.mxu3 %vm295_vm0, %v2021_v44 }
  0x7c   : > { %1964 = vmatmul.msk.bf16.gmra.mxu0 %vm295_vm0, %v1998_v25  ;;  %1972 = vmatmul.msk.bf16.gmra.mxu1 %vm295_vm0, %v2006_v26 }
  0x7d   : > { %1980 = vmatmul.msk.bf16.gmra.mxu2 %vm295_vm0, %v2014_v32  ;;  %1988 = vmatmul.msk.bf16.gmra.mxu3 %vm295_vm0, %v2022_v6 }
  0x8c   : > { %1965 = vmatmul.msk.bf16.gmra.mxu0 %vm295_vm0, %v1999_v29  ;;  %1973 = vmatmul.msk.bf16.gmra.mxu1 %vm295_vm0, %v2007_v30 }
  0x8d   : > { %1981 = vmatmul.msk.bf16.gmra.mxu2 %vm295_vm0, %v2015_v43 }
  0x99   : > { %v786_v34 = vpop.f32.mrf.mxu0  ;;  %v826_v36 = vpop.f32.mrf.mxu1 }
  0x9a   : > { %v946_v35 = vadd.f32 %v786_v34, %v360_v31  ;;  %v962_v53 = vadd.f32 %v826_v36, %v376_v48 }
  0x9c   : > { %1010 = vst.msk [vmem:[#allocation2] sm:$0xff] %vm295_vm0, %v946_v35 }
  0x9d   : > { %1026 = vst.msk [vmem:[#allocation2 + $0x80] sm:$0xff] %vm295_vm0, %v962_v53 }
  0xa0   : > { %v866_v33 = vpop.f32.mrf.mxu2 }
  0xa1   : > { %v788_v38 = vpop.f32.mrf.mxu0  ;;  %v828_v41 = vpop.f32.mrf.mxu1 }
  0xa2   : > { %v947_v49 = vadd.f32 %v788_v38, %v361_v45  ;;  %v963_v54 = vadd.f32 %v828_v41, %v377_v50  ;;  %v380_v45 = vld [vmem:[#allocation2 + $0xa0] sm:$0xff] }
  0xa3   : > { %v1077_v39 = vld [vmem:[#allocation2] sm:$0xff] }
  0xa4   : > { %v1145_v40 = vadd.f32 %v2325_v37, %v1077_v39  ;;  %1011 = vst.msk [vmem:[#allocation2 + $0x8] sm:$0xff] %vm295_vm0, %v947_v49  ;;  %v1473_v62 = vmul.f32 %v1077_v39, %v1077_v39  ;;  %v1338_v1 = vsel %vm295_vm0, %v1077_v39, 0.0  ;;  %v2382_v11 = vld [vmem:[#allocation2 + $0x80] sm:$0xff] }
  0xa5   : > { %1027 = vst.msk [vmem:[#allocation2 + $0x88] sm:$0xff] %vm295_vm0, %v963_v54  ;;  %v1161_v16 = vadd.f32 %v2325_v37, %v2382_v11  ;;  %v393_v54 = vld [vmem:[#allocation2 + $0x108] sm:$0xff] }
  0xa6   : > { %v1209_v42 = vpack.c.bf16 %v1145_v40, %v1145_v40  ;;  %v1537_v13 = vsel %vm295_vm0, %v1473_v62, 0.0 }
  0xa7   : > { %v1225_v24 = vpack.c.bf16 %v1161_v16, %v1161_v16 }
  0xa8   : > { %1274 = vst.msk [vmem:[%s2343_s14] sm:$0xf] %vm1273_vm1, %v1209_v42  ;;  %v365_v42 = vld [vmem:[#allocation2 + $0x28] sm:$0xff] }
  0xa9   : > { %v791_v47 = vpop.f32.mrf.mxu0  ;;  %v831_v52 = vpop.f32.mrf.mxu1  ;;  %1290 = vst.msk [vmem:[%s2343_s14 + $0x40] sm:$0xf] %vm1273_vm1, %v1225_v24 }
  0xaa   : > { %v948_v51 = vadd.f32 %v791_v47, %v362_v46  ;;  %v964_v58 = vadd.f32 %v831_v52, %v378_v56  ;;  %v392_v46 = vld [vmem:[#allocation2 + $0x100] sm:$0xff]  ;;  %v381_v52 = vld [vmem:[#allocation2 + $0xa8] sm:$0xff] }
  0xab   : > { %v1078_v0 = vld [vmem:[#allocation2 + $0x8] sm:$0xff] }
  0xac   : > { %1012 = vst.msk [vmem:[#allocation2 + $0x10] sm:$0xff] %vm295_vm0, %v948_v51  ;;  %v1146_v2 = vadd.f32 %v2325_v37, %v1078_v0  ;;  %v1339_v3 = vsel %vm295_vm0, %v1078_v0, 0.0  ;;  %v1474_v4 = vmul.f32 %v1078_v0, %v1078_v0  ;;  %v2388_v18 = vld [vmem:[#allocation2 + $0x88] sm:$0xff]  ;;  %v978_v51 = vadd.f32 %v866_v33, %v392_v46  ;;  %v2023_v0 = vld [vmem:[%s2163_s9 + $0xf8] sm:$0xff] }
  0xad   : > { %1028 = vst.msk [vmem:[#allocation2 + $0x90] sm:$0xff] %vm295_vm0, %v964_v58  ;;  %v1340_v7 = vadd.f32 %v1339_v3, %v1338_v1  ;;  %v1162_v26 = vadd.f32 %v2325_v37, %v2388_v18  ;;  %1989 = vmatmul.msk.bf16.gmra.mxu3 %vm295_vm0, %v2023_v0 }
  0xae   : > { %v1210_v14 = vpack.c.bf16 %v1146_v2, %v1146_v2  ;;  %v1538_v15 = vsel %vm295_vm0, %v1474_v4, 0.0  ;;  %1042 = vst.msk [vmem:[#allocation2 + $0x100] sm:$0xff] %vm295_vm0, %v978_v51  ;;  %v906_v51 = vpop.f32.mrf.mxu3 }
  0xaf   : > { %v1539_v19 = vadd.f32 %v1538_v15, %v1537_v13  ;;  %v1226_v35 = vpack.c.bf16 %v1162_v26, %v1162_v26 }
  0xb0   : > { %1275 = vst.msk [vmem:[%s2343_s14 + $0x4] sm:$0xf] %vm1273_vm1, %v1210_v14 }
  0xb1   : > { %v793_v57 = vpop.f32.mrf.mxu0  ;;  %v833_v61 = vpop.f32.mrf.mxu1  ;;  %1291 = vst.msk [vmem:[%s2343_s14 + $0x44] sm:$0xf] %vm1273_vm1, %v1226_v35 }
  0xb2   : > { %v949_v59 = vadd.f32 %v793_v57, %v363_v55  ;;  %v965_v63 = vadd.f32 %v833_v61, %v379_v60  ;;  %v868_v55 = vpop.f32.mrf.mxu2 }
  0xb3   : > { %v1079_v5 = vld [vmem:[#allocation2 + $0x10] sm:$0xff]  ;;  %v979_v58 = vadd.f32 %v868_v55, %v393_v54  ;;  %v369_v54 = vld [vmem:[#allocation2 + $0x48] sm:$0xff] }
  0xb4   : > { %1013 = vst.msk [vmem:[#allocation2 + $0x18] sm:$0xff] %vm295_vm0, %v949_v59  ;;  %v1147_v8 = vadd.f32 %v2325_v37, %v1079_v5  ;;  %v1341_v9 = vsel %vm295_vm0, %v1079_v5, 0.0  ;;  %v1475_v10 = vmul.f32 %v1079_v5, %v1079_v5  ;;  %v2396_v27 = vld [vmem:[#allocation2 + $0x90] sm:$0xff] }
  0xb5   : > { %1029 = vst.msk [vmem:[#allocation2 + $0x98] sm:$0xff] %vm295_vm0, %v965_v63  ;;  %v1342_v21 = vadd.f32 %v1341_v9, %v1340_v7  ;;  %v1163_v39 = vadd.f32 %v2325_v37, %v2396_v27  ;;  %v366_v63 = vld [vmem:[#allocation2 + $0x30] sm:$0xff]  ;;  %v2445_v13 = vld [vmem:[#allocation2 + $0x100] sm:$0xff] }
  0xb6   : > { %v1211_v20 = vpack.c.bf16 %v1147_v8, %v1147_v8  ;;  %v1540_v22 = vsel %vm295_vm0, %v1475_v10, 0.0  ;;  %1043 = vst.msk [vmem:[#allocation2 + $0x108] sm:$0xff] %vm295_vm0, %v979_v58  ;;  %v1177_v15 = vadd.f32 %v2325_v37, %v2445_v13 }
  0xb7   : > { %v1541_v28 = vadd.f32 %v1540_v22, %v1539_v19  ;;  %v1227_v44 = vpack.c.bf16 %v1163_v39, %v1163_v39 }
  0xb8   : > { %1276 = vst.msk [vmem:[%s2343_s14 + $0x8] sm:$0xf] %vm1273_vm1, %v1211_v20 }
  0xb9   : > { %v796_v17 = vpop.f32.mrf.mxu0  ;;  %v836_v32 = vpop.f32.mrf.mxu1  ;;  %1292 = vst.msk [vmem:[%s2343_s14 + $0x48] sm:$0xf] %vm1273_vm1, %v1227_v44 }
  0xba   : > { %v950_v25 = vadd.f32 %v796_v17, %v364_v12  ;;  %v966_v49 = vadd.f32 %v836_v32, %v380_v45  ;;  %v871_v10 = vpop.f32.mrf.mxu2  ;;  %v367_v17 = vld [vmem:[#allocation2 + $0x38] sm:$0xff] }
  0xbb   : > { %v1080_v23 = vld [vmem:[#allocation2 + $0x18] sm:$0xff] }
  0xbc   : > { %v1148_v29 = vadd.f32 %v2325_v37, %v1080_v23  ;;  %v1343_v30 = vsel %vm295_vm0, %v1080_v23, 0.0  ;;  %v1476_v31 = vmul.f32 %v1080_v23, %v1080_v23  ;;  %1014 = vst.msk [vmem:[#allocation2 + $0x20] sm:$0xff] %vm295_vm0, %v950_v25  ;;  %v2408_v40 = vld [vmem:[#allocation2 + $0x98] sm:$0xff]  ;;  %v382_v23 = vld [vmem:[#allocation2 + $0xb0] sm:$0xff] }
  0xbd   : > { %v1344_v34 = vadd.f32 %v1343_v30, %v1342_v21  ;;  %v1164_v43 = vadd.f32 %v2325_v37, %v2408_v40  ;;  %1030 = vst.msk [vmem:[#allocation2 + $0xa0] sm:$0xff] %vm295_vm0, %v966_v49  ;;  %v2451_v20 = vld [vmem:[#allocation2 + $0x108] sm:$0xff]  ;;  %v1241_v21 = vpack.c.bf16 %v1177_v15, %v1177_v15 }
  0xbe   : > { %v1212_v36 = vpack.c.bf16 %v1148_v29, %v1148_v29  ;;  %v1542_v38 = vsel %vm295_vm0, %v1476_v31, 0.0  ;;  %v1178_v25 = vadd.f32 %v2325_v37, %v2451_v20  ;;  %v394_v29 = vld [vmem:[#allocation2 + $0x110] sm:$0xff] }
  0xbf   : > { %v1543_v41 = vadd.f32 %v1542_v38, %v1541_v28  ;;  %v1228_v48 = vpack.c.bf16 %v1164_v43, %v1164_v43  ;;  %1306 = vst.msk [vmem:[%s2343_s14 + $0x80] sm:$0xf] %vm1273_vm1, %v1241_v21  ;;  %v980_v39 = vadd.f32 %v871_v10, %v394_v29  ;;  %v368_v43 = vld [vmem:[#allocation2 + $0x40] sm:$0xff] }
  0xc0   : > { %1277 = vst.msk [vmem:[%s2343_s14 + $0xc] sm:$0xf] %vm1273_vm1, %v1212_v36  ;;  %v1242_v31 = vpack.c.bf16 %v1178_v25, %v1178_v25  ;;  %v395_v36 = vld [vmem:[#allocation2 + $0x118] sm:$0xff]  ;;  %v385_v25 = vld [vmem:[#allocation2 + $0xc8] sm:$0xff] }
  0xc1   : > { %v798_v47 = vpop.f32.mrf.mxu0  ;;  %1293 = vst.msk [vmem:[%s2343_s14 + $0x4c] sm:$0xf] %vm1273_vm1, %v1228_v48  ;;  %v838_v53 = vpop.f32.mrf.mxu1 }
  0xc2   : > { %v951_v50 = vadd.f32 %v798_v47, %v365_v42  ;;  %v967_v57 = vadd.f32 %v838_v53, %v381_v52  ;;  %v873_v38 = vpop.f32.mrf.mxu2  ;;  %1307 = vst.msk [vmem:[%s2343_s14 + $0x84] sm:$0xf] %vm1273_vm1, %v1242_v31 }
  0xc3   : > { %v1081_v56 = vld [vmem:[#allocation2 + $0x20] sm:$0xff]  ;;  %v981_v44 = vadd.f32 %v873_v38, %v395_v36  ;;  %1044 = vst.msk [vmem:[#allocation2 + $0x110] sm:$0xff] %vm295_vm0, %v980_v39 }
  0xc4   : > { %1015 = vst.msk [vmem:[#allocation2 + $0x28] sm:$0xff] %vm295_vm0, %v951_v50  ;;  %v1149_v59 = vadd.f32 %v2325_v37, %v1081_v56  ;;  %v1345_v60 = vsel %vm295_vm0, %v1081_v56, 0.0  ;;  %v1477_v61 = vmul.f32 %v1081_v56, %v1081_v56  ;;  %v2441_v8 = vld [vmem:[#allocation2 + $0xa0] sm:$0xff] }
  0xc5   : > { %v2425_v62 = vadd.f32 %v1345_v60, %v1344_v34  ;;  %1031 = vst.msk [vmem:[#allocation2 + $0xa8] sm:$0xff] %vm295_vm0, %v967_v57  ;;  %v1165_v12 = vadd.f32 %v2325_v37, %v2441_v8  ;;  %v383_v34 = vld [vmem:[#allocation2 + $0xb8] sm:$0xff] }
  0xc6   : > { %v1213_v1 = vpack.c.bf16 %v1149_v59, %v1149_v59  ;;  %v1544_v2 = vsel %vm295_vm0, %v1477_v61, 0.0  ;;  %1045 = vst.msk [vmem:[#allocation2 + $0x118] sm:$0xff] %vm295_vm0, %v981_v44  ;;  %v371_v44 = vld [vmem:[#allocation2 + $0x58] sm:$0xff] }
  0xc7   : > { %v2431_v3 = vadd.f32 %v1544_v2, %v1543_v41  ;;  %v1229_v19 = vpack.c.bf16 %v1165_v12, %v1165_v12 }
  0xc8   : > { %1278 = vst.msk [vmem:[%s2343_s14 + $0x10] sm:$0xf] %vm1273_vm1, %v1213_v1 }
  0xc9   : > { %v801_v4 = vpop.f32.mrf.mxu0  ;;  %v841_v9 = vpop.f32.mrf.mxu1  ;;  %1294 = vst.msk [vmem:[%s2343_s14 + $0x50] sm:$0xf] %vm1273_vm1, %v1229_v19 }
  0xca   : > { %v952_v5 = vadd.f32 %v801_v4, %v366_v63  ;;  %v968_v32 = vadd.f32 %v841_v9, %v382_v23  ;;  %v876_v50 = vpop.f32.mrf.mxu2  ;;  %v2489_v56 = vld [vmem:[#allocation2 + $0x110] sm:$0xff]  ;;  %v396_v9 = vld [vmem:[#allocation2 + $0x120] sm:$0xff] }
  0xcb   : > { %v2436_v6 = vld [vmem:[#allocation2 + $0x28] sm:$0xff]  ;;  %v1179_v59 = vadd.f32 %v2325_v37, %v2489_v56  ;;  %v370_v23 = vld [vmem:[#allocation2 + $0x50] sm:$0xff] }
  0xcc   : > { %v1150_v7 = vadd.f32 %v2325_v37, %v2436_v6  ;;  %1016 = vst.msk [vmem:[#allocation2 + $0x30] sm:$0xff] %vm295_vm0, %v952_v5  ;;  %v2449_v16 = vld [vmem:[#allocation2 + $0xa8] sm:$0xff]  ;;  %v384_v5 = vld [vmem:[#allocation2 + $0xc0] sm:$0xff] }
  0xcd   : > { %v1166_v22 = vadd.f32 %v2325_v37, %v2449_v16  ;;  %1032 = vst.msk [vmem:[#allocation2 + $0xb0] sm:$0xff] %vm295_vm0, %v968_v32  ;;  %v2497_v0 = vld [vmem:[#allocation2 + $0x118] sm:$0xff]  ;;  %v1243_v2 = vpack.c.bf16 %v1179_v59, %v1179_v59 }
  0xce   : > { %v1214_v14 = vpack.c.bf16 %v1150_v7, %v1150_v7  ;;  %v1180_v4 = vadd.f32 %v2325_v37, %v2497_v0 }
  0xcf   : > { %v1230_v28 = vpack.c.bf16 %v1166_v22, %v1166_v22  ;;  %1308 = vst.msk [vmem:[%s2343_s14 + $0x88] sm:$0xf] %vm1273_vm1, %v1243_v2  ;;  %v408_v22 = vld [vmem:[#allocation2 + $0x180] sm:$0xff] }
  0xd0   : > { %1279 = vst.msk [vmem:[%s2343_s14 + $0x14] sm:$0xf] %vm1273_vm1, %v1214_v14  ;;  %v1244_v15 = vpack.c.bf16 %v1180_v4, %v1180_v4  ;;  %v994_v29 = vadd.f32 %v906_v51, %v408_v22 }
  0xd1   : > { %v803_v24 = vpop.f32.mrf.mxu0  ;;  %v843_v35 = vpop.f32.mrf.mxu1  ;;  %1295 = vst.msk [vmem:[%s2343_s14 + $0x54] sm:$0xf] %vm1273_vm1, %v1230_v28 }
  0xd2   : > { %v953_v26 = vadd.f32 %v803_v24, %v367_v17  ;;  %v969_v42 = vadd.f32 %v843_v35, %v383_v34  ;;  %v878_v12 = vpop.f32.mrf.mxu2  ;;  %v908_v17 = vpop.f32.mrf.mxu3  ;;  %v982_v24 = vadd.f32 %v876_v50, %v396_v9  ;;  %1309 = vst.msk [vmem:[%s2343_s14 + $0x8c] sm:$0xf] %vm1273_vm1, %v1244_v15 }
  0xd3   : > { %v2463_v30 = vld [vmem:[#allocation2 + $0x30] sm:$0xff]  ;;  %1058 = vst.msk [vmem:[#allocation2 + $0x180] sm:$0xff] %vm295_vm0, %v994_v29 }
  0xd4   : > { %v1151_v33 = vadd.f32 %v2325_v37, %v2463_v30  ;;  %1017 = vst.msk [vmem:[#allocation2 + $0x38] sm:$0xff] %vm295_vm0, %v953_v26  ;;  %v2483_v53 = vld [vmem:[#allocation2 + $0xb0] sm:$0xff]  ;;  %v397_v26 = vld [vmem:[#allocation2 + $0x128] sm:$0xff] }
  0xd5   : > { %1033 = vst.msk [vmem:[#allocation2 + $0xb8] sm:$0xff] %vm295_vm0, %v969_v42  ;;  %v1167_v55 = vadd.f32 %v2325_v37, %v2483_v53  ;;  %v983_v35 = vadd.f32 %v878_v12, %v397_v26 }
  0xd6   : > { %v1215_v41 = vpack.c.bf16 %v1151_v33, %v1151_v33  ;;  %v409_v33 = vld [vmem:[#allocation2 + $0x188] sm:$0xff]  ;;  %1046 = vst.msk [vmem:[#allocation2 + $0x120] sm:$0xff] %vm295_vm0, %v982_v24 }
  0xd7   : > { %v1231_v58 = vpack.c.bf16 %v1167_v55, %v1167_v55  ;;  %1047 = vst.msk [vmem:[#allocation2 + $0x128] sm:$0xff] %vm295_vm0, %v983_v35 }
  0xd8   : > { %1280 = vst.msk [vmem:[%s2343_s14 + $0x18] sm:$0xf] %vm1273_vm1, %v1215_v41  ;;  %v995_v41 = vadd.f32 %v908_v17, %v409_v33 }
  0xd9   : > { %v806_v45 = vpop.f32.mrf.mxu0  ;;  %v846_v49 = vpop.f32.mrf.mxu1  ;;  %1296 = vst.msk [vmem:[%s2343_s14 + $0x58] sm:$0xf] %vm1273_vm1, %v1231_v58 }
  0xda   : > { %v954_v46 = vadd.f32 %v806_v45, %v368_v43  ;;  %v970_v21 = vadd.f32 %v846_v49, %v384_v5  ;;  %v881_v39 = vpop.f32.mrf.mxu2  ;;  %v911_v42 = vpop.f32.mrf.mxu3  ;;  %v386_v45 = vld [vmem:[#allocation2 + $0xd0] sm:$0xff]  ;;  %1059 = vst.msk [vmem:[#allocation2 + $0x188] sm:$0xff] %vm295_vm0, %v995_v41  ;;  %v2543_v2 = vld [vmem:[#allocation2 + $0x180] sm:$0xff]  ;;  %v387_v41 = vld [vmem:[#allocation2 + $0xd8] sm:$0xff] }
  0xdb   : > { %v2477_v47 = vld [vmem:[#allocation2 + $0x38] sm:$0xff]  ;;  %v1193_v15 = vadd.f32 %v2325_v37, %v2543_v2 }
  0xdc   : > { %v1152_v48 = vadd.f32 %v2325_v37, %v2477_v47  ;;  %1018 = vst.msk [vmem:[#allocation2 + $0x40] sm:$0xff] %vm295_vm0, %v954_v46  ;;  %v2493_v60 = vld [vmem:[#allocation2 + $0xb8] sm:$0xff]  ;;  %v398_v46 = vld [vmem:[#allocation2 + $0x130] sm:$0xff] }
  0xdd   : > { %v1168_v63 = vadd.f32 %v2325_v37, %v2493_v60  ;;  %1034 = vst.msk [vmem:[#allocation2 + $0xc0] sm:$0xff] %vm295_vm0, %v970_v21  ;;  %v984_v51 = vadd.f32 %v881_v39, %v398_v46  ;;  %v2533_v55 = vld [vmem:[#allocation2 + $0x120] sm:$0xff]  ;;  %v1257_v22 = vpack.c.bf16 %v1193_v15, %v1193_v15 }
  0xde   : > { %v1216_v52 = vpack.c.bf16 %v1152_v48, %v1152_v48  ;;  %v1181_v59 = vadd.f32 %v2325_v37, %v2533_v55  ;;  %v2552_v17 = vld [vmem:[#allocation2 + $0x128] sm:$0xff] }
  0xdf   : > { %v1232_v14 = vpack.c.bf16 %v1168_v63, %v1168_v63  ;;  %1048 = vst.msk [vmem:[#allocation2 + $0x130] sm:$0xff] %vm295_vm0, %v984_v51  ;;  %v373_v51 = vld [vmem:[#allocation2 + $0x68] sm:$0xff] }
  0xe0   : > { %1281 = vst.msk [vmem:[%s2343_s14 + $0x1c] sm:$0xf] %vm1273_vm1, %v1216_v52 }
  0xe1   : > { %v808_v57 = vpop.f32.mrf.mxu0  ;;  %v848_v10 = vpop.f32.mrf.mxu1  ;;  %1297 = vst.msk [vmem:[%s2343_s14 + $0x5c] sm:$0xf] %vm1273_vm1, %v1232_v14  ;;  %v2562_v24 = vld [vmem:[#allocation2 + $0x188] sm:$0xff] }
  0xe2   : > { %v955_v61 = vadd.f32 %v808_v57, %v369_v54  ;;  %v971_v32 = vadd.f32 %v848_v10, %v385_v25  ;;  %v410_v57 = vld [vmem:[#allocation2 + $0x190] sm:$0xff]  ;;  %v883_v5 = vpop.f32.mrf.mxu2  ;;  %v913_v12 = vpop.f32.mrf.mxu3  ;;  %1322 = vst.msk [vmem:[%s2343_s14 + $0xc0] sm:$0xf] %vm1273_vm1, %v1257_v22 }
  0xe3   : > { %v2499_v1 = vld [vmem:[#allocation2 + $0x40] sm:$0xff]  ;;  %v996_v10 = vadd.f32 %v911_v42, %v410_v57 }
  0xe4   : > { %v1153_v7 = vadd.f32 %v2325_v37, %v2499_v1  ;;  %1019 = vst.msk [vmem:[#allocation2 + $0x48] sm:$0xff] %vm295_vm0, %v955_v61  ;;  %v2528_v49 = vld [vmem:[#allocation2 + $0xc0] sm:$0xff] }
  0xe5   : > { %1035 = vst.msk [vmem:[#allocation2 + $0xc8] sm:$0xff] %vm295_vm0, %v971_v32  ;;  %v1169_v54 = vadd.f32 %v2325_v37, %v2528_v49 }
  0xe6   : > { %v1217_v19 = vpack.c.bf16 %v1153_v7, %v1153_v7  ;;  %v1245_v7 = vpack.c.bf16 %v1181_v59, %v1181_v59  ;;  %1060 = vst.msk [vmem:[#allocation2 + $0x190] sm:$0xff] %vm295_vm0, %v996_v10  ;;  %v2580_v39 = vld [vmem:[#allocation2 + $0x130] sm:$0xff] }
  0xe7   : > { %v1233_v63 = vpack.c.bf16 %v1169_v54, %v1169_v54  ;;  %v411_v54 = vld [vmem:[#allocation2 + $0x198] sm:$0xff] }
  0xe8   : > { %1282 = vst.msk [vmem:[%s2343_s14 + $0x20] sm:$0xf] %vm1273_vm1, %v1217_v19  ;;  %v372_v19 = vld [vmem:[#allocation2 + $0x60] sm:$0xff] }
  0xe9   : > { %v811_v28 = vpop.f32.mrf.mxu0  ;;  %v851_v38 = vpop.f32.mrf.mxu1  ;;  %1298 = vst.msk [vmem:[%s2343_s14 + $0x60] sm:$0xf] %vm1273_vm1, %v1233_v63  ;;  %v1478_v63 = vmul.f32 %v2436_v6, %v2436_v6 }
  0xea   : > { %v956_v31 = vadd.f32 %v811_v28, %v370_v23  ;;  %v972_v50 = vadd.f32 %v851_v38, %v386_v45  ;;  %1310 = vst.msk [vmem:[%s2343_s14 + $0x90] sm:$0xf] %vm1273_vm1, %v1245_v7  ;;  %v1182_v23 = vadd.f32 %v2325_v37, %v2552_v17  ;;  %v1194_v28 = vadd.f32 %v2325_v37, %v2562_v24  ;;  %v399_v45 = vld [vmem:[#allocation2 + $0x138] sm:$0xff]  ;;  %v916_v46 = vpop.f32.mrf.mxu3 }
  0xeb   : > { %v2517_v34 = vld [vmem:[#allocation2 + $0x48] sm:$0xff] }
  0xec   : > { %v1154_v36 = vadd.f32 %v2325_v37, %v2517_v34  ;;  %1020 = vst.msk [vmem:[#allocation2 + $0x50] sm:$0xff] %vm295_vm0, %v956_v31  ;;  %v2545_v9 = vld [vmem:[#allocation2 + $0xc8] sm:$0xff]  ;;  %v1246_v31 = vpack.c.bf16 %v1182_v23, %v1182_v23  ;;  %v1258_v35 = vpack.c.bf16 %v1194_v28, %v1194_v28  ;;  %v388_v23 = vld [vmem:[#allocation2 + $0xe0] sm:$0xff] }
  0xed   : > { %1036 = vst.msk [vmem:[#allocation2 + $0xd0] sm:$0xff] %vm295_vm0, %v972_v50  ;;  %v1170_v21 = vadd.f32 %v2325_v37, %v2545_v9  ;;  %v1183_v50 = vadd.f32 %v2325_v37, %v2580_v39  ;;  %v2592_v59 = vld [vmem:[#allocation2 + $0x190] sm:$0xff] }
  0xee   : > { %v1218_v43 = vpack.c.bf16 %v1154_v36, %v1154_v36  ;;  %1311 = vst.msk [vmem:[%s2343_s14 + $0x94] sm:$0xf] %vm1273_vm1, %v1246_v31  ;;  %v1195_v10 = vadd.f32 %v2325_v37, %v2592_v59 }
  0xef   : > { %v1234_v26 = vpack.c.bf16 %v1170_v21, %v1170_v21  ;;  %1323 = vst.msk [vmem:[%s2343_s14 + $0xc4] sm:$0xf] %vm1273_vm1, %v1258_v35  ;;  %v1247_v57 = vpack.c.bf16 %v1183_v50, %v1183_v50  ;;  %v1479_v21 = vmul.f32 %v2463_v30, %v2463_v30  ;;  %v374_v50 = vld [vmem:[#allocation2 + $0x70] sm:$0xff] }
  0xf0   : > { %1283 = vst.msk [vmem:[%s2343_s14 + $0x24] sm:$0xf] %vm1273_vm1, %v1218_v43  ;;  %v886_v43 = vpop.f32.mrf.mxu2 }
  0xf1   : > { %v813_v48 = vpop.f32.mrf.mxu0  ;;  %v853_v4 = vpop.f32.mrf.mxu1  ;;  %1299 = vst.msk [vmem:[%s2343_s14 + $0x64] sm:$0xf] %vm1273_vm1, %v1234_v26  ;;  %v412_v26 = vld [vmem:[#allocation2 + $0x1a0] sm:$0xff] }
  0xf2   : > { %v957_v52 = vadd.f32 %v813_v48, %v371_v44  ;;  %1312 = vst.msk [vmem:[%s2343_s14 + $0x98] sm:$0xf] %vm1273_vm1, %v1247_v57 }
  0xf3   : > { %v2535_v58 = vld [vmem:[#allocation2 + $0x50] sm:$0xff] }
  0xf4   : > { %v1155_v61 = vadd.f32 %v2325_v37, %v2535_v58  ;;  %1021 = vst.msk [vmem:[#allocation2 + $0x58] sm:$0xff] %vm295_vm0, %v957_v52  ;;  %v2569_v32 = vld [vmem:[#allocation2 + $0xd0] sm:$0xff]  ;;  %v973_v52 = vadd.f32 %v853_v4, %v387_v41  ;;  %v997_v4 = vadd.f32 %v913_v12, %v411_v54  ;;  %v1480_v41 = vmul.f32 %v2477_v47, %v2477_v47 }
  0xf5   : > { %v1171_v36 = vadd.f32 %v2325_v37, %v2569_v32 }
  0xf6   : > { %v1219_v14 = vpack.c.bf16 %v1155_v61, %v1155_v61  ;;  %v985_v61 = vadd.f32 %v883_v5, %v399_v45  ;;  %1037 = vst.msk [vmem:[#allocation2 + $0xd8] sm:$0xff] %vm295_vm0, %v973_v52  ;;  %v1347_v5 = vsel %vm295_vm0, %v2436_v6, 0.0  ;;  %v389_v6 = vld [vmem:[#allocation2 + $0xe8] sm:$0xff]  ;;  %v998_v45 = vadd.f32 %v916_v46, %v412_v26 }
  0xf7   : > { %v1235_v44 = vpack.c.bf16 %v1171_v36, %v1171_v36  ;;  %v918_v36 = vpop.f32.mrf.mxu3  ;;  %1061 = vst.msk [vmem:[#allocation2 + $0x198] sm:$0xff] %vm295_vm0, %v997_v4  ;;  %v1351_v52 = vsel %vm295_vm0, %v2477_v47, 0.0 }
  0xf8   : > { %1284 = vst.msk [vmem:[%s2343_s14 + $0x28] sm:$0xf] %vm1273_vm1, %v1219_v14  ;;  %v888_v28 = vpop.f32.mrf.mxu2 }
  0xf9   : > { %v816_v25 = vpop.f32.mrf.mxu0  ;;  %v856_v42 = vpop.f32.mrf.mxu1  ;;  %1300 = vst.msk [vmem:[%s2343_s14 + $0x68] sm:$0xf] %vm1273_vm1, %v1235_v44 }
  0xfa   : > { %v958_v29 = vadd.f32 %v816_v25, %v372_v19  ;;  %v1259_v19 = vpack.c.bf16 %v1195_v10, %v1195_v10  ;;  %1049 = vst.msk [vmem:[#allocation2 + $0x138] sm:$0xff] %vm295_vm0, %v985_v61  ;;  %v400_v25 = vld [vmem:[#allocation2 + $0x140] sm:$0xff]  ;;  %v974_v31 = vadd.f32 %v856_v42, %v388_v23 }
  0xfb   : > { %v2571_v33 = vld [vmem:[#allocation2 + $0x58] sm:$0xff]  ;;  %v986_v35 = vadd.f32 %v886_v43, %v400_v25  ;;  %v401_v43 = vld [vmem:[#allocation2 + $0x148] sm:$0xff]  ;;  %1062 = vst.msk [vmem:[#allocation2 + $0x1a0] sm:$0xff] %vm295_vm0, %v998_v45  ;;  %v1482_v25 = vmul.f32 %v2517_v34, %v2517_v34 }
  0xfc   : > { %v1156_v38 = vadd.f32 %v2325_v37, %v2571_v33  ;;  %1022 = vst.msk [vmem:[#allocation2 + $0x60] sm:$0xff] %vm295_vm0, %v958_v29  ;;  %v1546_v29 = vsel %vm295_vm0, %v1478_v63, 0.0  ;;  %v1550_v63 = vsel %vm295_vm0, %v1480_v41, 0.0  ;;  %v987_v10 = vadd.f32 %v888_v28, %v401_v43 }
  0xfd   : > { %1324 = vst.msk [vmem:[%s2343_s14 + $0xc8] sm:$0xf] %vm1273_vm1, %v1259_v19  ;;  %v2628_v54 = vld [vmem:[#allocation2 + $0xd8] sm:$0xff]  ;;  %v1547_v46 = vadd.f32 %v1546_v29, %v2431_v3  ;;  %v1483_v29 = vmul.f32 %v2535_v58, %v2535_v58 }
  0xfe   : > { %v1220_v48 = vpack.c.bf16 %v1156_v38, %v1156_v38  ;;  %v1349_v38 = vsel %vm295_vm0, %v2463_v30, 0.0  ;;  %1038 = vst.msk [vmem:[#allocation2 + $0xe0] sm:$0xff] %vm295_vm0, %v974_v31  ;;  %v1481_v30 = vmul.f32 %v2499_v1, %v2499_v1  ;;  %v1172_v61 = vadd.f32 %v2325_v37, %v2628_v54  ;;  %v2657_v31 = vld [vmem:[#allocation2 + $0x198] sm:$0xff] }
  0xff   : > { %1050 = vst.msk [vmem:[#allocation2 + $0x140] sm:$0xff] %vm295_vm0, %v986_v35 }
 0x100   : > { %1285 = vst.msk [vmem:[%s2343_s14 + $0x2c] sm:$0xf] %vm1273_vm1, %v1220_v48  ;;  %v1348_v48 = vadd.f32 %v1347_v5, %v2425_v62  ;;  %v1236_v5 = vpack.c.bf16 %v1172_v61, %v1172_v61  ;;  %v1552_v23 = vsel %vm295_vm0, %v1481_v30, 0.0 }
 0x101   : > { %v818_v7 = vpop.f32.mrf.mxu0  ;;  %v858_v12 = vpop.f32.mrf.mxu1  ;;  %v2635_v47 = vld [vmem:[#allocation2 + $0x138] sm:$0xff]  ;;  %1051 = vst.msk [vmem:[#allocation2 + $0x148] sm:$0xff] %vm295_vm0, %v987_v10 }
 0x102   : > { %v959_v14 = vadd.f32 %v818_v7, %v373_v51  ;;  %v975_v42 = vadd.f32 %v858_v12, %v389_v6  ;;  %v1548_v51 = vsel %vm295_vm0, %v1479_v21, 0.0  ;;  %v1350_v62 = vadd.f32 %v1349_v38, %v1348_v48  ;;  %v2651_v12 = vpop.f32.mrf.mxu2  ;;  %1301 = vst.msk [vmem:[%s2343_s14 + $0x6c] sm:$0xf] %vm1273_vm1, %v1236_v5  ;;  %v2659_v6 = vpop.f32.mrf.mxu3  ;;  %v2684_v10 = vld [vmem:[#allocation2 + $0x1a0] sm:$0xff] }
 0x103   : > { %v2601_v15 = vld [vmem:[#allocation2 + $0x60] sm:$0xff]  ;;  %v1549_v4 = vadd.f32 %v1548_v51, %v1547_v46  ;;  %v1184_v21 = vadd.f32 %v2325_v37, %v2635_v47  ;;  %v1355_v38 = vsel %vm295_vm0, %v2517_v34, 0.0  ;;  %v1554_v34 = vsel %vm295_vm0, %v1482_v25, 0.0 }
 0x104   : > { %v1157_v22 = vadd.f32 %v2325_v37, %v2601_v15  ;;  %1023 = vst.msk [vmem:[#allocation2 + $0x68] sm:$0xff] %vm295_vm0, %v959_v14  ;;  %v413_v14 = vld [vmem:[#allocation2 + $0x1a8] sm:$0xff]  ;;  %v1352_v19 = vadd.f32 %v1351_v52, %v1350_v62  ;;  %v1357_v51 = vsel %vm295_vm0, %v2535_v58, 0.0  ;;  %v1484_v52 = vmul.f32 %v2571_v33, %v2571_v33 }
 0x105   : > { %1039 = vst.msk [vmem:[#allocation2 + $0xe8] sm:$0xff] %vm295_vm0, %v975_v42  ;;  %v1551_v28 = vadd.f32 %v1550_v63, %v1549_v4  ;;  %v999_v35 = vadd.f32 %v918_v36, %v413_v14  ;;  %v2665_v45 = vld [vmem:[#allocation2 + $0xe0] sm:$0xff]  ;;  %v375_v36 = vld [vmem:[#allocation2 + $0x78] sm:$0xff]  ;;  %v1359_v58 = vsel %vm295_vm0, %v2571_v33, 0.0  ;;  %v1485_v14 = vmul.f32 %v2601_v15, %v2601_v15 }
 0x106   : > { %v1221_v44 = vpack.c.bf16 %v1157_v22, %v1157_v22  ;;  %v1353_v22 = vsel %vm295_vm0, %v2499_v1, 0.0  ;;  %v1248_v1 = vpack.c.bf16 %v1184_v21, %v1184_v21  ;;  %v1173_v43 = vadd.f32 %v2325_v37, %v2665_v45  ;;  %v2679_v46 = vld [vmem:[#allocation2 + $0x140] sm:$0xff] }
 0x107   : > { %v1553_v42 = vadd.f32 %v1552_v23, %v1551_v28  ;;  %1063 = vst.msk [vmem:[#allocation2 + $0x1a8] sm:$0xff] %vm295_vm0, %v999_v35  ;;  %v1361_v28 = vsel %vm295_vm0, %v2601_v15, 0.0  ;;  %v402_v15 = vld [vmem:[#allocation2 + $0x150] sm:$0xff] }
 0x108   : > { %1286 = vst.msk [vmem:[%s2343_s14 + $0x30] sm:$0xf] %vm1273_vm1, %v1221_v44  ;;  %v1196_v44 = vadd.f32 %v2325_v37, %v2657_v31  ;;  %v1237_v63 = vpack.c.bf16 %v1173_v43, %v1173_v43 }
 0x109   : > { %v821_v57 = vpop.f32.mrf.mxu0  ;;  %v861_v48 = vpop.f32.mrf.mxu1  ;;  %1313 = vst.msk [vmem:[%s2343_s14 + $0x9c] sm:$0xf] %vm1273_vm1, %v1248_v1  ;;  %v1555_v21 = vadd.f32 %v1554_v34, %v1553_v42  ;;  %v2710_v42 = vld [vmem:[#allocation2 + $0x148] sm:$0xff]  ;;  %v1560_v34 = vsel %vm295_vm0, %v1485_v14, 0.0 }
 0x10a   : > { %v960_v7 = vadd.f32 %v821_v57, %v374_v50  ;;  %v1354_v50 = vadd.f32 %v1353_v22, %v1352_v19  ;;  %v1260_v30 = vpack.c.bf16 %v1196_v44, %v1196_v44  ;;  %v1556_v57 = vsel %vm295_vm0, %v1483_v29, 0.0  ;;  %1302 = vst.msk [vmem:[%s2343_s14 + $0x70] sm:$0xf] %vm1273_vm1, %v1237_v63  ;;  %v893_v35 = vpop.f32.mrf.mxu2  ;;  %v923_v43 = vpop.f32.mrf.mxu3  ;;  %v414_v63 = vld [vmem:[#allocation2 + $0x1b0] sm:$0xff] }
 0x10b   : > { %v2638_v3 = vld [vmem:[#allocation2 + $0x68] sm:$0xff]  ;;  %v1197_v19 = vadd.f32 %v2325_v37, %v2684_v10 }
 0x10c   : > { %v1158_v26 = vadd.f32 %v2325_v37, %v2638_v3  ;;  %1024 = vst.msk [vmem:[#allocation2 + $0x70] sm:$0xff] %vm295_vm0, %v960_v7  ;;  %v1356_v62 = vadd.f32 %v1355_v38, %v1354_v50  ;;  %v1185_v7 = vadd.f32 %v2325_v37, %v2679_v46  ;;  %v2695_v5 = vld [vmem:[#allocation2 + $0xe8] sm:$0xff]  ;;  %v1486_v29 = vmul.f32 %v2638_v3, %v2638_v3 }
 0x10d   : > { %1325 = vst.msk [vmem:[%s2343_s14 + $0xcc] sm:$0xf] %vm1273_vm1, %v1260_v30  ;;  %v1174_v33 = vadd.f32 %v2325_v37, %v2695_v5  ;;  %v1557_v38 = vadd.f32 %v1556_v57, %v1555_v21  ;;  %v1261_v44 = vpack.c.bf16 %v1197_v19, %v1197_v19  ;;  %v391_v19 = vld [vmem:[#allocation2 + $0xf8] sm:$0xff] }
 0x10e   : > { %v1222_v41 = vpack.c.bf16 %v1158_v26, %v1158_v26  ;;  %v1358_v22 = vadd.f32 %v1357_v51, %v1356_v62  ;;  %v1249_v25 = vpack.c.bf16 %v1185_v7, %v1185_v7  ;;  %v1558_v26 = vsel %vm295_vm0, %v1484_v52, 0.0  ;;  %v2723_v14 = vld [vmem:[#allocation2 + $0x1a8] sm:$0xff] }
 0x10f   : > { %v1238_v50 = vpack.c.bf16 %v1174_v33, %v1174_v33  ;;  %v1363_v51 = vsel %vm295_vm0, %v2638_v3, 0.0  ;;  %v1559_v62 = vadd.f32 %v1558_v26, %v1557_v38  ;;  %1326 = vst.msk [vmem:[%s2343_s14 + $0xd0] sm:$0xf] %vm1273_vm1, %v1261_v44  ;;  %v1562_v7 = vsel %vm295_vm0, %v1486_v29, 0.0  ;;  %v415_v44 = vld [vmem:[#allocation2 + $0x1b8] sm:$0xff] }
 0x110   : > { %1287 = vst.msk [vmem:[%s2343_s14 + $0x34] sm:$0xf] %vm1273_vm1, %v1222_v41  ;;  %v1360_v41 = vadd.f32 %v1359_v58, %v1358_v22  ;;  %v1198_v26 = vadd.f32 %v2325_v37, %v2723_v14 }
 0x111   : > { %v823_v61 = vpop.f32.mrf.mxu0  ;;  %1314 = vst.msk [vmem:[%s2343_s14 + $0xa0] sm:$0xf] %vm1273_vm1, %v1249_v25  ;;  %v863_v21 = vpop.f32.mrf.mxu1  ;;  %v1561_v22 = vadd.f32 %v1560_v34, %v1559_v62 }
 0x112   : > { %v961_v4 = vadd.f32 %v823_v61, %v375_v36  ;;  %v390_v36 = vld [vmem:[#allocation2 + $0xf0] sm:$0xff]  ;;  %v1362_v57 = vadd.f32 %v1361_v28, %v1360_v41  ;;  %v1186_v61 = vadd.f32 %v2325_v37, %v2710_v42  ;;  %1303 = vst.msk [vmem:[%s2343_s14 + $0x74] sm:$0xf] %vm1273_vm1, %v1238_v50  ;;  %v1262_v38 = vpack.c.bf16 %v1198_v26, %v1198_v26 }
 0x113   : > { %v1091_v23 = vld [vmem:[#allocation2 + $0x70] sm:$0xff]  ;;  %v976_v3 = vadd.f32 %v861_v48, %v390_v36  ;;  %v403_v48 = vld [vmem:[#allocation2 + $0x158] sm:$0xff]  ;;  %v1563_v29 = vadd.f32 %v1562_v7, %v1561_v22  ;;  %v977_v41 = vadd.f32 %v863_v21, %v391_v19  ;;  %v1489_v50 = vmul.f32 %v2382_v11, %v2382_v11 }
 0x114   : > { %v1159_v1 = vadd.f32 %v2325_v37, %v1091_v23  ;;  %1025 = vst.msk [vmem:[#allocation2 + $0x78] sm:$0xff] %vm295_vm0, %v961_v4  ;;  %v1487_v30 = vmul.f32 %v1091_v23, %v1091_v23  ;;  %v1365_v58 = vsel %vm295_vm0, %v1091_v23, 0.0  ;;  %v988_v4 = vadd.f32 %v2651_v12, %v402_v15 }
 0x115   : > { %v1364_v25 = vadd.f32 %v1363_v51, %v1362_v57  ;;  %v1250_v33 = vpack.c.bf16 %v1186_v61, %v1186_v61  ;;  %1040 = vst.msk [vmem:[#allocation2 + $0xf0] sm:$0xff] %vm295_vm0, %v976_v3  ;;  %v1000_v23 = vadd.f32 %v2659_v6, %v414_v63  ;;  %v896_v6 = vpop.f32.mrf.mxu2  ;;  %v1369_v51 = vsel %vm295_vm0, %v2382_v11, 0.0  ;;  %v2744_v57 = vpop.f32.mrf.mxu3 }
 0x116   : > { %v1223_v52 = vpack.c.bf16 %v1159_v1, %v1159_v1  ;;  %v1564_v28 = vsel %vm295_vm0, %v1487_v30, 0.0  ;;  %1052 = vst.msk [vmem:[#allocation2 + $0x150] sm:$0xff] %vm295_vm0, %v988_v4  ;;  %v989_v62 = vadd.f32 %v893_v35, %v403_v48  ;;  %v1490_v61 = vmul.f32 %v2388_v18, %v2388_v18 }
 0x117   : > { %v1366_v12 = vadd.f32 %v1365_v58, %v1364_v25  ;;  %1315 = vst.msk [vmem:[%s2343_s14 + $0xa4] sm:$0xf] %vm1273_vm1, %v1250_v33  ;;  %v1001_v58 = vadd.f32 %v923_v43, %v415_v44  ;;  %v1568_v11 = vsel %vm295_vm0, %v1489_v50, 0.0  ;;  %v1371_v35 = vsel %vm295_vm0, %v2388_v18, 0.0 }
 0x118   : > { %1288 = vst.msk [vmem:[%s2343_s14 + $0x38] sm:$0xf] %vm1273_vm1, %v1223_v52  ;;  %v1565_v52 = vadd.f32 %v1564_v28, %v1563_v29  ;;  %v1491_v19 = vmul.f32 %v2396_v27, %v2396_v27  ;;  %v1492_v21 = vmul.f32 %v2408_v40, %v2408_v40  ;;  %v1570_v33 = vsel %vm295_vm0, %v1490_v61, 0.0 }
 0x119   : > { %1327 = vst.msk [vmem:[%s2343_s14 + $0xd4] sm:$0xf] %vm1273_vm1, %v1262_v38  ;;  %v1373_v26 = vsel %vm295_vm0, %v2396_v27, 0.0  ;;  %v1375_v28 = vsel %vm295_vm0, %v2408_v40, 0.0  ;;  %v404_v40 = vld [vmem:[#allocation2 + $0x160] sm:$0xff] }
 0x11a   : > { %1064 = vst.msk [vmem:[#allocation2 + $0x1b0] sm:$0xff] %vm295_vm0, %v1000_v23  ;;  %v1574_v44 = vsel %vm295_vm0, %v1492_v21, 0.0 }
 0x11b   : > { %v1092_v1 = vld [vmem:[#allocation2 + $0x78] sm:$0xff]  ;;  %1041 = vst.msk [vmem:[#allocation2 + $0xf8] sm:$0xff] %vm295_vm0, %v977_v41 }
 0x11c   : > { %v1160_v36 = vadd.f32 %v2325_v37, %v1092_v1  ;;  %v1367_v15 = vsel %vm295_vm0, %v1092_v1, 0.0  ;;  %v1488_v34 = vmul.f32 %v1092_v1, %v1092_v1  ;;  %v2760_v43 = vld [vmem:[#allocation2 + $0xf0] sm:$0xff]  ;;  %1053 = vst.msk [vmem:[#allocation2 + $0x158] sm:$0xff] %vm295_vm0, %v989_v62  ;;  %v1493_v1 = vmul.f32 %v2441_v8, %v2441_v8 }
 0x11d   : > { %v1368_v30 = vadd.f32 %v1367_v15, %v1366_v12  ;;  %v1175_v18 = vadd.f32 %v2325_v37, %v2760_v43  ;;  %1065 = vst.msk [vmem:[#allocation2 + $0x1b8] sm:$0xff] %vm295_vm0, %v1001_v58  ;;  %v2771_v29 = vld [vmem:[#allocation2 + $0x150] sm:$0xff]  ;;  %v1572_v12 = vsel %vm295_vm0, %v1491_v19, 0.0  ;;  %v2779_v37 = vld [vmem:[%s3134_s2] ss:$0 sm:$0xff]  ;;  %v898_v41 = vpop.f32.mrf.mxu2 }
 0x11e   : > { %v1224_v63 = vpack.c.bf16 %v1160_v36, %v1160_v36  ;;  %v1566_v7 = vsel %vm295_vm0, %v1488_v34, 0.0  ;;  %v1187_v27 = vadd.f32 %v2779_v37, %v2771_v29  ;;  %v990_v34 = vadd.f32 %v896_v6, %v404_v40 }
 0x11f   : > { %v1370_v3 = vadd.f32 %v1369_v51, %v1368_v30  ;;  %v1567_v4 = vadd.f32 %v1566_v7, %v1565_v52  ;;  %v1239_v38 = vpack.c.bf16 %v1175_v18, %v1175_v18  ;;  %v928_v51 = vpop.f32.mrf.mxu3  ;;  %v1377_v52 = vsel %vm295_vm0, %v2441_v8, 0.0 }
 0x120   : > { %1289 = vst.msk [vmem:[%s2343_s14 + $0x3c] sm:$0xf] %vm1273_vm1, %v1224_v63  ;;  %v1494_v30 = vmul.f32 %v2449_v16, %v2449_v16  ;;  %v1251_v62 = vpack.c.bf16 %v1187_v27, %v1187_v27  ;;  %v1495_v7 = vmul.f32 %v2483_v53, %v2483_v53  ;;  %v1576_v8 = vsel %vm295_vm0, %v1493_v1, 0.0 }
 0x121   : > { %v1372_v22 = vadd.f32 %v1371_v35, %v1370_v3  ;;  %v1569_v25 = vadd.f32 %v1568_v11, %v1567_v4  ;;  %v2784_v15 = vld [vmem:[#allocation2 + $0x1b0] sm:$0xff]  ;;  %1304 = vst.msk [vmem:[%s2343_s14 + $0x78] sm:$0xf] %vm1273_vm1, %v1239_v38  ;;  %v1379_v4 = vsel %vm295_vm0, %v2449_v16, 0.0  ;;  %v1381_v16 = vsel %vm295_vm0, %v2483_v53, 0.0 }
 0x122   : > { %v1199_v61 = vadd.f32 %v2779_v37, %v2784_v15  ;;  %v2794_v63 = vld [vmem:[#allocation2 + $0xf8] sm:$0xff]  ;;  %1054 = vst.msk [vmem:[#allocation2 + $0x160] sm:$0xff] %vm295_vm0, %v990_v34  ;;  %v1578_v18 = vsel %vm295_vm0, %v1494_v30, 0.0  ;;  %v1580_v1 = vsel %vm295_vm0, %v1495_v7, 0.0  ;;  %v1383_v53 = vsel %vm295_vm0, %v2493_v60, 0.0 }
 0x123   : > { %v1374_v23 = vadd.f32 %v1373_v26, %v1372_v22  ;;  %v1571_v48 = vadd.f32 %v1570_v33, %v1569_v25  ;;  %v1176_v3 = vadd.f32 %v2779_v37, %v2794_v63  ;;  %1316 = vst.msk [vmem:[%s2343_s14 + $0xa8] sm:$0xf] %vm1273_vm1, %v1251_v62  ;;  %v2806_v35 = vld [vmem:[#allocation2 + $0x158] sm:$0xff]  ;;  %v416_v26 = vld [vmem:[#allocation2 + $0x1c0] sm:$0xff] }
 0x124   : > { %v1263_v11 = vpack.c.bf16 %v1199_v61, %v1199_v61  ;;  %v1188_v25 = vadd.f32 %v2779_v37, %v2806_v35  ;;  %v2810_v33 = vld [vmem:[#allocation2 + $0x1b8] sm:$0xff] }
 0x125   : > { %v1376_v50 = vadd.f32 %v1375_v28, %v1374_v23  ;;  %v1573_v36 = vadd.f32 %v1572_v12, %v1571_v48  ;;  %v1240_v22 = vpack.c.bf16 %v1176_v3, %v1176_v3  ;;  %v1496_v28 = vmul.f32 %v2493_v60, %v2493_v60  ;;  %v405_v48 = vld [vmem:[#allocation2 + $0x168] sm:$0xff]  ;;  %v901_v34 = vpop.f32.mrf.mxu2 }
 0x126   : > { %1328 = vst.msk [vmem:[%s2343_s14 + $0xd8] sm:$0xf] %vm1273_vm1, %v1263_v11  ;;  %v1200_v23 = vadd.f32 %v2779_v37, %v2810_v33  ;;  %v417_v12 = vld [vmem:[#allocation2 + $0x1c8] sm:$0xff]  ;;  %v1252_v40 = vpack.c.bf16 %v1188_v25, %v1188_v25  ;;  %v991_v62 = vadd.f32 %v898_v41, %v405_v48  ;;  %v1498_v60 = vmul.f32 %v2545_v9, %v2545_v9 }
 0x127   : > { %v1378_v58 = vadd.f32 %v1377_v52, %v1376_v50  ;;  %v1575_v6 = vadd.f32 %v1574_v44, %v1573_v36  ;;  %1305 = vst.msk [vmem:[%s2343_s14 + $0x7c] sm:$0xf] %vm1273_vm1, %v1240_v22  ;;  %v1497_v44 = vmul.f32 %v2528_v49, %v2528_v49  ;;  %v1002_v36 = vadd.f32 %v2744_v57, %v416_v26  ;;  %v931_v7 = vpop.f32.mrf.mxu3 }
 0x128   : > { %v1264_v50 = vpack.c.bf16 %v1200_v23, %v1200_v23  ;;  %1317 = vst.msk [vmem:[%s2343_s14 + $0xac] sm:$0xf] %vm1273_vm1, %v1252_v40  ;;  %v1003_v61 = vadd.f32 %v928_v51, %v417_v12  ;;  %v1500_v11 = vmul.f32 %v2628_v54, %v2628_v54  ;;  %v1586_v25 = vsel %vm295_vm0, %v1498_v60, 0.0  ;;  %v406_v12 = vld [vmem:[#allocation2 + $0x170] sm:$0xff] }
 0x129   : > { %v1380_v19 = vadd.f32 %v1379_v4, %v1378_v58  ;;  %v1577_v21 = vadd.f32 %v1576_v8, %v1575_v6  ;;  %v1582_v58 = vsel %vm295_vm0, %v1496_v28, 0.0  ;;  %v1385_v6 = vsel %vm295_vm0, %v2528_v49, 0.0  ;;  %v2838_v3 = vld [vmem:[#allocation2 + $0x160] sm:$0xff]  ;;  %1066 = vst.msk [vmem:[#allocation2 + $0x1c0] sm:$0xff] %vm295_vm0, %v1002_v36 }
 0x12a   : > { %1329 = vst.msk [vmem:[%s2343_s14 + $0xdc] sm:$0xf] %vm1273_vm1, %v1264_v50  ;;  %v1189_v41 = vadd.f32 %v2779_v37, %v2838_v3  ;;  %v1584_v51 = vsel %vm295_vm0, %v1497_v44, 0.0  ;;  %v1387_v49 = vsel %vm295_vm0, %v2545_v9, 0.0  ;;  %v1499_v4 = vmul.f32 %v2569_v32, %v2569_v32  ;;  %v419_v50 = vld [vmem:[#allocation2 + $0x1d8] sm:$0xff] }
 0x12b   : > { %v1579_v38 = vadd.f32 %v1578_v18, %v1577_v21  ;;  %v1382_v27 = vadd.f32 %v1381_v16, %v1380_v19  ;;  %1055 = vst.msk [vmem:[#allocation2 + $0x168] sm:$0xff] %vm295_vm0, %v991_v62  ;;  %v1389_v26 = vsel %vm295_vm0, %v2569_v32, 0.0  ;;  %v1391_v28 = vsel %vm295_vm0, %v2628_v54, 0.0 }
 0x12c   : > { %v1253_v22 = vpack.c.bf16 %v1189_v41, %v1189_v41  ;;  %1067 = vst.msk [vmem:[#allocation2 + $0x1c8] sm:$0xff] %vm295_vm0, %v1003_v61  ;;  %v1588_v16 = vsel %vm295_vm0, %v1499_v4, 0.0  ;;  %v1590_v23 = vsel %vm295_vm0, %v1500_v11, 0.0  ;;  %v1501_v48 = vmul.f32 %v2665_v45, %v2665_v45 }
 0x12d   : > { %v1384_v52 = vadd.f32 %v1383_v53, %v1382_v27  ;;  %v1581_v30 = vadd.f32 %v1580_v1, %v1579_v38  ;;  %v418_v1 = vld [vmem:[#allocation2 + $0x1d0] sm:$0xff]  ;;  %v407_v38 = vld [vmem:[#allocation2 + $0x178] sm:$0xff]  ;;  %v903_v27 = vpop.f32.mrf.mxu2  ;;  %v992_v53 = vadd.f32 %v901_v34, %v406_v12  ;;  %v1502_v54 = vmul.f32 %v2695_v5, %v2695_v5 }
 0x12e   : > { %1318 = vst.msk [vmem:[%s2343_s14 + $0xb0] sm:$0xf] %vm1273_vm1, %v1253_v22  ;;  %v1004_v44 = vadd.f32 %v931_v7, %v418_v1  ;;  %v993_v62 = vadd.f32 %v903_v27, %v407_v38  ;;  %v1592_v34 = vsel %vm295_vm0, %v1501_v48, 0.0  ;;  %v1503_v7 = vmul.f32 %v2760_v43, %v2760_v43 }
 0x12f   : > { %v1386_v57 = vadd.f32 %v1385_v6, %v1384_v52  ;;  %v1583_v8 = vadd.f32 %v1582_v58, %v1581_v30  ;;  %v933_v36 = vpop.f32.mrf.mxu3  ;;  %v1393_v52 = vsel %vm295_vm0, %v2665_v45, 0.0  ;;  %1056 = vst.msk [vmem:[#allocation2 + $0x170] sm:$0xff] %vm295_vm0, %v992_v53  ;;  %v1395_v45 = vsel %vm295_vm0, %v2695_v5, 0.0 }
 0x130   : > { %v2867_v30 = vld [vmem:[#allocation2 + $0x1c0] sm:$0xff]  ;;  %v1005_v61 = vadd.f32 %v933_v36, %v419_v50  ;;  %1068 = vst.msk [vmem:[#allocation2 + $0x1d0] sm:$0xff] %vm295_vm0, %v1004_v44  ;;  %v1594_v5 = vsel %vm295_vm0, %v1502_v54, 0.0  ;;  %v1401_v12 = vsel %vm295_vm0, %v2445_v13, 0.0  ;;  %v1506_v1 = vmul.f32 %v2451_v20, %v2451_v20 }
 0x131   : > { %v1388_v19 = vadd.f32 %v1387_v49, %v1386_v57  ;;  %v1585_v21 = vadd.f32 %v1584_v51, %v1583_v8  ;;  %v1201_v60 = vadd.f32 %v2779_v37, %v2867_v30  ;;  %1057 = vst.msk [vmem:[#allocation2 + $0x178] sm:$0xff] %vm295_vm0, %v993_v62  ;;  %v1507_v50 = vmul.f32 %v2489_v56, %v2489_v56 }
 0x132   : > { %v2871_v57 = vld [vmem:[#allocation2 + $0x168] sm:$0xff]  ;;  %1069 = vst.msk [vmem:[#allocation2 + $0x1d8] sm:$0xff] %vm295_vm0, %v1005_v61  ;;  %v1508_v36 = vmul.f32 %v2497_v0, %v2497_v0 }
 0x133   : > { %v1390_v18 = vadd.f32 %v1389_v26, %v1388_v19  ;;  %v1587_v9 = vadd.f32 %v1586_v25, %v1585_v21  ;;  %v1190_v8 = vadd.f32 %v2779_v37, %v2871_v57  ;;  %v2881_v41 = vld [vmem:[#allocation2 + $0x1c8] sm:$0xff]  ;;  %v1265_v4 = vpack.c.bf16 %v1201_v60, %v1201_v60 }
 0x134   : > { %v1202_v11 = vadd.f32 %v2779_v37, %v2881_v41  ;;  %v1397_v19 = vsel %vm295_vm0, %v2760_v43, 0.0  ;;  %v1504_v21 = vmul.f32 %v2794_v63, %v2794_v63  ;;  %v1505_v25 = vmul.f32 %v2445_v13, %v2445_v13 }
 0x135   : > { %v1392_v40 = vadd.f32 %v1391_v28, %v1390_v18  ;;  %v1589_v32 = vadd.f32 %v1588_v16, %v1587_v9  ;;  %v1254_v22 = vpack.c.bf16 %v1190_v8, %v1190_v8  ;;  %1330 = vst.msk [vmem:[%s2343_s14 + $0xe0] sm:$0xf] %vm1273_vm1, %v1265_v4  ;;  %v1596_v16 = vsel %vm295_vm0, %v1503_v7, 0.0 }
 0x136   : > { %v1266_v9 = vpack.c.bf16 %v1202_v11, %v1202_v11  ;;  %v1399_v28 = vsel %vm295_vm0, %v2794_v63, 0.0  ;;  %v1598_v38 = vsel %vm295_vm0, %v1504_v21, 0.0  ;;  %v2909_v27 = vld [vmem:[#allocation2 + $0x170] sm:$0xff]  ;;  %v1403_v13 = vsel %vm295_vm0, %v2451_v20, 0.0 }
 0x137   : > { %v1394_v58 = vadd.f32 %v1393_v52, %v1392_v40  ;;  %v1591_v6 = vadd.f32 %v1590_v23, %v1589_v32  ;;  %1319 = vst.msk [vmem:[%s2343_s14 + $0xb4] sm:$0xf] %vm1273_vm1, %v1254_v22  ;;  %v936_v48 = vpop.f32.mrf.mxu3  ;;  %v1600_v40 = vsel %vm295_vm0, %v1505_v25, 0.0  ;;  %v1191_v53 = vadd.f32 %v2779_v37, %v2909_v27  ;;  %v2914_v44 = vld [vmem:[#allocation2 + $0x1d0] sm:$0xff] }
 0x138   : > { %1331 = vst.msk [vmem:[%s2343_s14 + $0xe4] sm:$0xf] %vm1273_vm1, %v1266_v9  ;;  %v1203_v52 = vadd.f32 %v2779_v37, %v2914_v44  ;;  %v2924_v54 = vld [vmem:[#allocation2 + $0x178] sm:$0xff]  ;;  %v1602_v20 = vsel %vm295_vm0, %v1506_v1, 0.0  ;;  %v1407_v4 = vsel %vm295_vm0, %v2497_v0, 0.0  ;;  %v1509_v11 = vmul.f32 %v2533_v55, %v2533_v55 }
 0x139   : > { %v1593_v51 = vadd.f32 %v1592_v34, %v1591_v6  ;;  %v1396_v49 = vadd.f32 %v1395_v45, %v1394_v58  ;;  %v1255_v58 = vpack.c.bf16 %v1191_v53, %v1191_v53  ;;  %v1192_v6 = vadd.f32 %v2779_v37, %v2924_v54  ;;  %v2928_v60 = vld [vmem:[#allocation2 + $0x1d8] sm:$0xff] }
 0x13a   : > { %v1405_v34 = vsel %vm295_vm0, %v2489_v56, 0.0  ;;  %v1267_v45 = vpack.c.bf16 %v1203_v52, %v1203_v52  ;;  %v1204_v56 = vadd.f32 %v2779_v37, %v2928_v60  ;;  %v1606_v21 = vsel %vm295_vm0, %v1508_v36, 0.0 }
 0x13b   : > { %v1595_v26 = vadd.f32 %v1594_v5, %v1593_v51  ;;  %v1398_v18 = vadd.f32 %v1397_v19, %v1396_v49  ;;  %1320 = vst.msk [vmem:[%s2343_s14 + $0xb8] sm:$0xf] %vm1273_vm1, %v1255_v58  ;;  %v1256_v51 = vpack.c.bf16 %v1192_v6, %v1192_v6  ;;  %v1604_v49 = vsel %vm295_vm0, %v1507_v50, 0.0  ;;  %v420_v5 = vld [vmem:[#allocation2 + $0x1e0] sm:$0xff]  ;;  %v421_v19 = vld [vmem:[#allocation2 + $0x1e8] sm:$0xff] }
 0x13c   : > { %1332 = vst.msk [vmem:[%s2343_s14 + $0xe8] sm:$0xf] %vm1273_vm1, %v1267_v45  ;;  %v1409_v0 = vsel %vm295_vm0, %v2533_v55, 0.0  ;;  %v1510_v9 = vmul.f32 %v2552_v17, %v2552_v17  ;;  %v1411_v1 = vsel %vm295_vm0, %v2552_v17, 0.0  ;;  %v1415_v50 = vsel %vm295_vm0, %v2635_v47, 0.0 }
 0x13d   : > { %v1597_v43 = vadd.f32 %v1596_v16, %v1595_v26  ;;  %v1400_v23 = vadd.f32 %v1399_v28, %v1398_v18  ;;  %1321 = vst.msk [vmem:[%s2343_s14 + $0xbc] sm:$0xf] %vm1273_vm1, %v1256_v51  ;;  %v1006_v26 = vadd.f32 %v936_v48, %v420_v5  ;;  %v1268_v16 = vpack.c.bf16 %v1204_v56, %v1204_v56 }
 0x13e   : > { %v1511_v48 = vmul.f32 %v2580_v39, %v2580_v39  ;;  %v1513_v36 = vmul.f32 %v2679_v46, %v2679_v46  ;;  %v1514_v6 = vmul.f32 %v2710_v42, %v2710_v42  ;;  %v1515_v51 = vmul.f32 %v2771_v29, %v2771_v29 }
 0x13f   : > { %v1402_v63 = vadd.f32 %v1401_v12, %v1400_v23  ;;  %v1599_v32 = vadd.f32 %v1598_v38, %v1597_v43  ;;  %v938_v18 = vpop.f32.mrf.mxu3  ;;  %1070 = vst.msk [vmem:[#allocation2 + $0x1e0] sm:$0xff] %vm295_vm0, %v1006_v26  ;;  %v1608_v12 = vsel %vm295_vm0, %v1509_v11, 0.0 }
 0x140   : > { %v1007_v28 = vadd.f32 %v938_v18, %v421_v19  ;;  %1333 = vst.msk [vmem:[%s2343_s14 + $0xec] sm:$0xf] %vm1273_vm1, %v1268_v16  ;;  %v1612_v17 = vsel %vm295_vm0, %v1511_v48, 0.0  ;;  %v1618_v5 = vsel %vm295_vm0, %v1514_v6, 0.0  ;;  %v1421_v19 = vsel %vm295_vm0, %v2771_v29, 0.0  ;;  %v423_v16 = vld [vmem:[#allocation2 + $0x1f8] sm:$0xff] }
 0x141   : > { %v1404_v62 = vadd.f32 %v1403_v13, %v1402_v63  ;;  %v1601_v61 = vadd.f32 %v1600_v40, %v1599_v32  ;;  %v1610_v40 = vsel %vm295_vm0, %v1510_v9, 0.0  ;;  %v1413_v63 = vsel %vm295_vm0, %v2580_v39, 0.0  ;;  %v422_v9 = vld [vmem:[#allocation2 + $0x1f0] sm:$0xff] }
 0x142   : > { %1071 = vst.msk [vmem:[#allocation2 + $0x1e8] sm:$0xff] %vm295_vm0, %v1007_v28  ;;  %v1512_v32 = vmul.f32 %v2635_v47, %v2635_v47  ;;  %v1417_v39 = vsel %vm295_vm0, %v2679_v46, 0.0  ;;  %v1620_v26 = vsel %vm295_vm0, %v1515_v51, 0.0  ;;  %v1423_v18 = vsel %vm295_vm0, %v2806_v35, 0.0 }
 0x143   : > { %v1406_v7 = vadd.f32 %v1405_v34, %v1404_v62  ;;  %v1603_v8 = vadd.f32 %v1602_v20, %v1601_v61  ;;  %v1518_v48 = vmul.f32 %v2871_v57, %v2871_v57  ;;  %v1433_v6 = vsel %vm295_vm0, %v2543_v2, 0.0 }
 0x144   : > { %v1614_v58 = vsel %vm295_vm0, %v1512_v32, 0.0  ;;  %v1519_v32 = vmul.f32 %v2909_v27, %v2909_v27 }
 0x145   : > { %v1408_v22 = vadd.f32 %v1407_v4, %v1406_v7  ;;  %v1605_v25 = vadd.f32 %v1604_v49, %v1603_v8  ;;  %v1616_v7 = vsel %vm295_vm0, %v1513_v36, 0.0  ;;  %v1419_v8 = vsel %vm295_vm0, %v2710_v42, 0.0 }
 0x146   : > { %v2975_v20 = vld [vmem:[#allocation2 + $0x1e0] sm:$0xff]  ;;  %v1516_v42 = vmul.f32 %v2806_v35, %v2806_v35 }
 0x147   : > { %v1410_v43 = vadd.f32 %v1409_v0, %v1408_v22  ;;  %v1607_v23 = vadd.f32 %v1606_v21, %v1605_v25  ;;  %v941_v61 = vpop.f32.mrf.mxu3  ;;  %v1205_v47 = vadd.f32 %v2779_v37, %v2975_v20  ;;  %v1517_v0 = vmul.f32 %v2838_v3, %v2838_v3 }
 0x149   : > { %v1609_v55 = vadd.f32 %v1608_v12, %v1607_v23  ;;  %v1412_v38 = vadd.f32 %v1411_v1, %v1410_v43  ;;  %v2984_v46 = vld [vmem:[#allocation2 + $0x1e8] sm:$0xff]  ;;  %v1269_v11 = vpack.c.bf16 %v1205_v47, %v1205_v47  ;;  %v1008_v43 = vadd.f32 %v941_v61, %v422_v9 }
 0x14a   : > { %v1206_v56 = vadd.f32 %v2779_v37, %v2984_v46  ;;  %v1622_v12 = vsel %vm295_vm0, %v1516_v42, 0.0  ;;  %v1425_v1 = vsel %vm295_vm0, %v2838_v3, 0.0  ;;  %v1431_v61 = vsel %vm295_vm0, %v2924_v54, 0.0 }
 0x14b   : > { %v1414_v53 = vadd.f32 %v1413_v63, %v1412_v38  ;;  %v1611_v13 = vadd.f32 %v1610_v40, %v1609_v55  ;;  %1334 = vst.msk [vmem:[%s2343_s14 + $0xf0] sm:$0xf] %vm1273_vm1, %v1269_v11  ;;  %v1624_v40 = vsel %vm295_vm0, %v1517_v0, 0.0  ;;  %v1427_v63 = vsel %vm295_vm0, %v2871_v57, 0.0 }
 0x14c   : > { %v1270_v25 = vpack.c.bf16 %v1206_v56, %v1206_v56  ;;  %1072 = vst.msk [vmem:[#allocation2 + $0x1f0] sm:$0xff] %vm295_vm0, %v1008_v43  ;;  %v1521_v57 = vmul.f32 %v2543_v2, %v2543_v2  ;;  %v1435_v2 = vsel %vm295_vm0, %v2562_v24, 0.0  ;;  %v1437_v42 = vsel %vm295_vm0, %v2592_v59, 0.0 }
 0x14d   : > { %v1416_v52 = vadd.f32 %v1415_v50, %v1414_v53  ;;  %v1613_v62 = vadd.f32 %v1612_v17, %v1611_v13  ;;  %v1626_v13 = vsel %vm295_vm0, %v1518_v48, 0.0  ;;  %v1429_v17 = vsel %vm295_vm0, %v2909_v27, 0.0 }
 0x14e   : > { %1335 = vst.msk [vmem:[%s2343_s14 + $0xf4] sm:$0xf] %vm1273_vm1, %v1270_v25  ;;  %v1520_v50 = vmul.f32 %v2924_v54, %v2924_v54  ;;  %v1522_v27 = vmul.f32 %v2562_v24, %v2562_v24  ;;  %v1632_v54 = vsel %vm295_vm0, %v1521_v57, 0.0  ;;  %v1531_v57 = vmul.f32 %v2914_v44, %v2914_v44 }
 0x14f   : > { %v1418_v34 = vadd.f32 %v1417_v39, %v1416_v52  ;;  %v1615_v45 = vadd.f32 %v1614_v58, %v1613_v62  ;;  %v943_v23 = vpop.f32.mrf.mxu3  ;;  %v1628_v62 = vsel %vm295_vm0, %v1519_v32, 0.0  ;;  %v1529_v32 = vmul.f32 %v2867_v30, %v2867_v30 }
 0x150   : > { %v1009_v35 = vadd.f32 %v943_v23, %v423_v16  ;;  %v1441_v16 = vsel %vm295_vm0, %v2684_v10, 0.0 }
 0x151   : > { %v1420_v49 = vadd.f32 %v1419_v8, %v1418_v34  ;;  %v1617_v4 = vadd.f32 %v1616_v7, %v1615_v45  ;;  %v1630_v34 = vsel %vm295_vm0, %v1520_v50, 0.0 }
 0x152   : > { %1073 = vst.msk [vmem:[#allocation2 + $0x1f8] sm:$0xff] %vm295_vm0, %v1009_v35 }
 0x153   : > { %v1422_v21 = vadd.f32 %v1421_v19, %v1420_v49  ;;  %v1619_v22 = vadd.f32 %v1618_v5, %v1617_v4  ;;  %v3029_v45 = vld [vmem:[#allocation2 + $0x1f0] sm:$0xff]  ;;  %v1523_v49 = vmul.f32 %v2592_v59, %v2592_v59  ;;  %v1634_v19 = vsel %vm295_vm0, %v1522_v27, 0.0 }
 0x154   : > { %v1207_v8 = vadd.f32 %v2779_v37, %v3029_v45 }
 0x155   : > { %v1424_v28 = vadd.f32 %v1423_v18, %v1422_v21  ;;  %v1621_v29 = vadd.f32 %v1620_v26, %v1619_v22  ;;  %v1524_v21 = vmul.f32 %v2657_v31, %v2657_v31  ;;  %v1636_v26 = vsel %vm295_vm0, %v1523_v49, 0.0 }
 0x156   : > { %v1271_v5 = vpack.c.bf16 %v1207_v8, %v1207_v8  ;;  %v1525_v18 = vmul.f32 %v2684_v10, %v2684_v10  ;;  %v1445_v10 = vsel %vm295_vm0, %v2784_v15, 0.0 }
 0x157   : > { %v1623_v55 = vadd.f32 %v1622_v12, %v1621_v29  ;;  %v1426_v38 = vadd.f32 %v1425_v1, %v1424_v28  ;;  %v1638_v9 = vsel %vm295_vm0, %v1524_v21, 0.0  ;;  %v1526_v28 = vmul.f32 %v2723_v14, %v2723_v14 }
 0x158   : > { %1336 = vst.msk [vmem:[%s2343_s14 + $0xf8] sm:$0xf] %vm1273_vm1, %v1271_v5  ;;  %v1640_v23 = vsel %vm295_vm0, %v1525_v18, 0.0  ;;  %v1527_v12 = vmul.f32 %v2784_v15, %v2784_v15  ;;  %v1449_v15 = vsel %vm295_vm0, %v2867_v30, 0.0  ;;  %v1453_v30 = vsel %vm295_vm0, %v2914_v44, 0.0 }
 0x159   : > { %v1625_v53 = vadd.f32 %v1624_v40, %v1623_v55  ;;  %v1428_v3 = vadd.f32 %v1427_v63, %v1426_v38  ;;  %v3033_v51 = vld [vmem:[#allocation2 + $0x1f8] sm:$0xff]  ;;  %v1642_v35 = vsel %vm295_vm0, %v1526_v28, 0.0  ;;  %v1528_v55 = vmul.f32 %v2810_v33, %v2810_v33 }
 0x15a   : > { %v1208_v4 = vadd.f32 %v2779_v37, %v3033_v51  ;;  %v1439_v37 = vsel %vm295_vm0, %v2657_v31, 0.0  ;;  %v1443_v31 = vsel %vm295_vm0, %v2723_v14, 0.0  ;;  %v1644_v63 = vsel %vm295_vm0, %v1527_v12, 0.0 }
 0x15b   : > { %v1627_v36 = vadd.f32 %v1626_v13, %v1625_v53  ;;  %v1430_v52 = vadd.f32 %v1429_v17, %v1428_v3  ;;  %v1447_v14 = vsel %vm295_vm0, %v2810_v33, 0.0  ;;  %v1646_v13 = vsel %vm295_vm0, %v1528_v55, 0.0 }
 0x15c   : > { %v1272_v22 = vpack.c.bf16 %v1208_v4, %v1208_v4  ;;  %v1530_v17 = vmul.f32 %v2881_v41, %v2881_v41  ;;  %v1451_v33 = vsel %vm295_vm0, %v2881_v41, 0.0  ;;  %v1455_v41 = vsel %vm295_vm0, %v2928_v60, 0.0 }
 0x15d   : > { %v1629_v58 = vadd.f32 %v1628_v62, %v1627_v36  ;;  %v1432_v39 = vadd.f32 %v1431_v61, %v1430_v52  ;;  %v1648_v52 = vsel %vm295_vm0, %v1529_v32, 0.0  ;;  %v1457_v44 = vsel %vm295_vm0, %v2975_v20, 0.0 }
 0x15e   : > { %1337 = vst.msk [vmem:[%s2343_s14 + $0xfc] sm:$0xf] %vm1273_vm1, %v1272_v22  ;;  %v1536_v21 = vmul.f32 %v3033_v51, %v3033_v51 }
 0x15f   : > { %v1434_v47 = vadd.f32 %v1433_v6, %v1432_v39  ;;  %v1631_v7 = vadd.f32 %v1630_v34, %v1629_v58  ;;  %v1650_v58 = vsel %vm295_vm0, %v1530_v17, 0.0  ;;  %v1532_v39 = vmul.f32 %v2928_v60, %v2928_v60 }
 0x160   : > { %v1652_v34 = vsel %vm295_vm0, %v1531_v57, 0.0  ;;  %v1459_v60 = vsel %vm295_vm0, %v2984_v46, 0.0  ;;  %v1662_v18 = vsel %vm295_vm0, %v1536_v21, 0.0 }
 0x161   : > { %v1436_v11 = vadd.f32 %v1435_v2, %v1434_v47  ;;  %v1633_v56 = vadd.f32 %v1632_v54, %v1631_v7  ;;  %v1533_v47 = vmul.f32 %v2975_v20, %v2975_v20  ;;  %v1654_v54 = vsel %vm295_vm0, %v1532_v39, 0.0 }
 0x162   : > { %v1534_v2 = vmul.f32 %v2984_v46, %v2984_v46  ;;  %v1461_v20 = vsel %vm295_vm0, %v3029_v45, 0.0  ;;  %v1463_v46 = vsel %vm295_vm0, %v3033_v51, 0.0 }
 0x163   : > { %v1438_v24 = vadd.f32 %v1437_v42, %v1436_v11  ;;  %v1635_v25 = vadd.f32 %v1634_v19, %v1633_v56  ;;  %v1656_v11 = vsel %vm295_vm0, %v1533_v47, 0.0  ;;  %v1535_v56 = vmul.f32 %v3029_v45, %v3029_v45 }
 0x164   : > { %v1658_v42 = vsel %vm295_vm0, %v1534_v2, 0.0 }
 0x165   : > { %v1440_v0 = vadd.f32 %v1439_v37, %v1438_v24  ;;  %v1637_v59 = vadd.f32 %v1636_v26, %v1635_v25  ;;  %v1660_v25 = vsel %vm295_vm0, %v1535_v56, 0.0 }
 0x167   : > { %v1442_v29 = vadd.f32 %v1441_v16, %v1440_v0  ;;  %v1639_v43 = vadd.f32 %v1638_v9, %v1637_v59 }
 0x169   : > { %v1641_v1 = vadd.f32 %v1640_v23, %v1639_v43  ;;  %v1444_v48 = vadd.f32 %v1443_v31, %v1442_v29 }
 0x16b   : > { %v1446_v38 = vadd.f32 %v1445_v10, %v1444_v48  ;;  %v1643_v40 = vadd.f32 %v1642_v35, %v1641_v1 }
 0x16d   : > { %v1448_v53 = vadd.f32 %v1447_v14, %v1446_v38  ;;  %v1645_v3 = vadd.f32 %v1644_v63, %v1643_v40 }
 0x16f   : > { %v1450_v50 = vadd.f32 %v1449_v15, %v1448_v53  ;;  %v1647_v36 = vadd.f32 %v1646_v13, %v1645_v3 }
 0x171   : > { %v1452_v62 = vadd.f32 %v1451_v33, %v1450_v50  ;;  %v1649_v61 = vadd.f32 %v1648_v52, %v1647_v36 }
 0x173   : > { %v1454_v6 = vadd.f32 %v1453_v30, %v1452_v62  ;;  %v1651_v27 = vadd.f32 %v1650_v58, %v1649_v61 }
 0x175   : > { %v1456_v7 = vadd.f32 %v1455_v41, %v1454_v6  ;;  %v1653_v8 = vadd.f32 %v1652_v34, %v1651_v27 }
 0x177   : > { %v1655_v49 = vadd.f32 %v1654_v54, %v1653_v8  ;;  %v1458_v4 = vadd.f32 %v1457_v44, %v1456_v7 }
 0x179   : > { %v1657_v5 = vadd.f32 %v1656_v11, %v1655_v49  ;;  %v1460_v19 = vadd.f32 %v1459_v60, %v1458_v4 }
 0x17b   : > { %v1659_v22 = vadd.f32 %v1658_v42, %v1657_v5  ;;  %v1462_v24 = vadd.f32 %v1461_v20, %v1460_v19 }
 0x17d   : > { %v1661_v26 = vadd.f32 %v1660_v25, %v1659_v22  ;;  %v1464_v37 = vadd.f32 %v1463_v46, %v1462_v24 }
 0x17f   : > { %v1465_v0 = vrot.slane %v1464_v37, 4  ;;  %v1663_v59 = vadd.f32 %v1662_v18, %v1661_v26 }
 0x181   : > { %v1466_v9 = vadd.f32 %v1465_v0, %v1464_v37  ;;  %v1664_v45 = vrot.slane %v1663_v59, 4 }
 0x183   : > { %v1467_v16 = vrot.slane %v1466_v9, 2  ;;  %v1665_v28 = vadd.f32 %v1664_v45, %v1663_v59 }
 0x185   : > { %v1468_v29 = vadd.f32 %v1467_v16, %v1466_v9  ;;  %v1666_v43 = vrot.slane %v1665_v28, 2 }
 0x187   : > { %v1469_v23 = vrot.slane %v1468_v29, 1  ;;  %v1667_v31 = vadd.f32 %v1666_v43, %v1665_v28 }
 0x189   : > { %v1470_v51 = vadd.f32 %v1469_v23, %v1468_v29  ;;  %v1668_v12 = vrot.slane %v1667_v31, 1 }
 0x18b   : > { %1472 = vst.msk [vmem:[%s286_s23] sm:$0x1] %vm1471_vm2, %v1470_v51  ;;  %v1669_v1 = vadd.f32 %v1668_v12, %v1667_v31 }
 0x18d   : > { %1670 = vst.msk [vmem:[%s289_s26] sm:$0x1] %vm1471_vm2, %v1669_v1 }
 0x18e PF: > { %s16_s20 = sadd.s32 1, %s2089_s20   ;;  %s3138_s18 = smov %s2085_s19 }
 0x18f   : > { %p13_p6 = scmp.ge.s32.totalorder %s16_s20, 11   ;;  %s3139_s19 = smov %s3141_s21 }
 0x191   :  { %15 = sbr.rel (!%p13_p6) target bundleno = 2 (0x2), region = 97 }

// kernel: a_call__.20
= control target key start
LH: loop header
LB: loop body
LE: loop exit
PB: predicated region body
PF: predicated region fallthrough
CT: control target
= control target key end

     0   :  { %s1025_s12 = smov 0   ;;  %s1351_s0 = inlined_call_operand.vmem [shape: bf16[4608,64], index: 0, kind: input, shape index: {}]   ;;  %s1352_s1 = inlined_call_operand.vmem [shape: f32[1,64], index: 1, kind: input, shape index: {}]   ;;  %s1353_s2 = inlined_call_operand.vmem [shape: f32[1,64], index: 2, kind: input, shape index: {}]   ;;  %s1354_s3 = inlined_call_operand.vmem [shape: bf16[4608,64], index: 3, kind: output, shape index: {}]  }
   0x1 LB: > { %s815_s13 = sadd.s32 4294967295, %s1003_s12   ;;  %p819_p0 = scmp.ge.s32.totalorder %s1003_s12, 1  ;;  %s1003_s12 = sphi %s1025_s12, %s13_s12  }
   0x2   : > { %p138_p1 = scmp.lt.s32.totalorder %s1003_s12, 10 }
   0x4   : > { %p139_p2 = pnand %p819_p0, %p138_p1 }
   0x5   : > { %s820_s14 = sshll.u32 (!%p139_p2), %s815_s13, 6 }
   0x6   : > { %142 = sbr.rel (%p139_p2) target bundleno = 134 (0x86), region = 32  ;;  %p163_p3 = scmp.lt.s32.totalorder (!%p139_p2), %s820_s14, 575 }
   0xb   : > { %s1356_s14 = smov (!%p163_p3, %s820_s14), 575  ;;  %v1046_v0 = vld [vmem:[%s1352_s1] ss:$0 sm:$0xff]  ;;  %vm694_vm0 = vcmask 519168  }
   0xc   : > { %s821_s15 = sshll.u32 %s1356_s14, 2  ;;  %v1054_v5 = vld [vmem:[%s1353_s2] ss:$0 sm:$0xff] }
   0xd   : > { %s1041_s18 = scalar_lea.vmem %s1351_s0, %s821_s15  ;;  %s1078_s25 = scalar_lea.vmem %s1354_s3, %s821_s15 }
   0xe   : > { %v827_v1 = vld [vmem:[%s1041_s18] sm:$0xff]   ;;  %v954_v2 = vld [vmem:[%s1041_s18 + $0x8] sm:$0xff]   ;;  %v955_v3 = vld [vmem:[%s1041_s18 + $0x10] sm:$0xff]  }
   0xf   : > { %v828_v4 = vunpack.c.l.bf16 %v827_v1  ;;  %v829_v6 = vunpack.c.h.bf16 %v827_v1  ;;  %v832_v7 = vunpack.c.l.bf16 %v954_v2  ;;  %v833_v8 = vunpack.c.h.bf16 %v954_v2  ;;  %v956_v9 = vld [vmem:[%s1041_s18 + $0x18] sm:$0xff]   ;;  %v957_v41 = vld [vmem:[%s1041_s18 + $0x20] sm:$0xff]   ;;  %v958_v45 = vld [vmem:[%s1041_s18 + $0x28] sm:$0xff]  }
  0x10   : > { %v836_v10 = vunpack.c.l.bf16 %v955_v3  ;;  %v837_v11 = vunpack.c.h.bf16 %v955_v3  ;;  %v840_v12 = vunpack.c.l.bf16 %v956_v9  ;;  %v841_v13 = vunpack.c.h.bf16 %v956_v9  ;;  %v959_v46 = vld [vmem:[%s1041_s18 + $0x30] sm:$0xff]   ;;  %v960_v61 = vld [vmem:[%s1041_s18 + $0x38] sm:$0xff]  }
  0x11   : > { %v306_v14 = vmul.f32 %v1046_v0, %v828_v4  ;;  %v307_v15 = vmul.f32 %v1046_v0, %v829_v6  ;;  %v308_v16 = vmul.f32 %v1046_v0, %v832_v7  ;;  %v309_v17 = vmul.f32 %v1046_v0, %v833_v8 }
  0x12   : > { %v310_v18 = vmul.f32 %v1046_v0, %v836_v10  ;;  %v311_v19 = vmul.f32 %v1046_v0, %v837_v11  ;;  %v312_v20 = vmul.f32 %v1046_v0, %v840_v12  ;;  %v313_v21 = vmul.f32 %v1046_v0, %v841_v13 }
  0x13   : > { %v374_v22 = vadd.f32 %v1054_v5, %v306_v14  ;;  %v375_v23 = vadd.f32 %v1054_v5, %v307_v15  ;;  %v376_v24 = vadd.f32 %v1054_v5, %v308_v16  ;;  %v377_v25 = vadd.f32 %v1054_v5, %v309_v17 }
  0x14   : > { %v378_v26 = vadd.f32 %v1054_v5, %v310_v18  ;;  %v379_v27 = vadd.f32 %v1054_v5, %v311_v19  ;;  %v380_v28 = vadd.f32 %v1054_v5, %v312_v20  ;;  %v381_v29 = vadd.f32 %v1054_v5, %v313_v21 }
  0x15   : > { %vm438_vm1 = vcmp.ge.f32.partialorder %v374_v22, 0.0  ;;  %v502_v30 = vmul.f32 0.2, %v374_v22  ;;  %vm439_vm2 = vcmp.ge.f32.partialorder %v375_v23, 0.0  ;;  %v503_v31 = vmul.f32 0.2, %v375_v23 }
  0x16   : > { %vm440_vm3 = vcmp.ge.f32.partialorder %v376_v24, 0.0  ;;  %v504_v32 = vmul.f32 0.2, %v376_v24  ;;  %vm441_vm4 = vcmp.ge.f32.partialorder %v377_v25, 0.0  ;;  %v505_v33 = vmul.f32 0.2, %v377_v25 }
  0x17   : > { %v566_v34 = vsel %vm438_vm1, %v374_v22, %v502_v30  ;;  %v567_v35 = vsel %vm439_vm2, %v375_v23, %v503_v31  ;;  %vm442_vm5 = vcmp.ge.f32.partialorder %v378_v26, 0.0  ;;  %v506_v36 = vmul.f32 0.2, %v378_v26  ;;  %v961_v23 = vld [vmem:[%s1041_s18 + $0x40] sm:$0xff]  }
  0x18   : > { %v630_v37 = vpack.c.bf16 %v566_v34, %v566_v34  ;;  %v631_v38 = vpack.c.bf16 %v567_v35, %v567_v35  ;;  %v568_v39 = vsel %vm440_vm3, %v376_v24, %v504_v32  ;;  %v569_v40 = vsel %vm441_vm4, %v377_v25, %v505_v33 }
  0x19   : > { %v632_v42 = vpack.c.bf16 %v568_v39, %v568_v39  ;;  %v633_v43 = vpack.c.bf16 %v569_v40, %v569_v40  ;;  %v570_v44 = vsel %vm442_vm5, %v378_v26, %v506_v36  ;;  %vm443_vm6 = vcmp.ge.f32.partialorder %v379_v27, 0.0 }
  0x1a   : > { %695 = vst.msk [vmem:[%s1078_s25] sm:$0xf] %vm694_vm0, %v630_v37  ;;  %v634_v47 = vpack.c.bf16 %v570_v44, %v570_v44  ;;  %v507_v48 = vmul.f32 0.2, %v379_v27  ;;  %vm444_vm7 = vcmp.ge.f32.partialorder %v380_v28, 0.0  ;;  %vm445_vm8 = vcmp.ge.f32.partialorder %v381_v29, 0.0 }
  0x1b   : > { %696 = vst.msk [vmem:[%s1078_s25 + $0x4] sm:$0xf] %vm694_vm0, %v631_v38  ;;  %v508_v49 = vmul.f32 0.2, %v380_v28  ;;  %v509_v50 = vmul.f32 0.2, %v381_v29  ;;  %v844_v51 = vunpack.c.l.bf16 %v957_v41  ;;  %v845_v52 = vunpack.c.h.bf16 %v957_v41 }
  0x1c   : > { %697 = vst.msk [vmem:[%s1078_s25 + $0x8] sm:$0xf] %vm694_vm0, %v632_v42  ;;  %v571_v53 = vsel %vm443_vm6, %v379_v27, %v507_v48  ;;  %v848_v54 = vunpack.c.l.bf16 %v958_v45  ;;  %v849_v55 = vunpack.c.h.bf16 %v958_v45  ;;  %v852_v56 = vunpack.c.l.bf16 %v959_v46 }
  0x1d   : > { %698 = vst.msk [vmem:[%s1078_s25 + $0xc] sm:$0xf] %vm694_vm0, %v633_v43  ;;  %v635_v57 = vpack.c.bf16 %v571_v53, %v571_v53  ;;  %v572_v58 = vsel %vm444_vm7, %v380_v28, %v508_v49  ;;  %v573_v59 = vsel %vm445_vm8, %v381_v29, %v509_v50  ;;  %v314_v60 = vmul.f32 %v1046_v0, %v844_v51  ;;  %v962_v28 = vld [vmem:[%s1041_s18 + $0x48] sm:$0xff]  }
  0x1e   : > { %699 = vst.msk [vmem:[%s1078_s25 + $0x10] sm:$0xf] %vm694_vm0, %v634_v47  ;;  %v636_v62 = vpack.c.bf16 %v572_v58, %v572_v58  ;;  %v637_v63 = vpack.c.bf16 %v573_v59, %v573_v59  ;;  %v315_v1 = vmul.f32 %v1046_v0, %v845_v52  ;;  %v316_v2 = vmul.f32 %v1046_v0, %v848_v54  ;;  %v963_v54 = vld [vmem:[%s1041_s18 + $0x50] sm:$0xff]   ;;  %v964_v58 = vld [vmem:[%s1041_s18 + $0x58] sm:$0xff]  }
  0x1f   : > { %700 = vst.msk [vmem:[%s1078_s25 + $0x14] sm:$0xf] %vm694_vm0, %v635_v57  ;;  %v382_v3 = vadd.f32 %v1054_v5, %v314_v60  ;;  %v317_v4 = vmul.f32 %v1046_v0, %v849_v55  ;;  %v318_v6 = vmul.f32 %v1046_v0, %v852_v56  ;;  %v853_v7 = vunpack.c.h.bf16 %v959_v46 }
  0x20   : > { %701 = vst.msk [vmem:[%s1078_s25 + $0x18] sm:$0xf] %vm694_vm0, %v636_v62  ;;  %v383_v8 = vadd.f32 %v1054_v5, %v315_v1  ;;  %v384_v9 = vadd.f32 %v1054_v5, %v316_v2  ;;  %v856_v10 = vunpack.c.l.bf16 %v960_v61  ;;  %v857_v11 = vunpack.c.h.bf16 %v960_v61 }
  0x21   : > { %702 = vst.msk [vmem:[%s1078_s25 + $0x1c] sm:$0xf] %vm694_vm0, %v637_v63  ;;  %vm446_vm9 = vcmp.ge.f32.partialorder %v382_v3, 0.0  ;;  %v510_v12 = vmul.f32 0.2, %v382_v3  ;;  %v385_v13 = vadd.f32 %v1054_v5, %v317_v4  ;;  %v386_v14 = vadd.f32 %v1054_v5, %v318_v6 }
  0x22   : > { %vm447_vm10 = vcmp.ge.f32.partialorder %v383_v8, 0.0  ;;  %v511_v15 = vmul.f32 0.2, %v383_v8  ;;  %vm448_vm11 = vcmp.ge.f32.partialorder %v384_v9, 0.0  ;;  %v512_v16 = vmul.f32 0.2, %v384_v9 }
  0x23   : > { %v574_v17 = vsel %vm446_vm9, %v382_v3, %v510_v12  ;;  %vm449_vm12 = vcmp.ge.f32.partialorder %v385_v13, 0.0  ;;  %v513_v18 = vmul.f32 0.2, %v385_v13  ;;  %vm450_vm13 = vcmp.ge.f32.partialorder %v386_v14, 0.0 }
  0x24   : > { %v638_v19 = vpack.c.bf16 %v574_v17, %v574_v17  ;;  %v575_v20 = vsel %vm447_vm10, %v383_v8, %v511_v15  ;;  %v576_v21 = vsel %vm448_vm11, %v384_v9, %v512_v16  ;;  %v514_v22 = vmul.f32 0.2, %v386_v14  ;;  %v966_v15 = vld [vmem:[%s1041_s18 + $0x68] sm:$0xff]  }
  0x25   : > { %v639_v24 = vpack.c.bf16 %v575_v20, %v575_v20  ;;  %v640_v25 = vpack.c.bf16 %v576_v21, %v576_v21  ;;  %v577_v26 = vsel %vm449_vm12, %v385_v13, %v513_v18  ;;  %v319_v27 = vmul.f32 %v1046_v0, %v853_v7  ;;  %v965_v7 = vld [vmem:[%s1041_s18 + $0x60] sm:$0xff]  }
  0x26   : > { %703 = vst.msk [vmem:[%s1078_s25 + $0x20] sm:$0xf] %vm694_vm0, %v638_v19  ;;  %v641_v29 = vpack.c.bf16 %v577_v26, %v577_v26  ;;  %v578_v30 = vsel %vm450_vm13, %v386_v14, %v514_v22  ;;  %v320_v31 = vmul.f32 %v1046_v0, %v856_v10  ;;  %v321_v32 = vmul.f32 %v1046_v0, %v857_v11 }
  0x27   : > { %704 = vst.msk [vmem:[%s1078_s25 + $0x24] sm:$0xf] %vm694_vm0, %v639_v24  ;;  %v642_v33 = vpack.c.bf16 %v578_v30, %v578_v30  ;;  %v387_v34 = vadd.f32 %v1054_v5, %v319_v27  ;;  %v860_v35 = vunpack.c.l.bf16 %v961_v23  ;;  %v861_v36 = vunpack.c.h.bf16 %v961_v23 }
  0x28   : > { %705 = vst.msk [vmem:[%s1078_s25 + $0x28] sm:$0xf] %vm694_vm0, %v640_v25  ;;  %v388_v37 = vadd.f32 %v1054_v5, %v320_v31  ;;  %v389_v38 = vadd.f32 %v1054_v5, %v321_v32  ;;  %v864_v39 = vunpack.c.l.bf16 %v962_v28  ;;  %v865_v40 = vunpack.c.h.bf16 %v962_v28 }
  0x29   : > { %706 = vst.msk [vmem:[%s1078_s25 + $0x2c] sm:$0xf] %vm694_vm0, %v641_v29  ;;  %vm451_vm14 = vcmp.ge.f32.partialorder %v387_v34, 0.0  ;;  %v515_v41 = vmul.f32 0.2, %v387_v34  ;;  %v322_v42 = vmul.f32 %v1046_v0, %v860_v35  ;;  %v323_v43 = vmul.f32 %v1046_v0, %v861_v36 }
  0x2a   : > { %707 = vst.msk [vmem:[%s1078_s25 + $0x30] sm:$0xf] %vm694_vm0, %v642_v33  ;;  %vm452_vm15 = vcmp.ge.f32.partialorder %v388_v37, 0.0  ;;  %v516_v44 = vmul.f32 0.2, %v388_v37  ;;  %vm453_vm1 = vcmp.ge.f32.partialorder %v389_v38, 0.0  ;;  %v324_v45 = vmul.f32 %v1046_v0, %v864_v39 }
  0x2b   : > { %v579_v46 = vsel %vm451_vm14, %v387_v34, %v515_v41  ;;  %v517_v47 = vmul.f32 0.2, %v389_v38  ;;  %v390_v48 = vadd.f32 %v1054_v5, %v322_v42  ;;  %v391_v49 = vadd.f32 %v1054_v5, %v323_v43 }
  0x2c   : > { %v643_v50 = vpack.c.bf16 %v579_v46, %v579_v46  ;;  %v580_v51 = vsel %vm452_vm15, %v388_v37, %v516_v44  ;;  %v392_v52 = vadd.f32 %v1054_v5, %v324_v45  ;;  %v325_v53 = vmul.f32 %v1046_v0, %v865_v40  ;;  %v967_v40 = vld [vmem:[%s1041_s18 + $0x70] sm:$0xff]  }
  0x2d   : > { %v644_v55 = vpack.c.bf16 %v580_v51, %v580_v51  ;;  %v581_v56 = vsel %vm453_vm1, %v389_v38, %v517_v47  ;;  %vm454_vm2 = vcmp.ge.f32.partialorder %v390_v48, 0.0  ;;  %v518_v57 = vmul.f32 0.2, %v390_v48  ;;  %v968_v51 = vld [vmem:[%s1041_s18 + $0x78] sm:$0xff]  }
  0x2e   : > { %708 = vst.msk [vmem:[%s1078_s25 + $0x34] sm:$0xf] %vm694_vm0, %v643_v50  ;;  %v645_v59 = vpack.c.bf16 %v581_v56, %v581_v56  ;;  %vm455_vm3 = vcmp.ge.f32.partialorder %v391_v49, 0.0  ;;  %v519_v60 = vmul.f32 0.2, %v391_v49  ;;  %vm456_vm4 = vcmp.ge.f32.partialorder %v392_v52, 0.0 }
  0x2f   : > { %709 = vst.msk [vmem:[%s1078_s25 + $0x38] sm:$0xf] %vm694_vm0, %v644_v55  ;;  %v582_v61 = vsel %vm454_vm2, %v390_v48, %v518_v57  ;;  %v520_v62 = vmul.f32 0.2, %v392_v52  ;;  %v393_v63 = vadd.f32 %v1054_v5, %v325_v53  ;;  %v868_v1 = vunpack.c.l.bf16 %v963_v54 }
  0x30   : > { %710 = vst.msk [vmem:[%s1078_s25 + $0x3c] sm:$0xf] %vm694_vm0, %v645_v59  ;;  %v646_v2 = vpack.c.bf16 %v582_v61, %v582_v61  ;;  %v583_v3 = vsel %vm455_vm3, %v391_v49, %v519_v60  ;;  %v869_v4 = vunpack.c.h.bf16 %v963_v54  ;;  %v872_v6 = vunpack.c.l.bf16 %v964_v58  ;;  %v969_v59 = vld [vmem:[%s1041_s18 + $0x80] sm:$0xff]  }
  0x31   : > { %v647_v8 = vpack.c.bf16 %v583_v3, %v583_v3  ;;  %v584_v9 = vsel %vm456_vm4, %v392_v52, %v520_v62  ;;  %vm457_vm5 = vcmp.ge.f32.partialorder %v393_v63, 0.0  ;;  %v521_v10 = vmul.f32 0.2, %v393_v63 }
  0x32   : > { %711 = vst.msk [vmem:[%s1078_s25 + $0x40] sm:$0xf] %vm694_vm0, %v646_v2  ;;  %v648_v11 = vpack.c.bf16 %v584_v9, %v584_v9  ;;  %v326_v12 = vmul.f32 %v1046_v0, %v868_v1  ;;  %v327_v13 = vmul.f32 %v1046_v0, %v869_v4  ;;  %v328_v14 = vmul.f32 %v1046_v0, %v872_v6 }
  0x33   : > { %712 = vst.msk [vmem:[%s1078_s25 + $0x44] sm:$0xf] %vm694_vm0, %v647_v8  ;;  %v585_v16 = vsel %vm457_vm5, %v393_v63, %v521_v10  ;;  %v873_v17 = vunpack.c.h.bf16 %v964_v58  ;;  %v876_v18 = vunpack.c.l.bf16 %v965_v7  ;;  %v877_v19 = vunpack.c.h.bf16 %v965_v7 }
  0x34   : > { %713 = vst.msk [vmem:[%s1078_s25 + $0x48] sm:$0xf] %vm694_vm0, %v648_v11  ;;  %v649_v20 = vpack.c.bf16 %v585_v16, %v585_v16  ;;  %v394_v21 = vadd.f32 %v1054_v5, %v326_v12  ;;  %v395_v22 = vadd.f32 %v1054_v5, %v327_v13  ;;  %v396_v23 = vadd.f32 %v1054_v5, %v328_v14 }
  0x35   : > { %v329_v24 = vmul.f32 %v1046_v0, %v873_v17  ;;  %v330_v25 = vmul.f32 %v1046_v0, %v876_v18  ;;  %v331_v26 = vmul.f32 %v1046_v0, %v877_v19  ;;  %v880_v27 = vunpack.c.l.bf16 %v966_v15  ;;  %v970_v19 = vld [vmem:[%s1041_s18 + $0x88] sm:$0xff]  }
  0x36   : > { %714 = vst.msk [vmem:[%s1078_s25 + $0x4c] sm:$0xf] %vm694_vm0, %v649_v20  ;;  %vm458_vm6 = vcmp.ge.f32.partialorder %v394_v21, 0.0  ;;  %v522_v28 = vmul.f32 0.2, %v394_v21  ;;  %vm459_vm7 = vcmp.ge.f32.partialorder %v395_v22, 0.0  ;;  %v881_v29 = vunpack.c.h.bf16 %v966_v15 }
  0x37   : > { %v523_v30 = vmul.f32 0.2, %v395_v22  ;;  %vm460_vm8 = vcmp.ge.f32.partialorder %v396_v23, 0.0  ;;  %v524_v31 = vmul.f32 0.2, %v396_v23  ;;  %v397_v32 = vadd.f32 %v1054_v5, %v329_v24  ;;  %v971_v20 = vld [vmem:[%s1041_s18 + $0x90] sm:$0xff]  }
  0x38   : > { %v586_v33 = vsel %vm458_vm6, %v394_v21, %v522_v28  ;;  %v398_v34 = vadd.f32 %v1054_v5, %v330_v25  ;;  %v399_v35 = vadd.f32 %v1054_v5, %v331_v26  ;;  %v332_v36 = vmul.f32 %v1046_v0, %v880_v27 }
  0x39   : > { %v650_v37 = vpack.c.bf16 %v586_v33, %v586_v33  ;;  %v587_v38 = vsel %vm459_vm7, %v395_v22, %v523_v30  ;;  %v588_v39 = vsel %vm460_vm8, %v396_v23, %v524_v31  ;;  %vm461_vm9 = vcmp.ge.f32.partialorder %v397_v32, 0.0 }
  0x3a   : > { %v651_v41 = vpack.c.bf16 %v587_v38, %v587_v38  ;;  %v652_v42 = vpack.c.bf16 %v588_v39, %v588_v39  ;;  %v525_v43 = vmul.f32 0.2, %v397_v32  ;;  %vm462_vm10 = vcmp.ge.f32.partialorder %v398_v34, 0.0 }
  0x3b   : > { %715 = vst.msk [vmem:[%s1078_s25 + $0x50] sm:$0xf] %vm694_vm0, %v650_v37  ;;  %v526_v44 = vmul.f32 0.2, %v398_v34  ;;  %vm463_vm11 = vcmp.ge.f32.partialorder %v399_v35, 0.0  ;;  %v400_v45 = vadd.f32 %v1054_v5, %v332_v36  ;;  %v333_v46 = vmul.f32 %v1046_v0, %v881_v29 }
  0x3c   : > { %716 = vst.msk [vmem:[%s1078_s25 + $0x54] sm:$0xf] %vm694_vm0, %v651_v41  ;;  %v589_v47 = vsel %vm461_vm9, %v397_v32, %v525_v43  ;;  %v527_v48 = vmul.f32 0.2, %v399_v35  ;;  %v884_v49 = vunpack.c.l.bf16 %v967_v40  ;;  %v885_v50 = vunpack.c.h.bf16 %v967_v40  ;;  %v972_v41 = vld [vmem:[%s1041_s18 + $0x98] sm:$0xff]  }
  0x3d   : > { %717 = vst.msk [vmem:[%s1078_s25 + $0x58] sm:$0xf] %vm694_vm0, %v652_v42  ;;  %v653_v52 = vpack.c.bf16 %v589_v47, %v589_v47  ;;  %v590_v53 = vsel %vm462_vm10, %v398_v34, %v526_v44  ;;  %vm464_vm12 = vcmp.ge.f32.partialorder %v400_v45, 0.0  ;;  %v528_v54 = vmul.f32 0.2, %v400_v45 }
  0x3e   : > { %v654_v55 = vpack.c.bf16 %v590_v53, %v590_v53  ;;  %v591_v56 = vsel %vm463_vm11, %v399_v35, %v527_v48  ;;  %v401_v57 = vadd.f32 %v1054_v5, %v333_v46  ;;  %v334_v58 = vmul.f32 %v1046_v0, %v884_v49  ;;  %v973_v53 = vld [vmem:[%s1041_s18 + $0xa0] sm:$0xff]  }
  0x3f   : > { %718 = vst.msk [vmem:[%s1078_s25 + $0x5c] sm:$0xf] %vm694_vm0, %v653_v52  ;;  %v655_v60 = vpack.c.bf16 %v591_v56, %v591_v56  ;;  %v592_v61 = vsel %vm464_vm12, %v400_v45, %v528_v54  ;;  %v335_v62 = vmul.f32 %v1046_v0, %v885_v50  ;;  %v888_v63 = vunpack.c.l.bf16 %v968_v51 }
  0x40   : > { %719 = vst.msk [vmem:[%s1078_s25 + $0x60] sm:$0xf] %vm694_vm0, %v654_v55  ;;  %v656_v1 = vpack.c.bf16 %v592_v61, %v592_v61  ;;  %vm465_vm13 = vcmp.ge.f32.partialorder %v401_v57, 0.0  ;;  %v529_v2 = vmul.f32 0.2, %v401_v57  ;;  %v402_v3 = vadd.f32 %v1054_v5, %v334_v58 }
  0x41   : > { %720 = vst.msk [vmem:[%s1078_s25 + $0x64] sm:$0xf] %vm694_vm0, %v655_v60  ;;  %v403_v4 = vadd.f32 %v1054_v5, %v335_v62  ;;  %v336_v6 = vmul.f32 %v1046_v0, %v888_v63  ;;  %v889_v7 = vunpack.c.h.bf16 %v968_v51  ;;  %v892_v8 = vunpack.c.l.bf16 %v969_v59 }
  0x42   : > { %721 = vst.msk [vmem:[%s1078_s25 + $0x68] sm:$0xf] %vm694_vm0, %v656_v1  ;;  %v593_v9 = vsel %vm465_vm13, %v401_v57, %v529_v2  ;;  %vm466_vm14 = vcmp.ge.f32.partialorder %v402_v3, 0.0  ;;  %v530_v10 = vmul.f32 0.2, %v402_v3  ;;  %v893_v11 = vunpack.c.h.bf16 %v969_v59  ;;  %v974_v1 = vld [vmem:[%s1041_s18 + $0xa8] sm:$0xff]  }
  0x43   : > { %v657_v12 = vpack.c.bf16 %v593_v9, %v593_v9  ;;  %vm467_vm15 = vcmp.ge.f32.partialorder %v403_v4, 0.0  ;;  %v531_v13 = vmul.f32 0.2, %v403_v4  ;;  %v404_v14 = vadd.f32 %v1054_v5, %v336_v6 }
  0x44   : > { %v594_v15 = vsel %vm466_vm14, %v402_v3, %v530_v10  ;;  %v337_v16 = vmul.f32 %v1046_v0, %v889_v7  ;;  %v338_v17 = vmul.f32 %v1046_v0, %v892_v8  ;;  %v339_v18 = vmul.f32 %v1046_v0, %v893_v11 }
  0x45   : > { %722 = vst.msk [vmem:[%s1078_s25 + $0x6c] sm:$0xf] %vm694_vm0, %v657_v12  ;;  %v658_v21 = vpack.c.bf16 %v594_v15, %v594_v15  ;;  %v595_v22 = vsel %vm467_vm15, %v403_v4, %v531_v13  ;;  %vm468_vm1 = vcmp.ge.f32.partialorder %v404_v14, 0.0  ;;  %v532_v23 = vmul.f32 0.2, %v404_v14 }
  0x46   : > { %v659_v24 = vpack.c.bf16 %v595_v22, %v595_v22  ;;  %v405_v25 = vadd.f32 %v1054_v5, %v337_v16  ;;  %v406_v26 = vadd.f32 %v1054_v5, %v338_v17  ;;  %v407_v27 = vadd.f32 %v1054_v5, %v339_v18 }
  0x47   : > { %723 = vst.msk [vmem:[%s1078_s25 + $0x70] sm:$0xf] %vm694_vm0, %v658_v21  ;;  %v596_v28 = vsel %vm468_vm1, %v404_v14, %v532_v23  ;;  %v896_v29 = vunpack.c.l.bf16 %v970_v19  ;;  %v897_v30 = vunpack.c.h.bf16 %v970_v19  ;;  %v900_v31 = vunpack.c.l.bf16 %v971_v20  ;;  %v975_v14 = vld [vmem:[%s1041_s18 + $0xb0] sm:$0xff]  }
  0x48   : > { %724 = vst.msk [vmem:[%s1078_s25 + $0x74] sm:$0xf] %vm694_vm0, %v659_v24  ;;  %v660_v32 = vpack.c.bf16 %v596_v28, %v596_v28  ;;  %vm469_vm2 = vcmp.ge.f32.partialorder %v405_v25, 0.0  ;;  %v533_v33 = vmul.f32 0.2, %v405_v25  ;;  %vm470_vm3 = vcmp.ge.f32.partialorder %v406_v26, 0.0 }
  0x49   : > { %v534_v34 = vmul.f32 0.2, %v406_v26  ;;  %vm471_vm4 = vcmp.ge.f32.partialorder %v407_v27, 0.0  ;;  %v535_v35 = vmul.f32 0.2, %v407_v27  ;;  %v340_v36 = vmul.f32 %v1046_v0, %v896_v29 }
  0x4a   : > { %725 = vst.msk [vmem:[%s1078_s25 + $0x78] sm:$0xf] %vm694_vm0, %v660_v32  ;;  %v597_v37 = vsel %vm469_vm2, %v405_v25, %v533_v33  ;;  %v341_v38 = vmul.f32 %v1046_v0, %v897_v30  ;;  %v342_v39 = vmul.f32 %v1046_v0, %v900_v31  ;;  %v901_v40 = vunpack.c.h.bf16 %v971_v20  ;;  %v976_v25 = vld [vmem:[%s1041_s18 + $0xb8] sm:$0xff]  }
  0x4b   : > { %v661_v42 = vpack.c.bf16 %v597_v37, %v597_v37  ;;  %v598_v43 = vsel %vm470_vm3, %v406_v26, %v534_v34  ;;  %v599_v44 = vsel %vm471_vm4, %v407_v27, %v535_v35  ;;  %v408_v45 = vadd.f32 %v1054_v5, %v340_v36 }
  0x4c   : > { %v662_v46 = vpack.c.bf16 %v598_v43, %v598_v43  ;;  %v663_v47 = vpack.c.bf16 %v599_v44, %v599_v44  ;;  %v409_v48 = vadd.f32 %v1054_v5, %v341_v38  ;;  %v410_v49 = vadd.f32 %v1054_v5, %v342_v39 }
  0x4d   : > { %726 = vst.msk [vmem:[%s1078_s25 + $0x7c] sm:$0xf] %vm694_vm0, %v661_v42  ;;  %vm472_vm5 = vcmp.ge.f32.partialorder %v408_v45, 0.0  ;;  %v536_v50 = vmul.f32 0.2, %v408_v45  ;;  %v343_v51 = vmul.f32 %v1046_v0, %v901_v40  ;;  %v904_v52 = vunpack.c.l.bf16 %v972_v41 }
  0x4e   : > { %727 = vst.msk [vmem:[%s1078_s25 + $0x80] sm:$0xf] %vm694_vm0, %v662_v46  ;;  %vm473_vm6 = vcmp.ge.f32.partialorder %v409_v48, 0.0  ;;  %v537_v54 = vmul.f32 0.2, %v409_v48  ;;  %vm474_vm7 = vcmp.ge.f32.partialorder %v410_v49, 0.0  ;;  %v905_v55 = vunpack.c.h.bf16 %v972_v41 }
  0x4f   : > { %728 = vst.msk [vmem:[%s1078_s25 + $0x84] sm:$0xf] %vm694_vm0, %v663_v47  ;;  %v600_v56 = vsel %vm472_vm5, %v408_v45, %v536_v50  ;;  %v538_v57 = vmul.f32 0.2, %v410_v49  ;;  %v411_v58 = vadd.f32 %v1054_v5, %v343_v51  ;;  %v344_v59 = vmul.f32 %v1046_v0, %v904_v52  ;;  %v977_v46 = vld [vmem:[%s1041_s18 + $0xc0] sm:$0xff]   ;;  %v978_v50 = vld [vmem:[%s1041_s18 + $0xc8] sm:$0xff]  }
  0x50   : > { %v664_v60 = vpack.c.bf16 %v600_v56, %v600_v56  ;;  %v601_v61 = vsel %vm473_vm6, %v409_v48, %v537_v54  ;;  %v345_v62 = vmul.f32 %v1046_v0, %v905_v55  ;;  %v908_v63 = vunpack.c.l.bf16 %v973_v53 }
  0x51   : > { %v665_v2 = vpack.c.bf16 %v601_v61, %v601_v61  ;;  %v602_v3 = vsel %vm474_vm7, %v410_v49, %v538_v57  ;;  %vm475_vm8 = vcmp.ge.f32.partialorder %v411_v58, 0.0  ;;  %v539_v4 = vmul.f32 0.2, %v411_v58 }
  0x52   : > { %729 = vst.msk [vmem:[%s1078_s25 + $0x88] sm:$0xf] %vm694_vm0, %v664_v60  ;;  %v666_v6 = vpack.c.bf16 %v602_v3, %v602_v3  ;;  %v412_v7 = vadd.f32 %v1054_v5, %v344_v59  ;;  %v413_v8 = vadd.f32 %v1054_v5, %v345_v62  ;;  %v346_v9 = vmul.f32 %v1046_v0, %v908_v63  ;;  %v979_v62 = vld [vmem:[%s1041_s18 + $0xd0] sm:$0xff]  }
  0x53   : > { %730 = vst.msk [vmem:[%s1078_s25 + $0x8c] sm:$0xf] %vm694_vm0, %v665_v2  ;;  %v603_v10 = vsel %vm475_vm8, %v411_v58, %v539_v4  ;;  %v909_v11 = vunpack.c.h.bf16 %v973_v53  ;;  %v912_v12 = vunpack.c.l.bf16 %v974_v1  ;;  %v913_v13 = vunpack.c.h.bf16 %v974_v1 }
  0x54   : > { %731 = vst.msk [vmem:[%s1078_s25 + $0x90] sm:$0xf] %vm694_vm0, %v666_v6  ;;  %v667_v15 = vpack.c.bf16 %v603_v10, %v603_v10  ;;  %vm476_vm9 = vcmp.ge.f32.partialorder %v412_v7, 0.0  ;;  %v540_v16 = vmul.f32 0.2, %v412_v7  ;;  %vm477_vm10 = vcmp.ge.f32.partialorder %v413_v8, 0.0 }
  0x55   : > { %v541_v17 = vmul.f32 0.2, %v413_v8  ;;  %v414_v18 = vadd.f32 %v1054_v5, %v346_v9  ;;  %v347_v19 = vmul.f32 %v1046_v0, %v909_v11  ;;  %v348_v20 = vmul.f32 %v1046_v0, %v912_v12 }
  0x56   : > { %732 = vst.msk [vmem:[%s1078_s25 + $0x94] sm:$0xf] %vm694_vm0, %v667_v15  ;;  %v604_v21 = vsel %vm476_vm9, %v412_v7, %v540_v16  ;;  %v349_v22 = vmul.f32 %v1046_v0, %v913_v13  ;;  %v916_v23 = vunpack.c.l.bf16 %v975_v14  ;;  %v917_v24 = vunpack.c.h.bf16 %v975_v14 }
  0x57   : > { %v668_v26 = vpack.c.bf16 %v604_v21, %v604_v21  ;;  %v605_v27 = vsel %vm477_vm10, %v413_v8, %v541_v17  ;;  %vm478_vm11 = vcmp.ge.f32.partialorder %v414_v18, 0.0  ;;  %v542_v28 = vmul.f32 0.2, %v414_v18 }
  0x58   : > { %v669_v29 = vpack.c.bf16 %v605_v27, %v605_v27  ;;  %v415_v30 = vadd.f32 %v1054_v5, %v347_v19  ;;  %v416_v31 = vadd.f32 %v1054_v5, %v348_v20  ;;  %v417_v32 = vadd.f32 %v1054_v5, %v349_v22 }
  0x59   : > { %733 = vst.msk [vmem:[%s1078_s25 + $0x98] sm:$0xf] %vm694_vm0, %v668_v26  ;;  %v606_v33 = vsel %vm478_vm11, %v414_v18, %v542_v28  ;;  %v350_v34 = vmul.f32 %v1046_v0, %v916_v23  ;;  %v351_v35 = vmul.f32 %v1046_v0, %v917_v24  ;;  %v920_v36 = vunpack.c.l.bf16 %v976_v25  ;;  %v980_v24 = vld [vmem:[%s1041_s18 + $0xd8] sm:$0xff]  }
  0x5a   : > { %734 = vst.msk [vmem:[%s1078_s25 + $0x9c] sm:$0xf] %vm694_vm0, %v669_v29  ;;  %v670_v37 = vpack.c.bf16 %v606_v33, %v606_v33  ;;  %vm479_vm12 = vcmp.ge.f32.partialorder %v415_v30, 0.0  ;;  %v543_v38 = vmul.f32 0.2, %v415_v30  ;;  %vm480_vm13 = vcmp.ge.f32.partialorder %v416_v31, 0.0 }
  0x5b   : > { %v544_v39 = vmul.f32 0.2, %v416_v31  ;;  %vm481_vm14 = vcmp.ge.f32.partialorder %v417_v32, 0.0  ;;  %v545_v40 = vmul.f32 0.2, %v417_v32  ;;  %v418_v41 = vadd.f32 %v1054_v5, %v350_v34 }
  0x5c   : > { %735 = vst.msk [vmem:[%s1078_s25 + $0xa0] sm:$0xf] %vm694_vm0, %v670_v37  ;;  %v607_v42 = vsel %vm479_vm12, %v415_v30, %v543_v38  ;;  %v419_v43 = vadd.f32 %v1054_v5, %v351_v35  ;;  %v352_v44 = vmul.f32 %v1046_v0, %v920_v36  ;;  %v921_v45 = vunpack.c.h.bf16 %v976_v25  ;;  %v982_v37 = vld [vmem:[%s1041_s18 + $0xe8] sm:$0xff]  }
  0x5d   : > { %v671_v47 = vpack.c.bf16 %v607_v42, %v607_v42  ;;  %v608_v48 = vsel %vm480_vm13, %v416_v31, %v544_v39  ;;  %v609_v49 = vsel %vm481_vm14, %v417_v32, %v545_v40  ;;  %vm482_vm15 = vcmp.ge.f32.partialorder %v418_v41, 0.0  ;;  %v981_v32 = vld [vmem:[%s1041_s18 + $0xe0] sm:$0xff]  }
  0x5e   : > { %v672_v51 = vpack.c.bf16 %v608_v48, %v608_v48  ;;  %v673_v52 = vpack.c.bf16 %v609_v49, %v609_v49  ;;  %v546_v53 = vmul.f32 0.2, %v418_v41  ;;  %vm483_vm1 = vcmp.ge.f32.partialorder %v419_v43, 0.0 }
  0x5f   : > { %736 = vst.msk [vmem:[%s1078_s25 + $0xa4] sm:$0xf] %vm694_vm0, %v671_v47  ;;  %v547_v54 = vmul.f32 0.2, %v419_v43  ;;  %v420_v55 = vadd.f32 %v1054_v5, %v352_v44  ;;  %v353_v56 = vmul.f32 %v1046_v0, %v921_v45  ;;  %v924_v57 = vunpack.c.l.bf16 %v977_v46 }
  0x60   : > { %737 = vst.msk [vmem:[%s1078_s25 + $0xa8] sm:$0xf] %vm694_vm0, %v672_v51  ;;  %v610_v58 = vsel %vm482_vm15, %v418_v41, %v546_v53  ;;  %v925_v59 = vunpack.c.h.bf16 %v977_v46  ;;  %v928_v60 = vunpack.c.l.bf16 %v978_v50  ;;  %v929_v61 = vunpack.c.h.bf16 %v978_v50 }
  0x61   : > { %738 = vst.msk [vmem:[%s1078_s25 + $0xac] sm:$0xf] %vm694_vm0, %v673_v52  ;;  %v674_v63 = vpack.c.bf16 %v610_v58, %v610_v58  ;;  %v611_v1 = vsel %vm483_vm1, %v419_v43, %v547_v54  ;;  %vm484_vm2 = vcmp.ge.f32.partialorder %v420_v55, 0.0  ;;  %v548_v2 = vmul.f32 0.2, %v420_v55 }
  0x62   : > { %v675_v3 = vpack.c.bf16 %v611_v1, %v611_v1  ;;  %v421_v4 = vadd.f32 %v1054_v5, %v353_v56  ;;  %v354_v6 = vmul.f32 %v1046_v0, %v924_v57  ;;  %v355_v7 = vmul.f32 %v1046_v0, %v925_v59  ;;  %v983_v56 = vld [vmem:[%s1041_s18 + $0xf0] sm:$0xff]  }
  0x63   : > { %739 = vst.msk [vmem:[%s1078_s25 + $0xb0] sm:$0xf] %vm694_vm0, %v674_v63  ;;  %v612_v8 = vsel %vm484_vm2, %v420_v55, %v548_v2  ;;  %v356_v9 = vmul.f32 %v1046_v0, %v928_v60  ;;  %v357_v10 = vmul.f32 %v1046_v0, %v929_v61  ;;  %v932_v11 = vunpack.c.l.bf16 %v979_v62 }
  0x64   : > { %740 = vst.msk [vmem:[%s1078_s25 + $0xb4] sm:$0xf] %vm694_vm0, %v675_v3  ;;  %v676_v12 = vpack.c.bf16 %v612_v8, %v612_v8  ;;  %vm485_vm3 = vcmp.ge.f32.partialorder %v421_v4, 0.0  ;;  %v549_v13 = vmul.f32 0.2, %v421_v4  ;;  %v422_v14 = vadd.f32 %v1054_v5, %v354_v6 }
  0x65   : > { %v423_v15 = vadd.f32 %v1054_v5, %v355_v7  ;;  %v424_v16 = vadd.f32 %v1054_v5, %v356_v9  ;;  %v425_v17 = vadd.f32 %v1054_v5, %v357_v10  ;;  %v358_v18 = vmul.f32 %v1046_v0, %v932_v11 }
  0x66   : > { %741 = vst.msk [vmem:[%s1078_s25 + $0xb8] sm:$0xf] %vm694_vm0, %v676_v12  ;;  %v613_v19 = vsel %vm485_vm3, %v421_v4, %v549_v13  ;;  %vm486_vm4 = vcmp.ge.f32.partialorder %v422_v14, 0.0  ;;  %v550_v20 = vmul.f32 0.2, %v422_v14  ;;  %v933_v21 = vunpack.c.h.bf16 %v979_v62  ;;  %v984_v13 = vld [vmem:[%s1041_s18 + $0xf8] sm:$0xff]  }
  0x67   : > { %v677_v22 = vpack.c.bf16 %v613_v19, %v613_v19  ;;  %vm487_vm5 = vcmp.ge.f32.partialorder %v423_v15, 0.0  ;;  %v551_v23 = vmul.f32 0.2, %v423_v15  ;;  %vm488_vm6 = vcmp.ge.f32.partialorder %v424_v16, 0.0 }
  0x68   : > { %v614_v25 = vsel %vm486_vm4, %v422_v14, %v550_v20  ;;  %v552_v26 = vmul.f32 0.2, %v424_v16  ;;  %vm489_vm7 = vcmp.ge.f32.partialorder %v425_v17, 0.0  ;;  %v553_v27 = vmul.f32 0.2, %v425_v17 }
  0x69   : > { %742 = vst.msk [vmem:[%s1078_s25 + $0xbc] sm:$0xf] %vm694_vm0, %v677_v22  ;;  %v678_v28 = vpack.c.bf16 %v614_v25, %v614_v25  ;;  %v615_v29 = vsel %vm487_vm5, %v423_v15, %v551_v23  ;;  %v426_v30 = vadd.f32 %v1054_v5, %v358_v18  ;;  %v359_v31 = vmul.f32 %v1046_v0, %v933_v21 }
  0x6a   : > { %v679_v33 = vpack.c.bf16 %v615_v29, %v615_v29  ;;  %v616_v34 = vsel %vm488_vm6, %v424_v16, %v552_v26  ;;  %v617_v35 = vsel %vm489_vm7, %v425_v17, %v553_v27  ;;  %v936_v36 = vunpack.c.l.bf16 %v980_v24 }
  0x6b   : > { %743 = vst.msk [vmem:[%s1078_s25 + $0xc0] sm:$0xf] %vm694_vm0, %v678_v28  ;;  %v680_v38 = vpack.c.bf16 %v616_v34, %v616_v34  ;;  %v681_v39 = vpack.c.bf16 %v617_v35, %v617_v35  ;;  %vm490_vm8 = vcmp.ge.f32.partialorder %v426_v30, 0.0  ;;  %v554_v40 = vmul.f32 0.2, %v426_v30 }
  0x6c   : > { %744 = vst.msk [vmem:[%s1078_s25 + $0xc4] sm:$0xf] %vm694_vm0, %v679_v33  ;;  %v427_v41 = vadd.f32 %v1054_v5, %v359_v31  ;;  %v360_v42 = vmul.f32 %v1046_v0, %v936_v36  ;;  %v937_v43 = vunpack.c.h.bf16 %v980_v24  ;;  %v940_v44 = vunpack.c.l.bf16 %v981_v32  ;;  %v996_v33 = vld [vmem:[%s1353_s2] ss:$0 sm:$0xff] }
  0x6d   : > { %745 = vst.msk [vmem:[%s1078_s25 + $0xc8] sm:$0xf] %vm694_vm0, %v680_v38  ;;  %v618_v45 = vsel %vm490_vm8, %v426_v30, %v554_v40  ;;  %v941_v46 = vunpack.c.h.bf16 %v981_v32  ;;  %v944_v47 = vunpack.c.l.bf16 %v982_v37  ;;  %v945_v48 = vunpack.c.h.bf16 %v982_v37 }
  0x6e   : > { %746 = vst.msk [vmem:[%s1078_s25 + $0xcc] sm:$0xf] %vm694_vm0, %v681_v39  ;;  %v682_v49 = vpack.c.bf16 %v618_v45, %v618_v45  ;;  %vm491_vm9 = vcmp.ge.f32.partialorder %v427_v41, 0.0  ;;  %v555_v50 = vmul.f32 0.2, %v427_v41  ;;  %v428_v51 = vadd.f32 %v1054_v5, %v360_v42 }
  0x6f   : > { %v361_v52 = vmul.f32 %v1046_v0, %v937_v43  ;;  %v362_v53 = vmul.f32 %v1046_v0, %v940_v44  ;;  %v363_v54 = vmul.f32 %v1046_v0, %v941_v46  ;;  %v364_v55 = vmul.f32 %v1046_v0, %v944_v47 }
  0x70   : > { %747 = vst.msk [vmem:[%s1078_s25 + $0xd0] sm:$0xf] %vm694_vm0, %v682_v49  ;;  %v619_v57 = vsel %vm491_vm9, %v427_v41, %v555_v50  ;;  %vm492_vm10 = vcmp.ge.f32.partialorder %v428_v51, 0.0  ;;  %v556_v58 = vmul.f32 0.2, %v428_v51  ;;  %v365_v59 = vmul.f32 %v1046_v0, %v945_v48 }
  0x71   : > { %v683_v60 = vpack.c.bf16 %v619_v57, %v619_v57  ;;  %v429_v61 = vadd.f32 %v1054_v5, %v361_v52  ;;  %v430_v62 = vadd.f32 %v1054_v5, %v362_v53  ;;  %v431_v63 = vadd.f32 %v1054_v5, %v363_v54 }
  0x72   : > { %v620_v1 = vsel %vm492_vm10, %v428_v51, %v556_v58  ;;  %v432_v2 = vadd.f32 %v1054_v5, %v364_v55  ;;  %v433_v3 = vadd.f32 %v1054_v5, %v365_v59  ;;  %v948_v4 = vunpack.c.l.bf16 %v983_v56 }
  0x73   : > { %748 = vst.msk [vmem:[%s1078_s25 + $0xd4] sm:$0xf] %vm694_vm0, %v683_v60  ;;  %v684_v6 = vpack.c.bf16 %v620_v1, %v620_v1  ;;  %vm493_vm11 = vcmp.ge.f32.partialorder %v429_v61, 0.0  ;;  %v557_v7 = vmul.f32 0.2, %v429_v61  ;;  %vm494_vm12 = vcmp.ge.f32.partialorder %v430_v62, 0.0 }
  0x74   : > { %v558_v8 = vmul.f32 0.2, %v430_v62  ;;  %vm495_vm13 = vcmp.ge.f32.partialorder %v431_v63, 0.0  ;;  %v559_v9 = vmul.f32 0.2, %v431_v63  ;;  %vm496_vm14 = vcmp.ge.f32.partialorder %v432_v2, 0.0 }
  0x75   : > { %749 = vst.msk [vmem:[%s1078_s25 + $0xd8] sm:$0xf] %vm694_vm0, %v684_v6  ;;  %v621_v10 = vsel %vm493_vm11, %v429_v61, %v557_v7  ;;  %v560_v11 = vmul.f32 0.2, %v432_v2  ;;  %vm497_vm15 = vcmp.ge.f32.partialorder %v433_v3, 0.0  ;;  %v366_v12 = vmul.f32 %v1046_v0, %v948_v4 }
  0x76   : > { %v685_v14 = vpack.c.bf16 %v621_v10, %v621_v10  ;;  %v622_v15 = vsel %vm494_vm12, %v430_v62, %v558_v8  ;;  %v623_v16 = vsel %vm495_vm13, %v431_v63, %v559_v9  ;;  %v561_v17 = vmul.f32 0.2, %v433_v3 }
  0x77   : > { %v686_v18 = vpack.c.bf16 %v622_v15, %v622_v15  ;;  %v687_v19 = vpack.c.bf16 %v623_v16, %v623_v16  ;;  %v624_v20 = vsel %vm496_vm14, %v432_v2, %v560_v11  ;;  %v434_v21 = vadd.f32 %v1054_v5, %v366_v12  ;;  %v995_v5 = vld [vmem:[%s1352_s1] ss:$0 sm:$0xff] }
  0x78   : > { %750 = vst.msk [vmem:[%s1078_s25 + $0xdc] sm:$0xf] %vm694_vm0, %v685_v14  ;;  %v688_v22 = vpack.c.bf16 %v624_v20, %v624_v20  ;;  %v625_v23 = vsel %vm497_vm15, %v433_v3, %v561_v17  ;;  %v949_v24 = vunpack.c.h.bf16 %v983_v56  ;;  %v952_v25 = vunpack.c.l.bf16 %v984_v13 }
  0x79   : > { %751 = vst.msk [vmem:[%s1078_s25 + $0xe0] sm:$0xf] %vm694_vm0, %v686_v18  ;;  %v689_v0 = vpack.c.bf16 %v625_v23, %v625_v23  ;;  %vm498_vm1 = vcmp.ge.f32.partialorder %v434_v21, 0.0  ;;  %v562_v26 = vmul.f32 0.2, %v434_v21  ;;  %v953_v27 = vunpack.c.h.bf16 %v984_v13 }
  0x7a   : > { %752 = vst.msk [vmem:[%s1078_s25 + $0xe4] sm:$0xf] %vm694_vm0, %v687_v19  ;;  %v367_v28 = vmul.f32 %v995_v5, %v949_v24  ;;  %v368_v29 = vmul.f32 %v995_v5, %v952_v25 }
  0x7b   : > { %753 = vst.msk [vmem:[%s1078_s25 + $0xe8] sm:$0xf] %vm694_vm0, %v688_v22  ;;  %v626_v30 = vsel %vm498_vm1, %v434_v21, %v562_v26  ;;  %v369_v31 = vmul.f32 %v995_v5, %v953_v27 }
  0x7c   : > { %754 = vst.msk [vmem:[%s1078_s25 + $0xec] sm:$0xf] %vm694_vm0, %v689_v0  ;;  %v690_v32 = vpack.c.bf16 %v626_v30, %v626_v30  ;;  %v435_v34 = vadd.f32 %v996_v33, %v367_v28  ;;  %v436_v35 = vadd.f32 %v996_v33, %v368_v29 }
  0x7d   : > { %v437_v36 = vadd.f32 %v996_v33, %v369_v31 }
  0x7e   : > { %755 = vst.msk [vmem:[%s1078_s25 + $0xf0] sm:$0xf] %vm694_vm0, %v690_v32  ;;  %vm499_vm2 = vcmp.ge.f32.partialorder %v435_v34, 0.0  ;;  %v563_v37 = vmul.f32 0.2, %v435_v34  ;;  %vm500_vm3 = vcmp.ge.f32.partialorder %v436_v35, 0.0 }
  0x7f   : > { %v564_v38 = vmul.f32 0.2, %v436_v35  ;;  %vm501_vm4 = vcmp.ge.f32.partialorder %v437_v36, 0.0  ;;  %v565_v39 = vmul.f32 0.2, %v437_v36 }
  0x80   : > { %v627_v40 = vsel %vm499_vm2, %v435_v34, %v563_v37 }
  0x81   : > { %v691_v41 = vpack.c.bf16 %v627_v40, %v627_v40  ;;  %v628_v42 = vsel %vm500_vm3, %v436_v35, %v564_v38  ;;  %v629_v43 = vsel %vm501_vm4, %v437_v36, %v565_v39 }
  0x82   : > { %v692_v44 = vpack.c.bf16 %v628_v42, %v628_v42  ;;  %v693_v45 = vpack.c.bf16 %v629_v43, %v629_v43 }
  0x83   : > { %756 = vst.msk [vmem:[%s1078_s25 + $0xf4] sm:$0xf] %vm694_vm0, %v691_v41 }
  0x84   : > { %757 = vst.msk [vmem:[%s1078_s25 + $0xf8] sm:$0xf] %vm694_vm0, %v692_v44 }
  0x85   : > { %758 = vst.msk [vmem:[%s1078_s25 + $0xfc] sm:$0xf] %vm694_vm0, %v693_v45 }
  0x86 PF: > { %s13_s12 = sadd.s32 1, %s1003_s12  }
  0x87   : > { %p10_p4 = scmp.ge.s32.totalorder %s13_s12, 11  }
  0x89   :  { %12 = sbr.rel (!%p10_p4) target bundleno = 1 (0x1), region = 62 }

// kernel: a_call__.21
= control target key start
LH: loop header
LB: loop body
LE: loop exit
PB: predicated region body
PF: predicated region fallthrough
CT: control target
= control target key end

     0   :  { %s1786_s12 = smov 0   ;;  %s1788_s13 = smov 0   ;;  %s2315_s0 = inlined_call_operand.vmem [shape: bf16[18432,64], index: 0, kind: input, shape index: {}]   ;;  %s2316_s1 = inlined_call_operand.vmem [shape: bf16[64,12], index: 1, kind: input, shape index: {}]   ;;  %s2317_s2 = inlined_call_operand.vmem [shape: f32[1,12], index: 2, kind: input, shape index: {}]   ;;  %s2318_s3 = inlined_call_operand.vmem [shape: f32[18432,12], index: 3, kind: output, shape index: {}]  }
   0x1   :  { %s1790_s14 = smov 0  }
   0x2 LB: > { %s25_s15 = sadd.s32 1, %s1759_s13  ;;  %p1355_p0 = scmp.ge.s32.totalorder %s1763_s14, 1  ;;  %s1763_s14 = sphi %s1790_s14, %s13_s14   ;;  %s1759_s13 = sphi %s1788_s13, %s2320_s13   ;;  %s1755_s12 = sphi %s1786_s12, %s2319_s12  }
   0x3   : > { %p27_p1 = scmp.ge.s32.totalorder %s25_s15, 36  ;;  %p166_p2 = scmp.lt.s32.totalorder %s1763_s14, 37 }
   0x5   : > { %s2322_s15 = smov (%p27_p1, %s25_s15), 0  ;;  %p167_p3 = pnand %p1355_p0, %p166_p2 }
   0x6   : > { %s1356_s18 = sshll.u32 (!%p167_p3), %s1755_s12, 6 }
   0x7   : > { %170 = sbr.rel (%p167_p3) target bundleno = 305 (0x131), region = 32  ;;  %p199_p4 = scmp.lt.s32.totalorder (!%p167_p3), %s1356_s18, 2303 }
   0xc   : > { %v1573_v0 = vld [vmem:[%s2316_s1 + $0x18] sm:$0xff]  ;;  %v1572_v1 = vld [vmem:[%s2316_s1 + $0x10] sm:$0xff]  ;;  %s2324_s18 = smov (!%p199_p4, %s1356_s18), 2303  ;;  %v1571_v2 = vld [vmem:[%s2316_s1 + $0x8] sm:$0xff]  ;;  %vm609_vm0 = vcmask 523264   ;;  %vm224_vm1 = vcmask 97280  }
   0xd   : > { %710 = vmatpush.bf16.msra.mxu0 %v1573_v0  ;;  %1574 = vmatpush.bf16.msra.mxu1 %v1573_v0  ;;  %s1357_s23 = sshll.u32 %s2324_s18, 2  ;;  %v1570_v3 = vld [vmem:[%s2316_s1] sm:$0xff]  ;;  %v1765_v28 = vmov 0.0   ;;  %s1359_s4 = sshll.u32 %s2324_s18, 3 }
   0xe   : > { %1575 = vmatpush.bf16.msra.mxu2 %v1573_v0  ;;  %1576 = vmatpush.bf16.msra.mxu3 %v1573_v0  ;;  %s1822_s28 = scalar_lea.vmem %s2315_s0, %s1357_s23  ;;  %225 = vst.msk [vmem:[#allocation2] sm:$0xff] %vm224_vm1, %v1765_v28  ;;  %v1990_v41 = vld [vmem:[%s2317_s2] ss:$0 sm:$0xff]  ;;  %s2017_s7 = scalar_lea.vmem %s2318_s3, %s1359_s4 }
   0xf   : > { %v1538_v4 = vld [vmem:[%s1822_s28] sm:$0xff]  ;;  %v1539_v8 = vld [vmem:[%s1822_s28 + $0x8] sm:$0xff]  ;;  %v1540_v12 = vld [vmem:[%s1822_s28 + $0x10] sm:$0xff]  ;;  %226 = vst.msk [vmem:[#allocation2 + $0x8] sm:$0xff] %vm224_vm1, %v1765_v28 }
  0x10   : > { %v1546_v5 = vld [vmem:[%s1822_s28 + $0x40] sm:$0xff]  ;;  %v1547_v9 = vld [vmem:[%s1822_s28 + $0x48] sm:$0xff]  ;;  %v1548_v13 = vld [vmem:[%s1822_s28 + $0x50] sm:$0xff]  ;;  %227 = vst.msk [vmem:[#allocation2 + $0x10] sm:$0xff] %vm224_vm1, %v1765_v28 }
  0x11   : > { %711 = vmatpush.bf16.msra.mxu0 %v1572_v1  ;;  %1577 = vmatpush.bf16.msra.mxu1 %v1572_v1  ;;  %v1554_v6 = vld [vmem:[%s1822_s28 + $0x80] sm:$0xff]  ;;  %v1555_v10 = vld [vmem:[%s1822_s28 + $0x88] sm:$0xff]  ;;  %v1556_v14 = vld [vmem:[%s1822_s28 + $0x90] sm:$0xff]  ;;  %228 = vst.msk [vmem:[#allocation2 + $0x18] sm:$0xff] %vm224_vm1, %v1765_v28 }
  0x12   : > { %1578 = vmatpush.bf16.msra.mxu2 %v1572_v1  ;;  %1579 = vmatpush.bf16.msra.mxu3 %v1572_v1  ;;  %v1562_v7 = vld [vmem:[%s1822_s28 + $0xc0] sm:$0xff]  ;;  %v1563_v11 = vld [vmem:[%s1822_s28 + $0xc8] sm:$0xff]  ;;  %v1564_v15 = vld [vmem:[%s1822_s28 + $0xd0] sm:$0xff]  ;;  %229 = vst.msk [vmem:[#allocation2 + $0x20] sm:$0xff] %vm224_vm1, %v1765_v28 }
  0x13   : > { %v1541_v16 = vld [vmem:[%s1822_s28 + $0x18] sm:$0xff]  ;;  %v1542_v20 = vld [vmem:[%s1822_s28 + $0x20] sm:$0xff]  ;;  %v1543_v24 = vld [vmem:[%s1822_s28 + $0x28] sm:$0xff]  ;;  %230 = vst.msk [vmem:[#allocation2 + $0x28] sm:$0xff] %vm224_vm1, %v1765_v28 }
  0x14   : > { %v1549_v17 = vld [vmem:[%s1822_s28 + $0x58] sm:$0xff]  ;;  %v1550_v21 = vld [vmem:[%s1822_s28 + $0x60] sm:$0xff]  ;;  %v1551_v25 = vld [vmem:[%s1822_s28 + $0x68] sm:$0xff]  ;;  %231 = vst.msk [vmem:[#allocation2 + $0x30] sm:$0xff] %vm224_vm1, %v1765_v28 }
  0x15   : > { %712 = vmatpush.bf16.msra.mxu0 %v1571_v2  ;;  %1580 = vmatpush.bf16.msra.mxu1 %v1571_v2  ;;  %v1557_v18 = vld [vmem:[%s1822_s28 + $0x98] sm:$0xff]  ;;  %v1558_v22 = vld [vmem:[%s1822_s28 + $0xa0] sm:$0xff]  ;;  %v1559_v26 = vld [vmem:[%s1822_s28 + $0xa8] sm:$0xff]  ;;  %232 = vst.msk [vmem:[#allocation2 + $0x38] sm:$0xff] %vm224_vm1, %v1765_v28 }
  0x16   : > { %1581 = vmatpush.bf16.msra.mxu2 %v1571_v2  ;;  %1582 = vmatpush.bf16.msra.mxu3 %v1571_v2  ;;  %v1565_v19 = vld [vmem:[%s1822_s28 + $0xd8] sm:$0xff]  ;;  %v1566_v23 = vld [vmem:[%s1822_s28 + $0xe0] sm:$0xff]  ;;  %v1567_v27 = vld [vmem:[%s1822_s28 + $0xe8] sm:$0xff]  ;;  %233 = vst.msk [vmem:[#allocation2 + $0x40] sm:$0xff] %vm224_vm1, %v1765_v28 }
  0x17   : > { %234 = vst.msk [vmem:[#allocation2 + $0x48] sm:$0xff] %vm224_vm1, %v1765_v28  ;;  %v1544_v29 = vld [vmem:[%s1822_s28 + $0x30] sm:$0xff]  ;;  %v1545_v33 = vld [vmem:[%s1822_s28 + $0x38] sm:$0xff]  ;;  %v289_v37 = vld [vmem:[#allocation2] sm:$0xff] }
  0x18   : > { %v1552_v30 = vld [vmem:[%s1822_s28 + $0x70] sm:$0xff]  ;;  %235 = vst.msk [vmem:[#allocation2 + $0x50] sm:$0xff] %vm224_vm1, %v1765_v28  ;;  %v1553_v34 = vld [vmem:[%s1822_s28 + $0x78] sm:$0xff]  ;;  %v290_v57 = vld [vmem:[#allocation2 + $0x8] sm:$0xff] }
  0x19   : > { %713 = vmatpush.bf16.msra.mxu0 %v1570_v3  ;;  %1583 = vmatpush.bf16.msra.mxu1 %v1570_v3  ;;  %v1560_v31 = vld [vmem:[%s1822_s28 + $0xb0] sm:$0xff]  ;;  %236 = vst.msk [vmem:[#allocation2 + $0x58] sm:$0xff] %vm224_vm1, %v1765_v28  ;;  %v1561_v35 = vld [vmem:[%s1822_s28 + $0xb8] sm:$0xff] }
  0x1a   : > { %1584 = vmatpush.bf16.msra.mxu2 %v1570_v3  ;;  %1585 = vmatpush.bf16.msra.mxu3 %v1570_v3  ;;  %v1568_v32 = vld [vmem:[%s1822_s28 + $0xf0] sm:$0xff]  ;;  %237 = vst.msk [vmem:[#allocation2 + $0x60] sm:$0xff] %vm224_vm1, %v1765_v28  ;;  %v1569_v36 = vld [vmem:[%s1822_s28 + $0xf8] sm:$0xff] }
  0x1b   : > { %238 = vst.msk [vmem:[#allocation2 + $0x68] sm:$0xff] %vm224_vm1, %v1765_v28  ;;  %v291_v1 = vld [vmem:[#allocation2 + $0x10] sm:$0xff] }
  0x1c   : > { %1504 = vmatmul.msk.bf16.vlgmr.msra.gmra.mxu0 %vm609_vm0, %v1538_v4  ;;  %1512 = vmatmul.msk.bf16.vlgmr.msra.gmra.mxu1 %vm609_vm0, %v1546_v5  ;;  %239 = vst.msk [vmem:[#allocation2 + $0x70] sm:$0xff] %vm224_vm1, %v1765_v28 }
  0x1d   : > { %1520 = vmatmul.msk.bf16.vlgmr.msra.gmra.mxu2 %vm609_vm0, %v1554_v6  ;;  %1528 = vmatmul.msk.bf16.vlgmr.msra.gmra.mxu3 %vm609_vm0, %v1562_v7  ;;  %240 = vst.msk [vmem:[#allocation2 + $0x78] sm:$0xff] %vm224_vm1, %v1765_v28 }
  0x1e   : > { %241 = vst.msk [vmem:[#allocation2 + $0x80] sm:$0xff] %vm224_vm1, %v1765_v28 }
  0x1f   : > { %242 = vst.msk [vmem:[#allocation2 + $0x88] sm:$0xff] %vm224_vm1, %v1765_v28 }
  0x20   : > { %243 = vst.msk [vmem:[#allocation2 + $0x90] sm:$0xff] %vm224_vm1, %v1765_v28 }
  0x21   : > { %244 = vst.msk [vmem:[#allocation2 + $0x98] sm:$0xff] %vm224_vm1, %v1765_v28 }
  0x22   : > { %245 = vst.msk [vmem:[#allocation2 + $0xa0] sm:$0xff] %vm224_vm1, %v1765_v28 }
  0x23   : > { %246 = vst.msk [vmem:[#allocation2 + $0xa8] sm:$0xff] %vm224_vm1, %v1765_v28 }
  0x24   : > { %247 = vst.msk [vmem:[#allocation2 + $0xb0] sm:$0xff] %vm224_vm1, %v1765_v28 }
  0x25   : > { %248 = vst.msk [vmem:[#allocation2 + $0xb8] sm:$0xff] %vm224_vm1, %v1765_v28  ;;  %v305_v50 = vld [vmem:[#allocation2 + $0x80] sm:$0xff] }
  0x26   : > { %249 = vst.msk [vmem:[#allocation2 + $0xc0] sm:$0xff] %vm224_vm1, %v1765_v28  ;;  %v306_v59 = vld [vmem:[#allocation2 + $0x88] sm:$0xff] }
  0x27   : > { %250 = vst.msk [vmem:[#allocation2 + $0xc8] sm:$0xff] %vm224_vm1, %v1765_v28  ;;  %v307_v5 = vld [vmem:[#allocation2 + $0x90] sm:$0xff] }
  0x28   : > { %251 = vst.msk [vmem:[#allocation2 + $0xd0] sm:$0xff] %vm224_vm1, %v1765_v28 }
  0x29   : > { %252 = vst.msk [vmem:[#allocation2 + $0xd8] sm:$0xff] %vm224_vm1, %v1765_v28 }
  0x2a   : > { %253 = vst.msk [vmem:[#allocation2 + $0xe0] sm:$0xff] %vm224_vm1, %v1765_v28 }
  0x2b   : > { %254 = vst.msk [vmem:[#allocation2 + $0xe8] sm:$0xff] %vm224_vm1, %v1765_v28 }
  0x2c   : > { %1505 = vmatmul.msk.bf16.gmra.mxu0 %vm609_vm0, %v1539_v8  ;;  %1513 = vmatmul.msk.bf16.gmra.mxu1 %vm609_vm0, %v1547_v9  ;;  %255 = vst.msk [vmem:[#allocation2 + $0xf0] sm:$0xff] %vm224_vm1, %v1765_v28 }
  0x2d   : > { %1521 = vmatmul.msk.bf16.gmra.mxu2 %vm609_vm0, %v1555_v10  ;;  %1529 = vmatmul.msk.bf16.gmra.mxu3 %vm609_vm0, %v1563_v11  ;;  %256 = vst.msk [vmem:[#allocation2 + $0xf8] sm:$0xff] %vm224_vm1, %v1765_v28 }
  0x2e   : > { %257 = vst.msk [vmem:[#allocation2 + $0x100] sm:$0xff] %vm224_vm1, %v1765_v28 }
  0x2f   : > { %258 = vst.msk [vmem:[#allocation2 + $0x108] sm:$0xff] %vm224_vm1, %v1765_v28 }
  0x30   : > { %259 = vst.msk [vmem:[#allocation2 + $0x110] sm:$0xff] %vm224_vm1, %v1765_v28 }
  0x31   : > { %260 = vst.msk [vmem:[#allocation2 + $0x118] sm:$0xff] %vm224_vm1, %v1765_v28 }
  0x32   : > { %261 = vst.msk [vmem:[#allocation2 + $0x120] sm:$0xff] %vm224_vm1, %v1765_v28 }
  0x33   : > { %262 = vst.msk [vmem:[#allocation2 + $0x128] sm:$0xff] %vm224_vm1, %v1765_v28 }
  0x34   : > { %263 = vst.msk [vmem:[#allocation2 + $0x130] sm:$0xff] %vm224_vm1, %v1765_v28 }
  0x35   : > { %264 = vst.msk [vmem:[#allocation2 + $0x138] sm:$0xff] %vm224_vm1, %v1765_v28  ;;  %v321_v53 = vld [vmem:[#allocation2 + $0x100] sm:$0xff] }
  0x36   : > { %265 = vst.msk [vmem:[#allocation2 + $0x140] sm:$0xff] %vm224_vm1, %v1765_v28  ;;  %v322_v61 = vld [vmem:[#allocation2 + $0x108] sm:$0xff] }
  0x37   : > { %266 = vst.msk [vmem:[#allocation2 + $0x148] sm:$0xff] %vm224_vm1, %v1765_v28  ;;  %v323_v9 = vld [vmem:[#allocation2 + $0x110] sm:$0xff] }
  0x38   : > { %267 = vst.msk [vmem:[#allocation2 + $0x150] sm:$0xff] %vm224_vm1, %v1765_v28 }
  0x39   : > { %268 = vst.msk [vmem:[#allocation2 + $0x158] sm:$0xff] %vm224_vm1, %v1765_v28 }
  0x3a   : > { %269 = vst.msk [vmem:[#allocation2 + $0x160] sm:$0xff] %vm224_vm1, %v1765_v28 }
  0x3b   : > { %270 = vst.msk [vmem:[#allocation2 + $0x168] sm:$0xff] %vm224_vm1, %v1765_v28 }
  0x3c   : > { %1506 = vmatmul.msk.bf16.gmra.mxu0 %vm609_vm0, %v1540_v12  ;;  %1514 = vmatmul.msk.bf16.gmra.mxu1 %vm609_vm0, %v1548_v13  ;;  %271 = vst.msk [vmem:[#allocation2 + $0x170] sm:$0xff] %vm224_vm1, %v1765_v28  ;;  %v292_v13 = vld [vmem:[#allocation2 + $0x18] sm:$0xff] }
  0x3d   : > { %1522 = vmatmul.msk.bf16.gmra.mxu2 %vm609_vm0, %v1556_v14  ;;  %1530 = vmatmul.msk.bf16.gmra.mxu3 %vm609_vm0, %v1564_v15  ;;  %272 = vst.msk [vmem:[#allocation2 + $0x178] sm:$0xff] %vm224_vm1, %v1765_v28  ;;  %v308_v15 = vld [vmem:[#allocation2 + $0x98] sm:$0xff] }
  0x3e   : > { %273 = vst.msk [vmem:[#allocation2 + $0x180] sm:$0xff] %vm224_vm1, %v1765_v28 }
  0x3f   : > { %274 = vst.msk [vmem:[#allocation2 + $0x188] sm:$0xff] %vm224_vm1, %v1765_v28 }
  0x40   : > { %275 = vst.msk [vmem:[#allocation2 + $0x190] sm:$0xff] %vm224_vm1, %v1765_v28 }
  0x41   : > { %276 = vst.msk [vmem:[#allocation2 + $0x198] sm:$0xff] %vm224_vm1, %v1765_v28 }
  0x42   : > { %277 = vst.msk [vmem:[#allocation2 + $0x1a0] sm:$0xff] %vm224_vm1, %v1765_v28 }
  0x43   : > { %278 = vst.msk [vmem:[#allocation2 + $0x1a8] sm:$0xff] %vm224_vm1, %v1765_v28 }
  0x44   : > { %279 = vst.msk [vmem:[#allocation2 + $0x1b0] sm:$0xff] %vm224_vm1, %v1765_v28 }
  0x45   : > { %280 = vst.msk [vmem:[#allocation2 + $0x1b8] sm:$0xff] %vm224_vm1, %v1765_v28  ;;  %v337_v54 = vld [vmem:[#allocation2 + $0x180] sm:$0xff] }
  0x46   : > { %281 = vst.msk [vmem:[#allocation2 + $0x1c0] sm:$0xff] %vm224_vm1, %v1765_v28  ;;  %v338_v63 = vld [vmem:[#allocation2 + $0x188] sm:$0xff] }
  0x47   : > { %282 = vst.msk [vmem:[#allocation2 + $0x1c8] sm:$0xff] %vm224_vm1, %v1765_v28  ;;  %v339_v11 = vld [vmem:[#allocation2 + $0x190] sm:$0xff] }
  0x48   : > { %283 = vst.msk [vmem:[#allocation2 + $0x1d0] sm:$0xff] %vm224_vm1, %v1765_v28 }
  0x49   : > { %284 = vst.msk [vmem:[#allocation2 + $0x1d8] sm:$0xff] %vm224_vm1, %v1765_v28 }
  0x4a   : > { %285 = vst.msk [vmem:[#allocation2 + $0x1e0] sm:$0xff] %vm224_vm1, %v1765_v28 }
  0x4b   : > { %286 = vst.msk [vmem:[#allocation2 + $0x1e8] sm:$0xff] %vm224_vm1, %v1765_v28 }
  0x4c   : > { %1507 = vmatmul.msk.bf16.gmra.mxu0 %vm609_vm0, %v1541_v16  ;;  %1515 = vmatmul.msk.bf16.gmra.mxu1 %vm609_vm0, %v1549_v17  ;;  %287 = vst.msk [vmem:[#allocation2 + $0x1f0] sm:$0xff] %vm224_vm1, %v1765_v28  ;;  %v324_v17 = vld [vmem:[#allocation2 + $0x118] sm:$0xff] }
  0x4d   : > { %1523 = vmatmul.msk.bf16.gmra.mxu2 %vm609_vm0, %v1557_v18  ;;  %1531 = vmatmul.msk.bf16.gmra.mxu3 %vm609_vm0, %v1565_v19  ;;  %288 = vst.msk [vmem:[#allocation2 + $0x1f8] sm:$0xff] %vm224_vm1, %v1765_v28 }
  0x5c   : > { %1508 = vmatmul.msk.bf16.gmra.mxu0 %vm609_vm0, %v1542_v20  ;;  %1516 = vmatmul.msk.bf16.gmra.mxu1 %vm609_vm0, %v1550_v21  ;;  %v340_v20 = vld [vmem:[#allocation2 + $0x198] sm:$0xff] }
  0x5d   : > { %1524 = vmatmul.msk.bf16.gmra.mxu2 %vm609_vm0, %v1558_v22  ;;  %1532 = vmatmul.msk.bf16.gmra.mxu3 %vm609_vm0, %v1566_v23 }
  0x6c   : > { %1509 = vmatmul.msk.bf16.gmra.mxu0 %vm609_vm0, %v1543_v24  ;;  %1517 = vmatmul.msk.bf16.gmra.mxu1 %vm609_vm0, %v1551_v25 }
  0x6d   : > { %1525 = vmatmul.msk.bf16.gmra.mxu2 %vm609_vm0, %v1559_v26  ;;  %1533 = vmatmul.msk.bf16.gmra.mxu3 %vm609_vm0, %v1567_v27  ;;  %v293_v26 = vld [vmem:[#allocation2 + $0x20] sm:$0xff] }
  0x7c   : > { %1510 = vmatmul.msk.bf16.gmra.mxu0 %vm609_vm0, %v1544_v29  ;;  %1518 = vmatmul.msk.bf16.gmra.mxu1 %vm609_vm0, %v1552_v30 }
  0x7d   : > { %1526 = vmatmul.msk.bf16.gmra.mxu2 %vm609_vm0, %v1560_v31  ;;  %1534 = vmatmul.msk.bf16.gmra.mxu3 %vm609_vm0, %v1568_v32  ;;  %v309_v31 = vld [vmem:[#allocation2 + $0xa0] sm:$0xff] }
  0x8c   : > { %1511 = vmatmul.msk.bf16.gmra.mxu0 %vm609_vm0, %v1545_v33  ;;  %1519 = vmatmul.msk.bf16.gmra.mxu1 %vm609_vm0, %v1553_v34 }
  0x8d   : > { %1527 = vmatmul.msk.bf16.gmra.mxu2 %vm609_vm0, %v1561_v35  ;;  %1535 = vmatmul.msk.bf16.gmra.mxu3 %vm609_vm0, %v1569_v36 }
  0x99   : > { %v715_v38 = vpop.f32.mrf.mxu0  ;;  %v755_v39 = vpop.f32.mrf.mxu1 }
  0x9a   : > { %v875_v40 = vadd.f32 %v715_v38, %v289_v37  ;;  %v891_v56 = vadd.f32 %v755_v39, %v305_v50 }
  0x9c   : > { %940 = vst.msk [vmem:[#allocation2] sm:$0xff] %vm224_vm1, %v875_v40 }
  0x9d   : > { %956 = vst.msk [vmem:[#allocation2 + $0x80] sm:$0xff] %vm224_vm1, %v891_v56 }
  0xa0   : > { %v795_v42 = vpop.f32.mrf.mxu2  ;;  %v835_v43 = vpop.f32.mrf.mxu3 }
  0xa1   : > { %v717_v44 = vpop.f32.mrf.mxu0  ;;  %v757_v45 = vpop.f32.mrf.mxu1  ;;  %v907_v58 = vadd.f32 %v795_v42, %v321_v53  ;;  %v923_v60 = vadd.f32 %v835_v43, %v337_v54 }
  0xa2   : > { %v876_v62 = vadd.f32 %v717_v44, %v290_v57  ;;  %v892_v0 = vadd.f32 %v757_v45, %v306_v59 }
  0xa3   : > { %v1007_v46 = vld [vmem:[#allocation2] sm:$0xff]  ;;  %972 = vst.msk [vmem:[#allocation2 + $0x100] sm:$0xff] %vm224_vm1, %v907_v58 }
  0xa4   : > { %v1075_v47 = vadd.f32 %v1990_v41, %v1007_v46  ;;  %988 = vst.msk [vmem:[#allocation2 + $0x180] sm:$0xff] %vm224_vm1, %v923_v60  ;;  %v1023_v18 = vld [vmem:[#allocation2 + $0x80] sm:$0xff] }
  0xa5   : > { %941 = vst.msk [vmem:[#allocation2 + $0x8] sm:$0xff] %vm224_vm1, %v876_v62  ;;  %v1091_v21 = vadd.f32 %v1990_v41, %v1023_v18 }
  0xa6   : > { %1612 = vtanh.f32 %v1075_v47  ;;  %957 = vst.msk [vmem:[#allocation2 + $0x88] sm:$0xff] %vm224_vm1, %v892_v0 }
  0xa7   : > { %1614 = vtanh.f32 %v1091_v21 }
  0xa8   : > { %v797_v48 = vpop.f32.mrf.mxu2  ;;  %v837_v49 = vpop.f32.mrf.mxu3 }
  0xa9   : > { %v720_v51 = vpop.f32.mrf.mxu0  ;;  %v760_v52 = vpop.f32.mrf.mxu1  ;;  %v908_v4 = vadd.f32 %v797_v48, %v322_v61  ;;  %v924_v8 = vadd.f32 %v837_v49, %v338_v63 }
  0xaa   : > { %v877_v10 = vadd.f32 %v720_v51, %v291_v1  ;;  %v893_v12 = vadd.f32 %v760_v52, %v307_v5  ;;  %v1039_v22 = vld [vmem:[#allocation2 + $0x100] sm:$0xff] }
  0xab   : > { %973 = vst.msk [vmem:[#allocation2 + $0x108] sm:$0xff] %vm224_vm1, %v908_v4  ;;  %v1107_v27 = vadd.f32 %v1990_v41, %v1039_v22  ;;  %v1055_v28 = vld [vmem:[#allocation2 + $0x180] sm:$0xff] }
  0xac   : > { %v1613_v55 = vpop.eup %1612  ;;  %989 = vst.msk [vmem:[#allocation2 + $0x188] sm:$0xff] %vm224_vm1, %v924_v8  ;;  %v1123_v33 = vadd.f32 %v1990_v41, %v1055_v28  ;;  %v1008_v34 = vld [vmem:[#allocation2 + $0x8] sm:$0xff]  ;;  %v325_v22 = vld [vmem:[#allocation2 + $0x120] sm:$0xff] }
  0xad   : > { %1203 = vst.msk [vmem:[%s2017_s7] sm:$0xff] %vm224_vm1, %v1613_v55  ;;  %1616 = vtanh.f32 %v1107_v27  ;;  %v1076_v36 = vadd.f32 %v1990_v41, %v1008_v34  ;;  %v1024_v37 = vld [vmem:[#allocation2 + $0x88] sm:$0xff]  ;;  %v1615_v49 = vpop.eup %1614 }
  0xae   : > { %942 = vst.msk [vmem:[#allocation2 + $0x10] sm:$0xff] %vm224_vm1, %v877_v10  ;;  %1618 = vtanh.f32 %v1123_v33  ;;  %v1092_v39 = vadd.f32 %v1990_v41, %v1024_v37 }
  0xaf   : > { %958 = vst.msk [vmem:[#allocation2 + $0x90] sm:$0xff] %vm224_vm1, %v893_v12  ;;  %1620 = vtanh.f32 %v1076_v36 }
  0xb0   : > { %v800_v2 = vpop.f32.mrf.mxu2  ;;  %v840_v3 = vpop.f32.mrf.mxu3  ;;  %1622 = vtanh.f32 %v1092_v39  ;;  %1219 = vst.msk [vmem:[%s2017_s7 + $0x80] sm:$0xff] %vm224_vm1, %v1615_v49  ;;  %v295_v39 = vld [vmem:[#allocation2 + $0x30] sm:$0xff] }
  0xb1   : > { %v722_v6 = vpop.f32.mrf.mxu0  ;;  %v762_v7 = vpop.f32.mrf.mxu1  ;;  %v909_v14 = vadd.f32 %v800_v2, %v323_v9  ;;  %v925_v16 = vadd.f32 %v840_v3, %v339_v11 }
  0xb2   : > { %v878_v19 = vadd.f32 %v722_v6, %v292_v13  ;;  %v894_v23 = vadd.f32 %v762_v7, %v308_v15  ;;  %v1040_v40 = vld [vmem:[#allocation2 + $0x108] sm:$0xff] }
  0xb3   : > { %974 = vst.msk [vmem:[#allocation2 + $0x110] sm:$0xff] %vm224_vm1, %v909_v14  ;;  %v1108_v43 = vadd.f32 %v1990_v41, %v1040_v40  ;;  %v1056_v44 = vld [vmem:[#allocation2 + $0x188] sm:$0xff]  ;;  %v1617_v54 = vpop.eup %1616 }
  0xb4   : > { %990 = vst.msk [vmem:[#allocation2 + $0x190] sm:$0xff] %vm224_vm1, %v925_v16  ;;  %v1124_v45 = vadd.f32 %v1990_v41, %v1056_v44  ;;  %v1619_v59 = vpop.eup %1618  ;;  %v311_v44 = vld [vmem:[#allocation2 + $0xb0] sm:$0xff] }
  0xb5   : > { %943 = vst.msk [vmem:[#allocation2 + $0x18] sm:$0xff] %vm224_vm1, %v878_v19  ;;  %v1009_v46 = vld [vmem:[#allocation2 + $0x10] sm:$0xff]  ;;  %1624 = vtanh.f32 %v1108_v43  ;;  %v1621_v62 = vpop.eup %1620 }
  0xb6   : > { %959 = vst.msk [vmem:[#allocation2 + $0x98] sm:$0xff] %vm224_vm1, %v894_v23  ;;  %v1077_v47 = vadd.f32 %v1990_v41, %v1009_v46  ;;  %v1025_v48 = vld [vmem:[#allocation2 + $0x90] sm:$0xff]  ;;  %1626 = vtanh.f32 %v1124_v45  ;;  %v1623_v1 = vpop.eup %1622 }
  0xb7   : > { %v1093_v50 = vadd.f32 %v1990_v41, %v1025_v48  ;;  %1235 = vst.msk [vmem:[%s2017_s7 + $0x100] sm:$0xff] %vm224_vm1, %v1617_v54  ;;  %v327_v46 = vld [vmem:[#allocation2 + $0x130] sm:$0xff]  ;;  %v328_v54 = vld [vmem:[#allocation2 + $0x138] sm:$0xff] }
  0xb8   : > { %v802_v24 = vpop.f32.mrf.mxu2  ;;  %v842_v25 = vpop.f32.mrf.mxu3  ;;  %1628 = vtanh.f32 %v1077_v47  ;;  %1251 = vst.msk [vmem:[%s2017_s7 + $0x180] sm:$0xff] %vm224_vm1, %v1619_v59  ;;  %v343_v48 = vld [vmem:[#allocation2 + $0x1b0] sm:$0xff] }
  0xb9   : > { %v910_v29 = vadd.f32 %v802_v24, %v324_v17  ;;  %v725_v30 = vpop.f32.mrf.mxu0  ;;  %v765_v32 = vpop.f32.mrf.mxu1  ;;  %v926_v35 = vadd.f32 %v842_v25, %v340_v20  ;;  %1630 = vtanh.f32 %v1093_v50  ;;  %1204 = vst.msk [vmem:[%s2017_s7 + $0x8] sm:$0xff] %vm224_vm1, %v1621_v62  ;;  %v341_v24 = vld [vmem:[#allocation2 + $0x1a0] sm:$0xff]  ;;  %v296_v50 = vld [vmem:[#allocation2 + $0x38] sm:$0xff] }
  0xba   : > { %v879_v38 = vadd.f32 %v725_v30, %v293_v26  ;;  %v895_v42 = vadd.f32 %v765_v32, %v309_v31  ;;  %v1041_v51 = vld [vmem:[#allocation2 + $0x110] sm:$0xff]  ;;  %1220 = vst.msk [vmem:[%s2017_s7 + $0x88] sm:$0xff] %vm224_vm1, %v1623_v1  ;;  %v294_v26 = vld [vmem:[#allocation2 + $0x28] sm:$0xff] }
  0xbb   : > { %975 = vst.msk [vmem:[#allocation2 + $0x118] sm:$0xff] %vm224_vm1, %v910_v29  ;;  %v1109_v55 = vadd.f32 %v1990_v41, %v1041_v51  ;;  %v1057_v56 = vld [vmem:[#allocation2 + $0x190] sm:$0xff]  ;;  %v1625_v4 = vpop.eup %1624  ;;  %v310_v29 = vld [vmem:[#allocation2 + $0xa8] sm:$0xff] }
  0xbc   : > { %991 = vst.msk [vmem:[#allocation2 + $0x198] sm:$0xff] %vm224_vm1, %v926_v35  ;;  %v1125_v60 = vadd.f32 %v1990_v41, %v1057_v56  ;;  %v1010_v61 = vld [vmem:[#allocation2 + $0x18] sm:$0xff]  ;;  %v1627_v7 = vpop.eup %1626  ;;  %v326_v32 = vld [vmem:[#allocation2 + $0x128] sm:$0xff] }
  0xbd   : > { %944 = vst.msk [vmem:[#allocation2 + $0x20] sm:$0xff] %vm224_vm1, %v879_v38  ;;  %1632 = vtanh.f32 %v1109_v55  ;;  %v1078_v63 = vadd.f32 %v1990_v41, %v1010_v61  ;;  %v1026_v0 = vld [vmem:[#allocation2 + $0x98] sm:$0xff]  ;;  %v342_v35 = vld [vmem:[#allocation2 + $0x1a8] sm:$0xff]  ;;  %v297_v61 = vld [vmem:[#allocation2 + $0x40] sm:$0xff] }
  0xbe   : > { %960 = vst.msk [vmem:[#allocation2 + $0xa0] sm:$0xff] %vm224_vm1, %v895_v42  ;;  %1634 = vtanh.f32 %v1125_v60  ;;  %v1094_v2 = vadd.f32 %v1990_v41, %v1026_v0  ;;  %v1629_v10 = vpop.eup %1628 }
  0xbf   : > { %1636 = vtanh.f32 %v1078_v63  ;;  %1236 = vst.msk [vmem:[%s2017_s7 + $0x108] sm:$0xff] %vm224_vm1, %v1625_v4  ;;  %v1631_v13 = vpop.eup %1630 }
  0xc0   : > { %v2057_v52 = vpop.f32.mrf.mxu2  ;;  %v2059_v53 = vpop.f32.mrf.mxu3  ;;  %1638 = vtanh.f32 %v1094_v2  ;;  %1252 = vst.msk [vmem:[%s2017_s7 + $0x188] sm:$0xff] %vm224_vm1, %v1627_v7 }
  0xc1   : > { %v2064_v57 = vpop.f32.mrf.mxu0  ;;  %v2066_v58 = vpop.f32.mrf.mxu1  ;;  %1205 = vst.msk [vmem:[%s2017_s7 + $0x10] sm:$0xff] %vm224_vm1, %v1629_v10  ;;  %v911_v28 = vadd.f32 %v2057_v52, %v325_v22  ;;  %v927_v31 = vadd.f32 %v2059_v53, %v341_v24  ;;  %v312_v52 = vld [vmem:[#allocation2 + $0xb8] sm:$0xff] }
  0xc2   : > { %v1042_v3 = vld [vmem:[#allocation2 + $0x118] sm:$0xff]  ;;  %1221 = vst.msk [vmem:[%s2017_s7 + $0x90] sm:$0xff] %vm224_vm1, %v1631_v13  ;;  %v880_v34 = vadd.f32 %v2064_v57, %v294_v26  ;;  %v896_v38 = vadd.f32 %v2066_v58, %v310_v29 }
  0xc3   : > { %v1110_v5 = vadd.f32 %v1990_v41, %v1042_v3  ;;  %v1058_v6 = vld [vmem:[#allocation2 + $0x198] sm:$0xff]  ;;  %v1633_v17 = vpop.eup %1632  ;;  %976 = vst.msk [vmem:[#allocation2 + $0x120] sm:$0xff] %vm224_vm1, %v911_v28  ;;  %v313_v3 = vld [vmem:[#allocation2 + $0xc0] sm:$0xff] }
  0xc4   : > { %v1126_v8 = vadd.f32 %v1990_v41, %v1058_v6  ;;  %v1011_v9 = vld [vmem:[#allocation2 + $0x20] sm:$0xff]  ;;  %v1635_v20 = vpop.eup %1634  ;;  %1237 = vst.msk [vmem:[%s2017_s7 + $0x110] sm:$0xff] %vm224_vm1, %v1633_v17  ;;  %v344_v57 = vld [vmem:[#allocation2 + $0x1b8] sm:$0xff] }
  0xc5   : > { %1640 = vtanh.f32 %v1110_v5  ;;  %v1079_v11 = vadd.f32 %v1990_v41, %v1011_v9  ;;  %v1027_v12 = vld [vmem:[#allocation2 + $0xa0] sm:$0xff]  ;;  %v1637_v21 = vpop.eup %1636  ;;  %1253 = vst.msk [vmem:[%s2017_s7 + $0x190] sm:$0xff] %vm224_vm1, %v1635_v20 }
  0xc6   : > { %1642 = vtanh.f32 %v1126_v8  ;;  %v1095_v14 = vadd.f32 %v1990_v41, %v1027_v12  ;;  %v1639_v23 = vpop.eup %1638  ;;  %1206 = vst.msk [vmem:[%s2017_s7 + $0x18] sm:$0xff] %vm224_vm1, %v1637_v21 }
  0xc7   : > { %1644 = vtanh.f32 %v1079_v11  ;;  %1222 = vst.msk [vmem:[%s2017_s7 + $0x98] sm:$0xff] %vm224_vm1, %v1639_v23 }
  0xc8   : > { %v807_v15 = vpop.f32.mrf.mxu2  ;;  %v847_v16 = vpop.f32.mrf.mxu3  ;;  %1646 = vtanh.f32 %v1095_v14  ;;  %992 = vst.msk [vmem:[#allocation2 + $0x1a0] sm:$0xff] %vm224_vm1, %v927_v31 }
  0xc9   : > { %v730_v18 = vpop.f32.mrf.mxu0  ;;  %v770_v19 = vpop.f32.mrf.mxu1  ;;  %v912_v43 = vadd.f32 %v807_v15, %v326_v32  ;;  %v928_v45 = vadd.f32 %v847_v16, %v342_v35  ;;  %945 = vst.msk [vmem:[#allocation2 + $0x28] sm:$0xff] %vm224_vm1, %v880_v34 }
  0xca   : > { %v881_v47 = vadd.f32 %v730_v18, %v295_v39  ;;  %961 = vst.msk [vmem:[#allocation2 + $0xa8] sm:$0xff] %vm224_vm1, %v896_v38  ;;  %v897_v49 = vadd.f32 %v770_v19, %v311_v44  ;;  %v1043_v59 = vld [vmem:[#allocation2 + $0x120] sm:$0xff] }
  0xcb   : > { %v1641_v25 = vpop.eup %1640  ;;  %977 = vst.msk [vmem:[#allocation2 + $0x128] sm:$0xff] %vm224_vm1, %v912_v43  ;;  %v1111_v0 = vadd.f32 %v1990_v41, %v1043_v59 }
  0xcc   : > { %v1643_v27 = vpop.eup %1642  ;;  %1238 = vst.msk [vmem:[%s2017_s7 + $0x118] sm:$0xff] %vm224_vm1, %v1641_v25 }
  0xcd   : > { %v1645_v30 = vpop.eup %1644  ;;  %1254 = vst.msk [vmem:[%s2017_s7 + $0x198] sm:$0xff] %vm224_vm1, %v1643_v27  ;;  %1648 = vtanh.f32 %v1111_v0 }
  0xce   : > { %v1647_v33 = vpop.eup %1646  ;;  %1207 = vst.msk [vmem:[%s2017_s7 + $0x20] sm:$0xff] %vm224_vm1, %v1645_v30 }
  0xcf   : > { %1223 = vst.msk [vmem:[%s2017_s7 + $0xa0] sm:$0xff] %vm224_vm1, %v1647_v33  ;;  %v1059_v1 = vld [vmem:[#allocation2 + $0x1a0] sm:$0xff] }
  0xd0   : > { %v810_v36 = vpop.f32.mrf.mxu2  ;;  %v850_v37 = vpop.f32.mrf.mxu3  ;;  %993 = vst.msk [vmem:[#allocation2 + $0x1a8] sm:$0xff] %vm224_vm1, %v928_v45  ;;  %v1127_v4 = vadd.f32 %v1990_v41, %v1059_v1  ;;  %v1012_v5 = vld [vmem:[#allocation2 + $0x28] sm:$0xff] }
  0xd1   : > { %v732_v40 = vpop.f32.mrf.mxu0  ;;  %v772_v42 = vpop.f32.mrf.mxu1  ;;  %v913_v51 = vadd.f32 %v810_v36, %v327_v46  ;;  %v929_v53 = vadd.f32 %v850_v37, %v343_v48  ;;  %946 = vst.msk [vmem:[#allocation2 + $0x30] sm:$0xff] %vm224_vm1, %v881_v47  ;;  %v1080_v7 = vadd.f32 %v1990_v41, %v1012_v5  ;;  %v1028_v8 = vld [vmem:[#allocation2 + $0xa8] sm:$0xff] }
  0xd2   : > { %v882_v55 = vadd.f32 %v732_v40, %v296_v50  ;;  %962 = vst.msk [vmem:[#allocation2 + $0xb0] sm:$0xff] %vm224_vm1, %v897_v49  ;;  %v898_v60 = vadd.f32 %v772_v42, %v312_v52  ;;  %1650 = vtanh.f32 %v1127_v4  ;;  %v1096_v10 = vadd.f32 %v1990_v41, %v1028_v8  ;;  %v1044_v11 = vld [vmem:[#allocation2 + $0x128] sm:$0xff] }
  0xd3   : > { %978 = vst.msk [vmem:[#allocation2 + $0x130] sm:$0xff] %vm224_vm1, %v913_v51  ;;  %1652 = vtanh.f32 %v1080_v7  ;;  %v1112_v13 = vadd.f32 %v1990_v41, %v1044_v11  ;;  %v1649_v25 = vpop.eup %1648  ;;  %v346_v7 = vld [vmem:[#allocation2 + $0x1c8] sm:$0xff]  ;;  %v299_v11 = vld [vmem:[#allocation2 + $0x50] sm:$0xff] }
  0xd4   : > { %994 = vst.msk [vmem:[#allocation2 + $0x1b0] sm:$0xff] %vm224_vm1, %v929_v53  ;;  %1654 = vtanh.f32 %v1096_v10 }
  0xd5   : > { %947 = vst.msk [vmem:[#allocation2 + $0x38] sm:$0xff] %vm224_vm1, %v882_v55  ;;  %1656 = vtanh.f32 %v1112_v13  ;;  %v315_v13 = vld [vmem:[#allocation2 + $0xd0] sm:$0xff] }
  0xd6   : > { %963 = vst.msk [vmem:[#allocation2 + $0xb8] sm:$0xff] %vm224_vm1, %v898_v60  ;;  %v298_v60 = vld [vmem:[#allocation2 + $0x48] sm:$0xff] }
  0xd7   : > { %v1060_v14 = vld [vmem:[#allocation2 + $0x1a8] sm:$0xff]  ;;  %1239 = vst.msk [vmem:[%s2017_s7 + $0x120] sm:$0xff] %vm224_vm1, %v1649_v25 }
  0xd8   : > { %v812_v56 = vpop.f32.mrf.mxu2  ;;  %v852_v58 = vpop.f32.mrf.mxu3  ;;  %v1128_v15 = vadd.f32 %v1990_v41, %v1060_v14  ;;  %v1013_v16 = vld [vmem:[#allocation2 + $0x30] sm:$0xff] }
  0xd9   : > { %v735_v62 = vpop.f32.mrf.mxu0  ;;  %v775_v63 = vpop.f32.mrf.mxu1  ;;  %v914_v2 = vadd.f32 %v812_v56, %v328_v54  ;;  %v930_v6 = vadd.f32 %v852_v58, %v344_v57  ;;  %v1081_v17 = vadd.f32 %v1990_v41, %v1013_v16  ;;  %v1029_v18 = vld [vmem:[#allocation2 + $0xb0] sm:$0xff]  ;;  %v329_v56 = vld [vmem:[#allocation2 + $0x140] sm:$0xff] }
  0xda   : > { %v883_v9 = vadd.f32 %v735_v62, %v297_v61  ;;  %v899_v12 = vadd.f32 %v775_v63, %v313_v3  ;;  %1658 = vtanh.f32 %v1128_v15  ;;  %v1097_v21 = vadd.f32 %v1990_v41, %v1029_v18  ;;  %v1045_v22 = vld [vmem:[#allocation2 + $0x130] sm:$0xff]  ;;  %v1651_v28 = vpop.eup %1650  ;;  %v345_v58 = vld [vmem:[#allocation2 + $0x1c0] sm:$0xff]  ;;  %v314_v63 = vld [vmem:[#allocation2 + $0xc8] sm:$0xff] }
  0xdb   : > { %979 = vst.msk [vmem:[#allocation2 + $0x138] sm:$0xff] %vm224_vm1, %v914_v2  ;;  %1660 = vtanh.f32 %v1081_v17  ;;  %v1113_v26 = vadd.f32 %v1990_v41, %v1045_v22  ;;  %v1061_v27 = vld [vmem:[#allocation2 + $0x1b0] sm:$0xff]  ;;  %v1653_v31 = vpop.eup %1652  ;;  %v330_v2 = vld [vmem:[#allocation2 + $0x148] sm:$0xff] }
  0xdc   : > { %995 = vst.msk [vmem:[#allocation2 + $0x1b8] sm:$0xff] %vm224_vm1, %v930_v6  ;;  %1662 = vtanh.f32 %v1097_v21  ;;  %v1129_v29 = vadd.f32 %v1990_v41, %v1061_v27  ;;  %v1014_v30 = vld [vmem:[#allocation2 + $0x38] sm:$0xff]  ;;  %v1655_v34 = vpop.eup %1654  ;;  %v331_v15 = vld [vmem:[#allocation2 + $0x150] sm:$0xff] }
  0xdd   : > { %948 = vst.msk [vmem:[#allocation2 + $0x40] sm:$0xff] %vm224_vm1, %v883_v9  ;;  %1664 = vtanh.f32 %v1113_v26  ;;  %v1082_v32 = vadd.f32 %v1990_v41, %v1014_v30  ;;  %v1030_v33 = vld [vmem:[#allocation2 + $0xb8] sm:$0xff]  ;;  %v1657_v37 = vpop.eup %1656  ;;  %v347_v17 = vld [vmem:[#allocation2 + $0x1d0] sm:$0xff] }
  0xde   : > { %964 = vst.msk [vmem:[#allocation2 + $0xc0] sm:$0xff] %vm224_vm1, %v899_v12  ;;  %1666 = vtanh.f32 %v1129_v29  ;;  %v1098_v35 = vadd.f32 %v1990_v41, %v1030_v33  ;;  %v316_v21 = vld [vmem:[#allocation2 + $0xd8] sm:$0xff] }
  0xdf   : > { %1255 = vst.msk [vmem:[%s2017_s7 + $0x1a0] sm:$0xff] %vm224_vm1, %v1651_v28  ;;  %1668 = vtanh.f32 %v1082_v32  ;;  %v348_v27 = vld [vmem:[#allocation2 + $0x1d8] sm:$0xff] }
  0xe0   : > { %v2133_v19 = vpop.f32.mrf.mxu2  ;;  %v2135_v20 = vpop.f32.mrf.mxu3  ;;  %1208 = vst.msk [vmem:[%s2017_s7 + $0x28] sm:$0xff] %vm224_vm1, %v1653_v31  ;;  %1670 = vtanh.f32 %v1098_v35  ;;  %v301_v31 = vld [vmem:[#allocation2 + $0x60] sm:$0xff] }
  0xe1   : > { %v2139_v23 = vpop.f32.mrf.mxu0  ;;  %v2141_v24 = vpop.f32.mrf.mxu1  ;;  %1224 = vst.msk [vmem:[%s2017_s7 + $0xa8] sm:$0xff] %vm224_vm1, %v1655_v34  ;;  %v915_v62 = vadd.f32 %v2133_v19, %v329_v56  ;;  %v931_v1 = vadd.f32 %v2135_v20, %v345_v58  ;;  %v300_v19 = vld [vmem:[#allocation2 + $0x58] sm:$0xff] }
  0xe2   : > { %v1046_v36 = vld [vmem:[#allocation2 + $0x138] sm:$0xff]  ;;  %v1659_v40 = vpop.eup %1658  ;;  %1240 = vst.msk [vmem:[%s2017_s7 + $0x128] sm:$0xff] %vm224_vm1, %v1657_v37  ;;  %v884_v6 = vadd.f32 %v2139_v23, %v298_v60  ;;  %v900_v10 = vadd.f32 %v2141_v24, %v314_v63 }
  0xe3   : > { %v1114_v38 = vadd.f32 %v1990_v41, %v1046_v36  ;;  %v1062_v39 = vld [vmem:[#allocation2 + $0x1b8] sm:$0xff]  ;;  %v1661_v44 = vpop.eup %1660  ;;  %1256 = vst.msk [vmem:[%s2017_s7 + $0x1a8] sm:$0xff] %vm224_vm1, %v1659_v40  ;;  %v317_v36 = vld [vmem:[#allocation2 + $0xe0] sm:$0xff] }
  0xe4   : > { %v1130_v42 = vadd.f32 %v1990_v41, %v1062_v39  ;;  %v1015_v43 = vld [vmem:[#allocation2 + $0x40] sm:$0xff]  ;;  %v1663_v49 = vpop.eup %1662  ;;  %1209 = vst.msk [vmem:[%s2017_s7 + $0x30] sm:$0xff] %vm224_vm1, %v1661_v44  ;;  %v332_v23 = vld [vmem:[#allocation2 + $0x158] sm:$0xff] }
  0xe5   : > { %1672 = vtanh.f32 %v1114_v38  ;;  %v1083_v45 = vadd.f32 %v1990_v41, %v1015_v43  ;;  %v1031_v46 = vld [vmem:[#allocation2 + $0xc0] sm:$0xff]  ;;  %v1665_v53 = vpop.eup %1664  ;;  %1225 = vst.msk [vmem:[%s2017_s7 + $0xb0] sm:$0xff] %vm224_vm1, %v1663_v49 }
  0xe6   : > { %1674 = vtanh.f32 %v1130_v42  ;;  %v1099_v50 = vadd.f32 %v1990_v41, %v1031_v46  ;;  %v1667_v54 = vpop.eup %1666  ;;  %1241 = vst.msk [vmem:[%s2017_s7 + $0x130] sm:$0xff] %vm224_vm1, %v1665_v53 }
  0xe7   : > { %1676 = vtanh.f32 %v1083_v45  ;;  %v1669_v55 = vpop.eup %1668  ;;  %1257 = vst.msk [vmem:[%s2017_s7 + $0x1b0] sm:$0xff] %vm224_vm1, %v1667_v54 }
  0xe8   : > { %v817_v47 = vpop.f32.mrf.mxu2  ;;  %v857_v48 = vpop.f32.mrf.mxu3  ;;  %1678 = vtanh.f32 %v1099_v50  ;;  %1210 = vst.msk [vmem:[%s2017_s7 + $0x38] sm:$0xff] %vm224_vm1, %v1669_v55 }
  0xe9   : > { %v740_v51 = vpop.f32.mrf.mxu0  ;;  %v780_v52 = vpop.f32.mrf.mxu1  ;;  %980 = vst.msk [vmem:[#allocation2 + $0x140] sm:$0xff] %vm224_vm1, %v915_v62  ;;  %v916_v12 = vadd.f32 %v817_v47, %v330_v2  ;;  %v932_v14 = vadd.f32 %v857_v48, %v346_v7  ;;  %v333_v47 = vld [vmem:[#allocation2 + $0x160] sm:$0xff] }
  0xea   : > { %v1671_v57 = vpop.eup %1670  ;;  %996 = vst.msk [vmem:[#allocation2 + $0x1c0] sm:$0xff] %vm224_vm1, %v931_v1  ;;  %v885_v16 = vadd.f32 %v740_v51, %v299_v11  ;;  %v901_v18 = vadd.f32 %v780_v52, %v315_v13 }
  0xeb   : > { %v1673_v59 = vpop.eup %1672  ;;  %1226 = vst.msk [vmem:[%s2017_s7 + $0xb8] sm:$0xff] %vm224_vm1, %v1671_v57 }
  0xec   : > { %v1675_v61 = vpop.eup %1674  ;;  %1242 = vst.msk [vmem:[%s2017_s7 + $0x138] sm:$0xff] %vm224_vm1, %v1673_v59 }
  0xed   : > { %v1677_v0 = vpop.eup %1676  ;;  %1258 = vst.msk [vmem:[%s2017_s7 + $0x1b8] sm:$0xff] %vm224_vm1, %v1675_v61 }
  0xee   : > { %v1679_v5 = vpop.eup %1678  ;;  %1211 = vst.msk [vmem:[%s2017_s7 + $0x40] sm:$0xff] %vm224_vm1, %v1677_v0 }
  0xef   : > { %1227 = vst.msk [vmem:[%s2017_s7 + $0xc0] sm:$0xff] %vm224_vm1, %v1679_v5 }
  0xf0   : > { %v820_v3 = vpop.f32.mrf.mxu2  ;;  %v860_v4 = vpop.f32.mrf.mxu3  ;;  %949 = vst.msk [vmem:[#allocation2 + $0x48] sm:$0xff] %vm224_vm1, %v884_v6  ;;  %v1047_v29 = vld [vmem:[#allocation2 + $0x140] sm:$0xff] }
  0xf1   : > { %v742_v8 = vpop.f32.mrf.mxu0  ;;  %v782_v9 = vpop.f32.mrf.mxu1  ;;  %965 = vst.msk [vmem:[#allocation2 + $0xc8] sm:$0xff] %vm224_vm1, %v900_v10  ;;  %v917_v20 = vadd.f32 %v820_v3, %v331_v15  ;;  %v933_v22 = vadd.f32 %v860_v4, %v347_v17  ;;  %v1115_v33 = vadd.f32 %v1990_v41, %v1047_v29  ;;  %v1063_v34 = vld [vmem:[#allocation2 + $0x1c0] sm:$0xff] }
  0xf2   : > { %981 = vst.msk [vmem:[#allocation2 + $0x148] sm:$0xff] %vm224_vm1, %v916_v12  ;;  %v886_v26 = vadd.f32 %v742_v8, %v300_v19  ;;  %v902_v30 = vadd.f32 %v782_v9, %v316_v21  ;;  %v1131_v37 = vadd.f32 %v1990_v41, %v1063_v34  ;;  %v349_v29 = vld [vmem:[#allocation2 + $0x1e0] sm:$0xff] }
  0xf3   : > { %997 = vst.msk [vmem:[#allocation2 + $0x1c8] sm:$0xff] %vm224_vm1, %v932_v14  ;;  %1680 = vtanh.f32 %v1115_v33  ;;  %v318_v33 = vld [vmem:[#allocation2 + $0xe8] sm:$0xff] }
  0xf4   : > { %950 = vst.msk [vmem:[#allocation2 + $0x50] sm:$0xff] %vm224_vm1, %v885_v16  ;;  %1682 = vtanh.f32 %v1131_v37 }
  0xf5   : > { %966 = vst.msk [vmem:[#allocation2 + $0xd0] sm:$0xff] %vm224_vm1, %v901_v18 }
  0xf6   : > { %982 = vst.msk [vmem:[#allocation2 + $0x150] sm:$0xff] %vm224_vm1, %v917_v20 }
  0xf7   : > { %v1016_v38 = vld [vmem:[#allocation2 + $0x48] sm:$0xff]  ;;  %998 = vst.msk [vmem:[#allocation2 + $0x1d0] sm:$0xff] %vm224_vm1, %v933_v22 }
  0xf8   : > { %v822_v24 = vpop.f32.mrf.mxu2  ;;  %v862_v25 = vpop.f32.mrf.mxu3  ;;  %v1084_v40 = vadd.f32 %v1990_v41, %v1016_v38  ;;  %v1032_v42 = vld [vmem:[#allocation2 + $0xc8] sm:$0xff]  ;;  %951 = vst.msk [vmem:[#allocation2 + $0x58] sm:$0xff] %vm224_vm1, %v886_v26 }
  0xf9   : > { %v745_v28 = vpop.f32.mrf.mxu0  ;;  %v785_v32 = vpop.f32.mrf.mxu1  ;;  %v918_v35 = vadd.f32 %v822_v24, %v332_v23  ;;  %v934_v39 = vadd.f32 %v862_v25, %v348_v27  ;;  %v1100_v44 = vadd.f32 %v1990_v41, %v1032_v42  ;;  %v1048_v45 = vld [vmem:[#allocation2 + $0x148] sm:$0xff]  ;;  %967 = vst.msk [vmem:[#allocation2 + $0xd8] sm:$0xff] %vm224_vm1, %v902_v30 }
  0xfa   : > { %v887_v43 = vadd.f32 %v745_v28, %v301_v31  ;;  %v903_v46 = vadd.f32 %v785_v32, %v317_v36  ;;  %1684 = vtanh.f32 %v1084_v40  ;;  %v1116_v48 = vadd.f32 %v1990_v41, %v1048_v45  ;;  %v1064_v49 = vld [vmem:[#allocation2 + $0x1c8] sm:$0xff]  ;;  %v1681_v59 = vpop.eup %1680  ;;  %v303_v45 = vld [vmem:[#allocation2 + $0x70] sm:$0xff] }
  0xfb   : > { %983 = vst.msk [vmem:[#allocation2 + $0x158] sm:$0xff] %vm224_vm1, %v918_v35  ;;  %1686 = vtanh.f32 %v1100_v44  ;;  %v1132_v50 = vadd.f32 %v1990_v41, %v1064_v49  ;;  %v1017_v51 = vld [vmem:[#allocation2 + $0x50] sm:$0xff]  ;;  %v1683_v63 = vpop.eup %1682  ;;  %v334_v38 = vld [vmem:[#allocation2 + $0x168] sm:$0xff] }
  0xfc   : > { %999 = vst.msk [vmem:[#allocation2 + $0x1d8] sm:$0xff] %vm224_vm1, %v934_v39  ;;  %1688 = vtanh.f32 %v1116_v48  ;;  %v1085_v54 = vadd.f32 %v1990_v41, %v1017_v51  ;;  %v1033_v55 = vld [vmem:[#allocation2 + $0xd0] sm:$0xff]  ;;  %v350_v42 = vld [vmem:[#allocation2 + $0x1e8] sm:$0xff] }
  0xfd   : > { %952 = vst.msk [vmem:[#allocation2 + $0x60] sm:$0xff] %vm224_vm1, %v887_v43  ;;  %1690 = vtanh.f32 %v1132_v50  ;;  %v1101_v57 = vadd.f32 %v1990_v41, %v1033_v55  ;;  %v1049_v58 = vld [vmem:[#allocation2 + $0x150] sm:$0xff] }
  0xfe   : > { %968 = vst.msk [vmem:[#allocation2 + $0xe0] sm:$0xff] %vm224_vm1, %v903_v46  ;;  %1692 = vtanh.f32 %v1085_v54  ;;  %v1117_v60 = vadd.f32 %v1990_v41, %v1049_v58  ;;  %v1065_v61 = vld [vmem:[#allocation2 + $0x1d0] sm:$0xff] }
  0xff   : > { %1243 = vst.msk [vmem:[%s2017_s7 + $0x140] sm:$0xff] %vm224_vm1, %v1681_v59  ;;  %1694 = vtanh.f32 %v1101_v57  ;;  %v1133_v0 = vadd.f32 %v1990_v41, %v1065_v61  ;;  %v1018_v1 = vld [vmem:[#allocation2 + $0x58] sm:$0xff]  ;;  %v335_v49 = vld [vmem:[#allocation2 + $0x170] sm:$0xff] }
 0x100   : > { %v825_v52 = vpop.f32.mrf.mxu2  ;;  %v2207_v53 = vpop.f32.mrf.mxu3  ;;  %1259 = vst.msk [vmem:[%s2017_s7 + $0x1c0] sm:$0xff] %vm224_vm1, %v1683_v63  ;;  %1696 = vtanh.f32 %v1117_v60  ;;  %v1086_v4 = vadd.f32 %v1990_v41, %v1018_v1  ;;  %v1034_v5 = vld [vmem:[#allocation2 + $0xd8] sm:$0xff]  ;;  %v351_v51 = vld [vmem:[#allocation2 + $0x1f0] sm:$0xff] }
 0x101   : > { %v919_v56 = vadd.f32 %v825_v52, %v333_v47  ;;  %v2215_v62 = vpop.f32.mrf.mxu0  ;;  %v2220_v2 = vpop.f32.mrf.mxu1  ;;  %1698 = vtanh.f32 %v1133_v0  ;;  %v1102_v7 = vadd.f32 %v1990_v41, %v1034_v5  ;;  %v935_v37 = vadd.f32 %v2207_v53, %v349_v29  ;;  %v319_v47 = vld [vmem:[#allocation2 + $0xf0] sm:$0xff]  ;;  %v304_v53 = vld [vmem:[#allocation2 + $0x78] sm:$0xff] }
 0x102   : > { %v1685_v3 = vpop.eup %1684  ;;  %v1050_v8 = vld [vmem:[#allocation2 + $0x158] sm:$0xff]  ;;  %1700 = vtanh.f32 %v1086_v4  ;;  %v904_v44 = vadd.f32 %v2220_v2, %v318_v33 }
 0x103   : > { %984 = vst.msk [vmem:[#allocation2 + $0x160] sm:$0xff] %vm224_vm1, %v919_v56  ;;  %v1687_v6 = vpop.eup %1686  ;;  %v1118_v10 = vadd.f32 %v1990_v41, %v1050_v8  ;;  %v1066_v11 = vld [vmem:[#allocation2 + $0x1d8] sm:$0xff]  ;;  %1702 = vtanh.f32 %v1102_v7 }
 0x104   : > { %1212 = vst.msk [vmem:[%s2017_s7 + $0x48] sm:$0xff] %vm224_vm1, %v1685_v3  ;;  %v1689_v9 = vpop.eup %1688  ;;  %v1134_v13 = vadd.f32 %v1990_v41, %v1066_v11  ;;  %v1019_v14 = vld [vmem:[#allocation2 + $0x60] sm:$0xff]  ;;  %v320_v56 = vld [vmem:[#allocation2 + $0xf8] sm:$0xff] }
 0x105   : > { %1228 = vst.msk [vmem:[%s2017_s7 + $0xc8] sm:$0xff] %vm224_vm1, %v1687_v6  ;;  %v1691_v12 = vpop.eup %1690  ;;  %1704 = vtanh.f32 %v1118_v10  ;;  %v1087_v18 = vadd.f32 %v1990_v41, %v1019_v14  ;;  %v1035_v19 = vld [vmem:[#allocation2 + $0xe0] sm:$0xff]  ;;  %v336_v59 = vld [vmem:[#allocation2 + $0x178] sm:$0xff] }
 0x106   : > { %1244 = vst.msk [vmem:[%s2017_s7 + $0x148] sm:$0xff] %vm224_vm1, %v1689_v9  ;;  %v1693_v17 = vpop.eup %1692  ;;  %1706 = vtanh.f32 %v1134_v13  ;;  %v1103_v21 = vadd.f32 %v1990_v41, %v1035_v19  ;;  %v1740_v3 = vld [vmem:[%s2317_s2] ss:$0 sm:$0xff] }
 0x107   : > { %1260 = vst.msk [vmem:[%s2017_s7 + $0x1c8] sm:$0xff] %vm224_vm1, %v1691_v12  ;;  %v1695_v20 = vpop.eup %1694  ;;  %1708 = vtanh.f32 %v1087_v18 }
 0x108   : > { %v827_v15 = vpop.f32.mrf.mxu2  ;;  %v867_v16 = vpop.f32.mrf.mxu3  ;;  %1213 = vst.msk [vmem:[%s2017_s7 + $0x50] sm:$0xff] %vm224_vm1, %v1693_v17  ;;  %1710 = vtanh.f32 %v1103_v21 }
 0x109   : > { %v1697_v23 = vpop.eup %1696  ;;  %1229 = vst.msk [vmem:[%s2017_s7 + $0xd0] sm:$0xff] %vm224_vm1, %v1695_v20  ;;  %v750_v27 = vpop.f32.mrf.mxu0  ;;  %v920_v46 = vadd.f32 %v827_v15, %v334_v38  ;;  %v936_v48 = vadd.f32 %v867_v16, %v350_v42 }
 0x10a   : > { %v1051_v22 = vld [vmem:[#allocation2 + $0x160] sm:$0xff]  ;;  %v1699_v25 = vpop.eup %1698  ;;  %1245 = vst.msk [vmem:[%s2017_s7 + $0x150] sm:$0xff] %vm224_vm1, %v1697_v23  ;;  %v790_v30 = vpop.f32.mrf.mxu1  ;;  %v889_v50 = vadd.f32 %v750_v27, %v303_v45 }
 0x10b   : > { %v1119_v24 = vadd.f32 %v1990_v41, %v1051_v22  ;;  %v1701_v26 = vpop.eup %1700  ;;  %1261 = vst.msk [vmem:[%s2017_s7 + $0x1d0] sm:$0xff] %vm224_vm1, %v1699_v25  ;;  %v302_v41 = vld [vmem:[#allocation2 + $0x68] sm:$0xff]  ;;  %v905_v52 = vadd.f32 %v790_v30, %v319_v47 }
 0x10c   : > { %v1703_v28 = vpop.eup %1702  ;;  %1214 = vst.msk [vmem:[%s2017_s7 + $0x58] sm:$0xff] %vm224_vm1, %v1701_v26  ;;  %v888_v40 = vadd.f32 %v2215_v62, %v302_v41  ;;  %v352_v62 = vld [vmem:[#allocation2 + $0x1f8] sm:$0xff] }
 0x10d   : > { %1712 = vtanh.f32 %v1119_v24  ;;  %v1705_v31 = vpop.eup %1704  ;;  %1230 = vst.msk [vmem:[%s2017_s7 + $0xd8] sm:$0xff] %vm224_vm1, %v1703_v28 }
 0x10e   : > { %v1707_v32 = vpop.eup %1706  ;;  %1246 = vst.msk [vmem:[%s2017_s7 + $0x158] sm:$0xff] %vm224_vm1, %v1705_v31 }
 0x10f   : > { %v1709_v36 = vpop.eup %1708  ;;  %1262 = vst.msk [vmem:[%s2017_s7 + $0x1d8] sm:$0xff] %vm224_vm1, %v1707_v32 }
 0x110   : > { %v830_v34 = vpop.f32.mrf.mxu2  ;;  %v870_v35 = vpop.f32.mrf.mxu3  ;;  %1215 = vst.msk [vmem:[%s2017_s7 + $0x60] sm:$0xff] %vm224_vm1, %v1709_v36 }
 0x111   : > { %v1711_v39 = vpop.eup %1710  ;;  %1000 = vst.msk [vmem:[#allocation2 + $0x1e0] sm:$0xff] %vm224_vm1, %v935_v37  ;;  %v752_v54 = vpop.f32.mrf.mxu0  ;;  %v921_v55 = vadd.f32 %v830_v34, %v335_v49  ;;  %v937_v58 = vadd.f32 %v870_v35, %v351_v51 }
 0x112   : > { %1231 = vst.msk [vmem:[%s2017_s7 + $0xe0] sm:$0xff] %vm224_vm1, %v1711_v39  ;;  %v792_v57 = vpop.f32.mrf.mxu1  ;;  %v890_v61 = vadd.f32 %v752_v54, %v304_v53 }
 0x113   : > { %v1713_v43 = vpop.eup %1712  ;;  %953 = vst.msk [vmem:[#allocation2 + $0x68] sm:$0xff] %vm224_vm1, %v888_v40  ;;  %v906_v0 = vadd.f32 %v792_v57, %v320_v56 }
 0x114   : > { %1247 = vst.msk [vmem:[%s2017_s7 + $0x160] sm:$0xff] %vm224_vm1, %v1713_v43 }
 0x115   : > { %969 = vst.msk [vmem:[#allocation2 + $0xe8] sm:$0xff] %vm224_vm1, %v904_v44 }
 0x116   : > { %985 = vst.msk [vmem:[#allocation2 + $0x168] sm:$0xff] %vm224_vm1, %v920_v46 }
 0x117   : > { %1001 = vst.msk [vmem:[#allocation2 + $0x1e8] sm:$0xff] %vm224_vm1, %v936_v48 }
 0x118   : > { %v832_v60 = vpop.f32.mrf.mxu2  ;;  %954 = vst.msk [vmem:[#allocation2 + $0x70] sm:$0xff] %vm224_vm1, %v889_v50  ;;  %v872_v63 = vpop.f32.mrf.mxu3  ;;  %v1067_v1 = vld [vmem:[#allocation2 + $0x1e0] sm:$0xff] }
 0x119   : > { %970 = vst.msk [vmem:[#allocation2 + $0xf0] sm:$0xff] %vm224_vm1, %v905_v52  ;;  %v922_v2 = vadd.f32 %v832_v60, %v336_v59  ;;  %v1135_v4 = vadd.f32 %v1740_v3, %v1067_v1  ;;  %v938_v6 = vadd.f32 %v872_v63, %v352_v62 }
 0x11a   : > { %986 = vst.msk [vmem:[#allocation2 + $0x170] sm:$0xff] %vm224_vm1, %v921_v55  ;;  %v1020_v5 = vld [vmem:[#allocation2 + $0x68] sm:$0xff] }
 0x11b   : > { %1002 = vst.msk [vmem:[#allocation2 + $0x1f0] sm:$0xff] %vm224_vm1, %v937_v58  ;;  %v1088_v7 = vadd.f32 %v1740_v3, %v1020_v5  ;;  %1714 = vtanh.f32 %v1135_v4 }
 0x11c   : > { %v1036_v8 = vld [vmem:[#allocation2 + $0xe8] sm:$0xff]  ;;  %955 = vst.msk [vmem:[#allocation2 + $0x78] sm:$0xff] %vm224_vm1, %v890_v61 }
 0x11d   : > { %v1104_v9 = vadd.f32 %v1740_v3, %v1036_v8  ;;  %v1052_v10 = vld [vmem:[#allocation2 + $0x168] sm:$0xff]  ;;  %971 = vst.msk [vmem:[#allocation2 + $0xf8] sm:$0xff] %vm224_vm1, %v906_v0  ;;  %1716 = vtanh.f32 %v1088_v7 }
 0x11e   : > { %v1120_v11 = vadd.f32 %v1740_v3, %v1052_v10  ;;  %v1068_v12 = vld [vmem:[#allocation2 + $0x1e8] sm:$0xff]  ;;  %987 = vst.msk [vmem:[#allocation2 + $0x178] sm:$0xff] %vm224_vm1, %v922_v2 }
 0x11f   : > { %1718 = vtanh.f32 %v1104_v9  ;;  %v1136_v13 = vadd.f32 %v1740_v3, %v1068_v12  ;;  %v1021_v14 = vld [vmem:[#allocation2 + $0x70] sm:$0xff]  ;;  %1003 = vst.msk [vmem:[#allocation2 + $0x1f8] sm:$0xff] %vm224_vm1, %v938_v6 }
 0x120   : > { %1720 = vtanh.f32 %v1120_v11  ;;  %v1089_v15 = vadd.f32 %v1740_v3, %v1021_v14  ;;  %v1037_v16 = vld [vmem:[#allocation2 + $0xf0] sm:$0xff] }
 0x121   : > { %1722 = vtanh.f32 %v1136_v13  ;;  %v1105_v17 = vadd.f32 %v1740_v3, %v1037_v16  ;;  %v1053_v18 = vld [vmem:[#allocation2 + $0x170] sm:$0xff]  ;;  %v1715_v21 = vpop.eup %1714 }
 0x122   : > { %1724 = vtanh.f32 %v1089_v15  ;;  %v1121_v19 = vadd.f32 %v1740_v3, %v1053_v18  ;;  %v1069_v20 = vld [vmem:[#allocation2 + $0x1f0] sm:$0xff]  ;;  %1263 = vst.msk [vmem:[%s2017_s7 + $0x1e0] sm:$0xff] %vm224_vm1, %v1715_v21 }
 0x123   : > { %1726 = vtanh.f32 %v1105_v17  ;;  %v1137_v22 = vadd.f32 %v1740_v3, %v1069_v20  ;;  %v1022_v23 = vld [vmem:[#allocation2 + $0x78] sm:$0xff]  ;;  %v1717_v24 = vpop.eup %1716 }
 0x124   : > { %1728 = vtanh.f32 %v1121_v19  ;;  %v1090_v25 = vadd.f32 %v1740_v3, %v1022_v23  ;;  %v1038_v26 = vld [vmem:[#allocation2 + $0xf8] sm:$0xff]  ;;  %1216 = vst.msk [vmem:[%s2017_s7 + $0x68] sm:$0xff] %vm224_vm1, %v1717_v24 }
 0x125   : > { %v1719_v27 = vpop.eup %1718  ;;  %1730 = vtanh.f32 %v1137_v22  ;;  %v1106_v28 = vadd.f32 %v1740_v3, %v1038_v26  ;;  %v1054_v29 = vld [vmem:[#allocation2 + $0x178] sm:$0xff] }
 0x126   : > { %v1721_v30 = vpop.eup %1720  ;;  %1232 = vst.msk [vmem:[%s2017_s7 + $0xe8] sm:$0xff] %vm224_vm1, %v1719_v27  ;;  %1732 = vtanh.f32 %v1090_v25  ;;  %v1122_v31 = vadd.f32 %v1740_v3, %v1054_v29  ;;  %v1070_v41 = vld [vmem:[#allocation2 + $0x1f8] sm:$0xff] }
 0x127   : > { %v1723_v32 = vpop.eup %1722  ;;  %1248 = vst.msk [vmem:[%s2017_s7 + $0x168] sm:$0xff] %vm224_vm1, %v1721_v30  ;;  %1734 = vtanh.f32 %v1106_v28  ;;  %v1138_v33 = vadd.f32 %v1740_v3, %v1070_v41 }
 0x128   : > { %v1725_v34 = vpop.eup %1724  ;;  %1264 = vst.msk [vmem:[%s2017_s7 + $0x1e8] sm:$0xff] %vm224_vm1, %v1723_v32  ;;  %1736 = vtanh.f32 %v1122_v31 }
 0x129   : > { %v1727_v35 = vpop.eup %1726  ;;  %1217 = vst.msk [vmem:[%s2017_s7 + $0x70] sm:$0xff] %vm224_vm1, %v1725_v34  ;;  %1738 = vtanh.f32 %v1138_v33 }
 0x12a   : > { %v1729_v36 = vpop.eup %1728  ;;  %1233 = vst.msk [vmem:[%s2017_s7 + $0xf0] sm:$0xff] %vm224_vm1, %v1727_v35 }
 0x12b   : > { %v1731_v37 = vpop.eup %1730  ;;  %1249 = vst.msk [vmem:[%s2017_s7 + $0x170] sm:$0xff] %vm224_vm1, %v1729_v36 }
 0x12c   : > { %v1733_v38 = vpop.eup %1732  ;;  %1265 = vst.msk [vmem:[%s2017_s7 + $0x1f0] sm:$0xff] %vm224_vm1, %v1731_v37 }
 0x12d   : > { %v1735_v39 = vpop.eup %1734  ;;  %1218 = vst.msk [vmem:[%s2017_s7 + $0x78] sm:$0xff] %vm224_vm1, %v1733_v38 }
 0x12e   : > { %v1737_v40 = vpop.eup %1736  ;;  %1234 = vst.msk [vmem:[%s2017_s7 + $0xf8] sm:$0xff] %vm224_vm1, %v1735_v39 }
 0x12f   : > { %v1739_v42 = vpop.eup %1738  ;;  %1250 = vst.msk [vmem:[%s2017_s7 + $0x178] sm:$0xff] %vm224_vm1, %v1737_v40 }
 0x130   : > { %1266 = vst.msk [vmem:[%s2017_s7 + $0x1f8] sm:$0xff] %vm224_vm1, %v1739_v42 }
 0x131 PF: > { %s13_s14 = sadd.s32 1, %s1763_s14   ;;  %s2319_s12 = smov %s1759_s13 }
 0x132   : > { %p10_p5 = scmp.ge.s32.totalorder %s13_s14, 38   ;;  %s2320_s13 = smov %s2322_s15 }
 0x134   :  { %12 = sbr.rel (!%p10_p5) target bundleno = 2 (0x2), region = 73 }

</bundles_post_ra>
